<compile_context>
chip_gen: v6e
topology: v6e:2x2x1
jax: 0.10.0
libtpu: 0.0.40
codegen_flags: <defaults>
</compile_context>

<pallas_src>
import functools

import jax
import jax.numpy as jnp
from jax import lax
from jax.experimental import pallas as pl
from jax.experimental.pallas import tpu as pltpu


def _sigmoid(v):
    # Numerically stable sigmoid on the EUP (tanh); avoids the inf intermediate
    # of 1/(1+exp(-v)) and keeps the divide off the VALU.
    return 0.5 * jnp.tanh(0.5 * v) + 0.5


def _double_conv_cbam_kernel(
    x_ref,      # (bt, Cin, HW)  VMEM   input images, flattened spatial dim
    row_ref,    # (1, HW) int32  VMEM   row index of each flattened position
    col_ref,    # (1, HW) int32  VMEM   col index of each flattened position
    wc1_ref,    # (9, C, Cin)    VMEM   conv1 weights, one (C, Cin) mat per tap
    s1_ref,     # (C, 1)         VMEM   folded BN1 scale
    t1_ref,     # (C, 1)         VMEM   folded BN1 bias (includes conv1 bias)
    wc2_ref,    # (9, C, C)      VMEM   conv2 weights
    s2_ref,     # (C, 1)         VMEM   folded BN2 scale
    t2_ref,     # (C, 1)         VMEM   folded BN2 bias
    w1_ref,     # (Cr, C)        VMEM   channel-gate MLP fc1 weight
    b1_ref,     # (Cr, 1)        VMEM
    w2_ref,     # (C, Cr)        VMEM   channel-gate MLP fc2 weight
    b2_ref,     # (C, 1)         VMEM
    wsp_ref,    # (98,)          SMEM   spatial 7x7 conv weights (max|mean)
    bnsp_ref,   # (2,)           SMEM   folded spatial BN scale/bias
    o_ref,      # (bt, C, HW)    VMEM
    *, H, W, bt):
    HW = H * W
    f32 = jnp.float32

    row = row_ref[...]
    col = col_ref[...]
    # Boundary-validity masks for spatial offsets -3..3 (shared by the 3x3 and
    # 7x7 convolutions).  Each is a (1, HW) boolean vector.
    row_ok = {o: (row >= -o) & (row <= H - 1 - o) for o in range(-3, 4)}
    col_ok = {o: (col >= -o) & (col <= W - 1 - o) for o in range(-3, 4)}

    def shift2d(v, oi, oj):
        """v[:, h*W+w] -> v[:, (h+oi)*W + (w+oj)], zero outside the image."""
        s = oi * W + oj
        if s != 0:
            v = pltpu.roll(v, (-s) % HW, axis=1)          # XLU lane rotation
        if oi != 0 or oj != 0:
            v = jnp.where(row_ok[oi] & col_ok[oj], v, 0.0)
        return v

    def conv3x3(v, w_ref):
        acc = None
        for oi in (-1, 0, 1):
            for oj in (-1, 0, 1):
                w_tap = w_ref[(oi + 1) * 3 + (oj + 1)]    # (Cout, Cin_tap)
                tap = jnp.dot(w_tap, shift2d(v, oi, oj),
                              preferred_element_type=f32)
                acc = tap if acc is None else acc + tap
        return acc

    s1 = s1_ref[...]
    t1 = t1_ref[...]
    s2 = s2_ref[...]
    t2 = t2_ref[...]
    w1 = w1_ref[...]
    b1 = b1_ref[...]
    w2 = w2_ref[...]
    b2 = b2_ref[...]
    bn_sp_scale = bnsp_ref[0]
    bn_sp_bias = bnsp_ref[1]

    for b in range(bt):
        x_b = x_ref[b].astype(f32)                        # (Cin, HW)

        # -------- DoubleConv: (conv3x3 -> BN -> ReLU) x 2 --------
        y = jnp.maximum(conv3x3(x_b, wc1_ref) * s1 + t1, 0.0)   # (C, HW)
        y = jnp.maximum(conv3x3(y, wc2_ref) * s2 + t2, 0.0)     # (C, HW)

        # -------- CBAM ChannelGate: avg + max pool -> shared MLP --------
        avg = jnp.sum(y, axis=1, keepdims=True) * (1.0 / HW)    # (C, 1)
        mx = jnp.max(y, axis=1, keepdims=True)                  # (C, 1)
        hidden = (
            jnp.maximum(jnp.dot(w1, avg, preferred_element_type=f32) + b1, 0.0)
            + jnp.maximum(jnp.dot(w1, mx, preferred_element_type=f32) + b1, 0.0))
        att = jnp.dot(w2, hidden, preferred_element_type=f32) + 2.0 * b2
        x_cg = y * _sigmoid(att)                                # (C, HW)

        # -------- CBAM SpatialGate: channel max|mean -> 7x7 conv -> BN ------
        c_max = jnp.max(x_cg, axis=0, keepdims=True)            # (1, HW)
        c_mean = jnp.sum(x_cg, axis=0, keepdims=True) * (1.0 / x_cg.shape[0])
        acc = jnp.zeros((1, HW), f32)
        for oi in range(-3, 4):
            for oj in range(-3, 4):
                tap = (oi + 3) * 7 + (oj + 3)
                acc = acc + (wsp_ref[tap] * shift2d(c_max, oi, oj)
                             + wsp_ref[49 + tap] * shift2d(c_mean, oi, oj))
        sp = _sigmoid(acc * bn_sp_scale + bn_sp_bias)           # (1, HW)

        o_ref[b] = (x_cg * sp).astype(o_ref.dtype)


def _pick_block_batch(n):
    # >=2 grid steps when possible (v7x has 2 TensorCores), <=4 images/step.
    target = max(1, min(4, n // 2))
    for bt in range(target, 0, -1):
        if n % bt == 0:
            return bt
    return 1


def _full_spec(shape):
    return pl.BlockSpec(shape, lambda *_: (0,) * len(shape))


def double_conv_cbam_forward(x, params, *, block_batch=None):
    """x: (N, Cin, H, W) float32.  params: output of fold_params()."""
    wc1, s1, t1, wc2, s2, t2, w1, b1, w2, b2, wsp, bnsp = params
    N, Cin, H, W = x.shape
    C = wc1.shape[1]
    Cr = w1.shape[0]
    HW = H * W

    bt = block_batch if block_batch is not None else _pick_block_batch(N)
    assert N % bt == 0, "batch must be divisible by the block batch size"
    grid = (N // bt,)

    # Lane-dense layout: flatten the spatial dims onto the lane axis.
    x2 = x.reshape(N, Cin, HW)
    lin = jnp.arange(HW, dtype=jnp.int32)
    rowid = (lin // W).reshape(1, HW)
    colid = (lin % W).reshape(1, HW)

    kernel = functools.partial(_double_conv_cbam_kernel, H=H, W=W, bt=bt)

    out = pl.pallas_call(
        kernel,
        out_shape=jax.ShapeDtypeStruct((N, C, HW), x.dtype),
        grid_spec=pltpu.PrefetchScalarGridSpec(
            num_scalar_prefetch=0,
            grid=grid,
            in_specs=[
                pl.BlockSpec((bt, Cin, HW), lambda g: (g, 0, 0)),
                _full_spec((1, HW)),
                _full_spec((1, HW)),
                _full_spec((9, C, Cin)),
                _full_spec((C, 1)),
                _full_spec((C, 1)),
                _full_spec((9, C, C)),
                _full_spec((C, 1)),
                _full_spec((C, 1)),
                _full_spec((Cr, C)),
                _full_spec((Cr, 1)),
                _full_spec((C, Cr)),
                _full_spec((C, 1)),
                pl.BlockSpec(memory_space=pltpu.MemorySpace.SMEM),  # 7x7 weights
                pl.BlockSpec(memory_space=pltpu.MemorySpace.SMEM),  # spatial BN
            ],
            out_specs=pl.BlockSpec((bt, C, HW), lambda g: (g, 0, 0)),
        ),
        compiler_params=pltpu.CompilerParams(
            dimension_semantics=("parallel",),
            vmem_limit_bytes=32 * 1024 * 1024),
    )(x2, rowid, colid, wc1, s1, t1, wc2, s2, t2, w1, b1, w2, b2, wsp, bnsp)
    return out.reshape(N, C, H, W)


def fold_params(cw1, cb1, g1, be1, m1, v1, cw2, cb2, g2, be2, m2, v2,
                fw1, fb1, fw2, fb2, sw, sg, sb, sm, sv, eps=1e-5):
    """Fold eval-mode BatchNorms (and conv biases) into scale/bias, and lay out
    the 3x3 conv weights as one (Cout, Cin) matrix per spatial tap."""
    Co, Ci = cw1.shape[0], cw1.shape[1]
    s1 = g1 / jnp.sqrt(v1 + eps)
    t1 = s1 * (cb1 - m1) + be1
    s2 = g2 / jnp.sqrt(v2 + eps)
    t2 = s2 * (cb2 - m2) + be2
    ssp = sg / jnp.sqrt(sv + eps)          # (1,)
    tsp = sb - sm * ssp                    # (1,)
    wc1 = jnp.transpose(cw1, (2, 3, 0, 1)).reshape(9, Co, Ci)
    wc2 = jnp.transpose(cw2, (2, 3, 0, 1)).reshape(9, Co, Co)
    return (wc1, s1.reshape(Co, 1), t1.reshape(Co, 1),
            wc2, s2.reshape(Co, 1), t2.reshape(Co, 1),
            fw1, fb1.reshape(-1, 1), fw2, fb2.reshape(-1, 1),
            sw.reshape(-1),
            jnp.concatenate([ssp, tsp]).astype(jnp.float32))


def double_conv_cbam_reference(x, cw1, cb1, g1, be1, m1, v1,
                               cw2, cb2, g2, be2, m2, v2,
                               fw1, fb1, fw2, fb2,
                               sw, sg, sb, sm, sv, eps=1e-5):
    """Pure-JAX reference matching the PyTorch forward (BN in eval mode)."""
    def conv(z, w, bias, pad):
        out = lax.conv_general_dilated(
            z, w, window_strides=(1, 1), padding=[(pad, pad), (pad, pad)],
            dimension_numbers=("NCHW", "OIHW", "NCHW"),
            precision=lax.Precision.HIGHEST)
        if bias is not None:
            out = out + bias[None, :, None, None]
        return out

    def bn(z, g, b, m, v):
        scale = (g / jnp.sqrt(v + eps))[None, :, None, None]
        return (z - m[None, :, None, None]) * scale + b[None, :, None, None]

    y = jax.nn.relu(bn(conv(x, cw1, cb1, 1), g1, be1, m1, v1))
    y = jax.nn.relu(bn(conv(y, cw2, cb2, 1), g2, be2, m2, v2))

    # ChannelGate
    avg = jnp.mean(y, axis=(2, 3))
    mx = jnp.max(y, axis=(2, 3))

    def mlp(p):
        h = jax.nn.relu(p @ fw1.T + fb1)
        return h @ fw2.T + fb2

    att = mlp(avg) + mlp(mx)
    y_cg = y * jax.nn.sigmoid(att)[:, :, None, None]

    # SpatialGate
    comp = jnp.concatenate([jnp.max(y_cg, axis=1, keepdims=True),
                            jnp.mean(y_cg, axis=1, keepdims=True)], axis=1)
    sconv = conv(comp, sw, None, 3)
    sbn = bn(sconv, sg, sb, sm, sv)
    return y_cg * jax.nn.sigmoid(sbn)


if __name__ == "__main__":
    N, in_ch, out_ch, H, W = 2, 4, 32, 16, 16
    reduction_ratio = 3                      # DoubleConv_CBAM uses CBAM(out_ch, 3)
    Cr = out_ch // reduction_ratio           # = 10

    ks = jax.random.split(jax.random.PRNGKey(0), 22)

    # DoubleConv parameters (Conv2d has bias; BNs use eval-mode running stats).
    cw1 = jax.random.normal(ks[0], (out_ch, in_ch, 3, 3), jnp.float32) * 0.25
    cb1 = 0.1 * jax.random.normal(ks[1], (out_ch,), jnp.float32)
    g1 = 1.0 + 0.1 * jax.random.normal(ks[2], (out_ch,), jnp.float32)
    be1 = 0.1 * jax.random.normal(ks[3], (out_ch,), jnp.float32)
    m1 = 0.1 * jax.random.normal(ks[4], (out_ch,), jnp.float32)
    v1 = 1.0 + 0.1 * jax.random.uniform(ks[5], (out_ch,), jnp.float32)

    cw2 = jax.random.normal(ks[6], (out_ch, out_ch, 3, 3), jnp.float32) * 0.1
    cb2 = 0.1 * jax.random.normal(ks[7], (out_ch,), jnp.float32)
    g2 = 1.0 + 0.1 * jax.random.normal(ks[8], (out_ch,), jnp.float32)
    be2 = 0.1 * jax.random.normal(ks[9], (out_ch,), jnp.float32)
    m2 = 0.1 * jax.random.normal(ks[10], (out_ch,), jnp.float32)
    v2 = 1.0 + 0.1 * jax.random.uniform(ks[11], (out_ch,), jnp.float32)

    # CBAM ChannelGate MLP: Linear(C, C//3) -> ReLU -> Linear(C//3, C).
    fw1 = jax.random.normal(ks[12], (Cr, out_ch), jnp.float32) * 0.2
    fb1 = 0.1 * jax.random.normal(ks[13], (Cr,), jnp.float32)
    fw2 = jax.random.normal(ks[14], (out_ch, Cr), jnp.float32) * 0.2
    fb2 = 0.1 * jax.random.normal(ks[15], (out_ch,), jnp.float32)

    # CBAM SpatialGate: Conv2d(2, 1, 7, pad=3, bias=False) + BatchNorm2d(1).
    sw = jax.random.normal(ks[16], (1, 2, 7, 7), jnp.float32) * 0.1
    sg = 1.0 + 0.1 * jax.random.normal(ks[17], (1,), jnp.float32)
    sb = 0.1 * jax.random.normal(ks[18], (1,), jnp.float32)
    sm = 0.1 * jax.random.normal(ks[19], (1,), jnp.float32)
    sv = 1.0 + 0.1 * jax.random.uniform(ks[20], (1,), jnp.float32)

    x = jax.random.normal(ks[21], (N, in_ch, H, W), jnp.float32)

    params = fold_params(cw1, cb1, g1, be1, m1, v1, cw2, cb2, g2, be2, m2, v2,
                         fw1, fb1, fw2, fb2, sw, sg, sb, sm, sv)

    out = jax.block_until_ready(double_conv_cbam_forward(x, params))
    ref = jax.block_until_ready(
        double_conv_cbam_reference(x, cw1, cb1, g1, be1, m1, v1,
                                   cw2, cb2, g2, be2, m2, v2,
                                   fw1, fb1, fw2, fb2, sw, sg, sb, sm, sv))

    assert out.shape == (N, out_ch, H, W)
    err = float(jnp.max(jnp.abs(out - ref)))
    assert err < 2e-2, f"max abs err {err}"
    print("KERNEL_OK")
</pallas_src>

<mosaic_0001>
module attributes {stable_mosaic.version = 11 : i64} {
  func.func @_double_conv_cbam_kernel(%arg0: i32, %arg1: memref<1x4x256xf32, #tpu.memory_space<vmem>>, %arg2: memref<1x256xi32, #tpu.memory_space<vmem>>, %arg3: memref<1x256xi32, #tpu.memory_space<vmem>>, %arg4: memref<9x32x4xf32, #tpu.memory_space<vmem>>, %arg5: memref<32x1xf32, #tpu.memory_space<vmem>>, %arg6: memref<32x1xf32, #tpu.memory_space<vmem>>, %arg7: memref<9x32x32xf32, #tpu.memory_space<vmem>>, %arg8: memref<32x1xf32, #tpu.memory_space<vmem>>, %arg9: memref<32x1xf32, #tpu.memory_space<vmem>>, %arg10: memref<10x32xf32, #tpu.memory_space<vmem>>, %arg11: memref<10x1xf32, #tpu.memory_space<vmem>>, %arg12: memref<32x10xf32, #tpu.memory_space<vmem>>, %arg13: memref<32x1xf32, #tpu.memory_space<vmem>>, %arg14: memref<98xf32, #tpu.memory_space<smem>>, %arg15: memref<2xf32, #tpu.memory_space<smem>>, %arg16: memref<1x32x256xf32, #tpu.memory_space<vmem>>) attributes {dimension_semantics = [#tpu.dimension_semantics<parallel>], iteration_bounds = array<i64: 2>, scalar_prefetch = 0 : i64, scratch_operands = 0 : i64, tpu.core_type = #tpu.core_type<tc>, window_params = [{transform_indices = @transform_0, window_bounds = array<i64: 1, 4, 256>}, {pipeline_mode = #tpu.pipeline_mode<synchronous>, transform_indices = @transform_1, window_bounds = array<i64: 1, 256>}, {pipeline_mode = #tpu.pipeline_mode<synchronous>, transform_indices = @transform_2, window_bounds = array<i64: 1, 256>}, {pipeline_mode = #tpu.pipeline_mode<synchronous>, transform_indices = @transform_3, window_bounds = array<i64: 9, 32, 4>}, {pipeline_mode = #tpu.pipeline_mode<synchronous>, transform_indices = @transform_4, window_bounds = array<i64: 32, 1>}, {pipeline_mode = #tpu.pipeline_mode<synchronous>, transform_indices = @transform_5, window_bounds = array<i64: 32, 1>}, {pipeline_mode = #tpu.pipeline_mode<synchronous>, transform_indices = @transform_6, window_bounds = array<i64: 9, 32, 32>}, {pipeline_mode = #tpu.pipeline_mode<synchronous>, transform_indices = @transform_7, window_bounds = array<i64: 32, 1>}, {pipeline_mode = #tpu.pipeline_mode<synchronous>, transform_indices = @transform_8, window_bounds = array<i64: 32, 1>}, {pipeline_mode = #tpu.pipeline_mode<synchronous>, transform_indices = @transform_9, window_bounds = array<i64: 10, 32>}, {pipeline_mode = #tpu.pipeline_mode<synchronous>, transform_indices = @transform_10, window_bounds = array<i64: 10, 1>}, {pipeline_mode = #tpu.pipeline_mode<synchronous>, transform_indices = @transform_11, window_bounds = array<i64: 32, 10>}, {pipeline_mode = #tpu.pipeline_mode<synchronous>, transform_indices = @transform_12, window_bounds = array<i64: 32, 1>}, {transform_indices = @transform_13, window_bounds = array<i64: 98>}, {transform_indices = @transform_14, window_bounds = array<i64: 2>}, {transform_indices = @transform_15, window_bounds = array<i64: 1, 32, 256>}]} {
    %c0 = arith.constant 0 : index
    %c0_0 = arith.constant 0 : index
    %0 = vector.load %arg2[%c0, %c0_0] : memref<1x256xi32, #tpu.memory_space<vmem>>, vector<1x256xi32>
    %c0_1 = arith.constant 0 : index
    %c0_2 = arith.constant 0 : index
    %1 = vector.load %arg3[%c0_1, %c0_2] : memref<1x256xi32, #tpu.memory_space<vmem>>, vector<1x256xi32>
    %c3_i32 = arith.constant 3 : i32
    %2 = vector.broadcast %c3_i32 : i32 to vector<1x256xi32>
    %3 = arith.cmpi sge, %0, %2 : vector<1x256xi32>
    %c18_i32 = arith.constant 18 : i32
    %4 = vector.broadcast %c18_i32 : i32 to vector<1x256xi32>
    %5 = arith.cmpi sle, %0, %4 : vector<1x256xi32>
    %6 = arith.andi %3, %5 : vector<1x256xi1>
    %c2_i32 = arith.constant 2 : i32
    %7 = vector.broadcast %c2_i32 : i32 to vector<1x256xi32>
    %8 = arith.cmpi sge, %0, %7 : vector<1x256xi32>
    %c17_i32 = arith.constant 17 : i32
    %9 = vector.broadcast %c17_i32 : i32 to vector<1x256xi32>
    %10 = arith.cmpi sle, %0, %9 : vector<1x256xi32>
    %11 = arith.andi %8, %10 : vector<1x256xi1>
    %c1_i32 = arith.constant 1 : i32
    %12 = vector.broadcast %c1_i32 : i32 to vector<1x256xi32>
    %13 = arith.cmpi sge, %0, %12 : vector<1x256xi32>
    %c16_i32 = arith.constant 16 : i32
    %14 = vector.broadcast %c16_i32 : i32 to vector<1x256xi32>
    %15 = arith.cmpi sle, %0, %14 : vector<1x256xi32>
    %16 = arith.andi %13, %15 : vector<1x256xi1>
    %c0_i32 = arith.constant 0 : i32
    %17 = vector.broadcast %c0_i32 : i32 to vector<1x256xi32>
    %18 = arith.cmpi sge, %0, %17 : vector<1x256xi32>
    %c15_i32 = arith.constant 15 : i32
    %19 = vector.broadcast %c15_i32 : i32 to vector<1x256xi32>
    %20 = arith.cmpi sle, %0, %19 : vector<1x256xi32>
    %21 = arith.andi %18, %20 : vector<1x256xi1>
    %c-1_i32 = arith.constant -1 : i32
    %22 = vector.broadcast %c-1_i32 : i32 to vector<1x256xi32>
    %23 = arith.cmpi sge, %0, %22 : vector<1x256xi32>
    %c14_i32 = arith.constant 14 : i32
    %24 = vector.broadcast %c14_i32 : i32 to vector<1x256xi32>
    %25 = arith.cmpi sle, %0, %24 : vector<1x256xi32>
    %26 = arith.andi %23, %25 : vector<1x256xi1>
    %c-2_i32 = arith.constant -2 : i32
    %27 = vector.broadcast %c-2_i32 : i32 to vector<1x256xi32>
    %28 = arith.cmpi sge, %0, %27 : vector<1x256xi32>
    %c13_i32 = arith.constant 13 : i32
    %29 = vector.broadcast %c13_i32 : i32 to vector<1x256xi32>
    %30 = arith.cmpi sle, %0, %29 : vector<1x256xi32>
    %31 = arith.andi %28, %30 : vector<1x256xi1>
    %c-3_i32 = arith.constant -3 : i32
    %32 = vector.broadcast %c-3_i32 : i32 to vector<1x256xi32>
    %33 = arith.cmpi sge, %0, %32 : vector<1x256xi32>
    %c12_i32 = arith.constant 12 : i32
    %34 = vector.broadcast %c12_i32 : i32 to vector<1x256xi32>
    %35 = arith.cmpi sle, %0, %34 : vector<1x256xi32>
    %36 = arith.andi %33, %35 : vector<1x256xi1>
    %c3_i32_3 = arith.constant 3 : i32
    %37 = vector.broadcast %c3_i32_3 : i32 to vector<1x256xi32>
    %38 = arith.cmpi sge, %1, %37 : vector<1x256xi32>
    %c18_i32_4 = arith.constant 18 : i32
    %39 = vector.broadcast %c18_i32_4 : i32 to vector<1x256xi32>
    %40 = arith.cmpi sle, %1, %39 : vector<1x256xi32>
    %41 = arith.andi %38, %40 : vector<1x256xi1>
    %c2_i32_5 = arith.constant 2 : i32
    %42 = vector.broadcast %c2_i32_5 : i32 to vector<1x256xi32>
    %43 = arith.cmpi sge, %1, %42 : vector<1x256xi32>
    %c17_i32_6 = arith.constant 17 : i32
    %44 = vector.broadcast %c17_i32_6 : i32 to vector<1x256xi32>
    %45 = arith.cmpi sle, %1, %44 : vector<1x256xi32>
    %46 = arith.andi %43, %45 : vector<1x256xi1>
    %c1_i32_7 = arith.constant 1 : i32
    %47 = vector.broadcast %c1_i32_7 : i32 to vector<1x256xi32>
    %48 = arith.cmpi sge, %1, %47 : vector<1x256xi32>
    %c16_i32_8 = arith.constant 16 : i32
    %49 = vector.broadcast %c16_i32_8 : i32 to vector<1x256xi32>
    %50 = arith.cmpi sle, %1, %49 : vector<1x256xi32>
    %51 = arith.andi %48, %50 : vector<1x256xi1>
    %c0_i32_9 = arith.constant 0 : i32
    %52 = vector.broadcast %c0_i32_9 : i32 to vector<1x256xi32>
    %53 = arith.cmpi sge, %1, %52 : vector<1x256xi32>
    %c15_i32_10 = arith.constant 15 : i32
    %54 = vector.broadcast %c15_i32_10 : i32 to vector<1x256xi32>
    %55 = arith.cmpi sle, %1, %54 : vector<1x256xi32>
    %56 = arith.andi %53, %55 : vector<1x256xi1>
    %c-1_i32_11 = arith.constant -1 : i32
    %57 = vector.broadcast %c-1_i32_11 : i32 to vector<1x256xi32>
    %58 = arith.cmpi sge, %1, %57 : vector<1x256xi32>
    %c14_i32_12 = arith.constant 14 : i32
    %59 = vector.broadcast %c14_i32_12 : i32 to vector<1x256xi32>
    %60 = arith.cmpi sle, %1, %59 : vector<1x256xi32>
    %61 = arith.andi %58, %60 : vector<1x256xi1>
    %c-2_i32_13 = arith.constant -2 : i32
    %62 = vector.broadcast %c-2_i32_13 : i32 to vector<1x256xi32>
    %63 = arith.cmpi sge, %1, %62 : vector<1x256xi32>
    %c13_i32_14 = arith.constant 13 : i32
    %64 = vector.broadcast %c13_i32_14 : i32 to vector<1x256xi32>
    %65 = arith.cmpi sle, %1, %64 : vector<1x256xi32>
    %66 = arith.andi %63, %65 : vector<1x256xi1>
    %c-3_i32_15 = arith.constant -3 : i32
    %67 = vector.broadcast %c-3_i32_15 : i32 to vector<1x256xi32>
    %68 = arith.cmpi sge, %1, %67 : vector<1x256xi32>
    %c12_i32_16 = arith.constant 12 : i32
    %69 = vector.broadcast %c12_i32_16 : i32 to vector<1x256xi32>
    %70 = arith.cmpi sle, %1, %69 : vector<1x256xi32>
    %71 = arith.andi %68, %70 : vector<1x256xi1>
    %c0_17 = arith.constant 0 : index
    %c0_18 = arith.constant 0 : index
    %72 = vector.load %arg5[%c0_17, %c0_18] : memref<32x1xf32, #tpu.memory_space<vmem>>, vector<32x1xf32>
    %c0_19 = arith.constant 0 : index
    %c0_20 = arith.constant 0 : index
    %73 = vector.load %arg6[%c0_19, %c0_20] : memref<32x1xf32, #tpu.memory_space<vmem>>, vector<32x1xf32>
    %c0_21 = arith.constant 0 : index
    %c0_22 = arith.constant 0 : index
    %74 = vector.load %arg8[%c0_21, %c0_22] : memref<32x1xf32, #tpu.memory_space<vmem>>, vector<32x1xf32>
    %c0_23 = arith.constant 0 : index
    %c0_24 = arith.constant 0 : index
    %75 = vector.load %arg9[%c0_23, %c0_24] : memref<32x1xf32, #tpu.memory_space<vmem>>, vector<32x1xf32>
    %c0_25 = arith.constant 0 : index
    %c0_26 = arith.constant 0 : index
    %76 = vector.load %arg10[%c0_25, %c0_26] : memref<10x32xf32, #tpu.memory_space<vmem>>, vector<10x32xf32>
    %c0_27 = arith.constant 0 : index
    %c0_28 = arith.constant 0 : index
    %77 = vector.load %arg11[%c0_27, %c0_28] : memref<10x1xf32, #tpu.memory_space<vmem>>, vector<10x1xf32>
    %c0_29 = arith.constant 0 : index
    %c0_30 = arith.constant 0 : index
    %78 = vector.load %arg12[%c0_29, %c0_30] : memref<32x10xf32, #tpu.memory_space<vmem>>, vector<32x10xf32>
    %c0_31 = arith.constant 0 : index
    %c0_32 = arith.constant 0 : index
    %79 = vector.load %arg13[%c0_31, %c0_32] : memref<32x1xf32, #tpu.memory_space<vmem>>, vector<32x1xf32>
    %c0_33 = arith.constant 0 : index
    %80 = memref.load %arg15[%c0_33] : memref<2xf32, #tpu.memory_space<smem>>
    %c1 = arith.constant 1 : index
    %81 = memref.load %arg15[%c1] : memref<2xf32, #tpu.memory_space<smem>>
    %c0_34 = arith.constant 0 : index
    %c0_35 = arith.constant 0 : index
    %c0_36 = arith.constant 0 : index
    %82 = vector.load %arg1[%c0_34, %c0_35, %c0_36] : memref<1x4x256xf32, #tpu.memory_space<vmem>>, vector<1x4x256xf32>
    %83 = vector.shape_cast %82 : vector<1x4x256xf32> to vector<4x256xf32>
    %c0_37 = arith.constant 0 : index
    %c0_38 = arith.constant 0 : index
    %c0_39 = arith.constant 0 : index
    %84 = vector.load %arg4[%c0_37, %c0_38, %c0_39] : memref<9x32x4xf32, #tpu.memory_space<vmem>>, vector<1x32x4xf32>
    %85 = vector.shape_cast %84 : vector<1x32x4xf32> to vector<32x4xf32>
    %c17_i32_40 = arith.constant 17 : i32
    %86 = tpu.dynamic_rotate %83 by %c17_i32_40 dim 1 : vector<4x256xf32>, i32 -> vector<4x256xf32>
    %87 = arith.andi %16, %51 : vector<1x256xi1>
    %cst = arith.constant 0.000000e+00 : f32
    %88 = vector.shape_cast %87 : vector<1x256xi1> to vector<1x256xi1>
    %89 = vector.broadcast %88 : vector<1x256xi1> to vector<4x256xi1>
    %90 = vector.broadcast %cst : f32 to vector<4x256xf32>
    %91 = arith.select %89, %86, %90 : vector<4x256xi1>, vector<4x256xf32>
    %cst_41 = arith.constant dense<0.000000e+00> : vector<32x256xf32>
    %92 = tpu.matmul %85, %91, %cst_41 {dimension_numbers = #tpu.dot_dimension_numbers<[1], [0], [0], [1], [0, 0, 1, 1], [], []>} : vector<32x4xf32>, vector<4x256xf32>, vector<32x256xf32> -> vector<32x256xf32>
    %c1_42 = arith.constant 1 : index
    %c0_43 = arith.constant 0 : index
    %c0_44 = arith.constant 0 : index
    %93 = vector.load %arg4[%c1_42, %c0_43, %c0_44] : memref<9x32x4xf32, #tpu.memory_space<vmem>>, vector<1x32x4xf32>
    %94 = vector.shape_cast %93 : vector<1x32x4xf32> to vector<32x4xf32>
    %c16_i32_45 = arith.constant 16 : i32
    %95 = tpu.dynamic_rotate %83 by %c16_i32_45 dim 1 : vector<4x256xf32>, i32 -> vector<4x256xf32>
    %96 = arith.andi %16, %56 : vector<1x256xi1>
    %cst_46 = arith.constant 0.000000e+00 : f32
    %97 = vector.shape_cast %96 : vector<1x256xi1> to vector<1x256xi1>
    %98 = vector.broadcast %97 : vector<1x256xi1> to vector<4x256xi1>
    %99 = vector.broadcast %cst_46 : f32 to vector<4x256xf32>
    %100 = arith.select %98, %95, %99 : vector<4x256xi1>, vector<4x256xf32>
    %cst_47 = arith.constant dense<0.000000e+00> : vector<32x256xf32>
    %101 = tpu.matmul %94, %100, %cst_47 {dimension_numbers = #tpu.dot_dimension_numbers<[1], [0], [0], [1], [0, 0, 1, 1], [], []>} : vector<32x4xf32>, vector<4x256xf32>, vector<32x256xf32> -> vector<32x256xf32>
    %102 = arith.addf %92, %101 : vector<32x256xf32>
    %c2 = arith.constant 2 : index
    %c0_48 = arith.constant 0 : index
    %c0_49 = arith.constant 0 : index
    %103 = vector.load %arg4[%c2, %c0_48, %c0_49] : memref<9x32x4xf32, #tpu.memory_space<vmem>>, vector<1x32x4xf32>
    %104 = vector.shape_cast %103 : vector<1x32x4xf32> to vector<32x4xf32>
    %c15_i32_50 = arith.constant 15 : i32
    %105 = tpu.dynamic_rotate %83 by %c15_i32_50 dim 1 : vector<4x256xf32>, i32 -> vector<4x256xf32>
    %106 = arith.andi %16, %61 : vector<1x256xi1>
    %cst_51 = arith.constant 0.000000e+00 : f32
    %107 = vector.shape_cast %106 : vector<1x256xi1> to vector<1x256xi1>
    %108 = vector.broadcast %107 : vector<1x256xi1> to vector<4x256xi1>
    %109 = vector.broadcast %cst_51 : f32 to vector<4x256xf32>
    %110 = arith.select %108, %105, %109 : vector<4x256xi1>, vector<4x256xf32>
    %cst_52 = arith.constant dense<0.000000e+00> : vector<32x256xf32>
    %111 = tpu.matmul %104, %110, %cst_52 {dimension_numbers = #tpu.dot_dimension_numbers<[1], [0], [0], [1], [0, 0, 1, 1], [], []>} : vector<32x4xf32>, vector<4x256xf32>, vector<32x256xf32> -> vector<32x256xf32>
    %112 = arith.addf %102, %111 : vector<32x256xf32>
    %c3 = arith.constant 3 : index
    %c0_53 = arith.constant 0 : index
    %c0_54 = arith.constant 0 : index
    %113 = vector.load %arg4[%c3, %c0_53, %c0_54] : memref<9x32x4xf32, #tpu.memory_space<vmem>>, vector<1x32x4xf32>
    %114 = vector.shape_cast %113 : vector<1x32x4xf32> to vector<32x4xf32>
    %c1_i32_55 = arith.constant 1 : i32
    %115 = tpu.dynamic_rotate %83 by %c1_i32_55 dim 1 : vector<4x256xf32>, i32 -> vector<4x256xf32>
    %116 = arith.andi %21, %51 : vector<1x256xi1>
    %cst_56 = arith.constant 0.000000e+00 : f32
    %117 = vector.shape_cast %116 : vector<1x256xi1> to vector<1x256xi1>
    %118 = vector.broadcast %117 : vector<1x256xi1> to vector<4x256xi1>
    %119 = vector.broadcast %cst_56 : f32 to vector<4x256xf32>
    %120 = arith.select %118, %115, %119 : vector<4x256xi1>, vector<4x256xf32>
    %cst_57 = arith.constant dense<0.000000e+00> : vector<32x256xf32>
    %121 = tpu.matmul %114, %120, %cst_57 {dimension_numbers = #tpu.dot_dimension_numbers<[1], [0], [0], [1], [0, 0, 1, 1], [], []>} : vector<32x4xf32>, vector<4x256xf32>, vector<32x256xf32> -> vector<32x256xf32>
    %122 = arith.addf %112, %121 : vector<32x256xf32>
    %c4 = arith.constant 4 : index
    %c0_58 = arith.constant 0 : index
    %c0_59 = arith.constant 0 : index
    %123 = vector.load %arg4[%c4, %c0_58, %c0_59] : memref<9x32x4xf32, #tpu.memory_space<vmem>>, vector<1x32x4xf32>
    %124 = vector.shape_cast %123 : vector<1x32x4xf32> to vector<32x4xf32>
    %cst_60 = arith.constant dense<0.000000e+00> : vector<32x256xf32>
    %125 = tpu.matmul %124, %83, %cst_60 {dimension_numbers = #tpu.dot_dimension_numbers<[1], [0], [0], [1], [0, 0, 1, 1], [], []>} : vector<32x4xf32>, vector<4x256xf32>, vector<32x256xf32> -> vector<32x256xf32>
    %126 = arith.addf %122, %125 : vector<32x256xf32>
    %c5 = arith.constant 5 : index
    %c0_61 = arith.constant 0 : index
    %c0_62 = arith.constant 0 : index
    %127 = vector.load %arg4[%c5, %c0_61, %c0_62] : memref<9x32x4xf32, #tpu.memory_space<vmem>>, vector<1x32x4xf32>
    %128 = vector.shape_cast %127 : vector<1x32x4xf32> to vector<32x4xf32>
    %c255_i32 = arith.constant 255 : i32
    %129 = tpu.dynamic_rotate %83 by %c255_i32 dim 1 : vector<4x256xf32>, i32 -> vector<4x256xf32>
    %130 = arith.andi %21, %61 : vector<1x256xi1>
    %cst_63 = arith.constant 0.000000e+00 : f32
    %131 = vector.shape_cast %130 : vector<1x256xi1> to vector<1x256xi1>
    %132 = vector.broadcast %131 : vector<1x256xi1> to vector<4x256xi1>
    %133 = vector.broadcast %cst_63 : f32 to vector<4x256xf32>
    %134 = arith.select %132, %129, %133 : vector<4x256xi1>, vector<4x256xf32>
    %cst_64 = arith.constant dense<0.000000e+00> : vector<32x256xf32>
    %135 = tpu.matmul %128, %134, %cst_64 {dimension_numbers = #tpu.dot_dimension_numbers<[1], [0], [0], [1], [0, 0, 1, 1], [], []>} : vector<32x4xf32>, vector<4x256xf32>, vector<32x256xf32> -> vector<32x256xf32>
    %136 = arith.addf %126, %135 : vector<32x256xf32>
    %c6 = arith.constant 6 : index
    %c0_65 = arith.constant 0 : index
    %c0_66 = arith.constant 0 : index
    %137 = vector.load %arg4[%c6, %c0_65, %c0_66] : memref<9x32x4xf32, #tpu.memory_space<vmem>>, vector<1x32x4xf32>
    %138 = vector.shape_cast %137 : vector<1x32x4xf32> to vector<32x4xf32>
    %c241_i32 = arith.constant 241 : i32
    %139 = tpu.dynamic_rotate %83 by %c241_i32 dim 1 : vector<4x256xf32>, i32 -> vector<4x256xf32>
    %140 = arith.andi %26, %51 : vector<1x256xi1>
    %cst_67 = arith.constant 0.000000e+00 : f32
    %141 = vector.shape_cast %140 : vector<1x256xi1> to vector<1x256xi1>
    %142 = vector.broadcast %141 : vector<1x256xi1> to vector<4x256xi1>
    %143 = vector.broadcast %cst_67 : f32 to vector<4x256xf32>
    %144 = arith.select %142, %139, %143 : vector<4x256xi1>, vector<4x256xf32>
    %cst_68 = arith.constant dense<0.000000e+00> : vector<32x256xf32>
    %145 = tpu.matmul %138, %144, %cst_68 {dimension_numbers = #tpu.dot_dimension_numbers<[1], [0], [0], [1], [0, 0, 1, 1], [], []>} : vector<32x4xf32>, vector<4x256xf32>, vector<32x256xf32> -> vector<32x256xf32>
    %146 = arith.addf %136, %145 : vector<32x256xf32>
    %c7 = arith.constant 7 : index
    %c0_69 = arith.constant 0 : index
    %c0_70 = arith.constant 0 : index
    %147 = vector.load %arg4[%c7, %c0_69, %c0_70] : memref<9x32x4xf32, #tpu.memory_space<vmem>>, vector<1x32x4xf32>
    %148 = vector.shape_cast %147 : vector<1x32x4xf32> to vector<32x4xf32>
    %c240_i32 = arith.constant 240 : i32
    %149 = tpu.dynamic_rotate %83 by %c240_i32 dim 1 : vector<4x256xf32>, i32 -> vector<4x256xf32>
    %150 = arith.andi %26, %56 : vector<1x256xi1>
    %cst_71 = arith.constant 0.000000e+00 : f32
    %151 = vector.shape_cast %150 : vector<1x256xi1> to vector<1x256xi1>
    %152 = vector.broadcast %151 : vector<1x256xi1> to vector<4x256xi1>
    %153 = vector.broadcast %cst_71 : f32 to vector<4x256xf32>
    %154 = arith.select %152, %149, %153 : vector<4x256xi1>, vector<4x256xf32>
    %cst_72 = arith.constant dense<0.000000e+00> : vector<32x256xf32>
    %155 = tpu.matmul %148, %154, %cst_72 {dimension_numbers = #tpu.dot_dimension_numbers<[1], [0], [0], [1], [0, 0, 1, 1], [], []>} : vector<32x4xf32>, vector<4x256xf32>, vector<32x256xf32> -> vector<32x256xf32>
    %156 = arith.addf %146, %155 : vector<32x256xf32>
    %c8 = arith.constant 8 : index
    %c0_73 = arith.constant 0 : index
    %c0_74 = arith.constant 0 : index
    %157 = vector.load %arg4[%c8, %c0_73, %c0_74] : memref<9x32x4xf32, #tpu.memory_space<vmem>>, vector<1x32x4xf32>
    %158 = vector.shape_cast %157 : vector<1x32x4xf32> to vector<32x4xf32>
    %c239_i32 = arith.constant 239 : i32
    %159 = tpu.dynamic_rotate %83 by %c239_i32 dim 1 : vector<4x256xf32>, i32 -> vector<4x256xf32>
    %160 = arith.andi %26, %61 : vector<1x256xi1>
    %cst_75 = arith.constant 0.000000e+00 : f32
    %161 = vector.shape_cast %160 : vector<1x256xi1> to vector<1x256xi1>
    %162 = vector.broadcast %161 : vector<1x256xi1> to vector<4x256xi1>
    %163 = vector.broadcast %cst_75 : f32 to vector<4x256xf32>
    %164 = arith.select %162, %159, %163 : vector<4x256xi1>, vector<4x256xf32>
    %cst_76 = arith.constant dense<0.000000e+00> : vector<32x256xf32>
    %165 = tpu.matmul %158, %164, %cst_76 {dimension_numbers = #tpu.dot_dimension_numbers<[1], [0], [0], [1], [0, 0, 1, 1], [], []>} : vector<32x4xf32>, vector<4x256xf32>, vector<32x256xf32> -> vector<32x256xf32>
    %166 = arith.addf %156, %165 : vector<32x256xf32>
    %167 = vector.broadcast %72 : vector<32x1xf32> to vector<32x256xf32>
    %168 = arith.mulf %166, %167 : vector<32x256xf32>
    %169 = vector.broadcast %73 : vector<32x1xf32> to vector<32x256xf32>
    %170 = arith.addf %168, %169 : vector<32x256xf32>
    %cst_77 = arith.constant 0.000000e+00 : f32
    %171 = vector.broadcast %cst_77 : f32 to vector<32x256xf32>
    %172 = arith.maximumf %170, %171 : vector<32x256xf32>
    %c0_78 = arith.constant 0 : index
    %c0_79 = arith.constant 0 : index
    %c0_80 = arith.constant 0 : index
    %173 = vector.load %arg7[%c0_78, %c0_79, %c0_80] : memref<9x32x32xf32, #tpu.memory_space<vmem>>, vector<1x32x32xf32>
    %174 = vector.shape_cast %173 : vector<1x32x32xf32> to vector<32x32xf32>
    %c17_i32_81 = arith.constant 17 : i32
    %175 = tpu.dynamic_rotate %172 by %c17_i32_81 dim 1 : vector<32x256xf32>, i32 -> vector<32x256xf32>
    %176 = arith.andi %16, %51 : vector<1x256xi1>
    %cst_82 = arith.constant 0.000000e+00 : f32
    %177 = vector.shape_cast %176 : vector<1x256xi1> to vector<1x256xi1>
    %178 = vector.broadcast %177 : vector<1x256xi1> to vector<32x256xi1>
    %179 = vector.broadcast %cst_82 : f32 to vector<32x256xf32>
    %180 = arith.select %178, %175, %179 : vector<32x256xi1>, vector<32x256xf32>
    %cst_83 = arith.constant dense<0.000000e+00> : vector<32x256xf32>
    %181 = tpu.matmul %174, %180, %cst_83 {dimension_numbers = #tpu.dot_dimension_numbers<[1], [0], [0], [1], [0, 0, 1, 1], [], []>} : vector<32x32xf32>, vector<32x256xf32>, vector<32x256xf32> -> vector<32x256xf32>
    %c1_84 = arith.constant 1 : index
    %c0_85 = arith.constant 0 : index
    %c0_86 = arith.constant 0 : index
    %182 = vector.load %arg7[%c1_84, %c0_85, %c0_86] : memref<9x32x32xf32, #tpu.memory_space<vmem>>, vector<1x32x32xf32>
    %183 = vector.shape_cast %182 : vector<1x32x32xf32> to vector<32x32xf32>
    %c16_i32_87 = arith.constant 16 : i32
    %184 = tpu.dynamic_rotate %172 by %c16_i32_87 dim 1 : vector<32x256xf32>, i32 -> vector<32x256xf32>
    %185 = arith.andi %16, %56 : vector<1x256xi1>
    %cst_88 = arith.constant 0.000000e+00 : f32
    %186 = vector.shape_cast %185 : vector<1x256xi1> to vector<1x256xi1>
    %187 = vector.broadcast %186 : vector<1x256xi1> to vector<32x256xi1>
    %188 = vector.broadcast %cst_88 : f32 to vector<32x256xf32>
    %189 = arith.select %187, %184, %188 : vector<32x256xi1>, vector<32x256xf32>
    %cst_89 = arith.constant dense<0.000000e+00> : vector<32x256xf32>
    %190 = tpu.matmul %183, %189, %cst_89 {dimension_numbers = #tpu.dot_dimension_numbers<[1], [0], [0], [1], [0, 0, 1, 1], [], []>} : vector<32x32xf32>, vector<32x256xf32>, vector<32x256xf32> -> vector<32x256xf32>
    %191 = arith.addf %181, %190 : vector<32x256xf32>
    %c2_90 = arith.constant 2 : index
    %c0_91 = arith.constant 0 : index
    %c0_92 = arith.constant 0 : index
    %192 = vector.load %arg7[%c2_90, %c0_91, %c0_92] : memref<9x32x32xf32, #tpu.memory_space<vmem>>, vector<1x32x32xf32>
    %193 = vector.shape_cast %192 : vector<1x32x32xf32> to vector<32x32xf32>
    %c15_i32_93 = arith.constant 15 : i32
    %194 = tpu.dynamic_rotate %172 by %c15_i32_93 dim 1 : vector<32x256xf32>, i32 -> vector<32x256xf32>
    %195 = arith.andi %16, %61 : vector<1x256xi1>
    %cst_94 = arith.constant 0.000000e+00 : f32
    %196 = vector.shape_cast %195 : vector<1x256xi1> to vector<1x256xi1>
    %197 = vector.broadcast %196 : vector<1x256xi1> to vector<32x256xi1>
    %198 = vector.broadcast %cst_94 : f32 to vector<32x256xf32>
    %199 = arith.select %197, %194, %198 : vector<32x256xi1>, vector<32x256xf32>
    %cst_95 = arith.constant dense<0.000000e+00> : vector<32x256xf32>
    %200 = tpu.matmul %193, %199, %cst_95 {dimension_numbers = #tpu.dot_dimension_numbers<[1], [0], [0], [1], [0, 0, 1, 1], [], []>} : vector<32x32xf32>, vector<32x256xf32>, vector<32x256xf32> -> vector<32x256xf32>
    %201 = arith.addf %191, %200 : vector<32x256xf32>
    %c3_96 = arith.constant 3 : index
    %c0_97 = arith.constant 0 : index
    %c0_98 = arith.constant 0 : index
    %202 = vector.load %arg7[%c3_96, %c0_97, %c0_98] : memref<9x32x32xf32, #tpu.memory_space<vmem>>, vector<1x32x32xf32>
    %203 = vector.shape_cast %202 : vector<1x32x32xf32> to vector<32x32xf32>
    %c1_i32_99 = arith.constant 1 : i32
    %204 = tpu.dynamic_rotate %172 by %c1_i32_99 dim 1 : vector<32x256xf32>, i32 -> vector<32x256xf32>
    %205 = arith.andi %21, %51 : vector<1x256xi1>
    %cst_100 = arith.constant 0.000000e+00 : f32
    %206 = vector.shape_cast %205 : vector<1x256xi1> to vector<1x256xi1>
    %207 = vector.broadcast %206 : vector<1x256xi1> to vector<32x256xi1>
    %208 = vector.broadcast %cst_100 : f32 to vector<32x256xf32>
    %209 = arith.select %207, %204, %208 : vector<32x256xi1>, vector<32x256xf32>
    %cst_101 = arith.constant dense<0.000000e+00> : vector<32x256xf32>
    %210 = tpu.matmul %203, %209, %cst_101 {dimension_numbers = #tpu.dot_dimension_numbers<[1], [0], [0], [1], [0, 0, 1, 1], [], []>} : vector<32x32xf32>, vector<32x256xf32>, vector<32x256xf32> -> vector<32x256xf32>
    %211 = arith.addf %201, %210 : vector<32x256xf32>
    %c4_102 = arith.constant 4 : index
    %c0_103 = arith.constant 0 : index
    %c0_104 = arith.constant 0 : index
    %212 = vector.load %arg7[%c4_102, %c0_103, %c0_104] : memref<9x32x32xf32, #tpu.memory_space<vmem>>, vector<1x32x32xf32>
    %213 = vector.shape_cast %212 : vector<1x32x32xf32> to vector<32x32xf32>
    %cst_105 = arith.constant dense<0.000000e+00> : vector<32x256xf32>
    %214 = tpu.matmul %213, %172, %cst_105 {dimension_numbers = #tpu.dot_dimension_numbers<[1], [0], [0], [1], [0, 0, 1, 1], [], []>} : vector<32x32xf32>, vector<32x256xf32>, vector<32x256xf32> -> vector<32x256xf32>
    %215 = arith.addf %211, %214 : vector<32x256xf32>
    %c5_106 = arith.constant 5 : index
    %c0_107 = arith.constant 0 : index
    %c0_108 = arith.constant 0 : index
    %216 = vector.load %arg7[%c5_106, %c0_107, %c0_108] : memref<9x32x32xf32, #tpu.memory_space<vmem>>, vector<1x32x32xf32>
    %217 = vector.shape_cast %216 : vector<1x32x32xf32> to vector<32x32xf32>
    %c255_i32_109 = arith.constant 255 : i32
    %218 = tpu.dynamic_rotate %172 by %c255_i32_109 dim 1 : vector<32x256xf32>, i32 -> vector<32x256xf32>
    %219 = arith.andi %21, %61 : vector<1x256xi1>
    %cst_110 = arith.constant 0.000000e+00 : f32
    %220 = vector.shape_cast %219 : vector<1x256xi1> to vector<1x256xi1>
    %221 = vector.broadcast %220 : vector<1x256xi1> to vector<32x256xi1>
    %222 = vector.broadcast %cst_110 : f32 to vector<32x256xf32>
    %223 = arith.select %221, %218, %222 : vector<32x256xi1>, vector<32x256xf32>
    %cst_111 = arith.constant dense<0.000000e+00> : vector<32x256xf32>
    %224 = tpu.matmul %217, %223, %cst_111 {dimension_numbers = #tpu.dot_dimension_numbers<[1], [0], [0], [1], [0, 0, 1, 1], [], []>} : vector<32x32xf32>, vector<32x256xf32>, vector<32x256xf32> -> vector<32x256xf32>
    %225 = arith.addf %215, %224 : vector<32x256xf32>
    %c6_112 = arith.constant 6 : index
    %c0_113 = arith.constant 0 : index
    %c0_114 = arith.constant 0 : index
    %226 = vector.load %arg7[%c6_112, %c0_113, %c0_114] : memref<9x32x32xf32, #tpu.memory_space<vmem>>, vector<1x32x32xf32>
    %227 = vector.shape_cast %226 : vector<1x32x32xf32> to vector<32x32xf32>
    %c241_i32_115 = arith.constant 241 : i32
    %228 = tpu.dynamic_rotate %172 by %c241_i32_115 dim 1 : vector<32x256xf32>, i32 -> vector<32x256xf32>
    %229 = arith.andi %26, %51 : vector<1x256xi1>
    %cst_116 = arith.constant 0.000000e+00 : f32
    %230 = vector.shape_cast %229 : vector<1x256xi1> to vector<1x256xi1>
    %231 = vector.broadcast %230 : vector<1x256xi1> to vector<32x256xi1>
    %232 = vector.broadcast %cst_116 : f32 to vector<32x256xf32>
    %233 = arith.select %231, %228, %232 : vector<32x256xi1>, vector<32x256xf32>
    %cst_117 = arith.constant dense<0.000000e+00> : vector<32x256xf32>
    %234 = tpu.matmul %227, %233, %cst_117 {dimension_numbers = #tpu.dot_dimension_numbers<[1], [0], [0], [1], [0, 0, 1, 1], [], []>} : vector<32x32xf32>, vector<32x256xf32>, vector<32x256xf32> -> vector<32x256xf32>
    %235 = arith.addf %225, %234 : vector<32x256xf32>
    %c7_118 = arith.constant 7 : index
    %c0_119 = arith.constant 0 : index
    %c0_120 = arith.constant 0 : index
    %236 = vector.load %arg7[%c7_118, %c0_119, %c0_120] : memref<9x32x32xf32, #tpu.memory_space<vmem>>, vector<1x32x32xf32>
    %237 = vector.shape_cast %236 : vector<1x32x32xf32> to vector<32x32xf32>
    %c240_i32_121 = arith.constant 240 : i32
    %238 = tpu.dynamic_rotate %172 by %c240_i32_121 dim 1 : vector<32x256xf32>, i32 -> vector<32x256xf32>
    %239 = arith.andi %26, %56 : vector<1x256xi1>
    %cst_122 = arith.constant 0.000000e+00 : f32
    %240 = vector.shape_cast %239 : vector<1x256xi1> to vector<1x256xi1>
    %241 = vector.broadcast %240 : vector<1x256xi1> to vector<32x256xi1>
    %242 = vector.broadcast %cst_122 : f32 to vector<32x256xf32>
    %243 = arith.select %241, %238, %242 : vector<32x256xi1>, vector<32x256xf32>
    %cst_123 = arith.constant dense<0.000000e+00> : vector<32x256xf32>
    %244 = tpu.matmul %237, %243, %cst_123 {dimension_numbers = #tpu.dot_dimension_numbers<[1], [0], [0], [1], [0, 0, 1, 1], [], []>} : vector<32x32xf32>, vector<32x256xf32>, vector<32x256xf32> -> vector<32x256xf32>
    %245 = arith.addf %235, %244 : vector<32x256xf32>
    %c8_124 = arith.constant 8 : index
    %c0_125 = arith.constant 0 : index
    %c0_126 = arith.constant 0 : index
    %246 = vector.load %arg7[%c8_124, %c0_125, %c0_126] : memref<9x32x32xf32, #tpu.memory_space<vmem>>, vector<1x32x32xf32>
    %247 = vector.shape_cast %246 : vector<1x32x32xf32> to vector<32x32xf32>
    %c239_i32_127 = arith.constant 239 : i32
    %248 = tpu.dynamic_rotate %172 by %c239_i32_127 dim 1 : vector<32x256xf32>, i32 -> vector<32x256xf32>
    %249 = arith.andi %26, %61 : vector<1x256xi1>
    %cst_128 = arith.constant 0.000000e+00 : f32
    %250 = vector.shape_cast %249 : vector<1x256xi1> to vector<1x256xi1>
    %251 = vector.broadcast %250 : vector<1x256xi1> to vector<32x256xi1>
    %252 = vector.broadcast %cst_128 : f32 to vector<32x256xf32>
    %253 = arith.select %251, %248, %252 : vector<32x256xi1>, vector<32x256xf32>
    %cst_129 = arith.constant dense<0.000000e+00> : vector<32x256xf32>
    %254 = tpu.matmul %247, %253, %cst_129 {dimension_numbers = #tpu.dot_dimension_numbers<[1], [0], [0], [1], [0, 0, 1, 1], [], []>} : vector<32x32xf32>, vector<32x256xf32>, vector<32x256xf32> -> vector<32x256xf32>
    %255 = arith.addf %245, %254 : vector<32x256xf32>
    %256 = vector.broadcast %74 : vector<32x1xf32> to vector<32x256xf32>
    %257 = arith.mulf %255, %256 : vector<32x256xf32>
    %258 = vector.broadcast %75 : vector<32x1xf32> to vector<32x256xf32>
    %259 = arith.addf %257, %258 : vector<32x256xf32>
    %cst_130 = arith.constant 0.000000e+00 : f32
    %260 = vector.broadcast %cst_130 : f32 to vector<32x256xf32>
    %261 = arith.maximumf %259, %260 : vector<32x256xf32>
    %cst_131 = arith.constant dense<0.000000e+00> : vector<32xf32>
    %262 = vector.multi_reduction <add>, %261, %cst_131 [1] : vector<32x256xf32> to vector<32xf32>
    %263 = vector.shape_cast %262 : vector<32xf32> to vector<32x1xf32>
    %cst_132 = arith.constant 3.906250e-03 : f32
    %264 = vector.broadcast %cst_132 : f32 to vector<32x1xf32>
    %265 = arith.mulf %263, %264 : vector<32x1xf32>
    %cst_133 = arith.constant dense<0xFF800000> : vector<32xf32>
    %266 = vector.multi_reduction <maximumf>, %261, %cst_133 [1] : vector<32x256xf32> to vector<32xf32>
    %267 = vector.shape_cast %266 : vector<32xf32> to vector<32x1xf32>
    %cst_134 = arith.constant dense<0.000000e+00> : vector<10x1xf32>
    %268 = tpu.matmul %76, %265, %cst_134 {dimension_numbers = #tpu.dot_dimension_numbers<[1], [0], [0], [1], [0, 0, 1, 1], [], []>} : vector<10x32xf32>, vector<32x1xf32>, vector<10x1xf32> -> vector<10x1xf32>
    %269 = arith.addf %268, %77 : vector<10x1xf32>
    %cst_135 = arith.constant 0.000000e+00 : f32
    %270 = vector.broadcast %cst_135 : f32 to vector<10x1xf32>
    %271 = arith.maximumf %269, %270 : vector<10x1xf32>
    %cst_136 = arith.constant dense<0.000000e+00> : vector<10x1xf32>
    %272 = tpu.matmul %76, %267, %cst_136 {dimension_numbers = #tpu.dot_dimension_numbers<[1], [0], [0], [1], [0, 0, 1, 1], [], []>} : vector<10x32xf32>, vector<32x1xf32>, vector<10x1xf32> -> vector<10x1xf32>
    %273 = arith.addf %272, %77 : vector<10x1xf32>
    %cst_137 = arith.constant 0.000000e+00 : f32
    %274 = vector.broadcast %cst_137 : f32 to vector<10x1xf32>
    %275 = arith.maximumf %273, %274 : vector<10x1xf32>
    %276 = arith.addf %271, %275 : vector<10x1xf32>
    %cst_138 = arith.constant dense<0.000000e+00> : vector<32x1xf32>
    %277 = tpu.matmul %78, %276, %cst_138 {dimension_numbers = #tpu.dot_dimension_numbers<[1], [0], [0], [1], [0, 0, 1, 1], [], []>} : vector<32x10xf32>, vector<10x1xf32>, vector<32x1xf32> -> vector<32x1xf32>
    %cst_139 = arith.constant 2.000000e+00 : f32
    %278 = vector.broadcast %cst_139 : f32 to vector<32x1xf32>
    %279 = arith.mulf %278, %79 : vector<32x1xf32>
    %280 = arith.addf %277, %279 : vector<32x1xf32>
    %cst_140 = arith.constant 5.000000e-01 : f32
    %281 = vector.broadcast %cst_140 : f32 to vector<32x1xf32>
    %282 = arith.mulf %281, %280 : vector<32x1xf32>
    %283 = math.tanh %282 : vector<32x1xf32>
    %cst_141 = arith.constant 5.000000e-01 : f32
    %284 = vector.broadcast %cst_141 : f32 to vector<32x1xf32>
    %285 = arith.mulf %284, %283 : vector<32x1xf32>
    %cst_142 = arith.constant 5.000000e-01 : f32
    %286 = vector.broadcast %cst_142 : f32 to vector<32x1xf32>
    %287 = arith.addf %285, %286 : vector<32x1xf32>
    %288 = vector.broadcast %287 : vector<32x1xf32> to vector<32x256xf32>
    %289 = arith.mulf %261, %288 : vector<32x256xf32>
    %cst_143 = arith.constant dense<0xFF800000> : vector<256xf32>
    %290 = vector.multi_reduction <maximumf>, %289, %cst_143 [0] : vector<32x256xf32> to vector<256xf32>
    %291 = vector.shape_cast %290 : vector<256xf32> to vector<1x256xf32>
    %cst_144 = arith.constant dense<0.000000e+00> : vector<256xf32>
    %292 = vector.multi_reduction <add>, %289, %cst_144 [0] : vector<32x256xf32> to vector<256xf32>
    %293 = vector.shape_cast %292 : vector<256xf32> to vector<1x256xf32>
    %cst_145 = arith.constant 3.125000e-02 : f32
    %294 = vector.broadcast %cst_145 : f32 to vector<1x256xf32>
    %295 = arith.mulf %293, %294 : vector<1x256xf32>
    %cst_146 = arith.constant 0.000000e+00 : f32
    %296 = vector.broadcast %cst_146 : f32 to vector<1x256xf32>
    %c0_147 = arith.constant 0 : index
    %297 = memref.load %arg14[%c0_147] : memref<98xf32, #tpu.memory_space<smem>>
    %c51_i32 = arith.constant 51 : i32
    %298 = tpu.dynamic_rotate %291 by %c51_i32 dim 1 : vector<1x256xf32>, i32 -> vector<1x256xf32>
    %299 = arith.andi %6, %41 : vector<1x256xi1>
    %cst_148 = arith.constant 0.000000e+00 : f32
    %300 = vector.broadcast %cst_148 : f32 to vector<1x256xf32>
    %301 = arith.select %299, %298, %300 : vector<1x256xi1>, vector<1x256xf32>
    %302 = vector.broadcast %297 : f32 to vector<1x256xf32>
    %303 = arith.mulf %302, %301 : vector<1x256xf32>
    %c49 = arith.constant 49 : index
    %304 = memref.load %arg14[%c49] : memref<98xf32, #tpu.memory_space<smem>>
    %c51_i32_149 = arith.constant 51 : i32
    %305 = tpu.dynamic_rotate %295 by %c51_i32_149 dim 1 : vector<1x256xf32>, i32 -> vector<1x256xf32>
    %306 = arith.andi %6, %41 : vector<1x256xi1>
    %cst_150 = arith.constant 0.000000e+00 : f32
    %307 = vector.broadcast %cst_150 : f32 to vector<1x256xf32>
    %308 = arith.select %306, %305, %307 : vector<1x256xi1>, vector<1x256xf32>
    %309 = vector.broadcast %304 : f32 to vector<1x256xf32>
    %310 = arith.mulf %309, %308 : vector<1x256xf32>
    %311 = arith.addf %303, %310 : vector<1x256xf32>
    %312 = arith.addf %296, %311 : vector<1x256xf32>
    %c1_151 = arith.constant 1 : index
    %313 = memref.load %arg14[%c1_151] : memref<98xf32, #tpu.memory_space<smem>>
    %c50_i32 = arith.constant 50 : i32
    %314 = tpu.dynamic_rotate %291 by %c50_i32 dim 1 : vector<1x256xf32>, i32 -> vector<1x256xf32>
    %315 = arith.andi %6, %46 : vector<1x256xi1>
    %cst_152 = arith.constant 0.000000e+00 : f32
    %316 = vector.broadcast %cst_152 : f32 to vector<1x256xf32>
    %317 = arith.select %315, %314, %316 : vector<1x256xi1>, vector<1x256xf32>
    %318 = vector.broadcast %313 : f32 to vector<1x256xf32>
    %319 = arith.mulf %318, %317 : vector<1x256xf32>
    %c50 = arith.constant 50 : index
    %320 = memref.load %arg14[%c50] : memref<98xf32, #tpu.memory_space<smem>>
    %c50_i32_153 = arith.constant 50 : i32
    %321 = tpu.dynamic_rotate %295 by %c50_i32_153 dim 1 : vector<1x256xf32>, i32 -> vector<1x256xf32>
    %322 = arith.andi %6, %46 : vector<1x256xi1>
    %cst_154 = arith.constant 0.000000e+00 : f32
    %323 = vector.broadcast %cst_154 : f32 to vector<1x256xf32>
    %324 = arith.select %322, %321, %323 : vector<1x256xi1>, vector<1x256xf32>
    %325 = vector.broadcast %320 : f32 to vector<1x256xf32>
    %326 = arith.mulf %325, %324 : vector<1x256xf32>
    %327 = arith.addf %319, %326 : vector<1x256xf32>
    %328 = arith.addf %312, %327 : vector<1x256xf32>
    %c2_155 = arith.constant 2 : index
    %329 = memref.load %arg14[%c2_155] : memref<98xf32, #tpu.memory_space<smem>>
    %c49_i32 = arith.constant 49 : i32
    %330 = tpu.dynamic_rotate %291 by %c49_i32 dim 1 : vector<1x256xf32>, i32 -> vector<1x256xf32>
    %331 = arith.andi %6, %51 : vector<1x256xi1>
    %cst_156 = arith.constant 0.000000e+00 : f32
    %332 = vector.broadcast %cst_156 : f32 to vector<1x256xf32>
    %333 = arith.select %331, %330, %332 : vector<1x256xi1>, vector<1x256xf32>
    %334 = vector.broadcast %329 : f32 to vector<1x256xf32>
    %335 = arith.mulf %334, %333 : vector<1x256xf32>
    %c51 = arith.constant 51 : index
    %336 = memref.load %arg14[%c51] : memref<98xf32, #tpu.memory_space<smem>>
    %c49_i32_157 = arith.constant 49 : i32
    %337 = tpu.dynamic_rotate %295 by %c49_i32_157 dim 1 : vector<1x256xf32>, i32 -> vector<1x256xf32>
    %338 = arith.andi %6, %51 : vector<1x256xi1>
    %cst_158 = arith.constant 0.000000e+00 : f32
    %339 = vector.broadcast %cst_158 : f32 to vector<1x256xf32>
    %340 = arith.select %338, %337, %339 : vector<1x256xi1>, vector<1x256xf32>
    %341 = vector.broadcast %336 : f32 to vector<1x256xf32>
    %342 = arith.mulf %341, %340 : vector<1x256xf32>
    %343 = arith.addf %335, %342 : vector<1x256xf32>
    %344 = arith.addf %328, %343 : vector<1x256xf32>
    %c3_159 = arith.constant 3 : index
    %345 = memref.load %arg14[%c3_159] : memref<98xf32, #tpu.memory_space<smem>>
    %c48_i32 = arith.constant 48 : i32
    %346 = tpu.dynamic_rotate %291 by %c48_i32 dim 1 : vector<1x256xf32>, i32 -> vector<1x256xf32>
    %347 = arith.andi %6, %56 : vector<1x256xi1>
    %cst_160 = arith.constant 0.000000e+00 : f32
    %348 = vector.broadcast %cst_160 : f32 to vector<1x256xf32>
    %349 = arith.select %347, %346, %348 : vector<1x256xi1>, vector<1x256xf32>
    %350 = vector.broadcast %345 : f32 to vector<1x256xf32>
    %351 = arith.mulf %350, %349 : vector<1x256xf32>
    %c52 = arith.constant 52 : index
    %352 = memref.load %arg14[%c52] : memref<98xf32, #tpu.memory_space<smem>>
    %c48_i32_161 = arith.constant 48 : i32
    %353 = tpu.dynamic_rotate %295 by %c48_i32_161 dim 1 : vector<1x256xf32>, i32 -> vector<1x256xf32>
    %354 = arith.andi %6, %56 : vector<1x256xi1>
    %cst_162 = arith.constant 0.000000e+00 : f32
    %355 = vector.broadcast %cst_162 : f32 to vector<1x256xf32>
    %356 = arith.select %354, %353, %355 : vector<1x256xi1>, vector<1x256xf32>
    %357 = vector.broadcast %352 : f32 to vector<1x256xf32>
    %358 = arith.mulf %357, %356 : vector<1x256xf32>
    %359 = arith.addf %351, %358 : vector<1x256xf32>
    %360 = arith.addf %344, %359 : vector<1x256xf32>
    %c4_163 = arith.constant 4 : index
    %361 = memref.load %arg14[%c4_163] : memref<98xf32, #tpu.memory_space<smem>>
    %c47_i32 = arith.constant 47 : i32
    %362 = tpu.dynamic_rotate %291 by %c47_i32 dim 1 : vector<1x256xf32>, i32 -> vector<1x256xf32>
    %363 = arith.andi %6, %61 : vector<1x256xi1>
    %cst_164 = arith.constant 0.000000e+00 : f32
    %364 = vector.broadcast %cst_164 : f32 to vector<1x256xf32>
    %365 = arith.select %363, %362, %364 : vector<1x256xi1>, vector<1x256xf32>
    %366 = vector.broadcast %361 : f32 to vector<1x256xf32>
    %367 = arith.mulf %366, %365 : vector<1x256xf32>
    %c53 = arith.constant 53 : index
    %368 = memref.load %arg14[%c53] : memref<98xf32, #tpu.memory_space<smem>>
    %c47_i32_165 = arith.constant 47 : i32
    %369 = tpu.dynamic_rotate %295 by %c47_i32_165 dim 1 : vector<1x256xf32>, i32 -> vector<1x256xf32>
    %370 = arith.andi %6, %61 : vector<1x256xi1>
    %cst_166 = arith.constant 0.000000e+00 : f32
    %371 = vector.broadcast %cst_166 : f32 to vector<1x256xf32>
    %372 = arith.select %370, %369, %371 : vector<1x256xi1>, vector<1x256xf32>
    %373 = vector.broadcast %368 : f32 to vector<1x256xf32>
    %374 = arith.mulf %373, %372 : vector<1x256xf32>
    %375 = arith.addf %367, %374 : vector<1x256xf32>
    %376 = arith.addf %360, %375 : vector<1x256xf32>
    %c5_167 = arith.constant 5 : index
    %377 = memref.load %arg14[%c5_167] : memref<98xf32, #tpu.memory_space<smem>>
    %c46_i32 = arith.constant 46 : i32
    %378 = tpu.dynamic_rotate %291 by %c46_i32 dim 1 : vector<1x256xf32>, i32 -> vector<1x256xf32>
    %379 = arith.andi %6, %66 : vector<1x256xi1>
    %cst_168 = arith.constant 0.000000e+00 : f32
    %380 = vector.broadcast %cst_168 : f32 to vector<1x256xf32>
    %381 = arith.select %379, %378, %380 : vector<1x256xi1>, vector<1x256xf32>
    %382 = vector.broadcast %377 : f32 to vector<1x256xf32>
    %383 = arith.mulf %382, %381 : vector<1x256xf32>
    %c54 = arith.constant 54 : index
    %384 = memref.load %arg14[%c54] : memref<98xf32, #tpu.memory_space<smem>>
    %c46_i32_169 = arith.constant 46 : i32
    %385 = tpu.dynamic_rotate %295 by %c46_i32_169 dim 1 : vector<1x256xf32>, i32 -> vector<1x256xf32>
    %386 = arith.andi %6, %66 : vector<1x256xi1>
    %cst_170 = arith.constant 0.000000e+00 : f32
    %387 = vector.broadcast %cst_170 : f32 to vector<1x256xf32>
    %388 = arith.select %386, %385, %387 : vector<1x256xi1>, vector<1x256xf32>
    %389 = vector.broadcast %384 : f32 to vector<1x256xf32>
    %390 = arith.mulf %389, %388 : vector<1x256xf32>
    %391 = arith.addf %383, %390 : vector<1x256xf32>
    %392 = arith.addf %376, %391 : vector<1x256xf32>
    %c6_171 = arith.constant 6 : index
    %393 = memref.load %arg14[%c6_171] : memref<98xf32, #tpu.memory_space<smem>>
    %c45_i32 = arith.constant 45 : i32
    %394 = tpu.dynamic_rotate %291 by %c45_i32 dim 1 : vector<1x256xf32>, i32 -> vector<1x256xf32>
    %395 = arith.andi %6, %71 : vector<1x256xi1>
    %cst_172 = arith.constant 0.000000e+00 : f32
    %396 = vector.broadcast %cst_172 : f32 to vector<1x256xf32>
    %397 = arith.select %395, %394, %396 : vector<1x256xi1>, vector<1x256xf32>
    %398 = vector.broadcast %393 : f32 to vector<1x256xf32>
    %399 = arith.mulf %398, %397 : vector<1x256xf32>
    %c55 = arith.constant 55 : index
    %400 = memref.load %arg14[%c55] : memref<98xf32, #tpu.memory_space<smem>>
    %c45_i32_173 = arith.constant 45 : i32
    %401 = tpu.dynamic_rotate %295 by %c45_i32_173 dim 1 : vector<1x256xf32>, i32 -> vector<1x256xf32>
    %402 = arith.andi %6, %71 : vector<1x256xi1>
    %cst_174 = arith.constant 0.000000e+00 : f32
    %403 = vector.broadcast %cst_174 : f32 to vector<1x256xf32>
    %404 = arith.select %402, %401, %403 : vector<1x256xi1>, vector<1x256xf32>
    %405 = vector.broadcast %400 : f32 to vector<1x256xf32>
    %406 = arith.mulf %405, %404 : vector<1x256xf32>
    %407 = arith.addf %399, %406 : vector<1x256xf32>
    %408 = arith.addf %392, %407 : vector<1x256xf32>
    %c7_175 = arith.constant 7 : index
    %409 = memref.load %arg14[%c7_175] : memref<98xf32, #tpu.memory_space<smem>>
    %c35_i32 = arith.constant 35 : i32
    %410 = tpu.dynamic_rotate %291 by %c35_i32 dim 1 : vector<1x256xf32>, i32 -> vector<1x256xf32>
    %411 = arith.andi %11, %41 : vector<1x256xi1>
    %cst_176 = arith.constant 0.000000e+00 : f32
    %412 = vector.broadcast %cst_176 : f32 to vector<1x256xf32>
    %413 = arith.select %411, %410, %412 : vector<1x256xi1>, vector<1x256xf32>
    %414 = vector.broadcast %409 : f32 to vector<1x256xf32>
    %415 = arith.mulf %414, %413 : vector<1x256xf32>
    %c56 = arith.constant 56 : index
    %416 = memref.load %arg14[%c56] : memref<98xf32, #tpu.memory_space<smem>>
    %c35_i32_177 = arith.constant 35 : i32
    %417 = tpu.dynamic_rotate %295 by %c35_i32_177 dim 1 : vector<1x256xf32>, i32 -> vector<1x256xf32>
    %418 = arith.andi %11, %41 : vector<1x256xi1>
    %cst_178 = arith.constant 0.000000e+00 : f32
    %419 = vector.broadcast %cst_178 : f32 to vector<1x256xf32>
    %420 = arith.select %418, %417, %419 : vector<1x256xi1>, vector<1x256xf32>
    %421 = vector.broadcast %416 : f32 to vector<1x256xf32>
    %422 = arith.mulf %421, %420 : vector<1x256xf32>
    %423 = arith.addf %415, %422 : vector<1x256xf32>
    %424 = arith.addf %408, %423 : vector<1x256xf32>
    %c8_179 = arith.constant 8 : index
    %425 = memref.load %arg14[%c8_179] : memref<98xf32, #tpu.memory_space<smem>>
    %c34_i32 = arith.constant 34 : i32
    %426 = tpu.dynamic_rotate %291 by %c34_i32 dim 1 : vector<1x256xf32>, i32 -> vector<1x256xf32>
    %427 = arith.andi %11, %46 : vector<1x256xi1>
    %cst_180 = arith.constant 0.000000e+00 : f32
    %428 = vector.broadcast %cst_180 : f32 to vector<1x256xf32>
    %429 = arith.select %427, %426, %428 : vector<1x256xi1>, vector<1x256xf32>
    %430 = vector.broadcast %425 : f32 to vector<1x256xf32>
    %431 = arith.mulf %430, %429 : vector<1x256xf32>
    %c57 = arith.constant 57 : index
    %432 = memref.load %arg14[%c57] : memref<98xf32, #tpu.memory_space<smem>>
    %c34_i32_181 = arith.constant 34 : i32
    %433 = tpu.dynamic_rotate %295 by %c34_i32_181 dim 1 : vector<1x256xf32>, i32 -> vector<1x256xf32>
    %434 = arith.andi %11, %46 : vector<1x256xi1>
    %cst_182 = arith.constant 0.000000e+00 : f32
    %435 = vector.broadcast %cst_182 : f32 to vector<1x256xf32>
    %436 = arith.select %434, %433, %435 : vector<1x256xi1>, vector<1x256xf32>
    %437 = vector.broadcast %432 : f32 to vector<1x256xf32>
    %438 = arith.mulf %437, %436 : vector<1x256xf32>
    %439 = arith.addf %431, %438 : vector<1x256xf32>
    %440 = arith.addf %424, %439 : vector<1x256xf32>
    %c9 = arith.constant 9 : index
    %441 = memref.load %arg14[%c9] : memref<98xf32, #tpu.memory_space<smem>>
    %c33_i32 = arith.constant 33 : i32
    %442 = tpu.dynamic_rotate %291 by %c33_i32 dim 1 : vector<1x256xf32>, i32 -> vector<1x256xf32>
    %443 = arith.andi %11, %51 : vector<1x256xi1>
    %cst_183 = arith.constant 0.000000e+00 : f32
    %444 = vector.broadcast %cst_183 : f32 to vector<1x256xf32>
    %445 = arith.select %443, %442, %444 : vector<1x256xi1>, vector<1x256xf32>
    %446 = vector.broadcast %441 : f32 to vector<1x256xf32>
    %447 = arith.mulf %446, %445 : vector<1x256xf32>
    %c58 = arith.constant 58 : index
    %448 = memref.load %arg14[%c58] : memref<98xf32, #tpu.memory_space<smem>>
    %c33_i32_184 = arith.constant 33 : i32
    %449 = tpu.dynamic_rotate %295 by %c33_i32_184 dim 1 : vector<1x256xf32>, i32 -> vector<1x256xf32>
    %450 = arith.andi %11, %51 : vector<1x256xi1>
    %cst_185 = arith.constant 0.000000e+00 : f32
    %451 = vector.broadcast %cst_185 : f32 to vector<1x256xf32>
    %452 = arith.select %450, %449, %451 : vector<1x256xi1>, vector<1x256xf32>
    %453 = vector.broadcast %448 : f32 to vector<1x256xf32>
    %454 = arith.mulf %453, %452 : vector<1x256xf32>
    %455 = arith.addf %447, %454 : vector<1x256xf32>
    %456 = arith.addf %440, %455 : vector<1x256xf32>
    %c10 = arith.constant 10 : index
    %457 = memref.load %arg14[%c10] : memref<98xf32, #tpu.memory_space<smem>>
    %c32_i32 = arith.constant 32 : i32
    %458 = tpu.dynamic_rotate %291 by %c32_i32 dim 1 : vector<1x256xf32>, i32 -> vector<1x256xf32>
    %459 = arith.andi %11, %56 : vector<1x256xi1>
    %cst_186 = arith.constant 0.000000e+00 : f32
    %460 = vector.broadcast %cst_186 : f32 to vector<1x256xf32>
    %461 = arith.select %459, %458, %460 : vector<1x256xi1>, vector<1x256xf32>
    %462 = vector.broadcast %457 : f32 to vector<1x256xf32>
    %463 = arith.mulf %462, %461 : vector<1x256xf32>
    %c59 = arith.constant 59 : index
    %464 = memref.load %arg14[%c59] : memref<98xf32, #tpu.memory_space<smem>>
    %c32_i32_187 = arith.constant 32 : i32
    %465 = tpu.dynamic_rotate %295 by %c32_i32_187 dim 1 : vector<1x256xf32>, i32 -> vector<1x256xf32>
    %466 = arith.andi %11, %56 : vector<1x256xi1>
    %cst_188 = arith.constant 0.000000e+00 : f32
    %467 = vector.broadcast %cst_188 : f32 to vector<1x256xf32>
    %468 = arith.select %466, %465, %467 : vector<1x256xi1>, vector<1x256xf32>
    %469 = vector.broadcast %464 : f32 to vector<1x256xf32>
    %470 = arith.mulf %469, %468 : vector<1x256xf32>
    %471 = arith.addf %463, %470 : vector<1x256xf32>
    %472 = arith.addf %456, %471 : vector<1x256xf32>
    %c11 = arith.constant 11 : index
    %473 = memref.load %arg14[%c11] : memref<98xf32, #tpu.memory_space<smem>>
    %c31_i32 = arith.constant 31 : i32
    %474 = tpu.dynamic_rotate %291 by %c31_i32 dim 1 : vector<1x256xf32>, i32 -> vector<1x256xf32>
    %475 = arith.andi %11, %61 : vector<1x256xi1>
    %cst_189 = arith.constant 0.000000e+00 : f32
    %476 = vector.broadcast %cst_189 : f32 to vector<1x256xf32>
    %477 = arith.select %475, %474, %476 : vector<1x256xi1>, vector<1x256xf32>
    %478 = vector.broadcast %473 : f32 to vector<1x256xf32>
    %479 = arith.mulf %478, %477 : vector<1x256xf32>
    %c60 = arith.constant 60 : index
    %480 = memref.load %arg14[%c60] : memref<98xf32, #tpu.memory_space<smem>>
    %c31_i32_190 = arith.constant 31 : i32
    %481 = tpu.dynamic_rotate %295 by %c31_i32_190 dim 1 : vector<1x256xf32>, i32 -> vector<1x256xf32>
    %482 = arith.andi %11, %61 : vector<1x256xi1>
    %cst_191 = arith.constant 0.000000e+00 : f32
    %483 = vector.broadcast %cst_191 : f32 to vector<1x256xf32>
    %484 = arith.select %482, %481, %483 : vector<1x256xi1>, vector<1x256xf32>
    %485 = vector.broadcast %480 : f32 to vector<1x256xf32>
    %486 = arith.mulf %485, %484 : vector<1x256xf32>
    %487 = arith.addf %479, %486 : vector<1x256xf32>
    %488 = arith.addf %472, %487 : vector<1x256xf32>
    %c12 = arith.constant 12 : index
    %489 = memref.load %arg14[%c12] : memref<98xf32, #tpu.memory_space<smem>>
    %c30_i32 = arith.constant 30 : i32
    %490 = tpu.dynamic_rotate %291 by %c30_i32 dim 1 : vector<1x256xf32>, i32 -> vector<1x256xf32>
    %491 = arith.andi %11, %66 : vector<1x256xi1>
    %cst_192 = arith.constant 0.000000e+00 : f32
    %492 = vector.broadcast %cst_192 : f32 to vector<1x256xf32>
    %493 = arith.select %491, %490, %492 : vector<1x256xi1>, vector<1x256xf32>
    %494 = vector.broadcast %489 : f32 to vector<1x256xf32>
    %495 = arith.mulf %494, %493 : vector<1x256xf32>
    %c61 = arith.constant 61 : index
    %496 = memref.load %arg14[%c61] : memref<98xf32, #tpu.memory_space<smem>>
    %c30_i32_193 = arith.constant 30 : i32
    %497 = tpu.dynamic_rotate %295 by %c30_i32_193 dim 1 : vector<1x256xf32>, i32 -> vector<1x256xf32>
    %498 = arith.andi %11, %66 : vector<1x256xi1>
    %cst_194 = arith.constant 0.000000e+00 : f32
    %499 = vector.broadcast %cst_194 : f32 to vector<1x256xf32>
    %500 = arith.select %498, %497, %499 : vector<1x256xi1>, vector<1x256xf32>
    %501 = vector.broadcast %496 : f32 to vector<1x256xf32>
    %502 = arith.mulf %501, %500 : vector<1x256xf32>
    %503 = arith.addf %495, %502 : vector<1x256xf32>
    %504 = arith.addf %488, %503 : vector<1x256xf32>
    %c13 = arith.constant 13 : index
    %505 = memref.load %arg14[%c13] : memref<98xf32, #tpu.memory_space<smem>>
    %c29_i32 = arith.constant 29 : i32
    %506 = tpu.dynamic_rotate %291 by %c29_i32 dim 1 : vector<1x256xf32>, i32 -> vector<1x256xf32>
    %507 = arith.andi %11, %71 : vector<1x256xi1>
    %cst_195 = arith.constant 0.000000e+00 : f32
    %508 = vector.broadcast %cst_195 : f32 to vector<1x256xf32>
    %509 = arith.select %507, %506, %508 : vector<1x256xi1>, vector<1x256xf32>
    %510 = vector.broadcast %505 : f32 to vector<1x256xf32>
    %511 = arith.mulf %510, %509 : vector<1x256xf32>
    %c62 = arith.constant 62 : index
    %512 = memref.load %arg14[%c62] : memref<98xf32, #tpu.memory_space<smem>>
    %c29_i32_196 = arith.constant 29 : i32
    %513 = tpu.dynamic_rotate %295 by %c29_i32_196 dim 1 : vector<1x256xf32>, i32 -> vector<1x256xf32>
    %514 = arith.andi %11, %71 : vector<1x256xi1>
    %cst_197 = arith.constant 0.000000e+00 : f32
    %515 = vector.broadcast %cst_197 : f32 to vector<1x256xf32>
    %516 = arith.select %514, %513, %515 : vector<1x256xi1>, vector<1x256xf32>
    %517 = vector.broadcast %512 : f32 to vector<1x256xf32>
    %518 = arith.mulf %517, %516 : vector<1x256xf32>
    %519 = arith.addf %511, %518 : vector<1x256xf32>
    %520 = arith.addf %504, %519 : vector<1x256xf32>
    %c14 = arith.constant 14 : index
    %521 = memref.load %arg14[%c14] : memref<98xf32, #tpu.memory_space<smem>>
    %c19_i32 = arith.constant 19 : i32
    %522 = tpu.dynamic_rotate %291 by %c19_i32 dim 1 : vector<1x256xf32>, i32 -> vector<1x256xf32>
    %523 = arith.andi %16, %41 : vector<1x256xi1>
    %cst_198 = arith.constant 0.000000e+00 : f32
    %524 = vector.broadcast %cst_198 : f32 to vector<1x256xf32>
    %525 = arith.select %523, %522, %524 : vector<1x256xi1>, vector<1x256xf32>
    %526 = vector.broadcast %521 : f32 to vector<1x256xf32>
    %527 = arith.mulf %526, %525 : vector<1x256xf32>
    %c63 = arith.constant 63 : index
    %528 = memref.load %arg14[%c63] : memref<98xf32, #tpu.memory_space<smem>>
    %c19_i32_199 = arith.constant 19 : i32
    %529 = tpu.dynamic_rotate %295 by %c19_i32_199 dim 1 : vector<1x256xf32>, i32 -> vector<1x256xf32>
    %530 = arith.andi %16, %41 : vector<1x256xi1>
    %cst_200 = arith.constant 0.000000e+00 : f32
    %531 = vector.broadcast %cst_200 : f32 to vector<1x256xf32>
    %532 = arith.select %530, %529, %531 : vector<1x256xi1>, vector<1x256xf32>
    %533 = vector.broadcast %528 : f32 to vector<1x256xf32>
    %534 = arith.mulf %533, %532 : vector<1x256xf32>
    %535 = arith.addf %527, %534 : vector<1x256xf32>
    %536 = arith.addf %520, %535 : vector<1x256xf32>
    %c15 = arith.constant 15 : index
    %537 = memref.load %arg14[%c15] : memref<98xf32, #tpu.memory_space<smem>>
    %c18_i32_201 = arith.constant 18 : i32
    %538 = tpu.dynamic_rotate %291 by %c18_i32_201 dim 1 : vector<1x256xf32>, i32 -> vector<1x256xf32>
    %539 = arith.andi %16, %46 : vector<1x256xi1>
    %cst_202 = arith.constant 0.000000e+00 : f32
    %540 = vector.broadcast %cst_202 : f32 to vector<1x256xf32>
    %541 = arith.select %539, %538, %540 : vector<1x256xi1>, vector<1x256xf32>
    %542 = vector.broadcast %537 : f32 to vector<1x256xf32>
    %543 = arith.mulf %542, %541 : vector<1x256xf32>
    %c64 = arith.constant 64 : index
    %544 = memref.load %arg14[%c64] : memref<98xf32, #tpu.memory_space<smem>>
    %c18_i32_203 = arith.constant 18 : i32
    %545 = tpu.dynamic_rotate %295 by %c18_i32_203 dim 1 : vector<1x256xf32>, i32 -> vector<1x256xf32>
    %546 = arith.andi %16, %46 : vector<1x256xi1>
    %cst_204 = arith.constant 0.000000e+00 : f32
    %547 = vector.broadcast %cst_204 : f32 to vector<1x256xf32>
    %548 = arith.select %546, %545, %547 : vector<1x256xi1>, vector<1x256xf32>
    %549 = vector.broadcast %544 : f32 to vector<1x256xf32>
    %550 = arith.mulf %549, %548 : vector<1x256xf32>
    %551 = arith.addf %543, %550 : vector<1x256xf32>
    %552 = arith.addf %536, %551 : vector<1x256xf32>
    %c16 = arith.constant 16 : index
    %553 = memref.load %arg14[%c16] : memref<98xf32, #tpu.memory_space<smem>>
    %c17_i32_205 = arith.constant 17 : i32
    %554 = tpu.dynamic_rotate %291 by %c17_i32_205 dim 1 : vector<1x256xf32>, i32 -> vector<1x256xf32>
    %555 = arith.andi %16, %51 : vector<1x256xi1>
    %cst_206 = arith.constant 0.000000e+00 : f32
    %556 = vector.broadcast %cst_206 : f32 to vector<1x256xf32>
    %557 = arith.select %555, %554, %556 : vector<1x256xi1>, vector<1x256xf32>
    %558 = vector.broadcast %553 : f32 to vector<1x256xf32>
    %559 = arith.mulf %558, %557 : vector<1x256xf32>
    %c65 = arith.constant 65 : index
    %560 = memref.load %arg14[%c65] : memref<98xf32, #tpu.memory_space<smem>>
    %c17_i32_207 = arith.constant 17 : i32
    %561 = tpu.dynamic_rotate %295 by %c17_i32_207 dim 1 : vector<1x256xf32>, i32 -> vector<1x256xf32>
    %562 = arith.andi %16, %51 : vector<1x256xi1>
    %cst_208 = arith.constant 0.000000e+00 : f32
    %563 = vector.broadcast %cst_208 : f32 to vector<1x256xf32>
    %564 = arith.select %562, %561, %563 : vector<1x256xi1>, vector<1x256xf32>
    %565 = vector.broadcast %560 : f32 to vector<1x256xf32>
    %566 = arith.mulf %565, %564 : vector<1x256xf32>
    %567 = arith.addf %559, %566 : vector<1x256xf32>
    %568 = arith.addf %552, %567 : vector<1x256xf32>
    %c17 = arith.constant 17 : index
    %569 = memref.load %arg14[%c17] : memref<98xf32, #tpu.memory_space<smem>>
    %c16_i32_209 = arith.constant 16 : i32
    %570 = tpu.dynamic_rotate %291 by %c16_i32_209 dim 1 : vector<1x256xf32>, i32 -> vector<1x256xf32>
    %571 = arith.andi %16, %56 : vector<1x256xi1>
    %cst_210 = arith.constant 0.000000e+00 : f32
    %572 = vector.broadcast %cst_210 : f32 to vector<1x256xf32>
    %573 = arith.select %571, %570, %572 : vector<1x256xi1>, vector<1x256xf32>
    %574 = vector.broadcast %569 : f32 to vector<1x256xf32>
    %575 = arith.mulf %574, %573 : vector<1x256xf32>
    %c66 = arith.constant 66 : index
    %576 = memref.load %arg14[%c66] : memref<98xf32, #tpu.memory_space<smem>>
    %c16_i32_211 = arith.constant 16 : i32
    %577 = tpu.dynamic_rotate %295 by %c16_i32_211 dim 1 : vector<1x256xf32>, i32 -> vector<1x256xf32>
    %578 = arith.andi %16, %56 : vector<1x256xi1>
    %cst_212 = arith.constant 0.000000e+00 : f32
    %579 = vector.broadcast %cst_212 : f32 to vector<1x256xf32>
    %580 = arith.select %578, %577, %579 : vector<1x256xi1>, vector<1x256xf32>
    %581 = vector.broadcast %576 : f32 to vector<1x256xf32>
    %582 = arith.mulf %581, %580 : vector<1x256xf32>
    %583 = arith.addf %575, %582 : vector<1x256xf32>
    %584 = arith.addf %568, %583 : vector<1x256xf32>
    %c18 = arith.constant 18 : index
    %585 = memref.load %arg14[%c18] : memref<98xf32, #tpu.memory_space<smem>>
    %c15_i32_213 = arith.constant 15 : i32
    %586 = tpu.dynamic_rotate %291 by %c15_i32_213 dim 1 : vector<1x256xf32>, i32 -> vector<1x256xf32>
    %587 = arith.andi %16, %61 : vector<1x256xi1>
    %cst_214 = arith.constant 0.000000e+00 : f32
    %588 = vector.broadcast %cst_214 : f32 to vector<1x256xf32>
    %589 = arith.select %587, %586, %588 : vector<1x256xi1>, vector<1x256xf32>
    %590 = vector.broadcast %585 : f32 to vector<1x256xf32>
    %591 = arith.mulf %590, %589 : vector<1x256xf32>
    %c67 = arith.constant 67 : index
    %592 = memref.load %arg14[%c67] : memref<98xf32, #tpu.memory_space<smem>>
    %c15_i32_215 = arith.constant 15 : i32
    %593 = tpu.dynamic_rotate %295 by %c15_i32_215 dim 1 : vector<1x256xf32>, i32 -> vector<1x256xf32>
    %594 = arith.andi %16, %61 : vector<1x256xi1>
    %cst_216 = arith.constant 0.000000e+00 : f32
    %595 = vector.broadcast %cst_216 : f32 to vector<1x256xf32>
    %596 = arith.select %594, %593, %595 : vector<1x256xi1>, vector<1x256xf32>
    %597 = vector.broadcast %592 : f32 to vector<1x256xf32>
    %598 = arith.mulf %597, %596 : vector<1x256xf32>
    %599 = arith.addf %591, %598 : vector<1x256xf32>
    %600 = arith.addf %584, %599 : vector<1x256xf32>
    %c19 = arith.constant 19 : index
    %601 = memref.load %arg14[%c19] : memref<98xf32, #tpu.memory_space<smem>>
    %c14_i32_217 = arith.constant 14 : i32
    %602 = tpu.dynamic_rotate %291 by %c14_i32_217 dim 1 : vector<1x256xf32>, i32 -> vector<1x256xf32>
    %603 = arith.andi %16, %66 : vector<1x256xi1>
    %cst_218 = arith.constant 0.000000e+00 : f32
    %604 = vector.broadcast %cst_218 : f32 to vector<1x256xf32>
    %605 = arith.select %603, %602, %604 : vector<1x256xi1>, vector<1x256xf32>
    %606 = vector.broadcast %601 : f32 to vector<1x256xf32>
    %607 = arith.mulf %606, %605 : vector<1x256xf32>
    %c68 = arith.constant 68 : index
    %608 = memref.load %arg14[%c68] : memref<98xf32, #tpu.memory_space<smem>>
    %c14_i32_219 = arith.constant 14 : i32
    %609 = tpu.dynamic_rotate %295 by %c14_i32_219 dim 1 : vector<1x256xf32>, i32 -> vector<1x256xf32>
    %610 = arith.andi %16, %66 : vector<1x256xi1>
    %cst_220 = arith.constant 0.000000e+00 : f32
    %611 = vector.broadcast %cst_220 : f32 to vector<1x256xf32>
    %612 = arith.select %610, %609, %611 : vector<1x256xi1>, vector<1x256xf32>
    %613 = vector.broadcast %608 : f32 to vector<1x256xf32>
    %614 = arith.mulf %613, %612 : vector<1x256xf32>
    %615 = arith.addf %607, %614 : vector<1x256xf32>
    %616 = arith.addf %600, %615 : vector<1x256xf32>
    %c20 = arith.constant 20 : index
    %617 = memref.load %arg14[%c20] : memref<98xf32, #tpu.memory_space<smem>>
    %c13_i32_221 = arith.constant 13 : i32
    %618 = tpu.dynamic_rotate %291 by %c13_i32_221 dim 1 : vector<1x256xf32>, i32 -> vector<1x256xf32>
    %619 = arith.andi %16, %71 : vector<1x256xi1>
    %cst_222 = arith.constant 0.000000e+00 : f32
    %620 = vector.broadcast %cst_222 : f32 to vector<1x256xf32>
    %621 = arith.select %619, %618, %620 : vector<1x256xi1>, vector<1x256xf32>
    %622 = vector.broadcast %617 : f32 to vector<1x256xf32>
    %623 = arith.mulf %622, %621 : vector<1x256xf32>
    %c69 = arith.constant 69 : index
    %624 = memref.load %arg14[%c69] : memref<98xf32, #tpu.memory_space<smem>>
    %c13_i32_223 = arith.constant 13 : i32
    %625 = tpu.dynamic_rotate %295 by %c13_i32_223 dim 1 : vector<1x256xf32>, i32 -> vector<1x256xf32>
    %626 = arith.andi %16, %71 : vector<1x256xi1>
    %cst_224 = arith.constant 0.000000e+00 : f32
    %627 = vector.broadcast %cst_224 : f32 to vector<1x256xf32>
    %628 = arith.select %626, %625, %627 : vector<1x256xi1>, vector<1x256xf32>
    %629 = vector.broadcast %624 : f32 to vector<1x256xf32>
    %630 = arith.mulf %629, %628 : vector<1x256xf32>
    %631 = arith.addf %623, %630 : vector<1x256xf32>
    %632 = arith.addf %616, %631 : vector<1x256xf32>
    %c21 = arith.constant 21 : index
    %633 = memref.load %arg14[%c21] : memref<98xf32, #tpu.memory_space<smem>>
    %c3_i32_225 = arith.constant 3 : i32
    %634 = tpu.dynamic_rotate %291 by %c3_i32_225 dim 1 : vector<1x256xf32>, i32 -> vector<1x256xf32>
    %635 = arith.andi %21, %41 : vector<1x256xi1>
    %cst_226 = arith.constant 0.000000e+00 : f32
    %636 = vector.broadcast %cst_226 : f32 to vector<1x256xf32>
    %637 = arith.select %635, %634, %636 : vector<1x256xi1>, vector<1x256xf32>
    %638 = vector.broadcast %633 : f32 to vector<1x256xf32>
    %639 = arith.mulf %638, %637 : vector<1x256xf32>
    %c70 = arith.constant 70 : index
    %640 = memref.load %arg14[%c70] : memref<98xf32, #tpu.memory_space<smem>>
    %c3_i32_227 = arith.constant 3 : i32
    %641 = tpu.dynamic_rotate %295 by %c3_i32_227 dim 1 : vector<1x256xf32>, i32 -> vector<1x256xf32>
    %642 = arith.andi %21, %41 : vector<1x256xi1>
    %cst_228 = arith.constant 0.000000e+00 : f32
    %643 = vector.broadcast %cst_228 : f32 to vector<1x256xf32>
    %644 = arith.select %642, %641, %643 : vector<1x256xi1>, vector<1x256xf32>
    %645 = vector.broadcast %640 : f32 to vector<1x256xf32>
    %646 = arith.mulf %645, %644 : vector<1x256xf32>
    %647 = arith.addf %639, %646 : vector<1x256xf32>
    %648 = arith.addf %632, %647 : vector<1x256xf32>
    %c22 = arith.constant 22 : index
    %649 = memref.load %arg14[%c22] : memref<98xf32, #tpu.memory_space<smem>>
    %c2_i32_229 = arith.constant 2 : i32
    %650 = tpu.dynamic_rotate %291 by %c2_i32_229 dim 1 : vector<1x256xf32>, i32 -> vector<1x256xf32>
    %651 = arith.andi %21, %46 : vector<1x256xi1>
    %cst_230 = arith.constant 0.000000e+00 : f32
    %652 = vector.broadcast %cst_230 : f32 to vector<1x256xf32>
    %653 = arith.select %651, %650, %652 : vector<1x256xi1>, vector<1x256xf32>
    %654 = vector.broadcast %649 : f32 to vector<1x256xf32>
    %655 = arith.mulf %654, %653 : vector<1x256xf32>
    %c71 = arith.constant 71 : index
    %656 = memref.load %arg14[%c71] : memref<98xf32, #tpu.memory_space<smem>>
    %c2_i32_231 = arith.constant 2 : i32
    %657 = tpu.dynamic_rotate %295 by %c2_i32_231 dim 1 : vector<1x256xf32>, i32 -> vector<1x256xf32>
    %658 = arith.andi %21, %46 : vector<1x256xi1>
    %cst_232 = arith.constant 0.000000e+00 : f32
    %659 = vector.broadcast %cst_232 : f32 to vector<1x256xf32>
    %660 = arith.select %658, %657, %659 : vector<1x256xi1>, vector<1x256xf32>
    %661 = vector.broadcast %656 : f32 to vector<1x256xf32>
    %662 = arith.mulf %661, %660 : vector<1x256xf32>
    %663 = arith.addf %655, %662 : vector<1x256xf32>
    %664 = arith.addf %648, %663 : vector<1x256xf32>
    %c23 = arith.constant 23 : index
    %665 = memref.load %arg14[%c23] : memref<98xf32, #tpu.memory_space<smem>>
    %c1_i32_233 = arith.constant 1 : i32
    %666 = tpu.dynamic_rotate %291 by %c1_i32_233 dim 1 : vector<1x256xf32>, i32 -> vector<1x256xf32>
    %667 = arith.andi %21, %51 : vector<1x256xi1>
    %cst_234 = arith.constant 0.000000e+00 : f32
    %668 = vector.broadcast %cst_234 : f32 to vector<1x256xf32>
    %669 = arith.select %667, %666, %668 : vector<1x256xi1>, vector<1x256xf32>
    %670 = vector.broadcast %665 : f32 to vector<1x256xf32>
    %671 = arith.mulf %670, %669 : vector<1x256xf32>
    %c72 = arith.constant 72 : index
    %672 = memref.load %arg14[%c72] : memref<98xf32, #tpu.memory_space<smem>>
    %c1_i32_235 = arith.constant 1 : i32
    %673 = tpu.dynamic_rotate %295 by %c1_i32_235 dim 1 : vector<1x256xf32>, i32 -> vector<1x256xf32>
    %674 = arith.andi %21, %51 : vector<1x256xi1>
    %cst_236 = arith.constant 0.000000e+00 : f32
    %675 = vector.broadcast %cst_236 : f32 to vector<1x256xf32>
    %676 = arith.select %674, %673, %675 : vector<1x256xi1>, vector<1x256xf32>
    %677 = vector.broadcast %672 : f32 to vector<1x256xf32>
    %678 = arith.mulf %677, %676 : vector<1x256xf32>
    %679 = arith.addf %671, %678 : vector<1x256xf32>
    %680 = arith.addf %664, %679 : vector<1x256xf32>
    %c24 = arith.constant 24 : index
    %681 = memref.load %arg14[%c24] : memref<98xf32, #tpu.memory_space<smem>>
    %682 = vector.broadcast %681 : f32 to vector<1x256xf32>
    %683 = arith.mulf %682, %291 : vector<1x256xf32>
    %c73 = arith.constant 73 : index
    %684 = memref.load %arg14[%c73] : memref<98xf32, #tpu.memory_space<smem>>
    %685 = vector.broadcast %684 : f32 to vector<1x256xf32>
    %686 = arith.mulf %685, %295 : vector<1x256xf32>
    %687 = arith.addf %683, %686 : vector<1x256xf32>
    %688 = arith.addf %680, %687 : vector<1x256xf32>
    %c25 = arith.constant 25 : index
    %689 = memref.load %arg14[%c25] : memref<98xf32, #tpu.memory_space<smem>>
    %c255_i32_237 = arith.constant 255 : i32
    %690 = tpu.dynamic_rotate %291 by %c255_i32_237 dim 1 : vector<1x256xf32>, i32 -> vector<1x256xf32>
    %691 = arith.andi %21, %61 : vector<1x256xi1>
    %cst_238 = arith.constant 0.000000e+00 : f32
    %692 = vector.broadcast %cst_238 : f32 to vector<1x256xf32>
    %693 = arith.select %691, %690, %692 : vector<1x256xi1>, vector<1x256xf32>
    %694 = vector.broadcast %689 : f32 to vector<1x256xf32>
    %695 = arith.mulf %694, %693 : vector<1x256xf32>
    %c74 = arith.constant 74 : index
    %696 = memref.load %arg14[%c74] : memref<98xf32, #tpu.memory_space<smem>>
    %c255_i32_239 = arith.constant 255 : i32
    %697 = tpu.dynamic_rotate %295 by %c255_i32_239 dim 1 : vector<1x256xf32>, i32 -> vector<1x256xf32>
    %698 = arith.andi %21, %61 : vector<1x256xi1>
    %cst_240 = arith.constant 0.000000e+00 : f32
    %699 = vector.broadcast %cst_240 : f32 to vector<1x256xf32>
    %700 = arith.select %698, %697, %699 : vector<1x256xi1>, vector<1x256xf32>
    %701 = vector.broadcast %696 : f32 to vector<1x256xf32>
    %702 = arith.mulf %701, %700 : vector<1x256xf32>
    %703 = arith.addf %695, %702 : vector<1x256xf32>
    %704 = arith.addf %688, %703 : vector<1x256xf32>
    %c26 = arith.constant 26 : index
    %705 = memref.load %arg14[%c26] : memref<98xf32, #tpu.memory_space<smem>>
    %c254_i32 = arith.constant 254 : i32
    %706 = tpu.dynamic_rotate %291 by %c254_i32 dim 1 : vector<1x256xf32>, i32 -> vector<1x256xf32>
    %707 = arith.andi %21, %66 : vector<1x256xi1>
    %cst_241 = arith.constant 0.000000e+00 : f32
    %708 = vector.broadcast %cst_241 : f32 to vector<1x256xf32>
    %709 = arith.select %707, %706, %708 : vector<1x256xi1>, vector<1x256xf32>
    %710 = vector.broadcast %705 : f32 to vector<1x256xf32>
    %711 = arith.mulf %710, %709 : vector<1x256xf32>
    %c75 = arith.constant 75 : index
    %712 = memref.load %arg14[%c75] : memref<98xf32, #tpu.memory_space<smem>>
    %c254_i32_242 = arith.constant 254 : i32
    %713 = tpu.dynamic_rotate %295 by %c254_i32_242 dim 1 : vector<1x256xf32>, i32 -> vector<1x256xf32>
    %714 = arith.andi %21, %66 : vector<1x256xi1>
    %cst_243 = arith.constant 0.000000e+00 : f32
    %715 = vector.broadcast %cst_243 : f32 to vector<1x256xf32>
    %716 = arith.select %714, %713, %715 : vector<1x256xi1>, vector<1x256xf32>
    %717 = vector.broadcast %712 : f32 to vector<1x256xf32>
    %718 = arith.mulf %717, %716 : vector<1x256xf32>
    %719 = arith.addf %711, %718 : vector<1x256xf32>
    %720 = arith.addf %704, %719 : vector<1x256xf32>
    %c27 = arith.constant 27 : index
    %721 = memref.load %arg14[%c27] : memref<98xf32, #tpu.memory_space<smem>>
    %c253_i32 = arith.constant 253 : i32
    %722 = tpu.dynamic_rotate %291 by %c253_i32 dim 1 : vector<1x256xf32>, i32 -> vector<1x256xf32>
    %723 = arith.andi %21, %71 : vector<1x256xi1>
    %cst_244 = arith.constant 0.000000e+00 : f32
    %724 = vector.broadcast %cst_244 : f32 to vector<1x256xf32>
    %725 = arith.select %723, %722, %724 : vector<1x256xi1>, vector<1x256xf32>
    %726 = vector.broadcast %721 : f32 to vector<1x256xf32>
    %727 = arith.mulf %726, %725 : vector<1x256xf32>
    %c76 = arith.constant 76 : index
    %728 = memref.load %arg14[%c76] : memref<98xf32, #tpu.memory_space<smem>>
    %c253_i32_245 = arith.constant 253 : i32
    %729 = tpu.dynamic_rotate %295 by %c253_i32_245 dim 1 : vector<1x256xf32>, i32 -> vector<1x256xf32>
    %730 = arith.andi %21, %71 : vector<1x256xi1>
    %cst_246 = arith.constant 0.000000e+00 : f32
    %731 = vector.broadcast %cst_246 : f32 to vector<1x256xf32>
    %732 = arith.select %730, %729, %731 : vector<1x256xi1>, vector<1x256xf32>
    %733 = vector.broadcast %728 : f32 to vector<1x256xf32>
    %734 = arith.mulf %733, %732 : vector<1x256xf32>
    %735 = arith.addf %727, %734 : vector<1x256xf32>
    %736 = arith.addf %720, %735 : vector<1x256xf32>
    %c28 = arith.constant 28 : index
    %737 = memref.load %arg14[%c28] : memref<98xf32, #tpu.memory_space<smem>>
    %c243_i32 = arith.constant 243 : i32
    %738 = tpu.dynamic_rotate %291 by %c243_i32 dim 1 : vector<1x256xf32>, i32 -> vector<1x256xf32>
    %739 = arith.andi %26, %41 : vector<1x256xi1>
    %cst_247 = arith.constant 0.000000e+00 : f32
    %740 = vector.broadcast %cst_247 : f32 to vector<1x256xf32>
    %741 = arith.select %739, %738, %740 : vector<1x256xi1>, vector<1x256xf32>
    %742 = vector.broadcast %737 : f32 to vector<1x256xf32>
    %743 = arith.mulf %742, %741 : vector<1x256xf32>
    %c77 = arith.constant 77 : index
    %744 = memref.load %arg14[%c77] : memref<98xf32, #tpu.memory_space<smem>>
    %c243_i32_248 = arith.constant 243 : i32
    %745 = tpu.dynamic_rotate %295 by %c243_i32_248 dim 1 : vector<1x256xf32>, i32 -> vector<1x256xf32>
    %746 = arith.andi %26, %41 : vector<1x256xi1>
    %cst_249 = arith.constant 0.000000e+00 : f32
    %747 = vector.broadcast %cst_249 : f32 to vector<1x256xf32>
    %748 = arith.select %746, %745, %747 : vector<1x256xi1>, vector<1x256xf32>
    %749 = vector.broadcast %744 : f32 to vector<1x256xf32>
    %750 = arith.mulf %749, %748 : vector<1x256xf32>
    %751 = arith.addf %743, %750 : vector<1x256xf32>
    %752 = arith.addf %736, %751 : vector<1x256xf32>
    %c29 = arith.constant 29 : index
    %753 = memref.load %arg14[%c29] : memref<98xf32, #tpu.memory_space<smem>>
    %c242_i32 = arith.constant 242 : i32
    %754 = tpu.dynamic_rotate %291 by %c242_i32 dim 1 : vector<1x256xf32>, i32 -> vector<1x256xf32>
    %755 = arith.andi %26, %46 : vector<1x256xi1>
    %cst_250 = arith.constant 0.000000e+00 : f32
    %756 = vector.broadcast %cst_250 : f32 to vector<1x256xf32>
    %757 = arith.select %755, %754, %756 : vector<1x256xi1>, vector<1x256xf32>
    %758 = vector.broadcast %753 : f32 to vector<1x256xf32>
    %759 = arith.mulf %758, %757 : vector<1x256xf32>
    %c78 = arith.constant 78 : index
    %760 = memref.load %arg14[%c78] : memref<98xf32, #tpu.memory_space<smem>>
    %c242_i32_251 = arith.constant 242 : i32
    %761 = tpu.dynamic_rotate %295 by %c242_i32_251 dim 1 : vector<1x256xf32>, i32 -> vector<1x256xf32>
    %762 = arith.andi %26, %46 : vector<1x256xi1>
    %cst_252 = arith.constant 0.000000e+00 : f32
    %763 = vector.broadcast %cst_252 : f32 to vector<1x256xf32>
    %764 = arith.select %762, %761, %763 : vector<1x256xi1>, vector<1x256xf32>
    %765 = vector.broadcast %760 : f32 to vector<1x256xf32>
    %766 = arith.mulf %765, %764 : vector<1x256xf32>
    %767 = arith.addf %759, %766 : vector<1x256xf32>
    %768 = arith.addf %752, %767 : vector<1x256xf32>
    %c30 = arith.constant 30 : index
    %769 = memref.load %arg14[%c30] : memref<98xf32, #tpu.memory_space<smem>>
    %c241_i32_253 = arith.constant 241 : i32
    %770 = tpu.dynamic_rotate %291 by %c241_i32_253 dim 1 : vector<1x256xf32>, i32 -> vector<1x256xf32>
    %771 = arith.andi %26, %51 : vector<1x256xi1>
    %cst_254 = arith.constant 0.000000e+00 : f32
    %772 = vector.broadcast %cst_254 : f32 to vector<1x256xf32>
    %773 = arith.select %771, %770, %772 : vector<1x256xi1>, vector<1x256xf32>
    %774 = vector.broadcast %769 : f32 to vector<1x256xf32>
    %775 = arith.mulf %774, %773 : vector<1x256xf32>
    %c79 = arith.constant 79 : index
    %776 = memref.load %arg14[%c79] : memref<98xf32, #tpu.memory_space<smem>>
    %c241_i32_255 = arith.constant 241 : i32
    %777 = tpu.dynamic_rotate %295 by %c241_i32_255 dim 1 : vector<1x256xf32>, i32 -> vector<1x256xf32>
    %778 = arith.andi %26, %51 : vector<1x256xi1>
    %cst_256 = arith.constant 0.000000e+00 : f32
    %779 = vector.broadcast %cst_256 : f32 to vector<1x256xf32>
    %780 = arith.select %778, %777, %779 : vector<1x256xi1>, vector<1x256xf32>
    %781 = vector.broadcast %776 : f32 to vector<1x256xf32>
    %782 = arith.mulf %781, %780 : vector<1x256xf32>
    %783 = arith.addf %775, %782 : vector<1x256xf32>
    %784 = arith.addf %768, %783 : vector<1x256xf32>
    %c31 = arith.constant 31 : index
    %785 = memref.load %arg14[%c31] : memref<98xf32, #tpu.memory_space<smem>>
    %c240_i32_257 = arith.constant 240 : i32
    %786 = tpu.dynamic_rotate %291 by %c240_i32_257 dim 1 : vector<1x256xf32>, i32 -> vector<1x256xf32>
    %787 = arith.andi %26, %56 : vector<1x256xi1>
    %cst_258 = arith.constant 0.000000e+00 : f32
    %788 = vector.broadcast %cst_258 : f32 to vector<1x256xf32>
    %789 = arith.select %787, %786, %788 : vector<1x256xi1>, vector<1x256xf32>
    %790 = vector.broadcast %785 : f32 to vector<1x256xf32>
    %791 = arith.mulf %790, %789 : vector<1x256xf32>
    %c80 = arith.constant 80 : index
    %792 = memref.load %arg14[%c80] : memref<98xf32, #tpu.memory_space<smem>>
    %c240_i32_259 = arith.constant 240 : i32
    %793 = tpu.dynamic_rotate %295 by %c240_i32_259 dim 1 : vector<1x256xf32>, i32 -> vector<1x256xf32>
    %794 = arith.andi %26, %56 : vector<1x256xi1>
    %cst_260 = arith.constant 0.000000e+00 : f32
    %795 = vector.broadcast %cst_260 : f32 to vector<1x256xf32>
    %796 = arith.select %794, %793, %795 : vector<1x256xi1>, vector<1x256xf32>
    %797 = vector.broadcast %792 : f32 to vector<1x256xf32>
    %798 = arith.mulf %797, %796 : vector<1x256xf32>
    %799 = arith.addf %791, %798 : vector<1x256xf32>
    %800 = arith.addf %784, %799 : vector<1x256xf32>
    %c32 = arith.constant 32 : index
    %801 = memref.load %arg14[%c32] : memref<98xf32, #tpu.memory_space<smem>>
    %c239_i32_261 = arith.constant 239 : i32
    %802 = tpu.dynamic_rotate %291 by %c239_i32_261 dim 1 : vector<1x256xf32>, i32 -> vector<1x256xf32>
    %803 = arith.andi %26, %61 : vector<1x256xi1>
    %cst_262 = arith.constant 0.000000e+00 : f32
    %804 = vector.broadcast %cst_262 : f32 to vector<1x256xf32>
    %805 = arith.select %803, %802, %804 : vector<1x256xi1>, vector<1x256xf32>
    %806 = vector.broadcast %801 : f32 to vector<1x256xf32>
    %807 = arith.mulf %806, %805 : vector<1x256xf32>
    %c81 = arith.constant 81 : index
    %808 = memref.load %arg14[%c81] : memref<98xf32, #tpu.memory_space<smem>>
    %c239_i32_263 = arith.constant 239 : i32
    %809 = tpu.dynamic_rotate %295 by %c239_i32_263 dim 1 : vector<1x256xf32>, i32 -> vector<1x256xf32>
    %810 = arith.andi %26, %61 : vector<1x256xi1>
    %cst_264 = arith.constant 0.000000e+00 : f32
    %811 = vector.broadcast %cst_264 : f32 to vector<1x256xf32>
    %812 = arith.select %810, %809, %811 : vector<1x256xi1>, vector<1x256xf32>
    %813 = vector.broadcast %808 : f32 to vector<1x256xf32>
    %814 = arith.mulf %813, %812 : vector<1x256xf32>
    %815 = arith.addf %807, %814 : vector<1x256xf32>
    %816 = arith.addf %800, %815 : vector<1x256xf32>
    %c33 = arith.constant 33 : index
    %817 = memref.load %arg14[%c33] : memref<98xf32, #tpu.memory_space<smem>>
    %c238_i32 = arith.constant 238 : i32
    %818 = tpu.dynamic_rotate %291 by %c238_i32 dim 1 : vector<1x256xf32>, i32 -> vector<1x256xf32>
    %819 = arith.andi %26, %66 : vector<1x256xi1>
    %cst_265 = arith.constant 0.000000e+00 : f32
    %820 = vector.broadcast %cst_265 : f32 to vector<1x256xf32>
    %821 = arith.select %819, %818, %820 : vector<1x256xi1>, vector<1x256xf32>
    %822 = vector.broadcast %817 : f32 to vector<1x256xf32>
    %823 = arith.mulf %822, %821 : vector<1x256xf32>
    %c82 = arith.constant 82 : index
    %824 = memref.load %arg14[%c82] : memref<98xf32, #tpu.memory_space<smem>>
    %c238_i32_266 = arith.constant 238 : i32
    %825 = tpu.dynamic_rotate %295 by %c238_i32_266 dim 1 : vector<1x256xf32>, i32 -> vector<1x256xf32>
    %826 = arith.andi %26, %66 : vector<1x256xi1>
    %cst_267 = arith.constant 0.000000e+00 : f32
    %827 = vector.broadcast %cst_267 : f32 to vector<1x256xf32>
    %828 = arith.select %826, %825, %827 : vector<1x256xi1>, vector<1x256xf32>
    %829 = vector.broadcast %824 : f32 to vector<1x256xf32>
    %830 = arith.mulf %829, %828 : vector<1x256xf32>
    %831 = arith.addf %823, %830 : vector<1x256xf32>
    %832 = arith.addf %816, %831 : vector<1x256xf32>
    %c34 = arith.constant 34 : index
    %833 = memref.load %arg14[%c34] : memref<98xf32, #tpu.memory_space<smem>>
    %c237_i32 = arith.constant 237 : i32
    %834 = tpu.dynamic_rotate %291 by %c237_i32 dim 1 : vector<1x256xf32>, i32 -> vector<1x256xf32>
    %835 = arith.andi %26, %71 : vector<1x256xi1>
    %cst_268 = arith.constant 0.000000e+00 : f32
    %836 = vector.broadcast %cst_268 : f32 to vector<1x256xf32>
    %837 = arith.select %835, %834, %836 : vector<1x256xi1>, vector<1x256xf32>
    %838 = vector.broadcast %833 : f32 to vector<1x256xf32>
    %839 = arith.mulf %838, %837 : vector<1x256xf32>
    %c83 = arith.constant 83 : index
    %840 = memref.load %arg14[%c83] : memref<98xf32, #tpu.memory_space<smem>>
    %c237_i32_269 = arith.constant 237 : i32
    %841 = tpu.dynamic_rotate %295 by %c237_i32_269 dim 1 : vector<1x256xf32>, i32 -> vector<1x256xf32>
    %842 = arith.andi %26, %71 : vector<1x256xi1>
    %cst_270 = arith.constant 0.000000e+00 : f32
    %843 = vector.broadcast %cst_270 : f32 to vector<1x256xf32>
    %844 = arith.select %842, %841, %843 : vector<1x256xi1>, vector<1x256xf32>
    %845 = vector.broadcast %840 : f32 to vector<1x256xf32>
    %846 = arith.mulf %845, %844 : vector<1x256xf32>
    %847 = arith.addf %839, %846 : vector<1x256xf32>
    %848 = arith.addf %832, %847 : vector<1x256xf32>
    %c35 = arith.constant 35 : index
    %849 = memref.load %arg14[%c35] : memref<98xf32, #tpu.memory_space<smem>>
    %c227_i32 = arith.constant 227 : i32
    %850 = tpu.dynamic_rotate %291 by %c227_i32 dim 1 : vector<1x256xf32>, i32 -> vector<1x256xf32>
    %851 = arith.andi %31, %41 : vector<1x256xi1>
    %cst_271 = arith.constant 0.000000e+00 : f32
    %852 = vector.broadcast %cst_271 : f32 to vector<1x256xf32>
    %853 = arith.select %851, %850, %852 : vector<1x256xi1>, vector<1x256xf32>
    %854 = vector.broadcast %849 : f32 to vector<1x256xf32>
    %855 = arith.mulf %854, %853 : vector<1x256xf32>
    %c84 = arith.constant 84 : index
    %856 = memref.load %arg14[%c84] : memref<98xf32, #tpu.memory_space<smem>>
    %c227_i32_272 = arith.constant 227 : i32
    %857 = tpu.dynamic_rotate %295 by %c227_i32_272 dim 1 : vector<1x256xf32>, i32 -> vector<1x256xf32>
    %858 = arith.andi %31, %41 : vector<1x256xi1>
    %cst_273 = arith.constant 0.000000e+00 : f32
    %859 = vector.broadcast %cst_273 : f32 to vector<1x256xf32>
    %860 = arith.select %858, %857, %859 : vector<1x256xi1>, vector<1x256xf32>
    %861 = vector.broadcast %856 : f32 to vector<1x256xf32>
    %862 = arith.mulf %861, %860 : vector<1x256xf32>
    %863 = arith.addf %855, %862 : vector<1x256xf32>
    %864 = arith.addf %848, %863 : vector<1x256xf32>
    %c36 = arith.constant 36 : index
    %865 = memref.load %arg14[%c36] : memref<98xf32, #tpu.memory_space<smem>>
    %c226_i32 = arith.constant 226 : i32
    %866 = tpu.dynamic_rotate %291 by %c226_i32 dim 1 : vector<1x256xf32>, i32 -> vector<1x256xf32>
    %867 = arith.andi %31, %46 : vector<1x256xi1>
    %cst_274 = arith.constant 0.000000e+00 : f32
    %868 = vector.broadcast %cst_274 : f32 to vector<1x256xf32>
    %869 = arith.select %867, %866, %868 : vector<1x256xi1>, vector<1x256xf32>
    %870 = vector.broadcast %865 : f32 to vector<1x256xf32>
    %871 = arith.mulf %870, %869 : vector<1x256xf32>
    %c85 = arith.constant 85 : index
    %872 = memref.load %arg14[%c85] : memref<98xf32, #tpu.memory_space<smem>>
    %c226_i32_275 = arith.constant 226 : i32
    %873 = tpu.dynamic_rotate %295 by %c226_i32_275 dim 1 : vector<1x256xf32>, i32 -> vector<1x256xf32>
    %874 = arith.andi %31, %46 : vector<1x256xi1>
    %cst_276 = arith.constant 0.000000e+00 : f32
    %875 = vector.broadcast %cst_276 : f32 to vector<1x256xf32>
    %876 = arith.select %874, %873, %875 : vector<1x256xi1>, vector<1x256xf32>
    %877 = vector.broadcast %872 : f32 to vector<1x256xf32>
    %878 = arith.mulf %877, %876 : vector<1x256xf32>
    %879 = arith.addf %871, %878 : vector<1x256xf32>
    %880 = arith.addf %864, %879 : vector<1x256xf32>
    %c37 = arith.constant 37 : index
    %881 = memref.load %arg14[%c37] : memref<98xf32, #tpu.memory_space<smem>>
    %c225_i32 = arith.constant 225 : i32
    %882 = tpu.dynamic_rotate %291 by %c225_i32 dim 1 : vector<1x256xf32>, i32 -> vector<1x256xf32>
    %883 = arith.andi %31, %51 : vector<1x256xi1>
    %cst_277 = arith.constant 0.000000e+00 : f32
    %884 = vector.broadcast %cst_277 : f32 to vector<1x256xf32>
    %885 = arith.select %883, %882, %884 : vector<1x256xi1>, vector<1x256xf32>
    %886 = vector.broadcast %881 : f32 to vector<1x256xf32>
    %887 = arith.mulf %886, %885 : vector<1x256xf32>
    %c86 = arith.constant 86 : index
    %888 = memref.load %arg14[%c86] : memref<98xf32, #tpu.memory_space<smem>>
    %c225_i32_278 = arith.constant 225 : i32
    %889 = tpu.dynamic_rotate %295 by %c225_i32_278 dim 1 : vector<1x256xf32>, i32 -> vector<1x256xf32>
    %890 = arith.andi %31, %51 : vector<1x256xi1>
    %cst_279 = arith.constant 0.000000e+00 : f32
    %891 = vector.broadcast %cst_279 : f32 to vector<1x256xf32>
    %892 = arith.select %890, %889, %891 : vector<1x256xi1>, vector<1x256xf32>
    %893 = vector.broadcast %888 : f32 to vector<1x256xf32>
    %894 = arith.mulf %893, %892 : vector<1x256xf32>
    %895 = arith.addf %887, %894 : vector<1x256xf32>
    %896 = arith.addf %880, %895 : vector<1x256xf32>
    %c38 = arith.constant 38 : index
    %897 = memref.load %arg14[%c38] : memref<98xf32, #tpu.memory_space<smem>>
    %c224_i32 = arith.constant 224 : i32
    %898 = tpu.dynamic_rotate %291 by %c224_i32 dim 1 : vector<1x256xf32>, i32 -> vector<1x256xf32>
    %899 = arith.andi %31, %56 : vector<1x256xi1>
    %cst_280 = arith.constant 0.000000e+00 : f32
    %900 = vector.broadcast %cst_280 : f32 to vector<1x256xf32>
    %901 = arith.select %899, %898, %900 : vector<1x256xi1>, vector<1x256xf32>
    %902 = vector.broadcast %897 : f32 to vector<1x256xf32>
    %903 = arith.mulf %902, %901 : vector<1x256xf32>
    %c87 = arith.constant 87 : index
    %904 = memref.load %arg14[%c87] : memref<98xf32, #tpu.memory_space<smem>>
    %c224_i32_281 = arith.constant 224 : i32
    %905 = tpu.dynamic_rotate %295 by %c224_i32_281 dim 1 : vector<1x256xf32>, i32 -> vector<1x256xf32>
    %906 = arith.andi %31, %56 : vector<1x256xi1>
    %cst_282 = arith.constant 0.000000e+00 : f32
    %907 = vector.broadcast %cst_282 : f32 to vector<1x256xf32>
    %908 = arith.select %906, %905, %907 : vector<1x256xi1>, vector<1x256xf32>
    %909 = vector.broadcast %904 : f32 to vector<1x256xf32>
    %910 = arith.mulf %909, %908 : vector<1x256xf32>
    %911 = arith.addf %903, %910 : vector<1x256xf32>
    %912 = arith.addf %896, %911 : vector<1x256xf32>
    %c39 = arith.constant 39 : index
    %913 = memref.load %arg14[%c39] : memref<98xf32, #tpu.memory_space<smem>>
    %c223_i32 = arith.constant 223 : i32
    %914 = tpu.dynamic_rotate %291 by %c223_i32 dim 1 : vector<1x256xf32>, i32 -> vector<1x256xf32>
    %915 = arith.andi %31, %61 : vector<1x256xi1>
    %cst_283 = arith.constant 0.000000e+00 : f32
    %916 = vector.broadcast %cst_283 : f32 to vector<1x256xf32>
    %917 = arith.select %915, %914, %916 : vector<1x256xi1>, vector<1x256xf32>
    %918 = vector.broadcast %913 : f32 to vector<1x256xf32>
    %919 = arith.mulf %918, %917 : vector<1x256xf32>
    %c88 = arith.constant 88 : index
    %920 = memref.load %arg14[%c88] : memref<98xf32, #tpu.memory_space<smem>>
    %c223_i32_284 = arith.constant 223 : i32
    %921 = tpu.dynamic_rotate %295 by %c223_i32_284 dim 1 : vector<1x256xf32>, i32 -> vector<1x256xf32>
    %922 = arith.andi %31, %61 : vector<1x256xi1>
    %cst_285 = arith.constant 0.000000e+00 : f32
    %923 = vector.broadcast %cst_285 : f32 to vector<1x256xf32>
    %924 = arith.select %922, %921, %923 : vector<1x256xi1>, vector<1x256xf32>
    %925 = vector.broadcast %920 : f32 to vector<1x256xf32>
    %926 = arith.mulf %925, %924 : vector<1x256xf32>
    %927 = arith.addf %919, %926 : vector<1x256xf32>
    %928 = arith.addf %912, %927 : vector<1x256xf32>
    %c40 = arith.constant 40 : index
    %929 = memref.load %arg14[%c40] : memref<98xf32, #tpu.memory_space<smem>>
    %c222_i32 = arith.constant 222 : i32
    %930 = tpu.dynamic_rotate %291 by %c222_i32 dim 1 : vector<1x256xf32>, i32 -> vector<1x256xf32>
    %931 = arith.andi %31, %66 : vector<1x256xi1>
    %cst_286 = arith.constant 0.000000e+00 : f32
    %932 = vector.broadcast %cst_286 : f32 to vector<1x256xf32>
    %933 = arith.select %931, %930, %932 : vector<1x256xi1>, vector<1x256xf32>
    %934 = vector.broadcast %929 : f32 to vector<1x256xf32>
    %935 = arith.mulf %934, %933 : vector<1x256xf32>
    %c89 = arith.constant 89 : index
    %936 = memref.load %arg14[%c89] : memref<98xf32, #tpu.memory_space<smem>>
    %c222_i32_287 = arith.constant 222 : i32
    %937 = tpu.dynamic_rotate %295 by %c222_i32_287 dim 1 : vector<1x256xf32>, i32 -> vector<1x256xf32>
    %938 = arith.andi %31, %66 : vector<1x256xi1>
    %cst_288 = arith.constant 0.000000e+00 : f32
    %939 = vector.broadcast %cst_288 : f32 to vector<1x256xf32>
    %940 = arith.select %938, %937, %939 : vector<1x256xi1>, vector<1x256xf32>
    %941 = vector.broadcast %936 : f32 to vector<1x256xf32>
    %942 = arith.mulf %941, %940 : vector<1x256xf32>
    %943 = arith.addf %935, %942 : vector<1x256xf32>
    %944 = arith.addf %928, %943 : vector<1x256xf32>
    %c41 = arith.constant 41 : index
    %945 = memref.load %arg14[%c41] : memref<98xf32, #tpu.memory_space<smem>>
    %c221_i32 = arith.constant 221 : i32
    %946 = tpu.dynamic_rotate %291 by %c221_i32 dim 1 : vector<1x256xf32>, i32 -> vector<1x256xf32>
    %947 = arith.andi %31, %71 : vector<1x256xi1>
    %cst_289 = arith.constant 0.000000e+00 : f32
    %948 = vector.broadcast %cst_289 : f32 to vector<1x256xf32>
    %949 = arith.select %947, %946, %948 : vector<1x256xi1>, vector<1x256xf32>
    %950 = vector.broadcast %945 : f32 to vector<1x256xf32>
    %951 = arith.mulf %950, %949 : vector<1x256xf32>
    %c90 = arith.constant 90 : index
    %952 = memref.load %arg14[%c90] : memref<98xf32, #tpu.memory_space<smem>>
    %c221_i32_290 = arith.constant 221 : i32
    %953 = tpu.dynamic_rotate %295 by %c221_i32_290 dim 1 : vector<1x256xf32>, i32 -> vector<1x256xf32>
    %954 = arith.andi %31, %71 : vector<1x256xi1>
    %cst_291 = arith.constant 0.000000e+00 : f32
    %955 = vector.broadcast %cst_291 : f32 to vector<1x256xf32>
    %956 = arith.select %954, %953, %955 : vector<1x256xi1>, vector<1x256xf32>
    %957 = vector.broadcast %952 : f32 to vector<1x256xf32>
    %958 = arith.mulf %957, %956 : vector<1x256xf32>
    %959 = arith.addf %951, %958 : vector<1x256xf32>
    %960 = arith.addf %944, %959 : vector<1x256xf32>
    %c42 = arith.constant 42 : index
    %961 = memref.load %arg14[%c42] : memref<98xf32, #tpu.memory_space<smem>>
    %c211_i32 = arith.constant 211 : i32
    %962 = tpu.dynamic_rotate %291 by %c211_i32 dim 1 : vector<1x256xf32>, i32 -> vector<1x256xf32>
    %963 = arith.andi %36, %41 : vector<1x256xi1>
    %cst_292 = arith.constant 0.000000e+00 : f32
    %964 = vector.broadcast %cst_292 : f32 to vector<1x256xf32>
    %965 = arith.select %963, %962, %964 : vector<1x256xi1>, vector<1x256xf32>
    %966 = vector.broadcast %961 : f32 to vector<1x256xf32>
    %967 = arith.mulf %966, %965 : vector<1x256xf32>
    %c91 = arith.constant 91 : index
    %968 = memref.load %arg14[%c91] : memref<98xf32, #tpu.memory_space<smem>>
    %c211_i32_293 = arith.constant 211 : i32
    %969 = tpu.dynamic_rotate %295 by %c211_i32_293 dim 1 : vector<1x256xf32>, i32 -> vector<1x256xf32>
    %970 = arith.andi %36, %41 : vector<1x256xi1>
    %cst_294 = arith.constant 0.000000e+00 : f32
    %971 = vector.broadcast %cst_294 : f32 to vector<1x256xf32>
    %972 = arith.select %970, %969, %971 : vector<1x256xi1>, vector<1x256xf32>
    %973 = vector.broadcast %968 : f32 to vector<1x256xf32>
    %974 = arith.mulf %973, %972 : vector<1x256xf32>
    %975 = arith.addf %967, %974 : vector<1x256xf32>
    %976 = arith.addf %960, %975 : vector<1x256xf32>
    %c43 = arith.constant 43 : index
    %977 = memref.load %arg14[%c43] : memref<98xf32, #tpu.memory_space<smem>>
    %c210_i32 = arith.constant 210 : i32
    %978 = tpu.dynamic_rotate %291 by %c210_i32 dim 1 : vector<1x256xf32>, i32 -> vector<1x256xf32>
    %979 = arith.andi %36, %46 : vector<1x256xi1>
    %cst_295 = arith.constant 0.000000e+00 : f32
    %980 = vector.broadcast %cst_295 : f32 to vector<1x256xf32>
    %981 = arith.select %979, %978, %980 : vector<1x256xi1>, vector<1x256xf32>
    %982 = vector.broadcast %977 : f32 to vector<1x256xf32>
    %983 = arith.mulf %982, %981 : vector<1x256xf32>
    %c92 = arith.constant 92 : index
    %984 = memref.load %arg14[%c92] : memref<98xf32, #tpu.memory_space<smem>>
    %c210_i32_296 = arith.constant 210 : i32
    %985 = tpu.dynamic_rotate %295 by %c210_i32_296 dim 1 : vector<1x256xf32>, i32 -> vector<1x256xf32>
    %986 = arith.andi %36, %46 : vector<1x256xi1>
    %cst_297 = arith.constant 0.000000e+00 : f32
    %987 = vector.broadcast %cst_297 : f32 to vector<1x256xf32>
    %988 = arith.select %986, %985, %987 : vector<1x256xi1>, vector<1x256xf32>
    %989 = vector.broadcast %984 : f32 to vector<1x256xf32>
    %990 = arith.mulf %989, %988 : vector<1x256xf32>
    %991 = arith.addf %983, %990 : vector<1x256xf32>
    %992 = arith.addf %976, %991 : vector<1x256xf32>
    %c44 = arith.constant 44 : index
    %993 = memref.load %arg14[%c44] : memref<98xf32, #tpu.memory_space<smem>>
    %c209_i32 = arith.constant 209 : i32
    %994 = tpu.dynamic_rotate %291 by %c209_i32 dim 1 : vector<1x256xf32>, i32 -> vector<1x256xf32>
    %995 = arith.andi %36, %51 : vector<1x256xi1>
    %cst_298 = arith.constant 0.000000e+00 : f32
    %996 = vector.broadcast %cst_298 : f32 to vector<1x256xf32>
    %997 = arith.select %995, %994, %996 : vector<1x256xi1>, vector<1x256xf32>
    %998 = vector.broadcast %993 : f32 to vector<1x256xf32>
    %999 = arith.mulf %998, %997 : vector<1x256xf32>
    %c93 = arith.constant 93 : index
    %1000 = memref.load %arg14[%c93] : memref<98xf32, #tpu.memory_space<smem>>
    %c209_i32_299 = arith.constant 209 : i32
    %1001 = tpu.dynamic_rotate %295 by %c209_i32_299 dim 1 : vector<1x256xf32>, i32 -> vector<1x256xf32>
    %1002 = arith.andi %36, %51 : vector<1x256xi1>
    %cst_300 = arith.constant 0.000000e+00 : f32
    %1003 = vector.broadcast %cst_300 : f32 to vector<1x256xf32>
    %1004 = arith.select %1002, %1001, %1003 : vector<1x256xi1>, vector<1x256xf32>
    %1005 = vector.broadcast %1000 : f32 to vector<1x256xf32>
    %1006 = arith.mulf %1005, %1004 : vector<1x256xf32>
    %1007 = arith.addf %999, %1006 : vector<1x256xf32>
    %1008 = arith.addf %992, %1007 : vector<1x256xf32>
    %c45 = arith.constant 45 : index
    %1009 = memref.load %arg14[%c45] : memref<98xf32, #tpu.memory_space<smem>>
    %c208_i32 = arith.constant 208 : i32
    %1010 = tpu.dynamic_rotate %291 by %c208_i32 dim 1 : vector<1x256xf32>, i32 -> vector<1x256xf32>
    %1011 = arith.andi %36, %56 : vector<1x256xi1>
    %cst_301 = arith.constant 0.000000e+00 : f32
    %1012 = vector.broadcast %cst_301 : f32 to vector<1x256xf32>
    %1013 = arith.select %1011, %1010, %1012 : vector<1x256xi1>, vector<1x256xf32>
    %1014 = vector.broadcast %1009 : f32 to vector<1x256xf32>
    %1015 = arith.mulf %1014, %1013 : vector<1x256xf32>
    %c94 = arith.constant 94 : index
    %1016 = memref.load %arg14[%c94] : memref<98xf32, #tpu.memory_space<smem>>
    %c208_i32_302 = arith.constant 208 : i32
    %1017 = tpu.dynamic_rotate %295 by %c208_i32_302 dim 1 : vector<1x256xf32>, i32 -> vector<1x256xf32>
    %1018 = arith.andi %36, %56 : vector<1x256xi1>
    %cst_303 = arith.constant 0.000000e+00 : f32
    %1019 = vector.broadcast %cst_303 : f32 to vector<1x256xf32>
    %1020 = arith.select %1018, %1017, %1019 : vector<1x256xi1>, vector<1x256xf32>
    %1021 = vector.broadcast %1016 : f32 to vector<1x256xf32>
    %1022 = arith.mulf %1021, %1020 : vector<1x256xf32>
    %1023 = arith.addf %1015, %1022 : vector<1x256xf32>
    %1024 = arith.addf %1008, %1023 : vector<1x256xf32>
    %c46 = arith.constant 46 : index
    %1025 = memref.load %arg14[%c46] : memref<98xf32, #tpu.memory_space<smem>>
    %c207_i32 = arith.constant 207 : i32
    %1026 = tpu.dynamic_rotate %291 by %c207_i32 dim 1 : vector<1x256xf32>, i32 -> vector<1x256xf32>
    %1027 = arith.andi %36, %61 : vector<1x256xi1>
    %cst_304 = arith.constant 0.000000e+00 : f32
    %1028 = vector.broadcast %cst_304 : f32 to vector<1x256xf32>
    %1029 = arith.select %1027, %1026, %1028 : vector<1x256xi1>, vector<1x256xf32>
    %1030 = vector.broadcast %1025 : f32 to vector<1x256xf32>
    %1031 = arith.mulf %1030, %1029 : vector<1x256xf32>
    %c95 = arith.constant 95 : index
    %1032 = memref.load %arg14[%c95] : memref<98xf32, #tpu.memory_space<smem>>
    %c207_i32_305 = arith.constant 207 : i32
    %1033 = tpu.dynamic_rotate %295 by %c207_i32_305 dim 1 : vector<1x256xf32>, i32 -> vector<1x256xf32>
    %1034 = arith.andi %36, %61 : vector<1x256xi1>
    %cst_306 = arith.constant 0.000000e+00 : f32
    %1035 = vector.broadcast %cst_306 : f32 to vector<1x256xf32>
    %1036 = arith.select %1034, %1033, %1035 : vector<1x256xi1>, vector<1x256xf32>
    %1037 = vector.broadcast %1032 : f32 to vector<1x256xf32>
    %1038 = arith.mulf %1037, %1036 : vector<1x256xf32>
    %1039 = arith.addf %1031, %1038 : vector<1x256xf32>
    %1040 = arith.addf %1024, %1039 : vector<1x256xf32>
    %c47 = arith.constant 47 : index
    %1041 = memref.load %arg14[%c47] : memref<98xf32, #tpu.memory_space<smem>>
    %c206_i32 = arith.constant 206 : i32
    %1042 = tpu.dynamic_rotate %291 by %c206_i32 dim 1 : vector<1x256xf32>, i32 -> vector<1x256xf32>
    %1043 = arith.andi %36, %66 : vector<1x256xi1>
    %cst_307 = arith.constant 0.000000e+00 : f32
    %1044 = vector.broadcast %cst_307 : f32 to vector<1x256xf32>
    %1045 = arith.select %1043, %1042, %1044 : vector<1x256xi1>, vector<1x256xf32>
    %1046 = vector.broadcast %1041 : f32 to vector<1x256xf32>
    %1047 = arith.mulf %1046, %1045 : vector<1x256xf32>
    %c96 = arith.constant 96 : index
    %1048 = memref.load %arg14[%c96] : memref<98xf32, #tpu.memory_space<smem>>
    %c206_i32_308 = arith.constant 206 : i32
    %1049 = tpu.dynamic_rotate %295 by %c206_i32_308 dim 1 : vector<1x256xf32>, i32 -> vector<1x256xf32>
    %1050 = arith.andi %36, %66 : vector<1x256xi1>
    %cst_309 = arith.constant 0.000000e+00 : f32
    %1051 = vector.broadcast %cst_309 : f32 to vector<1x256xf32>
    %1052 = arith.select %1050, %1049, %1051 : vector<1x256xi1>, vector<1x256xf32>
    %1053 = vector.broadcast %1048 : f32 to vector<1x256xf32>
    %1054 = arith.mulf %1053, %1052 : vector<1x256xf32>
    %1055 = arith.addf %1047, %1054 : vector<1x256xf32>
    %1056 = arith.addf %1040, %1055 : vector<1x256xf32>
    %c48 = arith.constant 48 : index
    %1057 = memref.load %arg14[%c48] : memref<98xf32, #tpu.memory_space<smem>>
    %c205_i32 = arith.constant 205 : i32
    %1058 = tpu.dynamic_rotate %291 by %c205_i32 dim 1 : vector<1x256xf32>, i32 -> vector<1x256xf32>
    %1059 = arith.andi %36, %71 : vector<1x256xi1>
    %cst_310 = arith.constant 0.000000e+00 : f32
    %1060 = vector.broadcast %cst_310 : f32 to vector<1x256xf32>
    %1061 = arith.select %1059, %1058, %1060 : vector<1x256xi1>, vector<1x256xf32>
    %1062 = vector.broadcast %1057 : f32 to vector<1x256xf32>
    %1063 = arith.mulf %1062, %1061 : vector<1x256xf32>
    %c97 = arith.constant 97 : index
    %1064 = memref.load %arg14[%c97] : memref<98xf32, #tpu.memory_space<smem>>
    %c205_i32_311 = arith.constant 205 : i32
    %1065 = tpu.dynamic_rotate %295 by %c205_i32_311 dim 1 : vector<1x256xf32>, i32 -> vector<1x256xf32>
    %1066 = arith.andi %36, %71 : vector<1x256xi1>
    %cst_312 = arith.constant 0.000000e+00 : f32
    %1067 = vector.broadcast %cst_312 : f32 to vector<1x256xf32>
    %1068 = arith.select %1066, %1065, %1067 : vector<1x256xi1>, vector<1x256xf32>
    %1069 = vector.broadcast %1064 : f32 to vector<1x256xf32>
    %1070 = arith.mulf %1069, %1068 : vector<1x256xf32>
    %1071 = arith.addf %1063, %1070 : vector<1x256xf32>
    %1072 = arith.addf %1056, %1071 : vector<1x256xf32>
    %1073 = vector.broadcast %80 : f32 to vector<1x256xf32>
    %1074 = arith.mulf %1072, %1073 : vector<1x256xf32>
    %1075 = vector.broadcast %81 : f32 to vector<1x256xf32>
    %1076 = arith.addf %1074, %1075 : vector<1x256xf32>
    %cst_313 = arith.constant 5.000000e-01 : f32
    %1077 = vector.broadcast %cst_313 : f32 to vector<1x256xf32>
    %1078 = arith.mulf %1077, %1076 : vector<1x256xf32>
    %1079 = math.tanh %1078 : vector<1x256xf32>
    %cst_314 = arith.constant 5.000000e-01 : f32
    %1080 = vector.broadcast %cst_314 : f32 to vector<1x256xf32>
    %1081 = arith.mulf %1080, %1079 : vector<1x256xf32>
    %cst_315 = arith.constant 5.000000e-01 : f32
    %1082 = vector.broadcast %cst_315 : f32 to vector<1x256xf32>
    %1083 = arith.addf %1081, %1082 : vector<1x256xf32>
    %1084 = vector.broadcast %1083 : vector<1x256xf32> to vector<32x256xf32>
    %1085 = arith.mulf %289, %1084 : vector<32x256xf32>
    %c0_316 = arith.constant 0 : index
    %c0_317 = arith.constant 0 : index
    %c0_318 = arith.constant 0 : index
    %1086 = vector.load %arg16[%c0_316, %c0_317, %c0_318] : memref<1x32x256xf32, #tpu.memory_space<vmem>>, vector<1x32x256xf32>
    %1087 = vector.shape_cast %1086 : vector<1x32x256xf32> to vector<32x256xf32>
    %1088 = vector.shape_cast %1085 : vector<32x256xf32> to vector<1x32x256xf32>
    tpu.vector_store %arg16[%c0_316, %c0_317, %c0_318], %1088 {strides = array<i32>} : memref<1x32x256xf32, #tpu.memory_space<vmem>>, vector<1x32x256xf32>,
    return
  }
  func.func @transform_0(%arg0: i32) -> (i32, i32, i32) {
    %c0_i32 = arith.constant 0 : i32
    %c0_i32_0 = arith.constant 0 : i32
    %c0_i32_1 = arith.constant 0 : i32
    return %arg0, %c0_i32, %c0_i32_0 : i32, i32, i32
  }
  func.func @transform_1(%arg0: i32) -> (i32, i32) {
    %c0_i32 = arith.constant 0 : i32
    %c0_i32_0 = arith.constant 0 : i32
    %c0_i32_1 = arith.constant 0 : i32
    return %c0_i32, %c0_i32_0 : i32, i32
  }
  func.func @transform_2(%arg0: i32) -> (i32, i32) {
    %c0_i32 = arith.constant 0 : i32
    %c0_i32_0 = arith.constant 0 : i32
    %c0_i32_1 = arith.constant 0 : i32
    return %c0_i32, %c0_i32_0 : i32, i32
  }
  func.func @transform_3(%arg0: i32) -> (i32, i32, i32) {
    %c0_i32 = arith.constant 0 : i32
    %c0_i32_0 = arith.constant 0 : i32
    %c0_i32_1 = arith.constant 0 : i32
    %c0_i32_2 = arith.constant 0 : i32
    return %c0_i32, %c0_i32_0, %c0_i32_1 : i32, i32, i32
  }
  func.func @transform_4(%arg0: i32) -> (i32, i32) {
    %c0_i32 = arith.constant 0 : i32
    %c0_i32_0 = arith.constant 0 : i32
    %c0_i32_1 = arith.constant 0 : i32
    return %c0_i32, %c0_i32_0 : i32, i32
  }
  func.func @transform_5(%arg0: i32) -> (i32, i32) {
    %c0_i32 = arith.constant 0 : i32
    %c0_i32_0 = arith.constant 0 : i32
    %c0_i32_1 = arith.constant 0 : i32
    return %c0_i32, %c0_i32_0 : i32, i32
  }
  func.func @transform_6(%arg0: i32) -> (i32, i32, i32) {
    %c0_i32 = arith.constant 0 : i32
    %c0_i32_0 = arith.constant 0 : i32
    %c0_i32_1 = arith.constant 0 : i32
    %c0_i32_2 = arith.constant 0 : i32
    return %c0_i32, %c0_i32_0, %c0_i32_1 : i32, i32, i32
  }
  func.func @transform_7(%arg0: i32) -> (i32, i32) {
    %c0_i32 = arith.constant 0 : i32
    %c0_i32_0 = arith.constant 0 : i32
    %c0_i32_1 = arith.constant 0 : i32
    return %c0_i32, %c0_i32_0 : i32, i32
  }
  func.func @transform_8(%arg0: i32) -> (i32, i32) {
    %c0_i32 = arith.constant 0 : i32
    %c0_i32_0 = arith.constant 0 : i32
    %c0_i32_1 = arith.constant 0 : i32
    return %c0_i32, %c0_i32_0 : i32, i32
  }
  func.func @transform_9(%arg0: i32) -> (i32, i32) {
    %c0_i32 = arith.constant 0 : i32
    %c0_i32_0 = arith.constant 0 : i32
    %c0_i32_1 = arith.constant 0 : i32
    return %c0_i32, %c0_i32_0 : i32, i32
  }
  func.func @transform_10(%arg0: i32) -> (i32, i32) {
    %c0_i32 = arith.constant 0 : i32
    %c0_i32_0 = arith.constant 0 : i32
    %c0_i32_1 = arith.constant 0 : i32
    return %c0_i32, %c0_i32_0 : i32, i32
  }
  func.func @transform_11(%arg0: i32) -> (i32, i32) {
    %c0_i32 = arith.constant 0 : i32
    %c0_i32_0 = arith.constant 0 : i32
    %c0_i32_1 = arith.constant 0 : i32
    return %c0_i32, %c0_i32_0 : i32, i32
  }
  func.func @transform_12(%arg0: i32) -> (i32, i32) {
    %c0_i32 = arith.constant 0 : i32
    %c0_i32_0 = arith.constant 0 : i32
    %c0_i32_1 = arith.constant 0 : i32
    return %c0_i32, %c0_i32_0 : i32, i32
  }
  func.func @transform_13(%arg0: i32) -> i32 {
    %c0_i32 = arith.constant 0 : i32
    %c0_i32_0 = arith.constant 0 : i32
    return %c0_i32 : i32
  }
  func.func @transform_14(%arg0: i32) -> i32 {
    %c0_i32 = arith.constant 0 : i32
    %c0_i32_0 = arith.constant 0 : i32
    return %c0_i32 : i32
  }
  func.func @transform_15(%arg0: i32) -> (i32, i32, i32) {
    %c0_i32 = arith.constant 0 : i32
    %c0_i32_0 = arith.constant 0 : i32
    %c0_i32_1 = arith.constant 0 : i32
    return %arg0, %c0_i32, %c0_i32_0 : i32, i32, i32
  }
}

</mosaic_0001>

<bundles_post_ra>
// kernel: tpu_custom_call.1
= control target key start
LH: loop header
LB: loop body
LE: loop exit
PB: predicated region body
PF: predicated region fallthrough
CT: control target
= control target key end

     0   :  { %s11902_s0 = inlined_call_operand.vmem [shape: f32[2,4,256], index: 0, kind: input, shape index: {}]   ;;  %s11903_s1 = inlined_call_operand.vmem [shape: s32[1,256], index: 1, kind: input, shape index: {}]   ;;  %s11904_s2 = inlined_call_operand.vmem [shape: s32[1,256], index: 2, kind: input, shape index: {}]   ;;  %s11905_s3 = inlined_call_operand.vmem [shape: f32[9,32,4], index: 3, kind: input, shape index: {}]   ;;  %s11906_s4 = inlined_call_operand.vmem [shape: f32[32,1], index: 4, kind: input, shape index: {}]   ;;  %s11907_s5 = inlined_call_operand.vmem [shape: f32[32,1], index: 5, kind: input, shape index: {}]   ;;  %s11908_s6 = inlined_call_operand.vmem [shape: f32[9,32,32], index: 6, kind: input, shape index: {}]   ;;  %s11909_s7 = inlined_call_operand.vmem [shape: f32[32,1], index: 7, kind: input, shape index: {}]   ;;  %s11910_s8 = inlined_call_operand.vmem [shape: f32[32,1], index: 8, kind: input, shape index: {}]   ;;  %s11911_s9 = inlined_call_operand.vmem [shape: f32[10,32], index: 9, kind: input, shape index: {}]   ;;  %s11912_s10 = inlined_call_operand.vmem [shape: f32[10,1], index: 10, kind: input, shape index: {}]   ;;  %s11913_s11 = inlined_call_operand.vmem [shape: f32[32,10], index: 11, kind: input, shape index: {}]   ;;  %s11914_s12 = inlined_call_operand.vmem [shape: f32[32,1], index: 12, kind: input, shape index: {}]   ;;  %s11915_s13 = inlined_call_operand.vmem [shape: f32[98], index: 13, kind: input, shape index: {}]   ;;  %s11916_s14 = inlined_call_operand.vmem [shape: f32[2], index: 14, kind: input, shape index: {}]   ;;  %s11917_s15 = inlined_call_operand.hbm [shape: f32[2,32,256], index: 15, kind: output, shape index: {}]  }
   0x1   :  { %12236 = sst [smem:[#allocation104_spill]] %s11902_s0 }
   0x2   :  { %12237 = sst [smem:[#allocation105_spill]] %s11903_s1 }
   0x3   :  { %12238 = sst [smem:[#allocation106_spill]] %s11904_s2 }
   0x4   :  { %12239 = sst [smem:[#allocation107_spill]] %s11905_s3 }
   0x5   :  { %12240 = sst [smem:[#allocation108_spill]] %s11906_s4 }
   0x6   :  { %12241 = sst [smem:[#allocation109_spill]] %s11907_s5 }
   0x7   :  { %12242 = sst [smem:[#allocation110_spill]] %s11908_s6 }
   0x8   :  { %12243 = sst [smem:[#allocation111_spill]] %s11909_s7 }
   0x9   :  { %12244 = sst [smem:[#allocation112_spill]] %s11910_s8 }
   0xa   :  { %12245 = sst [smem:[#allocation113_spill]] %s11911_s9 }
   0xb   :  { %12246 = sst [smem:[#allocation114_spill]] %s11912_s10 }
   0xc   :  { %12247 = sst [smem:[#allocation115_spill]] %s11913_s11 }
   0xd   :  { %12248 = sst [smem:[#allocation116_spill]] %s11914_s12 }
   0xe   :  { %12249 = sst [smem:[#allocation117_spill]] %s11915_s13 }
   0xf   :  { %12250 = sst [smem:[#allocation118_spill]] %s11916_s14 }
  0x10   :  { %12251 = sst [smem:[#allocation119_spill]] %s11917_s15 }
  0x11   :  { %20 = vsyncpa [#allocation4], 0 }
  0x12   :  { %21 = vsyncpa [#allocation6], 0 }
  0x13   :  { %22 = vsyncpa [#allocation3], 0 }
  0x14   :  { %24 = vsyncpa [#allocation3 + $0x1], 0  ;;  %s7387_s18 = smov 0   ;;  %s7389_s19 = smov 0  }
  0x15   :  { %s7391_s20 = smov 0   ;;  %s7393_s21 = smov 0  }
  0x16 LB: > { %12252 = sst [smem:[#allocation11_spill]] %s7238_s18  ;;  %s7408_s22 = sadd.s32 4294967295, %s7250_s21   ;;  %s7250_s21 = sphi %s7393_s21, %s13026_s21   ;;  %s7246_s20 = sphi %s7391_s20, %s13029_s20   ;;  %s7242_s19 = sphi %s7389_s19, %s13028_s19   ;;  %s7238_s18 = sphi %s7387_s18, %s13027_s18  }
  0x17   : > { %12253 = sst [smem:[#allocation12_spill]] %s7242_s19  ;;  %s6629_s23 = sadd.s32 4294967294, %s7250_s21  }
  0x18   : > { %12254 = sst [smem:[#allocation13_spill]] %s7246_s20  ;;  %s7412_s24 = sadd.s32 1, %s7250_s21  }
  0x19   : > { %12255 = sst [smem:[#allocation14_spill]] %s7250_s21  ;;  %s357_s25 = sadd.s32 1, %s7246_s20 }
  0x1a   : > { %12256 = sst [smem:[#allocation15_spill]] %s7408_s22  ;;  %s354_s26 = ssub.s32 %s7250_s21, %s7412_s24 }
  0x1b   : > { %12257 = sst [smem:[#allocation16_spill]] %s7412_s24  ;;  %p367_p0 = scmp.ne.s32.totalorder %s7246_s20, %s7242_s19 }
  0x1c   : > { %p355_p1 = scmp.eq.s32.totalorder %s354_s26, 0  ;;  %p368_p2 = scmp.eq.s32.totalorder %s7408_s22, 1 }
  0x1d   : > { %p373_p3 = scmp.ne.s32.totalorder %s7242_s19, %s7238_s18  ;;  %p374_p4 = scmp.eq.s32.totalorder %s6629_s23, 1 }
  0x1e   : > { %s7423_s27 = scalar_select %p355_p1, %s7246_s20, %s357_s25  }
  0x1f   : > { %p7425_p5 = por %p368_p2, %p367_p0  ;;  %p7429_p6 = por %p374_p4, %p373_p3 }
  0x20   : > { %12258 = sst [smem:[#allocation17_spill]] %s7423_s27  ;;  %p6630_p7 = scmp.ge.s32.totalorder %s7250_s21, 1 }
  0x21   : > { %s12259_s28 = scalar_select %p7425_p5, 1, 0 }
  0x22   : > { %s12261_s29 = scalar_select %p7429_p6, 1, 0 }
  0x23   : > { %12260 = sst [smem:[#allocation18_spill]] %s12259_s28  ;;  %p381_p8 = scmp.lt.s32.totalorder %s7250_s21, 3 }
  0x24   : > { %12262 = sst [smem:[#allocation19_spill]] %s12261_s29  ;;  %p11921_p9 = scmp.eq.s32.totalorder %s7408_s22, 0 }
  0x25   : > { %p7436_p10 = pnand %p6630_p7, %p381_p8  ;;  %s12264_s13 = sld [smem:[#allocation117_spill]] }
  0x26   : > { %s12265_s14 = sld [smem:[#allocation118_spill]] }
  0x27   : > { %s12263_s30 = scalar_select %p7436_p10, 1, 0 }
  0x28   : > { %p7034_p11 = pneg %p7436_p10 }
  0x2a   : > { %p7450_p12 = pnand %p11921_p9, %p7034_p11 }
  0x2b   : > { %s430_s23 = sshll.u32 %s12264_s13, 4  ;;  %s431_s23 = int_to_ptr.vmem [resolvable:$true] %s430_s23 }
  0x2c   : > { %s441_s27 = sshll.u32 %s12265_s14, 4  ;;  %s7152_s24 = scalar_lea.vmem %s431_s23, 16  ;;  %s442_s27 = int_to_ptr.vmem [resolvable:$true] %s441_s27 }
  0x2d   : > { %p7153_p13 = scmp.ne.s32.totalorder %s431_s23, %s7152_s24  ;;  %p7154_p0 = pneg %p7450_p12 }
  0x2e   : > { %p7160_p3 = scmp.lt.s32.totalorder %s431_s23, %s431_s23  ;;  %p7161_p4 = scmp.lt.s32.totalorder %s7152_s24, %s7152_s24 }
  0x2f   : > { %p7155_p1 = pnand %p7154_p0, %p7153_p13 }
  0x30   : > { %p7162_p7 = por %p7161_p4, %p7160_p3 }
  0x31   : > { %p7156_p2 = pneg %p7155_p1 }
  0x33   : > { %p7163_p8 = pnand %p7162_p7, %p7156_p2 }
  0x35   : > { %7166 = shalt.err (!%p7163_p8)
}
  0x36   : > { %s7252_s16 = smov [#allocation2]   ;;  %s7167_s17 = scalar_lea.vmem %s442_s27, 16 }
  0x37   : > { %7037 = dma.vmem_to_smem (!%p7450_p12), %s431_s23, 16, %s7252_s16, [#allocation4]  }
  0x38   : > { %p7168_p11 = scmp.ne.s32.totalorder %s442_s27, %s7167_s17  ;;  %p7175_p5 = scmp.lt.s32.totalorder %s442_s27, %s442_s27 }
  0x39   : > { %p7176_p10 = scmp.lt.s32.totalorder %s7167_s17, %s7167_s17 }
  0x3a   : > { %p7170_p9 = pnand %p7168_p11, %p7154_p0 }
  0x3b   : > { %p7177_p13 = por %p7176_p10, %p7175_p5 }
  0x3c   : > { %p7171_p6 = pneg %p7170_p9 }
  0x3e   : > { %p7178_p1 = pnand %p7177_p13, %p7171_p6 }
  0x40   : > { %7181 = shalt.err (!%p7178_p1)
}
  0x41   : > { %s7253_s25 = smov [#allocation5]   ;;  %p12267_p2 = scmp.ne.s32.totalorder %s12263_s30, 0 }
  0x42   : > { %7040 = dma.vmem_to_smem (!%p7450_p12), %s442_s27, 16, %s7253_s25, [#allocation6]  }
  0x43   : > { %462 = sbr.rel (%p12267_p2) target bundleno = 2248 (0x8c8), region = 80 }
  0x48   : > { %p12268_p3 = scmp.eq.s32.totalorder %s7408_s22, 0 }
  0x4a   : > { %7225 = dma.done.wait (%p12268_p3), [#allocation4], 16   ;;  %p12269_p4 = pmov %p12268_p3 }
  0x4b   : > { %p12270_p9 = pmov %p12268_p3 }
  0x4c   : > { %7227 = vsyncadd (%p12269_p4), [#allocation4], 4294967280 }
  0x4d   : > { %7229 = dma.done.wait (%p12270_p9), [#allocation6], 16   ;;  %p12271_p5 = pmov %p12268_p3 }
  0x4f   : > { %7231 = vsyncadd (%p12271_p5), [#allocation6], 4294967280 }
  0x50   : > { %472 = sfence }
  0x51   : > { %p515_p6 = scmp.lt.s32.totalorder %s7408_s22, 1  ;;  %v7254_v0 = vmov 0   ;;  %s12272_s0 = sld [smem:[#allocation104_spill]]  ;;  %v11982_v2 = vmov 0.0   ;;  %v606_v14 = vlaneseq  ;;  %v12277_v15 = vmov 0 }
  0x52   : > { %7136 = vset.pattern.permute.xlu0 %v7254_v0  ;;  %7137 = vset.pattern.permute.xlu1 %v7254_v0  ;;  %s11936_s26 = smov 16   ;;  %s11932_s16 = smov 17   ;;  %v12280_v16 = vmov 0  ;;  %v12283_v17 = vmov 0  ;;  %v12287_v19 = vmov 0  ;;  %v12290_v20 = vmov 0 }
  0x53   : > { %s516_s20 = scalar_select %p515_p6, %s7408_s22, 1  ;;  %735 = vmatprep.mubr.f32.mxu0 %v11982_v2  ;;  %753 = vmatprep.mubr.f32.mxu1 %v11982_v2  ;;  %v7559_v18 = vshrl.u32 %v606_v14, 7  ;;  %v12294_v22 = vmov 0  ;;  %v12298_v26 = vmov 0  ;;  %v7601_v27 = vand.u32 127, %v606_v14 }
  0x54   : > { %s11930_s17 = smov 15   ;;  %s11928_s25 = smov 1   ;;  %v12302_v29 = vmov 0  ;;  %v12305_v36 = vmov 0  ;;  %v12318_v50 = vmov 0  ;;  %v12324_v55 = vmov 0 }
  0x55   : > { %s6970_s24 = sshll.u32 %s516_s20, 3  ;;  %s11924_s20 = smov 127   ;;  %12286 = vst [vmem:[#allocation23_spill] sm:$0xff] %v7559_v18  ;;  %v7578_v21 = vsub.s32 1, %v7559_v18  ;;  %v7585_v23 = vsub.s32 0, %v7559_v18  ;;  %12301 = vst [vmem:[#allocation30_spill] sm:$0xff] %v7601_v27 }
  0x56   : > { %s11934_s27 = smov 112   ;;  %s11938_s30 = smov 111   ;;  %v12329_v57 = vmov 0 }
  0x57   : > { %s519_s23 = scalar_lea.vmem %s12272_s0, %s6970_s24  ;;  %s11926_s24 = smov 113   ;;  %12293 = vst [vmem:[#allocation26_spill] sm:$0xff] %v7578_v21  ;;  %12297 = vst [vmem:[#allocation28_spill] sm:$0xff] %v7585_v23 }
  0x58   : > { %v7477_v1 = vld [vmem:[%s519_s23] sm:$0xff]  ;;  %s12273_s4 = sld [smem:[#allocation108_spill]]  ;;  %s12433_s0 = smov 113  }
  0x59   : > { %630 = vrot.lane.b32.xlu0 %v7477_v1, %s11936_s26  ;;  %602 = vrot.lane.b32.xlu1 %v7477_v1, %s11932_s16  ;;  %v7487_v3 = vcombine.high %v7477_v1, %v7477_v1  ;;  %s12274_s5 = sld [smem:[#allocation109_spill]]  ;;  %s7265_s14 = smov 50  }
  0x5a   : > { %s12275_s1 = sld [smem:[#allocation105_spill]]  ;;  %s7266_s29 = smov 49  }
  0x5b   : > { %s12276_s2 = sld [smem:[#allocation106_spill]]  ;;  %s7267_s23 = smov 48  }
  0x5c   : > { %s12321_s3 = sld [smem:[#allocation107_spill]]  ;;  %s12046_s13 = smov 35  }
  0x5d   : > { %632 = vrot.lane.b32.xlu0 %v7487_v3, %s11936_s26  ;;  %604 = vrot.lane.b32.xlu1 %v7487_v3, %s11932_s16  ;;  %s12430_s16 = smov 15   ;;  %s12432_s26 = smov 127  }
  0x5e   : > { %v567_v4 = vld [vmem:[%s12273_s4 + $0x18] sm:$0xff]  ;;  %v566_v5 = vld [vmem:[%s12273_s4 + $0x10] sm:$0xff]  ;;  %v565_v6 = vld [vmem:[%s12273_s4 + $0x8] sm:$0xff]  ;;  %s12436_s7 = sld [smem:[#allocation111_spill]]  ;;  %s12591_s21 = smov 2  }
  0x5f   : > { %v571_v7 = vld [vmem:[%s12274_s5 + $0x18] sm:$0xff]  ;;  %v564_v8 = vld [vmem:[%s12273_s4] sm:$0xff]  ;;  %v570_v9 = vld [vmem:[%s12274_s5 + $0x10] sm:$0xff]  ;;  %s12437_s8 = sld [smem:[#allocation112_spill]]  ;;  %s12042_s4 = smov 46  }
  0x60   : > { %v568_v10 = vld [vmem:[%s12274_s5] sm:$0xff]  ;;  %v569_v11 = vld [vmem:[%s12274_s5 + $0x8] sm:$0xff]  ;;  %s12444_s6 = sld [smem:[#allocation110_spill]]  ;;  %s12044_s5 = smov 45  }
  0x61   : > { %874 = vrot.lane.b32.xlu1 %v7487_v3, %s11930_s17  ;;  %872 = vrot.lane.b32.xlu0 %v7477_v1, %s11930_s17  ;;  %v520_v12 = vld [vmem:[%s12275_s1] sm:$0x3]  ;;  %s12431_s17 = smov 1   ;;  %s12523_s9 = sld [smem:[#allocation113_spill]] }
  0x62   : > { %v521_v13 = vld [vmem:[%s12276_s2] sm:$0x3]  ;;  %vm528_vm0 = vcmp.ge.s32.totalorder %v520_v12, 1  ;;  %vm529_vm1 = vcmp.le.s32.totalorder %v520_v12, 16  ;;  %vm531_vm14 = vcmp.ge.s32.totalorder %v520_v12, 0  ;;  %vm532_vm15 = vcmp.le.s32.totalorder %v520_v12, 15 }
  0x63   : > { %vm552_vm2 = vcmp.ge.s32.totalorder %v521_v13, 0  ;;  %vm553_vm3 = vcmp.le.s32.totalorder %v521_v13, 15  ;;  %vm549_vm4 = vcmp.ge.s32.totalorder %v521_v13, 1  ;;  %vm550_vm5 = vcmp.le.s32.totalorder %v521_v13, 16  ;;  %vm7547_vm6 = vmand %vm528_vm0, %vm529_vm1  ;;  %v6641_v53 = vld [vmem:[%s12321_s3 + $0x20] sm:$0xff]  ;;  %v6644_v54 = vld [vmem:[%s12321_s3 + $0x38] sm:$0xff] }
  0x64   : > { %v12278_v15 = vsel %vm7547_vm6, 4294967295, %v12277_v15  ;;  %vm7551_vm7 = vmand %vm552_vm2, %vm553_vm3  ;;  %vm555_vm9 = vcmp.ge.s32.totalorder %v521_v13, 4294967295  ;;  %vm556_vm10 = vcmp.le.s32.totalorder %v521_v13, 14  ;;  %vm11942_vm3 = vcmp.lt.s32.totalorder %v7601_v27, 17  ;;  %s12524_s11 = sld [smem:[#allocation115_spill]] }
  0x65   : > { %1015 = vrot.lane.b32.xlu1 %v7487_v3, %s11928_s25  ;;  %1013 = vrot.lane.b32.xlu0 %v7477_v1, %s11928_s25  ;;  %12279 = vst [vmem:[#allocation20_spill] sm:$0xff] %v12278_v15  ;;  %v12281_v16 = vsel %vm7551_vm7, 4294967295, %v12280_v16  ;;  %vm7555_vm8 = vmand %vm549_vm4, %vm550_vm5  ;;  %s12428_s25 = smov 16   ;;  %s12525_s10 = sld [smem:[#allocation114_spill]] }
  0x66   : > { %12282 = vst [vmem:[#allocation21_spill] sm:$0xff] %v12281_v16  ;;  %v12284_v17 = vsel %vm7555_vm8, 4294967295, %v12283_v17  ;;  %vm7565_vm11 = vmand %vm7547_vm6, %vm7551_vm7  ;;  %s12526_s12 = sld [smem:[#allocation116_spill]] }
  0x67   : > { %12285 = vst [vmem:[#allocation22_spill] sm:$0xff] %v12284_v17  ;;  %v12288_v19 = vsel %vm7565_vm11, 4294967295, %v12287_v19  ;;  %vm7573_vm12 = vmand %vm7547_vm6, %vm7555_vm8  ;;  %v638_v24 = vsel %vm7565_vm11, 1, %v7254_v0  ;;  %vm12327_vm11 = vcmask 1043456   ;;  %s9529_s18 = sld [smem:[#allocation2 + $0x10]] }
  0x68   : > { %12289 = vst [vmem:[#allocation24_spill] sm:$0xff] %v12288_v19  ;;  %v12291_v20 = vsel %vm7573_vm12, 4294967295, %v12290_v20  ;;  %vm7580_vm13 = vmand %vm555_vm9, %vm556_vm10  ;;  %v612_v25 = vsel %vm7573_vm12, 1, %v7254_v0  ;;  %v646_v28 = vrot.slane %v638_v24, %v7578_v21  ;;  %v642_v30 = vrot.slane %v638_v24, %v7585_v23  ;;  %s9561_s15 = sld [smem:[#allocation2 + $0x13]] }
  0x69   : > { %1274 = vrot.lane.b32.xlu1 %v7487_v3, %s11924_s20  ;;  %1272 = vrot.lane.b32.xlu0 %v7477_v1, %s11924_s20  ;;  %12292 = vst [vmem:[#allocation25_spill] sm:$0xff] %v12291_v20  ;;  %v12295_v22 = vsel %vm7580_vm13, 4294967295, %v12294_v22  ;;  %vm7597_vm0 = vmand %vm7547_vm6, %vm7580_vm13  ;;  %v616_v33 = vrot.slane %v612_v25, %v7585_v23  ;;  %v620_v34 = vrot.slane %v612_v25, %v7578_v21  ;;  %vm12316_vm9 = vcmp.lt.s32.totalorder %v7601_v27, 16  ;;  %s12048_s20 = smov 34   ;;  %s9574_s22 = sld [smem:[#allocation2 + $0x14]] }
  0x6a   : > { %12296 = vst [vmem:[#allocation27_spill] sm:$0xff] %v12295_v22  ;;  %v12299_v26 = vsel %vm7597_vm0, 4294967295, %v12298_v26  ;;  %vm7604_vm1 = vmand %vm531_vm14, %vm532_vm15  ;;  %v880_v35 = vsel %vm7597_vm0, 1, %v7254_v0  ;;  %vm7624_vm5 = vcmp.eq.s32.totalorder %v646_v28, 1  ;;  %vm7628_vm10 = vcmp.eq.s32.totalorder %v642_v30, 1  ;;  %s9586_s28 = sld [smem:[#allocation2 + $0x15]] }
  0x6b   : > { %12300 = vst [vmem:[#allocation29_spill] sm:$0xff] %v12299_v26  ;;  %v12303_v29 = vsel %vm7604_vm1, 4294967295, %v12302_v29  ;;  %vm7618_vm2 = vmand %vm7604_vm1, %vm7555_vm8  ;;  %v888_v39 = vrot.slane %v880_v35, %v7578_v21  ;;  %vm7633_vm0 = vcmp.eq.s32.totalorder %v616_v33, 1  ;;  %vm7637_vm4 = vcmp.eq.s32.totalorder %v620_v34, 1  ;;  %v596_v33 = vld [vmem:[%s12321_s3 + $0x8] sm:$0xff]  ;;  %s9628_s19 = sld [smem:[#allocation2 + $0x1a]] }
  0x6c   : > { %12304 = vst [vmem:[#allocation31_spill] sm:$0xff] %v12303_v29  ;;  %v12306_v36 = vsel %vm7618_vm2, 4294967295, %v12305_v36  ;;  %v884_v44 = vrot.slane %v880_v35, %v7585_v23  ;;  %v1021_v45 = vsel %vm7618_vm2, 1, %v7254_v0  ;;  %vm12317_vm14 = vmmov %vm12316_vm9  ;;  %vm12323_vm2 = vcmp.ge.s32.totalorder %v520_v12, 4294967295 }
  0x6d   : > { %1415 = vrot.lane.b32.xlu1 %v7487_v3, %s11926_s24  ;;  %1413 = vrot.lane.b32.xlu0 %v7477_v1, %s11926_s24  ;;  %12307 = vst [vmem:[#allocation32_spill] sm:$0xff] %v12306_v36  ;;  %vm7657_vm15 = vmand %vm7604_vm1, %vm7580_vm13  ;;  %v1025_v58 = vrot.slane %v1021_v45, %v7585_v23  ;;  %v1029_v59 = vrot.slane %v1021_v45, %v7578_v21  ;;  %vm12339_vm6 = vcmp.lt.s32.totalorder %v7601_v27, 15  ;;  %v12363_v45 = vmov 0  ;;  %s12429_s24 = smov 17  }
  0x6e   : > { %v12319_v50 = vsel %vm7657_vm15, 4294967295, %v12318_v50  ;;  %vm12328_vm12 = vmmov %vm12327_vm11  ;;  %v7695_v63 = vsel %vm7657_vm15, 1, %v7254_v0  ;;  %12596 = sst [smem:[#allocation88_spill]] %s9561_s15 }
  0x6f   : > { %12320 = vst [vmem:[#allocation33_spill] sm:$0xff] %v12319_v50  ;;  %v1288_v13 = vrot.slane %v7695_v63, %v7578_v21  ;;  %s9732_s15 = sld [smem:[#allocation2 + $0x20]] }
  0x70   : > { %12598 = sst [smem:[#allocation90_spill]] %s9586_s28 }
  0x71   : > { %1556 = vrot.lane.b32.xlu1 %v7487_v3, %s11934_s27  ;;  %1554 = vrot.lane.b32.xlu0 %v7477_v1, %s11934_s27  ;;  %s12434_s27 = smov 112   ;;  %s9789_s28 = sld [smem:[#allocation2 + $0x23]] }
  0x75   : > { %1697 = vrot.lane.b32.xlu1 %v7487_v3, %s11938_s30  ;;  %1695 = vrot.lane.b32.xlu0 %v7477_v1, %s11938_s30  ;;  %s12435_s30 = smov 111  }
  0x79   : > { %1848 = vperm.xlu0 %7136, %v567_v4   ;;  %1843 = vperm.xlu1 %7137, %v566_v5   ;;  %v12336_v4 = vmov 0 }
  0x7d   : > { %1838 = vperm.xlu0 %7136, %v565_v6   ;;  %1876 = vperm.xlu1 %7137, %v571_v7   ;;  %v12341_v7 = vmov 0 }
  0x81   : > { %1833 = vperm.xlu0 %7136, %v564_v8   ;;  %1871 = vperm.xlu1 %7137, %v570_v9   ;;  %v6642_v8 = vld [vmem:[%s12321_s3 + $0x28] sm:$0xff]  ;;  %v595_v9 = vld [vmem:[%s12321_s3] sm:$0xff] }
  0x85   : > { %1861 = vperm.xlu0 %7136, %v568_v10   ;;  %1866 = vperm.xlu1 %7137, %v569_v11   ;;  %v12346_v11 = vmov 0 }
  0xcb   : > { %v631_v31 = vpop.permute.xlu0 %630  ;;  %v603_v32 = vpop.permute.xlu1 %602 }
  0xcf   : > { %v633_v40 = vpop.permute.xlu0 %632  ;;  %v605_v42 = vpop.permute.xlu1 %604 }
  0xd0   : > { %v609_v46 = vsel %vm11942_vm3, %v603_v32, %v605_v42  ;;  %v610_v47 = vsel %vm11942_vm3, %v605_v42, %v603_v32  ;;  %v635_v48 = vsel %vm12316_vm9, %v631_v31, %v633_v40  ;;  %v636_v49 = vsel %vm12317_vm14, %v633_v40, %v631_v31  ;;  %v6643_v32 = vld [vmem:[%s12321_s3 + $0x30] sm:$0xff] }
  0xd1   : > { %v650_v51 = vsel %vm7624_vm5, %v635_v48, 0.0  ;;  %v649_v52 = vsel %vm7628_vm10, %v636_v49, 0.0  ;;  %vm12322_vm3 = vcmp.le.s32.totalorder %v520_v12, 14  ;;  %v624_v56 = vsel %vm7637_vm4, %v609_v46, 0.0 }
  0xd2   : > { %vm7674_vm1 = vmand %vm12323_vm2, %vm12322_vm3  ;;  %6645 = vmatprep.subr.msk.mxu0 %vm12327_vm11, %v650_v51  ;;  %7022 = vmatprep.subr.msk.mxu1 %vm12328_vm12, %v650_v51  ;;  %vm7682_vm9 = vcmp.eq.s32.totalorder %v888_v39, 1  ;;  %v623_v60 = vsel %vm7633_vm0, %v610_v47, 0.0  ;;  %vm7699_vm14 = vcmp.eq.s32.totalorder %v884_v44, 1  ;;  %v12349_v12 = vmov 0  ;;  %v6657_v47 = vld [vmem:[%s12321_s3 + $0x40] sm:$0xff] }
  0xd3   : > { %v12325_v55 = vsel %vm7674_vm1, 4294967295, %v12324_v55  ;;  %v12330_v57 = vsel %vm7682_vm9, 4294967295, %v12329_v57  ;;  %vm12332_vm2 = vmmov %vm12327_vm11  ;;  %v875_v61 = vpop.permute.xlu1 %874  ;;  %v873_v62 = vpop.permute.xlu0 %872  ;;  %vm12334_vm11 = vcmask 31744   ;;  %v12337_v4 = vsel %vm7699_vm14, 4294967295, %v12336_v4 }
  0xd4   : > { %12326 = vst [vmem:[#allocation34_spill] sm:$0xff] %v12325_v55  ;;  %12331 = vst [vmem:[#allocation35_spill] sm:$0xff] %v12330_v57  ;;  %6646 = vmatpush1.msk.msra.mxu0 %vm12332_vm2, %v649_v52  ;;  %v877_v5 = vsel %vm12339_vm6, %v873_v62, %v875_v61  ;;  %v12358_v39 = vmov 0  ;;  %v12370_v49 = vmov 0 }
  0xd5   : > { %vm12333_vm3 = vmmov %vm12332_vm2  ;;  %6647 = vmatmul.mubr.msk.f32.vlgmr.msra.gmra.mxu0 %vm12334_vm11, %v6641_v53  ;;  %12338 = vst [vmem:[#allocation36_spill] sm:$0xff] %v12337_v4  ;;  %v892_v10 = vsel %vm7682_vm9, %v877_v5, 0.0  ;;  %v12375_v5 = vmov 0 }
  0xd6   : > { %7023 = vmatpush1.msk.msra.mxu1 %vm12333_vm3, %v649_v52  ;;  %vm12335_vm12 = vmmov %vm12334_vm11  ;;  %vm12344_vm11 = vcmask 1043456   ;;  %741 = vmatprep.mubr.f32.mxu0 %v11982_v2 }
  0xd7   : > { %6650 = vmatmul.mubr.msk.f32.vlgmr.msra.gmra.mxu1 %vm12335_vm12, %v6644_v54  ;;  %vm12340_vm2 = vmmov %vm12339_vm6  ;;  %6651 = vmatprep.subr.msk.mxu1 %vm12344_vm11, %v624_v56  ;;  %v1016_v24 = vpop.permute.xlu1 %1015  ;;  %v1014_v25 = vpop.permute.xlu0 %1013  ;;  %v1284_v54 = vrot.slane %v7695_v63, %v7585_v23 }
  0xd8   : > { %v878_v6 = vsel %vm12340_vm2, %v875_v61, %v873_v62  ;;  %vm7711_vm3 = vmand %vm7674_vm1, %vm7555_vm8  ;;  %842 = vmatprep.mubr.f32.mxu1 %v11982_v2  ;;  %vm7728_vm2 = vcmp.eq.s32.totalorder %v1025_v58, 1  ;;  %vm12355_vm8 = vcmp.lt.s32.totalorder %v7601_v27, 1  ;;  %v598_v58 = vld [vmem:[%s12321_s3 + $0x18] sm:$0xff] }
  0xd9   : > { %v12342_v7 = vsel %vm7711_vm3, 4294967295, %v12341_v7  ;;  %vm12345_vm12 = vmmov %vm12344_vm11  ;;  %v12347_v11 = vsel %vm7728_vm2, 4294967295, %v12346_v11  ;;  %vm7732_vm11 = vcmp.eq.s32.totalorder %v1029_v59, 1  ;;  %v891_v14 = vsel %vm7699_vm14, %v878_v6, 0.0  ;;  %v6658_v59 = vld [vmem:[%s12321_s3 + $0x48] sm:$0xff] }
  0xda   : > { %12343 = vst [vmem:[#allocation37_spill] sm:$0xff] %v12342_v7  ;;  %6652 = vmatpush1.msk.msra.mxu1 %vm12345_vm12, %v623_v60  ;;  %12348 = vst [vmem:[#allocation38_spill] sm:$0xff] %v12347_v11  ;;  %v12350_v12 = vsel %vm7732_vm11, 4294967295, %v12349_v12  ;;  %v7744_v28 = vsel %vm7711_vm3, 1, %v7254_v0  ;;  %v1018_v30 = vsel %vm12355_vm8, %v1014_v25, %v1016_v24 }
  0xdb   : > { %12351 = vst [vmem:[#allocation39_spill] sm:$0xff] %v12350_v12  ;;  %vm12352_vm15 = vmmov %vm12345_vm12  ;;  %vm12353_vm12 = vcmask 31744   ;;  %v1033_v35 = vsel %vm7732_vm11, %v1018_v30, 0.0  ;;  %v1429_v40 = vrot.slane %v7744_v28, %v7578_v21  ;;  %v1275_v42 = vpop.permute.xlu1 %1274  ;;  %v1273_v44 = vpop.permute.xlu0 %1272 }
  0xdc   : > { %6661 = vmatprep.subr.msk.mxu0 %vm12352_vm15, %v892_v10  ;;  %6648 = vmatmul.mubr.msk.f32.gmra.mxu0 %vm12353_vm12, %v6642_v8  ;;  %vm12354_vm6 = vmmov %vm12353_vm12  ;;  %v6659_v8 = vld [vmem:[%s12321_s3 + $0x50] sm:$0xff] }
  0xdd   : > { %6653 = vmatmul.mubr.msk.f32.vlgmr.msra.gmra.mxu1 %vm12354_vm6, %v595_v9  ;;  %vm12356_vm9 = vmmov %vm12355_vm8  ;;  %747 = vmatprep.mubr.f32.mxu0 %v11982_v2  ;;  %vm7767_vm6 = vcmp.eq.s32.totalorder %v1288_v13, 1  ;;  %v6667_v9 = vld [vmem:[%s12321_s3 + $0x60] sm:$0xff]  ;;  %v12384_v13 = vmov 0 }
  0xde   : > { %v1019_v31 = vsel %vm12356_vm9, %v1016_v24, %v1014_v25  ;;  %848 = vmatprep.mubr.f32.mxu1 %v11982_v2  ;;  %6662 = vmatpush1.msk.msra.mxu0 %vm12352_vm15, %v891_v14  ;;  %vm12357_vm9 = vmmov %vm12352_vm15  ;;  %v12359_v39 = vsel %vm7767_vm6, 4294967295, %v12358_v39  ;;  %v1425_v25 = vrot.slane %v7744_v28, %v7585_v23 }
  0xdf   : > { %v1032_v34 = vsel %vm7728_vm2, %v1019_v31, 0.0  ;;  %6671 = vmatprep.subr.msk.mxu1 %vm12357_vm9, %v1033_v35  ;;  %12360 = vst [vmem:[#allocation40_spill] sm:$0xff] %v12359_v39  ;;  %vm12361_vm12 = vmmov %vm12357_vm9  ;;  %vm12368_vm2 = vcmp.lt.s32.totalorder %v7601_v27, 127  ;;  %v1416_v52 = vpop.permute.xlu1 %1415  ;;  %v1414_v53 = vpop.permute.xlu0 %1413  ;;  %v6668_v31 = vld [vmem:[%s12321_s3 + $0x68] sm:$0xff] }
  0xe0   : > { %6672 = vmatpush1.msk.msra.mxu1 %vm12361_vm12, %v1032_v34  ;;  %vm12362_vm3 = vmmov %vm12357_vm9  ;;  %vm12366_vm9 = vcmask 31744   ;;  %v1278_v46 = vsel %vm12368_vm2, %v1275_v42, %v1273_v44  ;;  %vm7800_vm2 = vcmp.eq.s32.totalorder %v1429_v40, 1  ;;  %v12392_v34 = vmov 0  ;;  %v6669_v40 = vld [vmem:[%s12321_s3 + $0x70] sm:$0xff] }
  0xe1   : > { %6681 = vmatprep.subr.msk.mxu0 %vm12362_vm3, %v7487_v3  ;;  %vm7780_vm15 = vmand %vm7674_vm1, %vm7551_vm7  ;;  %6649 = vmatmul.mubr.msk.f32.gmra.mxu0 %vm12366_vm9, %v6643_v32  ;;  %v597_v3 = vld [vmem:[%s12321_s3 + $0x10] sm:$0xff]  ;;  %v1292_v48 = vsel %vm7767_vm6, %v1278_v46, 0.0  ;;  %vm11963_vm3 = vcmp.lt.s32.totalorder %v7601_v27, 113  ;;  %v12371_v49 = vsel %vm7800_vm2, 4294967295, %v12370_v49  ;;  %v12396_v46 = vmov 0 }
  0xe2   : > { %v12364_v45 = vsel %vm7780_vm15, 4294967295, %v12363_v45  ;;  %vm12367_vm8 = vmmov %vm12366_vm9  ;;  %975 = vmatprep.mubr.f32.mxu0 %v11982_v2  ;;  %12372 = vst [vmem:[#allocation42_spill] sm:$0xff] %v12371_v49  ;;  %v7807_v51 = vsel %vm7780_vm15, 1, %v7254_v0  ;;  %v1419_v56 = vsel %vm11963_vm3, %v1416_v52, %v1414_v53  ;;  %vm12378_vm15 = vcmask 31744  }
  0xe3   : > { %12365 = vst [vmem:[#allocation41_spill] sm:$0xff] %v12364_v45  ;;  %6654 = vmatmul.mubr.msk.f32.gmra.mxu1 %vm12367_vm8, %v596_v33  ;;  %vm12369_vm8 = vmmov %vm12361_vm12  ;;  %v1433_v60 = vsel %vm7800_vm2, %v1419_v56, 0.0  ;;  %v1570_v61 = vrot.slane %v7807_v51, %v7578_v21  ;;  %v1557_v62 = vpop.permute.xlu1 %1556  ;;  %v1555_v63 = vpop.permute.xlu0 %1554  ;;  %vm7841_vm2 = vcmp.eq.s32.totalorder %v1284_v54, 1  ;;  %v6679_v56 = vld [vmem:[%s12321_s3 + $0x90] sm:$0xff] }
  0xe4   : > { %854 = vmatprep.mubr.f32.mxu1 %v11982_v2  ;;  %6691 = vmatprep.subr.msk.mxu1 %vm12369_vm8, %v1292_v48  ;;  %vm12373_vm12 = vmmov %vm12366_vm9 }
  0xe5   : > { %6663 = vmatmul.mubr.msk.f32.vlgmr.msra.gmra.mxu0 %vm12366_vm9, %v6657_v47  ;;  %vm12374_vm9 = vmmov %vm12369_vm8  ;;  %v1566_v47 = vrot.slane %v7807_v51, %v7585_v23  ;;  %v12402_v51 = vmov 0 }
  0xe6   : > { %981 = vmatprep.mubr.f32.mxu0 %v11982_v2  ;;  %6682 = vmatpush1.msk.msra.mxu0 %vm12369_vm8, %v7477_v1  ;;  %vm7835_vm3 = vmand %vm7674_vm1, %vm7580_vm13  ;;  %v12380_v1 = vmov 0  ;;  %vm12383_vm8 = vcmp.lt.s32.totalorder %v7601_v27, 127  ;;  %vm7886_vm1 = vcmp.eq.s32.totalorder %v1425_v25, 1  ;;  %vm12395_vm13 = vcmp.lt.s32.totalorder %v7601_v27, 113  ;;  %v6699_v25 = vld [vmem:[%s12321_s3 + $0xd0] sm:$0xff] }
  0xe7   : > { %6655 = vmatmul.mubr.msk.f32.gmra.mxu1 %vm12373_vm12, %v597_v3  ;;  %vm11970_vm12 = vcmp.lt.s32.totalorder %v7601_v27, 112  ;;  %6701 = vmatprep.subr.msk.mxu0 %vm12374_vm9, %v1433_v60  ;;  %v12376_v5 = vsel %vm7835_vm3, 4294967295, %v12375_v5  ;;  %vm12379_vm7 = vmmov %vm12378_vm15  ;;  %v12381_v1 = vsel %vm7841_vm2, 4294967295, %v12380_v1  ;;  %v1277_v6 = vsel %vm12383_vm8, %v1273_v44, %v1275_v42  ;;  %v1698_v28 = vpop.permute.xlu1 %1697  ;;  %v1696_v33 = vpop.permute.xlu0 %1695  ;;  %v6677_v42 = vld [vmem:[%s12321_s3 + $0x80] sm:$0xff] }
  0xe8   : > { %860 = vmatprep.mubr.f32.mxu1 %v11982_v2  ;;  %12377 = vst [vmem:[#allocation43_spill] sm:$0xff] %v12376_v5  ;;  %12382 = vst [vmem:[#allocation44_spill] sm:$0xff] %v12381_v1  ;;  %v1560_v10 = vsel %vm11970_vm12, %v1557_v62, %v1555_v63  ;;  %v1703_v14 = vsel %vm7835_vm3, 1, %v7254_v0  ;;  %v1291_v24 = vsel %vm7841_vm2, %v1277_v6, 0.0  ;;  %v6660_v0 = vld [vmem:[%s12321_s3 + $0x58] sm:$0xff]  ;;  %vm12388_vm8 = vcmask 1043456  }
  0xe9   : > { %6664 = vmatmul.mubr.msk.f32.gmra.mxu0 %vm12379_vm7, %v6658_v59  ;;  %vm7857_vm7 = vcmp.eq.s32.totalorder %v1570_v61, 1  ;;  %vm12387_vm9 = vmmov %vm12378_vm15  ;;  %v1711_v32 = vrot.slane %v1703_v14, %v7578_v21  ;;  %vm12390_vm12 = vcmask 31744   ;;  %v12393_v34 = vsel %vm7886_vm1, 4294967295, %v12392_v34  ;;  %v6680_v61 = vld [vmem:[%s12321_s3 + $0x98] sm:$0xff] }
  0xea   : > { %987 = vmatprep.mubr.f32.mxu0 %v11982_v2  ;;  %v12385_v13 = vsel %vm7857_vm7, 4294967295, %v12384_v13  ;;  %v1574_v30 = vsel %vm7857_vm7, %v1560_v10, 0.0  ;;  %vm12391_vm3 = vmmov %vm12390_vm12  ;;  %12394 = vst [vmem:[#allocation46_spill] sm:$0xff] %v12393_v34  ;;  %v1418_v35 = vsel %vm12395_vm13, %v1414_v53, %v1416_v52  ;;  %v6670_v52 = vld [vmem:[%s12321_s3 + $0x78] sm:$0xff]  ;;  %v6678_v53 = vld [vmem:[%s12321_s3 + $0x88] sm:$0xff]  ;;  %v1707_v60 = vrot.slane %v1703_v14, %v7585_v23 }
  0xeb   : > { %6656 = vmatmul.mubr.msk.f32.gmra.mxu1 %vm12378_vm15, %v598_v58  ;;  %12386 = vst [vmem:[#allocation45_spill] sm:$0xff] %v12385_v13  ;;  %v1432_v3 = vsel %vm7886_vm1, %v1418_v35, 0.0  ;;  %vm12399_vm13 = vmmov %vm12390_vm12  ;;  %v6687_v58 = vld [vmem:[%s12321_s3 + $0xa0] sm:$0xff]  ;;  %v6690_v14 = vld [vmem:[%s12321_s3 + $0xb8] sm:$0xff] }
  0xec   : > { %1116 = vmatprep.mubr.f32.mxu1 %v11982_v2  ;;  %v6718_v35 = vld [vmem:[%s12321_s3 + $0x108] sm:$0xff] }
  0xed   : > { %6665 = vmatmul.mubr.msk.f32.gmra.mxu0 %vm12378_vm15, %v6659_v8  ;;  %vm11977_vm15 = vcmp.lt.s32.totalorder %v7601_v27, 111  ;;  %v6689_v8 = vld [vmem:[%s12321_s3 + $0xb0] sm:$0xff] }
  0xee   : > { %993 = vmatprep.mubr.f32.mxu0 %v11982_v2  ;;  %v1701_v44 = vsel %vm11977_vm15, %v1698_v28, %v1696_v33  ;;  %vm7926_vm15 = vcmp.eq.s32.totalorder %v1566_v47, 1 }
  0xef   : > { %6673 = vmatmul.mubr.msk.f32.vlgmr.msra.gmra.mxu1 %vm12387_vm9, %v6667_v9  ;;  %vm12389_vm9 = vmmov %vm12388_vm8  ;;  %v12403_v51 = vsel %vm7926_vm15, 4294967295, %v12402_v51  ;;  %v6697_v9 = vld [vmem:[%s12321_s3 + $0xc0] sm:$0xff] }
  0xf0   : > { %1122 = vmatprep.mubr.f32.mxu1 %v11982_v2  ;;  %6692 = vmatpush1.msk.msra.mxu1 %vm12388_vm8, %v1291_v24  ;;  %12404 = vst [vmem:[#allocation48_spill] sm:$0xff] %v12403_v51  ;;  %v6698_v24 = vld [vmem:[%s12321_s3 + $0xc8] sm:$0xff] }
  0xf1   : > { %6711 = vmatprep.subr.msk.mxu1 %vm12389_vm9, %v1574_v30  ;;  %6666 = vmatmul.mubr.msk.f32.gmra.mxu0 %vm12390_vm12, %v6660_v0  ;;  %vm12400_vm9 = vmmov %vm12388_vm8  ;;  %v6707_v30 = vld [vmem:[%s12321_s3 + $0xe0] sm:$0xff]  ;;  %v6700_v0 = vld [vmem:[%s12321_s3 + $0xd8] sm:$0xff] }
  0xf2   : > { %1234 = vmatprep.mubr.f32.mxu0 %v11982_v2 }
  0xf3   : > { %6674 = vmatmul.mubr.msk.f32.gmra.mxu1 %vm12391_vm3, %v6668_v31  ;;  %vm7902_vm3 = vcmp.eq.s32.totalorder %v1711_v32, 1  ;;  %v6708_v31 = vld [vmem:[%s12321_s3 + $0xe8] sm:$0xff]  ;;  %v6709_v32 = vld [vmem:[%s12321_s3 + $0xf0] sm:$0xff] }
  0xf4   : > { %1128 = vmatprep.mubr.f32.mxu1 %v11982_v2  ;;  %v12397_v46 = vsel %vm7902_vm3, 4294967295, %v12396_v46  ;;  %v1715_v48 = vsel %vm7902_vm3, %v1701_v44, 0.0  ;;  %vm12405_vm3 = vcmp.lt.s32.totalorder %v7601_v27, 112 }
  0xf5   : > { %12398 = vst [vmem:[#allocation47_spill] sm:$0xff] %v12397_v46  ;;  %6683 = vmatmul.mubr.msk.f32.vlgmr.msra.gmra.mxu0 %vm12390_vm12, %v6677_v42  ;;  %v1559_v54 = vsel %vm12405_vm3, %v1555_v63, %v1557_v62  ;;  %v6688_v62 = vld [vmem:[%s12321_s3 + $0xa8] sm:$0xff]  ;;  %vm12408_vm3 = vcmask 1043456   ;;  %v12411_v63 = vmov 0  ;;  %v6720_v42 = vld [vmem:[%s12321_s3 + $0x118] sm:$0xff] }
  0xf6   : > { %1240 = vmatprep.mubr.f32.mxu0 %v11982_v2  ;;  %6702 = vmatpush1.msk.msra.mxu0 %vm12388_vm8, %v1432_v3  ;;  %v1573_v59 = vsel %vm7926_vm15, %v1559_v54, 0.0  ;;  %vm12406_vm8 = vmmov %vm12390_vm12 }
  0xf7   : > { %6675 = vmatmul.mubr.msk.f32.gmra.mxu1 %vm12399_vm13, %v6669_v40  ;;  %6721 = vmatprep.subr.msk.mxu0 %vm12400_vm9, %v1715_v48  ;;  %vm12401_vm13 = vmmov %vm12390_vm12  ;;  %v6719_v40 = vld [vmem:[%s12321_s3 + $0x110] sm:$0xff] }
  0xf8   : > { %1134 = vmatprep.mubr.f32.mxu1 %v11982_v2  ;;  %vm12407_vm9 = vmmov %vm12406_vm8 }
  0xf9   : > { %6684 = vmatmul.mubr.msk.f32.gmra.mxu0 %vm12390_vm12, %v6678_v53  ;;  %vm12410_vm12 = vmmov %vm12406_vm8 }
  0xfa   : > { %1246 = vmatprep.mubr.f32.mxu0 %v11982_v2 }
  0xfb   : > { %6676 = vmatmul.mubr.msk.f32.gmra.mxu1 %vm12401_vm13, %v6670_v52  ;;  %vm12409_vm13 = vmmov %vm12406_vm8 }
  0xfc   : > { %1375 = vmatprep.mubr.f32.mxu1 %v11982_v2 }
  0xfd   : > { %6685 = vmatmul.mubr.msk.f32.gmra.mxu0 %vm12406_vm8, %v6679_v56  ;;  %vm7956_vm8 = vcmp.eq.s32.totalorder %v1707_v60, 1 }
  0xfe   : > { %1252 = vmatprep.mubr.f32.mxu0 %v11982_v2  ;;  %v12412_v63 = vsel %vm7956_vm8, 4294967295, %v12411_v63 }
  0xff   : > { %6693 = vmatmul.mubr.msk.f32.vlgmr.msra.gmra.mxu1 %vm12407_vm9, %v6687_v58  ;;  %12413 = vst [vmem:[#allocation49_spill] sm:$0xff] %v12412_v63  ;;  %vm12414_vm9 = vcmp.lt.s32.totalorder %v7601_v27, 111 }
 0x100   : > { %1381 = vmatprep.mubr.f32.mxu1 %v11982_v2  ;;  %6712 = vmatpush1.msk.msra.mxu1 %vm12408_vm3, %v1573_v59  ;;  %v1700_v6 = vsel %vm12414_vm9, %v1696_v33, %v1698_v28  ;;  %vm12415_vm3 = vmmov %vm12410_vm12  ;;  %v6717_v28 = vld [vmem:[%s12321_s3 + $0x100] sm:$0xff]  ;;  %v6710_v33 = vld [vmem:[%s12321_s3 + $0xf8] sm:$0xff]  ;;  %s7268_s3 = smov 47  }
 0x101   : > { %6686 = vmatmul.mubr.msk.f32.gmra.mxu0 %vm12409_vm13, %v6680_v61  ;;  %v1714_v10 = vsel %vm7956_vm8, %v1700_v6, 0.0  ;;  %vm12416_vm13 = vmmov %vm12415_vm3 }
 0x102   : > { %1516 = vmatprep.mubr.f32.mxu0 %v11982_v2  ;;  %vm12418_vm9 = vmmov %vm12415_vm3 }
 0x103   : > { %6694 = vmatmul.mubr.msk.f32.gmra.mxu1 %vm12410_vm12, %v6688_v62  ;;  %vm12417_vm12 = vcmask 1043456   ;;  %vm12419_vm8 = vmmov %vm12415_vm3 }
 0x104   : > { %1387 = vmatprep.mubr.f32.mxu1 %v11982_v2 }
 0x105   : > { %6703 = vmatmul.mubr.msk.f32.vlgmr.msra.gmra.mxu0 %vm12416_vm13, %v6697_v9  ;;  %vm12420_vm13 = vmmov %vm12415_vm3 }
 0x106   : > { %1522 = vmatprep.mubr.f32.mxu0 %v11982_v2  ;;  %6722 = vmatpush1.msk.msra.mxu0 %vm12417_vm12, %v1714_v10  ;;  %vm12422_vm12 = vmmov %vm12415_vm3 }
 0x107   : > { %6695 = vmatmul.mubr.msk.f32.gmra.mxu1 %vm12415_vm3, %v6689_v8 }
 0x108   : > { %1393 = vmatprep.mubr.f32.mxu1 %v11982_v2 }
 0x109   : > { %6704 = vmatmul.mubr.msk.f32.gmra.mxu0 %vm12419_vm8, %v6698_v24  ;;  %vm12421_vm8 = vmmov %vm12415_vm3 }
 0x10a   : > { %1528 = vmatprep.mubr.f32.mxu0 %v11982_v2 }
 0x10b   : > { %6696 = vmatmul.mubr.msk.f32.gmra.mxu1 %vm12418_vm9, %v6690_v14  ;;  %vm12423_vm9 = vmmov %vm12415_vm3 }
 0x10c   : > { %1657 = vmatprep.mubr.f32.mxu1 %v11982_v2 }
 0x10d   : > { %6705 = vmatmul.mubr.msk.f32.gmra.mxu0 %vm12415_vm3, %v6699_v25 }
 0x10e   : > { %1534 = vmatprep.mubr.f32.mxu0 %v11982_v2 }
 0x10f   : > { %6713 = vmatmul.mubr.msk.f32.vlgmr.msra.gmra.mxu1 %vm12420_vm13, %v6707_v30  ;;  %vm12424_vm13 = vmmov %vm12415_vm3 }
 0x110   : > { %1663 = vmatprep.mubr.f32.mxu1 %v11982_v2 }
 0x111   : > { %6706 = vmatmul.mubr.msk.f32.gmra.mxu0 %vm12421_vm8, %v6700_v0  ;;  %vm12425_vm8 = vmmov %vm12415_vm3 }
 0x112   : > { %1798 = vmatprep.mubr.f32.mxu0 %v11982_v2 }
 0x113   : > { %6714 = vmatmul.mubr.msk.f32.gmra.mxu1 %vm12422_vm12, %v6708_v31  ;;  %vm12426_vm12 = vmmov %vm12415_vm3 }
 0x114   : > { %1669 = vmatprep.mubr.f32.mxu1 %v11982_v2 }
 0x115   : > { %6723 = vmatmul.mubr.msk.f32.vlgmr.msra.gmra.mxu0 %vm12415_vm3, %v6717_v28 }
 0x116   : > { %1804 = vmatprep.mubr.f32.mxu0 %v11982_v2 }
 0x117   : > { %6715 = vmatmul.mubr.msk.f32.gmra.mxu1 %vm12423_vm9, %v6709_v32  ;;  %vm12427_vm9 = vmmov %vm12415_vm3  ;;  %vm12438_vm3 = vcmp.lt.s32.totalorder %v7601_v27, 16 }
 0x118   : > { %1675 = vmatprep.mubr.f32.mxu1 %v11982_v2 }
 0x119   : > { %6724 = vmatmul.mubr.msk.f32.gmra.mxu0 %vm12425_vm8, %v6718_v35  ;;  %vm12440_vm8 = vmmov %vm12438_vm3 }
 0x11a   : > { %1810 = vmatprep.mubr.f32.mxu0 %v11982_v2 }
 0x11b   : > { %6716 = vmatmul.mubr.msk.f32.gmra.mxu1 %vm12424_vm13, %v6710_v33  ;;  %vm12439_vm13 = vmmov %vm12438_vm3 }
 0x11c   : > { %2045 = vmatprep.mubr.f32.mxu1 %v11982_v2 }
 0x11d   : > { %6725 = vmatmul.mubr.msk.f32.gmra.mxu0 %vm12426_vm12, %v6719_v40  ;;  %vm12441_vm12 = vmmov %vm12438_vm3 }
 0x11e   : > { %1816 = vmatprep.mubr.f32.mxu0 %v11982_v2 }
 0x121   : > { %6726 = vmatmul.mubr.msk.f32.gmra.mxu0 %vm12427_vm9, %v6720_v42  ;;  %vm12442_vm9 = vmmov %vm12438_vm3 }
 0x122   : > { %2146 = vmatprep.mubr.f32.mxu0 %v11982_v2 }
 0x195   : > { %v737_v44 = vpop.f32.mrf.mxu0 }
 0x197   : > { %v755_v3 = vpop.f32.mrf.mxu1  ;;  %v739_v47 = vpop.f32.mrf.mxu0 }
 0x199   : > { %v757_v48 = vpop.f32.mrf.mxu1 }
 0x19c   : > { %v8037_v52 = vpop.f32.mrf.mxu0 }
 0x19d   : > { %v844_v53 = vpop.f32.mrf.mxu1 }
 0x19e   : > { %v8039_v54 = vpop.f32.mrf.mxu0  ;;  %v845_v17 = vadd.f32 %v844_v53, %v737_v44 }
 0x19f   : > { %v846_v56 = vpop.f32.mrf.mxu1 }
 0x1a0   : > { %v847_v46 = vadd.f32 %v846_v56, %v739_v47 }
 0x1a1   : > { %v8041_v58 = vpop.f32.mrf.mxu0 }
 0x1a3   : > { %v8043_v59 = vpop.f32.mrf.mxu1  ;;  %v8045_v60 = vpop.f32.mrf.mxu0 }
 0x1a5   : > { %v8047_v61 = vpop.f32.mrf.mxu1  ;;  %v977_v6 = vpop.f32.mrf.mxu0 }
 0x1a6   : > { %v1000_v51 = vadd.f32 %v977_v6, %v845_v17  ;;  %v851_v17 = vadd.f32 %v8043_v59, %v8037_v52 }
 0x1a7   : > { %v8049_v62 = vpop.f32.mrf.mxu1  ;;  %v979_v9 = vpop.f32.mrf.mxu0 }
 0x1a8   : > { %v1001_v13 = vadd.f32 %v979_v9, %v847_v46  ;;  %v8091_v46 = vpop.permute.xlu1 %1843 }
 0x1a9   : > { %v8051_v8 = vpop.f32.mrf.mxu1  ;;  %v8053_v14 = vpop.f32.mrf.mxu0 }
 0x1ab   : > { %v862_v10 = vpop.f32.mrf.mxu1  ;;  %v8055_v30 = vpop.f32.mrf.mxu0 }
 0x1ac   : > { %v863_v24 = vadd.f32 %v862_v10, %v755_v3  ;;  %v8099_v57 = vpop.permute.xlu1 %1876 }
 0x1ad   : > { %v864_v25 = vpop.f32.mrf.mxu1  ;;  %v8057_v31 = vpop.f32.mrf.mxu0 }
 0x1ae   : > { %v865_v0 = vadd.f32 %v864_v25, %v757_v48 }
 0x1af   : > { %v1118_v32 = vpop.f32.mrf.mxu1  ;;  %v8059_v28 = vpop.f32.mrf.mxu0 }
 0x1b1   : > { %v1120_v33 = vpop.f32.mrf.mxu1  ;;  %v995_v35 = vpop.f32.mrf.mxu0 }
 0x1b2   : > { %v1006_v42 = vadd.f32 %v995_v35, %v863_v24  ;;  %v1142_v49 = vadd.f32 %v1120_v33, %v1001_v13  ;;  %v1002_v13 = vadd.f32 %v8053_v14, %v851_v17 }
 0x1b3   : > { %v1124_v40 = vpop.f32.mrf.mxu1  ;;  %v997_v2 = vpop.f32.mrf.mxu0 }
 0x1b4   : > { %v1007_v23 = vadd.f32 %v997_v2, %v865_v0  ;;  %v1143_v33 = vadd.f32 %v1124_v40, %v1002_v13 }
 0x1b5   : > { %v1126_v21 = vpop.f32.mrf.mxu1  ;;  %v1236_v45 = vpop.f32.mrf.mxu0 }
 0x1b7   : > { %v8061_v5 = vpop.f32.mrf.mxu1  ;;  %v1238_v10 = vpop.f32.mrf.mxu0 }
 0x1b8   : > { %v1260_v12 = vadd.f32 %v1238_v10, %v1142_v49 }
 0x1b9   : > { %v8063_v3 = vpop.f32.mrf.mxu1  ;;  %v1242_v48 = vpop.f32.mrf.mxu0 }
 0x1bb   : > { %v1136_v7 = vpop.f32.mrf.mxu1  ;;  %v1244_v50 = vpop.f32.mrf.mxu0 }
 0x1bc   : > { %v1147_v25 = vadd.f32 %v1136_v7, %v1006_v42  ;;  %v8075_v42 = vpop.permute.xlu0 %1848 }
 0x1bd   : > { %v1138_v55 = vpop.f32.mrf.mxu1  ;;  %v8065_v29 = vpop.f32.mrf.mxu0 }
 0x1be   : > { %v1148_v36 = vadd.f32 %v1138_v55, %v1007_v23 }
 0x1bf   : > { %v1377_v26 = vpop.f32.mrf.mxu1  ;;  %v8067_v19 = vpop.f32.mrf.mxu0 }
 0x1c1   : > { %v1379_v24 = vpop.f32.mrf.mxu1  ;;  %v1254_v35 = vpop.f32.mrf.mxu0 }
 0x1c2   : > { %v8069_v0 = vadd.f32 %v1254_v35, %v1147_v25  ;;  %v1401_v47 = vadd.f32 %v1379_v24, %v1260_v12  ;;  %v1261_v24 = vadd.f32 %v1242_v48, %v1143_v33 }
 0x1c3   : > { %v1383_v2 = vpop.f32.mrf.mxu1  ;;  %v1256_v20 = vpop.f32.mrf.mxu0 }
 0x1c4   : > { %v8071_v22 = vadd.f32 %v1256_v20, %v1148_v36  ;;  %v1141_v20 = vadd.f32 %v1118_v32, %v1000_v51  ;;  %v1839_v36 = vpop.permute.xlu0 %1838 }
 0x1c5   : > { %v1385_v15 = vpop.f32.mrf.mxu1  ;;  %v1518_v7 = vpop.f32.mrf.mxu0 }
 0x1c6   : > { %v1259_v1 = vadd.f32 %v1236_v45, %v1141_v20  ;;  %v853_v45 = vadd.f32 %v8047_v61, %v8039_v54  ;;  %v1402_v61 = vadd.f32 %v1383_v2, %v1261_v24 }
 0x1c7   : > { %v8073_v16 = vpop.f32.mrf.mxu1  ;;  %v1520_v55 = vpop.f32.mrf.mxu0 }
 0x1c8   : > { %v1400_v44 = vadd.f32 %v1377_v26, %v1259_v1  ;;  %v1834_v6 = vpop.permute.xlu0 %1833  ;;  %v1542_v49 = vadd.f32 %v1520_v55, %v1401_v47  ;;  %v1003_v32 = vadd.f32 %v8055_v30, %v853_v45  ;;  %v1872_v45 = vpop.permute.xlu1 %1871 }
 0x1c9   : > { %v8077_v23 = vpop.f32.mrf.mxu1  ;;  %v1524_v63 = vpop.f32.mrf.mxu0 }
 0x1ca   : > { %v1541_v56 = vadd.f32 %v1518_v7, %v1400_v44  ;;  %v1144_v10 = vadd.f32 %v1126_v21, %v1003_v32  ;;  %v1543_v47 = vadd.f32 %v1524_v63, %v1402_v61 }
 0x1cb   : > { %v8079_v18 = vpop.f32.mrf.mxu1  ;;  %v1526_v35 = vpop.f32.mrf.mxu0 }
 0x1cc   : > { %v1862_v7 = vpop.permute.xlu0 %1861  ;;  %v1262_v54 = vadd.f32 %v1244_v50, %v1144_v10 }
 0x1cd   : > { %v8081_v25 = vpop.f32.mrf.mxu1  ;;  %v8083_v34 = vpop.f32.mrf.mxu0 }
 0x1ce   : > { %v1403_v17 = vadd.f32 %v1385_v15, %v1262_v54  ;;  %v857_v15 = vadd.f32 %v8049_v62, %v8041_v58 }
 0x1cf   : > { %v1659_v39 = vpop.f32.mrf.mxu1  ;;  %v8085_v11 = vpop.f32.mrf.mxu0 }
 0x1d0   : > { %v1682_v26 = vadd.f32 %v1659_v39, %v1541_v56 }
 0x1d1   : > { %v8087_v53 = vpop.f32.mrf.mxu0  ;;  %v1661_v51 = vpop.f32.mrf.mxu1 }
 0x1d2   : > { %v1683_v52 = vadd.f32 %v1661_v51, %v1542_v49  ;;  %v1544_v51 = vadd.f32 %v1526_v35, %v1403_v17  ;;  %v1004_v35 = vadd.f32 %v8057_v31, %v857_v15  ;;  %v1867_v49 = vpop.permute.xlu1 %1866 }
 0x1d3   : > { %v8093_v9 = vpop.f32.mrf.mxu0  ;;  %v1665_v4 = vpop.f32.mrf.mxu1 }
 0x1d4   : > { %v1684_v21 = vadd.f32 %v1665_v4, %v1543_v47  ;;  %v859_v4 = vadd.f32 %v8051_v8, %v8045_v60 }
 0x1d5   : > { %v1800_v1 = vpop.f32.mrf.mxu0  ;;  %v1667_v56 = vpop.f32.mrf.mxu1 }
 0x1d6   : > { %v1823_v12 = vadd.f32 %v1800_v1, %v1682_v26  ;;  %v1685_v50 = vadd.f32 %v1667_v56, %v1544_v51  ;;  %v1005_v26 = vadd.f32 %v8059_v28, %v859_v4  ;;  %v1145_v1 = vadd.f32 %v8061_v5, %v1004_v35  ;;  %v574_v35 = vld [vmem:[%s12436_s7 + $0x10] sm:$0xff] }
 0x1d7   : > { %v1802_v59 = vpop.f32.mrf.mxu0  ;;  %v1671_v8 = vpop.f32.mrf.mxu1 }
 0x1d8   : > { %v1851_v20 = vmul.f32 %v1834_v6, %v1823_v12  ;;  %v1824_v44 = vadd.f32 %v1802_v59, %v1683_v52  ;;  %v1146_v58 = vadd.f32 %v8063_v3, %v1005_v26  ;;  %v1263_v62 = vadd.f32 %v8065_v29, %v1145_v1  ;;  %v573_v1 = vld [vmem:[%s12436_s7 + $0x8] sm:$0xff] }
 0x1d9   : > { %v1806_v39 = vpop.f32.mrf.mxu0  ;;  %v1673_v29 = vpop.f32.mrf.mxu1 }
 0x1da   : > { %v1879_v14 = vadd.f32 %v1862_v7, %v1851_v20  ;;  %v1852_v55 = vmul.f32 %v1834_v6, %v1824_v44  ;;  %v1825_v2 = vadd.f32 %v1806_v39, %v1684_v21  ;;  %v1264_v31 = vadd.f32 %v8067_v19, %v1146_v58  ;;  %v578_v58 = vld [vmem:[%s12437_s8 + $0x10] sm:$0xff] }
 0x1db   : > { %v1808_v13 = vpop.f32.mrf.mxu0  ;;  %v1404_v33 = vadd.f32 %v8073_v16, %v1263_v62  ;;  %v1677_v54 = vpop.f32.mrf.mxu1 }
 0x1dc   : > { %v8101_v30 = vmax.f32 %v1879_v14, 0.0  ;;  %v1880_v40 = vadd.f32 %v1862_v7, %v1852_v55  ;;  %v1826_v63 = vadd.f32 %v1808_v13, %v1685_v50  ;;  %v1853_v6 = vmul.f32 %v1839_v36, %v1825_v2 }
 0x1dd   : > { %v1812_v5 = vpop.f32.mrf.mxu0  ;;  %v1545_v3 = vadd.f32 %v8083_v34, %v1404_v33  ;;  %v1407_v55 = vadd.f32 %v8081_v25, %v8071_v22  ;;  %v1679_v17 = vpop.f32.mrf.mxu1 }
 0x1de   : > { %v8103_v48 = vmax.f32 %v1880_v40, 0.0  ;;  %1936 = vrot.lane.b32.xlu1 %v8101_v30, %s12428_s25  ;;  %v1854_v32 = vmul.f32 %v1839_v36, %v1826_v63  ;;  %v1881_v60 = vadd.f32 %v1867_v49, %v1853_v6  ;;  %v1405_v36 = vadd.f32 %v8077_v23, %v1264_v31  ;;  %v575_v63 = vld [vmem:[%s12436_s7 + $0x18] sm:$0xff]  ;;  %v577_v31 = vld [vmem:[%s12437_s8 + $0x8] sm:$0xff] }
 0x1df   : > { %v1686_v19 = vadd.f32 %v1671_v8, %v1545_v3  ;;  %v1814_v16 = vpop.f32.mrf.mxu0  ;;  %v1548_v47 = vadd.f32 %v8093_v9, %v1407_v55 }
 0x1e0   : > { %1944 = vrot.lane.b32.xlu0 %v8103_v48, %s12428_s25  ;;  %v1882_v28 = vadd.f32 %v1867_v49, %v1854_v32  ;;  %v8132_v52 = vmax.f32 %v1881_v60, 0.0  ;;  %v1546_v12 = vadd.f32 %v8085_v11, %v1405_v36  ;;  %v579_v49 = vld [vmem:[%s12437_s8 + $0x18] sm:$0xff]  ;;  %v572_v60 = vld [vmem:[%s12436_s7] sm:$0xff]  ;;  %s9498_s7 = sld [smem:[#allocation2 + $0x9]] }
 0x1e1   : > { %v1827_v24 = vadd.f32 %v1812_v5, %v1686_v19  ;;  %v1818_v14 = vpop.f32.mrf.mxu0 }
 0x1e2   : > { %1899 = vrot.lane.b32.xlu1 %v8101_v30, %s12429_s24  ;;  %v8137_v59 = vmax.f32 %v1882_v28, 0.0  ;;  %v1687_v10 = vadd.f32 %v1673_v29, %v1546_v12  ;;  %v576_v28 = vld [vmem:[%s12437_s8] sm:$0xff]  ;;  %s9508_s8 = sld [smem:[#allocation2 + $0xb]] }
 0x1e3   : > { %v1855_v23 = vmul.f32 %v8091_v46, %v1827_v24 }
 0x1e4   : > { %1907 = vrot.lane.b32.xlu0 %v8103_v48, %s12429_s24  ;;  %v1828_v34 = vadd.f32 %v1814_v16, %v1687_v10 }
 0x1e5   : > { %v1883_v7 = vadd.f32 %v1872_v45, %v1855_v23 }
 0x1e6   : > { %2176 = vrot.lane.b32.xlu1 %v8101_v30, %s12430_s16  ;;  %v1856_v11 = vmul.f32 %v8091_v46, %v1828_v34  ;;  %v1406_v46 = vadd.f32 %v8079_v18, %v8069_v0  ;;  %v1820_v18 = vpop.f32.mrf.mxu0  ;;  %v1689_v0 = vadd.f32 %v1679_v17, %v1548_v47 }
 0x1e7   : > { %v8155_v44 = vmax.f32 %v1883_v7, 0.0 }
 0x1e8   : > { %2184 = vrot.lane.b32.xlu0 %v8103_v48, %s12430_s16  ;;  %v1884_v20 = vadd.f32 %v1872_v45, %v1856_v11  ;;  %v1547_v39 = vadd.f32 %v8087_v53, %v1406_v46  ;;  %v1830_v51 = vadd.f32 %v1820_v18, %v1689_v0  ;;  %12584 = sst [smem:[#allocation82_spill]] %s9508_s8  ;;  %s12605_s8 = smov 126  }
 0x1ea   : > { %2322 = vrot.lane.b32.xlu1 %v8101_v30, %s12431_s17  ;;  %v8161_v61 = vmax.f32 %v1884_v20, 0.0  ;;  %v1688_v40 = vadd.f32 %v1677_v54, %v1547_v39  ;;  %v1858_v25 = vmul.f32 %v8075_v42, %v1830_v51  ;;  %v6727_v51 = vld [vmem:[%s12444_s6 + $0x20] sm:$0xff] }
 0x1ec   : > { %2330 = vrot.lane.b32.xlu0 %v8103_v48, %s12431_s17  ;;  %v1829_v56 = vadd.f32 %v1818_v14, %v1688_v40  ;;  %v1886_v9 = vadd.f32 %v8099_v57, %v1858_v25 }
 0x1ee   : > { %1938 = vrot.lane.b32.xlu1 %v8132_v52, %s12428_s25  ;;  %v1857_v22 = vmul.f32 %v8075_v42, %v1829_v56  ;;  %v8193_v45 = vmax.f32 %v1886_v9, 0.0  ;;  %v12446_v9 = vmov 0.0  }
 0x1f0   : > { %1946 = vrot.lane.b32.xlu0 %v8137_v59, %s12428_s25  ;;  %v1885_v53 = vadd.f32 %v8099_v57, %v1857_v22 }
 0x1f2   : > { %1901 = vrot.lane.b32.xlu1 %v8132_v52, %s12429_s24  ;;  %v8189_v21 = vmax.f32 %v1885_v53, 0.0 }
 0x1f4   : > { %1909 = vrot.lane.b32.xlu0 %v8137_v59, %s12429_s24 }
 0x1f6   : > { %2178 = vrot.lane.b32.xlu1 %v8132_v52, %s12430_s16 }
 0x1f8   : > { %2186 = vrot.lane.b32.xlu0 %v8137_v59, %s12430_s16 }
 0x1fa   : > { %2324 = vrot.lane.b32.xlu1 %v8132_v52, %s12431_s17 }
 0x1fc   : > { %2332 = vrot.lane.b32.xlu0 %v8137_v59, %s12431_s17 }
 0x1fe   : > { %1940 = vrot.lane.b32.xlu1 %v8155_v44, %s12428_s25 }
 0x200   : > { %1948 = vrot.lane.b32.xlu0 %v8161_v61, %s12428_s25 }
 0x202   : > { %1903 = vrot.lane.b32.xlu1 %v8155_v44, %s12429_s24 }
 0x204   : > { %1911 = vrot.lane.b32.xlu0 %v8161_v61, %s12429_s24 }
 0x206   : > { %2180 = vrot.lane.b32.xlu1 %v8155_v44, %s12430_s16 }
 0x208   : > { %2188 = vrot.lane.b32.xlu0 %v8161_v61, %s12430_s16 }
 0x20a   : > { %2326 = vrot.lane.b32.xlu1 %v8155_v44, %s12431_s17 }
 0x20c   : > { %2334 = vrot.lane.b32.xlu0 %v8161_v61, %s12431_s17 }
 0x20e   : > { %2586 = vrot.lane.b32.xlu1 %v8155_v44, %s12432_s26 }
 0x210   : > { %2594 = vrot.lane.b32.xlu0 %v8161_v61, %s12432_s26 }
 0x212   : > { %1942 = vrot.lane.b32.xlu1 %v8189_v21, %s12428_s25 }
 0x214   : > { %1950 = vrot.lane.b32.xlu0 %v8193_v45, %s12428_s25 }
 0x216   : > { %2584 = vrot.lane.b32.xlu1 %v8132_v52, %s12432_s26 }
 0x218   : > { %2592 = vrot.lane.b32.xlu0 %v8137_v59, %s12432_s26 }
 0x21a   : > { %1905 = vrot.lane.b32.xlu1 %v8189_v21, %s12429_s24 }
 0x21c   : > { %2740 = vrot.lane.b32.xlu0 %v8161_v61, %s12433_s0 }
 0x21e   : > { %2182 = vrot.lane.b32.xlu1 %v8189_v21, %s12430_s16 }
 0x220   : > { %1913 = vrot.lane.b32.xlu0 %v8193_v45, %s12429_s24 }
 0x222   : > { %2328 = vrot.lane.b32.xlu1 %v8189_v21, %s12431_s17 }
 0x224   : > { %2190 = vrot.lane.b32.xlu0 %v8193_v45, %s12430_s16 }
 0x226   : > { %2588 = vrot.lane.b32.xlu1 %v8189_v21, %s12432_s26 }
 0x228   : > { %2590 = vrot.lane.b32.xlu0 %v8103_v48, %s12432_s26 }
 0x22a   : > { %2734 = vrot.lane.b32.xlu1 %v8189_v21, %s12433_s0 }
 0x22c   : > { %2738 = vrot.lane.b32.xlu0 %v8137_v59, %s12433_s0 }
 0x22e   : > { %2732 = vrot.lane.b32.xlu1 %v8155_v44, %s12433_s0 }
 0x230   : > { %2736 = vrot.lane.b32.xlu0 %v8103_v48, %s12433_s0 }
 0x232   : > { %2582 = vrot.lane.b32.xlu1 %v8101_v30, %s12432_s26 }
 0x234   : > { %2336 = vrot.lane.b32.xlu0 %v8193_v45, %s12431_s17 }
 0x236   : > { %2730 = vrot.lane.b32.xlu1 %v8132_v52, %s12433_s0 }
 0x238   : > { %2886 = vrot.lane.b32.xlu0 %v8161_v61, %s12434_s27 }
 0x23a   : > { %2728 = vrot.lane.b32.xlu1 %v8101_v30, %s12433_s0 }
 0x23c   : > { %2884 = vrot.lane.b32.xlu0 %v8137_v59, %s12434_s27 }
 0x23e   : > { %2880 = vrot.lane.b32.xlu1 %v8189_v21, %s12434_s27 }
 0x240   : > { %2596 = vrot.lane.b32.xlu0 %v8193_v45, %s12432_s26 }
 0x242   : > { %2878 = vrot.lane.b32.xlu1 %v8155_v44, %s12434_s27 }
 0x244   : > { %2742 = vrot.lane.b32.xlu0 %v8193_v45, %s12433_s0 }
 0x246   : > { %3026 = vrot.lane.b32.xlu1 %v8189_v21, %s12435_s30 }
 0x248   : > { %3032 = vrot.lane.b32.xlu0 %v8161_v61, %s12435_s30 }
 0x24a   : > { %2876 = vrot.lane.b32.xlu1 %v8132_v52, %s12434_s27 }
 0x24c   : > { %2882 = vrot.lane.b32.xlu0 %v8103_v48, %s12434_s27 }
 0x24e   : > { %3024 = vrot.lane.b32.xlu1 %v8155_v44, %s12435_s30 }
 0x250   : > { %2888 = vrot.lane.b32.xlu0 %v8193_v45, %s12434_s27  ;;  %v8259_v57 = vpop.permute.xlu1 %1936 }
 0x252   : > { %v8261_v42 = vpop.permute.xlu0 %1944  ;;  %2874 = vrot.lane.b32.xlu1 %v8101_v30, %s12434_s27 }
 0x254   : > { %3034 = vrot.lane.b32.xlu0 %v8193_v45, %s12435_s30  ;;  %v8267_v13 = vpop.permute.xlu1 %1899 }
 0x256   : > { %v8269_v50 = vpop.permute.xlu0 %1907  ;;  %3022 = vrot.lane.b32.xlu1 %v8132_v52, %s12435_s30 }
 0x258   : > { %3030 = vrot.lane.b32.xlu0 %v8137_v59, %s12435_s30  ;;  %v8275_v2 = vpop.permute.xlu1 %2176 }
 0x25a   : > { %v8277_v15 = vpop.permute.xlu0 %2184  ;;  %3020 = vrot.lane.b32.xlu1 %v8101_v30, %s12435_s30 }
 0x25c   : > { %3028 = vrot.lane.b32.xlu0 %v8103_v48, %s12435_s30  ;;  %v8286_v4 = vpop.permute.xlu1 %2322 }
 0x25e   : > { %v8291_v6 = vpop.permute.xlu0 %2330  ;;  %3178 = vperm.xlu1 %7137, %v575_v63   ;;  %v6728_v63 = vld [vmem:[%s12444_s6 + $0x28] sm:$0xff] }
 0x260   : > { %3173 = vperm.xlu0 %7136, %v574_v35   ;;  %v1939_v26 = vpop.permute.xlu1 %1938 }
 0x262   : > { %v1947_v32 = vpop.permute.xlu0 %1946  ;;  %3206 = vperm.xlu1 %7137, %v579_v49   ;;  %v6729_v49 = vld [vmem:[%s12444_s6 + $0x30] sm:$0xff] }
 0x263   : > { %v1953_v40 = vsel %vm12442_vm9, %v1939_v26, %v1947_v32  ;;  %v1957_v18 = vsel %vm12438_vm3, %v1947_v32, %v1939_v26  ;;  %vm12447_vm9 = vcmp.lt.s32.totalorder %v7601_v27, 17 }
 0x264   : > { %3168 = vperm.xlu0 %7136, %v573_v1   ;;  %v8302_v62 = vpop.permute.xlu1 %1901 }
 0x266   : > { %v8307_v8 = vpop.permute.xlu0 %1909  ;;  %3201 = vperm.xlu1 %7137, %v578_v58  }
 0x268   : > { %3163 = vperm.xlu0 %7136, %v572_v60   ;;  %v8312_v33 = vpop.permute.xlu1 %2178 }
 0x26a   : > { %v8317_v5 = vpop.permute.xlu0 %2186  ;;  %3196 = vperm.xlu1 %7137, %v577_v31  }
 0x26c   : > { %3191 = vperm.xlu0 %7136, %v576_v28   ;;  %v8319_v36 = vpop.permute.xlu1 %2324 }
 0x26e   : > { %v8321_v3 = vpop.permute.xlu0 %2332 }
 0x270   : > { %v1941_v29 = vpop.permute.xlu1 %1940 }
 0x272   : > { %v1949_v12 = vpop.permute.xlu0 %1948 }
 0x273   : > { %v1954_v39 = vsel %vm12440_vm8, %v1941_v29, %v1949_v12  ;;  %v1958_v17 = vsel %vm12441_vm12, %v1949_v12, %v1941_v29  ;;  %vm1968_vm8 = vcmask 261120   ;;  %vm12445_vm12 = vmmov %vm12438_vm3  ;;  %v12454_v29 = vld [vmem:[#allocation35_spill] sm:$0xff] }
 0x274   : > { %v1904_v19 = vpop.permute.xlu1 %1903  ;;  %v1956_v22 = vsel %vm12445_vm12, %v8261_v42, %v8259_v57 }
 0x276   : > { %v1912_v16 = vpop.permute.xlu0 %1911 }
 0x278   : > { %v8323_v10 = vpop.permute.xlu1 %2180 }
 0x27a   : > { %v8325_v24 = vpop.permute.xlu0 %2188 }
 0x27c   : > { %v8327_v34 = vpop.permute.xlu1 %2326 }
 0x27e   : > { %v8329_v23 = vpop.permute.xlu0 %2334 }
 0x280   : > { %v8331_v11 = vpop.permute.xlu1 %2586 }
 0x282   : > { %v8333_v7 = vpop.permute.xlu0 %2594 }
 0x284   : > { %v1943_v20 = vpop.permute.xlu1 %1942 }
 0x286   : > { %v1951_v54 = vpop.permute.xlu0 %1950 }
 0x287   : > { %v1959_v46 = vsel %vm12438_vm3, %v1951_v54, %v1943_v20  ;;  %v1955_v14 = vsel %vm12439_vm13, %v1943_v20, %v1951_v54  ;;  %vm12443_vm13 = vmmov %vm12438_vm3  ;;  %v1895_v20 = vld [vmem:[%s12444_s6] sm:$0xff] }
 0x288   : > { %6731 = vmatprep.subr.msk.mxu1 %vm7624_vm5, %v1955_v14  ;;  %v8341_v55 = vpop.permute.xlu1 %2584  ;;  %v1952_v56 = vsel %vm12443_vm13, %v8259_v57, %v8261_v42  ;;  %vm12448_vm3 = vmmov %vm12447_vm9  ;;  %vm12451_vm13 = vcmp.lt.s32.totalorder %v7601_v27, 15 }
 0x289   : > { %6732 = vmatpush1.msk.msra.mxu1 %vm7628_vm10, %v1959_v46  ;;  %vm12452_vm12 = vmmov %vm12448_vm3  ;;  %v1920_v31 = vsel %vm12448_vm3, %v8307_v8, %v8302_v62 }
 0x28a   : > { %v8349_v47 = vpop.permute.xlu0 %2592  ;;  %6733 = vmatprep.subr.msk.mxu1 %vm7624_vm5, %v1954_v39  ;;  %v1916_v58 = vsel %vm12452_vm12, %v8302_v62, %v8307_v8  ;;  %vm12459_vm12 = vmmov %vm12448_vm3 }
 0x28b   : > { %6734 = vmatpush1.msk.msra.mxu1 %vm7628_vm10, %v1958_v17  ;;  %v1919_v54 = vsel %vm12459_vm12, %v8269_v50, %v8267_v13 }
 0x28c   : > { %6735 = vmatprep.subr.msk.mxu1 %vm7624_vm5, %v1953_v40  ;;  %v1906_v0 = vpop.permute.xlu1 %1905 }
 0x28d   : > { %6736 = vmatpush1.msk.msra.mxu1 %vm7628_vm10, %v1957_v18 }
 0x28e   : > { %v8374_v25 = vpop.permute.xlu0 %2740  ;;  %6737 = vmatprep.subr.msk.mxu1 %vm7624_vm5, %v1952_v56  ;;  %vm12449_vm5 = vmmov %vm12448_vm3 }
 0x28f   : > { %6738 = vmatpush1.msk.msra.mxu1 %vm7628_vm10, %v1956_v22  ;;  %v1917_v42 = vsel %vm12449_vm5, %v1904_v19, %v1912_v16  ;;  %vm12450_vm10 = vmmov %vm12448_vm3  ;;  %vm12455_vm5 = vnez %v12454_v29 }
 0x290   : > { %6739 = vmatmul.mubr.msk.f32.vlgmr.msra.gmra.mxu1 %vm1968_vm8, %v6727_v51  ;;  %v2183_v53 = vpop.permute.xlu1 %2182  ;;  %v1921_v26 = vsel %vm12450_vm10, %v1912_v16, %v1904_v19  ;;  %vm12456_vm10 = vmmov %vm12448_vm3  ;;  %v6730_v16 = vld [vmem:[%s12444_s6 + $0x38] sm:$0xff] }
 0x291   : > { %2051 = vmatprep.mubr.f32.mxu1 %v12446_v9  ;;  %v1915_v12 = vsel %vm12456_vm10, %v8267_v13, %v8269_v50 }
 0x292   : > { %v1914_v35 = vpop.permute.xlu0 %1913 }
 0x293   : > { %v1922_v57 = vsel %vm12447_vm9, %v1914_v35, %v1906_v0  ;;  %v1918_v37 = vsel %vm12448_vm3, %v1906_v0, %v1914_v35  ;;  %vm12453_vm9 = vmmov %vm12451_vm13  ;;  %v12468_v0 = vld [vmem:[#allocation38_spill] sm:$0xff] }
 0x294   : > { %6740 = vmatmul.mubr.msk.f32.gmra.mxu1 %vm1968_vm8, %v6728_v63  ;;  %6743 = vmatprep.subr.msk.mxu0 %vm7637_vm4, %v1918_v37  ;;  %v8392_v38 = vpop.permute.xlu1 %2328 }
 0x295   : > { %6744 = vmatpush1.msk.msra.mxu0 %vm7633_vm0, %v1922_v57  ;;  %2057 = vmatprep.mubr.f32.mxu1 %v12446_v9 }
 0x296   : > { %v2191_v1 = vpop.permute.xlu0 %2190  ;;  %6745 = vmatprep.subr.msk.mxu0 %vm7637_vm4, %v1917_v42 }
 0x297   : > { %v2199_v32 = vsel %vm12451_vm13, %v2191_v1, %v2183_v53  ;;  %6746 = vmatpush1.msk.msra.mxu0 %vm7633_vm0, %v1921_v26  ;;  %v2195_v60 = vsel %vm12453_vm9, %v2183_v53, %v2191_v1  ;;  %vm12458_vm13 = vmmov %vm12453_vm9  ;;  %v6827_v26 = vld [vmem:[%s12444_s6 + $0xe0] sm:$0xff] }
 0x298   : > { %6741 = vmatmul.mubr.msk.f32.gmra.mxu1 %vm1968_vm8, %v6729_v49  ;;  %6747 = vmatprep.subr.msk.mxu0 %vm7637_vm4, %v1916_v58  ;;  %v8423_v28 = vpop.permute.xlu1 %2588  ;;  %v2194_v8 = vsel %vm12458_vm13, %v8323_v10, %v8325_v24  ;;  %vm12469_vm13 = vnez %v12468_v0 }
 0x299   : > { %6759 = vmatprep.subr.msk.mxu1 %vm12455_vm5, %v2195_v60  ;;  %6748 = vmatpush1.msk.msra.mxu0 %vm7633_vm0, %v1920_v31  ;;  %v6773_v60 = vld [vmem:[%s12444_s6 + $0x70] sm:$0xff] }
 0x29a   : > { %6760 = vmatpush1.msk.msra.mxu1 %vm7699_vm14, %v2199_v32  ;;  %v8435_v62 = vpop.permute.xlu0 %2590  ;;  %6749 = vmatprep.subr.msk.mxu0 %vm7637_vm4, %v1915_v12  ;;  %vm12460_vm4 = vmmov %vm12453_vm9  ;;  %v6789_v31 = vld [vmem:[%s12444_s6 + $0x90] sm:$0xff] }
 0x29b   : > { %v2198_v43 = vsel %vm12460_vm4, %v8325_v24, %v8323_v10  ;;  %6761 = vmatprep.subr.msk.mxu1 %vm12455_vm5, %v2194_v8  ;;  %2063 = vmatprep.mubr.f32.mxu1 %v12446_v9  ;;  %vm12461_vm9 = vmmov %vm12460_vm4  ;;  %v1896_v10 = vld [vmem:[%s12444_s6 + $0x8] sm:$0xff]  ;;  %v12485_v12 = vld [vmem:[#allocation42_spill] sm:$0xff] }
 0x29c   : > { %6750 = vmatpush1.msk.msra.mxu0 %vm7633_vm0, %v1919_v54  ;;  %6762 = vmatpush1.msk.msra.mxu1 %vm7699_vm14, %v2198_v43  ;;  %v8464_v46 = vpop.permute.xlu1 %2734  ;;  %v2193_v13 = vsel %vm12461_vm9, %v8312_v33, %v8317_v5  ;;  %vm12462_vm3 = vmmov %vm12460_vm4  ;;  %v6790_v54 = vld [vmem:[%s12444_s6 + $0x98] sm:$0xff] }
 0x29d   : > { %6742 = vmatmul.mubr.msk.f32.gmra.mxu1 %vm1968_vm8, %v6730_v16  ;;  %6751 = vmatmul.mubr.msk.f32.vlgmr.msra.gmra.mxu0 %vm1968_vm8, %v1895_v20  ;;  %v2197_v41 = vsel %vm12462_vm3, %v8317_v5, %v8312_v33  ;;  %vm12463_vm0 = vmmov %vm12462_vm3  ;;  %v6755_v33 = vld [vmem:[%s12444_s6 + $0x40] sm:$0xff] }
 0x29e   : > { %6763 = vmatprep.subr.msk.mxu1 %vm12455_vm5, %v2193_v13  ;;  %v8478_v50 = vpop.permute.xlu0 %2738  ;;  %2152 = vmatprep.mubr.f32.mxu0 %v12446_v9  ;;  %v2192_v24 = vsel %vm12463_vm0, %v8275_v2, %v8277_v15  ;;  %vm12464_vm10 = vmmov %vm12463_vm0 }
 0x29f   : > { %6764 = vmatpush1.msk.msra.mxu1 %vm7699_vm14, %v2197_v41  ;;  %2284 = vmatprep.mubr.f32.mxu1 %v12446_v9  ;;  %v2196_v5 = vsel %vm12464_vm10, %v8277_v15, %v8275_v2  ;;  %v1897_v2 = vld [vmem:[%s12444_s6 + $0x10] sm:$0xff]  ;;  %v6756_v15 = vld [vmem:[%s12444_s6 + $0x48] sm:$0xff] }
 0x2a0   : > { %6765 = vmatprep.subr.msk.mxu1 %vm12455_vm5, %v2192_v24  ;;  %v8500_v14 = vpop.permute.xlu1 %2732 }
 0x2a1   : > { %6766 = vmatpush1.msk.msra.mxu1 %vm7699_vm14, %v2196_v5  ;;  %6752 = vmatmul.mubr.msk.f32.gmra.mxu0 %vm1968_vm8, %v1896_v10  ;;  %vm12465_vm14 = vcmp.lt.s32.totalorder %v7601_v27, 1  ;;  %v6795_v10 = vld [vmem:[%s12444_s6 + $0xa0] sm:$0xff] }
 0x2a2   : > { %6767 = vmatmul.mubr.msk.f32.vlgmr.msra.gmra.mxu1 %vm1968_vm8, %v6755_v33  ;;  %2504 = vmatprep.subr.mxu1 %v8193_v45  ;;  %v8507_v39 = vpop.permute.xlu0 %2736  ;;  %v1898_v45 = vld [vmem:[%s12444_s6 + $0x18] sm:$0xff]  ;;  %vm12466_vm5 = vmmov %vm12465_vm14 }
 0x2a3   : > { %2505 = vmatpush1.msra.mxu1 %v8189_v21  ;;  %2158 = vmatprep.mubr.f32.mxu0 %v12446_v9  ;;  %vm12470_vm12 = vmmov %vm12466_vm5 }
 0x2a4   : > { %2506 = vmatprep.subr.mxu1 %v8161_v61  ;;  %2290 = vmatprep.mubr.f32.mxu1 %v12446_v9  ;;  %v8519_v17 = vpop.permute.xlu1 %2582  ;;  %v6757_v61 = vld [vmem:[%s12444_s6 + $0x50] sm:$0xff]  ;;  %vm12471_vm4 = vmmov %vm12466_vm5 }
 0x2a5   : > { %2507 = vmatpush1.msra.mxu1 %v8155_v44  ;;  %6753 = vmatmul.mubr.msk.f32.gmra.mxu0 %vm1968_vm8, %v1897_v2  ;;  %v2344_v56 = vsel %vm12471_vm4, %v8329_v23, %v8327_v34  ;;  %vm12472_vm9 = vmmov %vm12471_vm4 }
 0x2a6   : > { %6768 = vmatmul.mubr.msk.f32.gmra.mxu1 %vm1968_vm8, %v6756_v15  ;;  %2508 = vmatprep.subr.mxu1 %v8137_v59  ;;  %v2337_v21 = vpop.permute.xlu0 %2336  ;;  %v2339_v22 = vsel %vm12472_vm9, %v8319_v36, %v8321_v3  ;;  %vm12473_vm3 = vmmov %vm12471_vm4 }
 0x2a7   : > { %2509 = vmatpush1.msra.mxu1 %v8132_v52  ;;  %2164 = vmatprep.mubr.f32.mxu0 %v12446_v9  ;;  %v2341_v44 = vsel %vm12465_vm14, %v8392_v38, %v2337_v21  ;;  %v2345_v59 = vsel %vm12466_vm5, %v2337_v21, %v8392_v38  ;;  %vm12474_vm0 = vmmov %vm12473_vm3  ;;  %vm12476_vm14 = vcmp.lt.s32.totalorder %v7601_v27, 127  ;;  %v6812_v21 = vld [vmem:[%s12444_s6 + $0xc8] sm:$0xff] }
 0x2a8   : > { %2510 = vmatprep.subr.mxu1 %v8103_v48  ;;  %2296 = vmatprep.mubr.f32.mxu1 %v12446_v9  ;;  %v8541_v40 = vpop.permute.xlu1 %2730  ;;  %v2340_v48 = vsel %vm12470_vm12, %v8327_v34, %v8329_v23  ;;  %v2343_v34 = vsel %vm12473_vm3, %v8321_v3, %v8319_v36  ;;  %v2338_v53 = vsel %vm12474_vm0, %v8286_v4, %v8291_v6  ;;  %v6771_v36 = vld [vmem:[%s12444_s6 + $0x60] sm:$0xff]  ;;  %vm12475_vm10 = vmmov %vm12474_vm0  ;;  %vm12482_vm12 = vcmp.lt.s32.totalorder %v7601_v27, 113 }
 0x2a9   : > { %2511 = vmatpush1.msra.mxu1 %v8101_v30  ;;  %6754 = vmatmul.mubr.msk.f32.gmra.mxu0 %vm1968_vm8, %v1898_v45  ;;  %v6758_v30 = vld [vmem:[%s12444_s6 + $0x58] sm:$0xff]  ;;  %v6787_v3 = vld [vmem:[%s12444_s6 + $0x80] sm:$0xff]  ;;  %v2342_v63 = vsel %vm12475_vm10, %v8291_v6, %v8286_v4  ;;  %v6772_v4 = vld [vmem:[%s12444_s6 + $0x68] sm:$0xff]  ;;  %vm12486_vm3 = vnez %v12485_v12 }
 0x2aa   : > { %6769 = vmatmul.mubr.msk.f32.gmra.mxu1 %vm1968_vm8, %v6757_v61  ;;  %6775 = vmatprep.subr.msk.mxu0 %vm7732_vm11, %v2341_v44  ;;  %v8548_v18 = vpop.permute.xlu0 %2886  ;;  %v6788_v6 = vld [vmem:[%s12444_s6 + $0x88] sm:$0xff]  ;;  %vm12483_vm4 = vmmov %vm12482_vm12 }
 0x2ab   : > { %6776 = vmatpush1.msk.msra.mxu0 %vm12469_vm13, %v2345_v59  ;;  %2302 = vmatprep.mubr.f32.mxu1 %v12446_v9 }
 0x2ac   : > { %6777 = vmatprep.subr.msk.mxu0 %vm7732_vm11, %v2340_v48  ;;  %v8566_v51 = vpop.permute.xlu1 %2728  ;;  %2430 = vmatprep.mubr.f32.mxu0 %v12446_v9  ;;  %v6797_v48 = vld [vmem:[%s12444_s6 + $0xb0] sm:$0xff] }
 0x2ad   : > { %6778 = vmatpush1.msk.msra.mxu0 %vm12469_vm13, %v2344_v56 }
 0x2ae   : > { %6770 = vmatmul.mubr.msk.f32.gmra.mxu1 %vm1968_vm8, %v6758_v30  ;;  %6779 = vmatprep.subr.msk.mxu0 %vm7732_vm11, %v2339_v22  ;;  %v8582_v23 = vpop.permute.xlu0 %2884 }
 0x2af   : > { %6780 = vmatpush1.msk.msra.mxu0 %vm12469_vm13, %v2343_v34  ;;  %2544 = vmatprep.mubr.f32.mxu1 %v12446_v9 }
 0x2b0   : > { %6781 = vmatprep.subr.msk.mxu0 %vm7732_vm11, %v2338_v53  ;;  %v8603_v35 = vpop.permute.xlu1 %2880  ;;  %vm12477_vm11 = vmmov %vm12476_vm14  ;;  %v12509_v53 = vld [vmem:[#allocation49_spill] sm:$0xff] }
 0x2b1   : > { %6782 = vmatpush1.msk.msra.mxu0 %vm12469_vm13, %v2342_v63  ;;  %vm12480_vm5 = vmmov %vm12477_vm11  ;;  %v6814_v63 = vld [vmem:[%s12444_s6 + $0xd8] sm:$0xff] }
 0x2b2   : > { %6783 = vmatmul.mubr.msk.f32.vlgmr.msra.gmra.mxu0 %vm1968_vm8, %v6771_v36  ;;  %6791 = vmatmul.mubr.msk.f32.vlgmr.msra.gmra.mxu1 %vm1968_vm8, %v6787_v3  ;;  %v2597_v57 = vpop.permute.xlu0 %2596  ;;  %v2604_v32 = vsel %vm12480_vm5, %v8333_v7, %v8331_v11  ;;  %vm12481_vm13 = vmmov %vm12480_vm5 }
 0x2b3   : > { %v2601_v37 = vsel %vm12476_vm14, %v8423_v28, %v2597_v57  ;;  %2436 = vmatprep.mubr.f32.mxu0 %v12446_v9  ;;  %2550 = vmatprep.mubr.f32.mxu1 %v12446_v9  ;;  %v2605_v38 = vsel %vm12477_vm11, %v2597_v57, %v8423_v28  ;;  %v2600_v58 = vsel %vm12481_vm13, %v8331_v11, %v8333_v7  ;;  %vm12484_vm9 = vmmov %vm12480_vm5 }
 0x2b4   : > { %6799 = vmatprep.subr.msk.mxu0 %vm7767_vm6, %v2605_v38  ;;  %v8625_v49 = vpop.permute.xlu1 %2878  ;;  %v2603_v7 = vsel %vm12484_vm9, %v8349_v47, %v8341_v55  ;;  %vm12487_vm0 = vmmov %vm12480_vm5 }
 0x2b5   : > { %6800 = vmatpush1.msk.msra.mxu0 %vm7841_vm2, %v2601_v37  ;;  %v2599_v19 = vsel %vm12487_vm0, %v8341_v55, %v8349_v47  ;;  %vm12489_vm10 = vmmov %vm12487_vm0  ;;  %v6774_v47 = vld [vmem:[%s12444_s6 + $0x78] sm:$0xff] }
 0x2b6   : > { %6784 = vmatmul.mubr.msk.f32.gmra.mxu0 %vm1968_vm8, %v6772_v4  ;;  %6792 = vmatmul.mubr.msk.f32.gmra.mxu1 %vm1968_vm8, %v6788_v6  ;;  %v2743_v1 = vpop.permute.xlu0 %2742  ;;  %v2602_v20 = vsel %vm12489_vm10, %v8435_v62, %v8519_v17  ;;  %vm12490_vm14 = vmmov %vm12483_vm4 }
 0x2b7   : > { %6801 = vmatprep.subr.msk.mxu0 %vm7767_vm6, %v2604_v32  ;;  %2442 = vmatprep.mubr.f32.mxu0 %v12446_v9  ;;  %v2751_v28 = vsel %vm12482_vm12, %v2743_v1, %v8464_v46  ;;  %v2747_v11 = vsel %vm12483_vm4, %v8464_v46, %v2743_v1  ;;  %v2750_v55 = vsel %vm12490_vm14, %v8374_v25, %v8500_v14  ;;  %vm12491_vm11 = vmmov %vm12483_vm4  ;;  %v6843_v1 = vld [vmem:[%s12444_s6 + $0x100] sm:$0xff]  ;;  %v6828_v32 = vld [vmem:[%s12444_s6 + $0xe8] sm:$0xff] }
 0x2b8   : > { %2556 = vmatprep.mubr.f32.mxu1 %v12446_v9  ;;  %6802 = vmatpush1.msk.msra.mxu0 %vm7841_vm2, %v2600_v58  ;;  %v3027_v29 = vpop.permute.xlu1 %3026  ;;  %v2746_v46 = vsel %vm12491_vm11, %v8500_v14, %v8374_v25  ;;  %vm12493_vm5 = vmmov %vm12483_vm4  ;;  %v6844_v58 = vld [vmem:[%s12444_s6 + $0x108] sm:$0xff] }
 0x2b9   : > { %6803 = vmatprep.subr.msk.mxu0 %vm7767_vm6, %v2603_v7  ;;  %6815 = vmatprep.subr.msk.mxu1 %vm12486_vm3, %v2751_v28  ;;  %v2749_v25 = vsel %vm12493_vm5, %v8478_v50, %v8541_v40  ;;  %vm12494_vm13 = vmmov %vm12483_vm4  ;;  %vm12510_vm5 = vnez %v12509_v53  ;;  %v6830_v28 = vld [vmem:[%s12444_s6 + $0xf8] sm:$0xff] }
 0x2ba   : > { %6785 = vmatmul.mubr.msk.f32.gmra.mxu0 %vm1968_vm8, %v6773_v60  ;;  %6793 = vmatmul.mubr.msk.f32.gmra.mxu1 %vm1968_vm8, %v6789_v31  ;;  %v8671_v8 = vpop.permute.xlu0 %3032  ;;  %v6829_v60 = vld [vmem:[%s12444_s6 + $0xf0] sm:$0xff] }
 0x2bb   : > { %6804 = vmatpush1.msk.msra.mxu0 %vm7841_vm2, %v2599_v19  ;;  %6816 = vmatpush1.msk.msra.mxu1 %vm7886_vm1, %v2747_v11  ;;  %v6845_v31 = vld [vmem:[%s12444_s6 + $0x110] sm:$0xff]  ;;  %v6846_v11 = vld [vmem:[%s12444_s6 + $0x118] sm:$0xff] }
 0x2bc   : > { %6805 = vmatprep.subr.msk.mxu0 %vm7767_vm6, %v2602_v20  ;;  %6817 = vmatprep.subr.msk.mxu1 %vm12486_vm3, %v2750_v55  ;;  %v2877_v43 = vpop.permute.xlu1 %2876  ;;  %vm12492_vm6 = vmmov %vm12487_vm0 }
 0x2bd   : > { %v2598_v13 = vsel %vm12492_vm6, %v8519_v17, %v8435_v62  ;;  %2448 = vmatprep.mubr.f32.mxu0 %v12446_v9  ;;  %2562 = vmatprep.mubr.f32.mxu1 %v12446_v9  ;;  %v2745_v62 = vsel %vm12494_vm13, %v8541_v40, %v8478_v50  ;;  %v6811_v50 = vld [vmem:[%s12444_s6 + $0xc0] sm:$0xff] }
 0x2be   : > { %6806 = vmatpush1.msk.msra.mxu0 %vm7841_vm2, %v2598_v13  ;;  %6818 = vmatpush1.msk.msra.mxu1 %vm7886_vm1, %v2746_v46  ;;  %v2883_v41 = vpop.permute.xlu0 %2882  ;;  %vm12495_vm2 = vmmov %vm12483_vm4  ;;  %vm12497_vm4 = vcmp.lt.s32.totalorder %v7601_v27, 112 }
 0x2bf   : > { %6786 = vmatmul.mubr.msk.f32.gmra.mxu0 %vm1968_vm8, %v6774_v47  ;;  %6794 = vmatmul.mubr.msk.f32.gmra.mxu1 %vm1968_vm8, %v6790_v54  ;;  %v2748_v33 = vsel %vm12495_vm2, %v8507_v39, %v8566_v51  ;;  %vm12496_vm12 = vmmov %vm12495_vm2 }
 0x2c0   : > { %6819 = vmatprep.subr.msk.mxu1 %vm12486_vm3, %v2749_v25  ;;  %2690 = vmatprep.mubr.f32.mxu0 %v12446_v9  ;;  %v3025_v24 = vpop.permute.xlu1 %3024  ;;  %v2744_v5 = vsel %vm12496_vm12, %v8566_v51, %v8507_v39  ;;  %vm12498_vm9 = vmmov %vm12497_vm4  ;;  %v6796_v39 = vld [vmem:[%s12444_s6 + $0xa8] sm:$0xff]  ;;  %v12506_v51 = vld [vmem:[#allocation47_spill] sm:$0xff] }
 0x2c1   : > { %6820 = vmatpush1.msk.msra.mxu1 %vm7886_vm1, %v2745_v62  ;;  %2836 = vmatprep.mubr.f32.mxu1 %v12446_v9  ;;  %vm12507_vm11 = vnez %v12506_v51 }
 0x2c2   : > { %6821 = vmatprep.subr.msk.mxu1 %vm12486_vm3, %v2748_v33  ;;  %v2889_v14 = vpop.permute.xlu0 %2888  ;;  %vm12502_vm3 = vcmp.lt.s32.totalorder %v7601_v27, 111 }
 0x2c3   : > { %6822 = vmatpush1.msk.msra.mxu1 %vm7886_vm1, %v2744_v5  ;;  %6807 = vmatmul.mubr.msk.f32.vlgmr.msra.gmra.mxu0 %vm1968_vm8, %v6795_v10  ;;  %v2893_v2 = vsel %vm12497_vm4, %v8603_v35, %v2889_v14  ;;  %v2897_v15 = vsel %vm12498_vm9, %v2889_v14, %v8603_v35  ;;  %vm12501_vm1 = vmmov %vm12497_vm4 }
 0x2c4   : > { %6823 = vmatmul.mubr.msk.f32.vlgmr.msra.gmra.mxu1 %vm1968_vm8, %v6811_v50  ;;  %2696 = vmatprep.mubr.f32.mxu0 %v12446_v9  ;;  %v2875_v17 = vpop.permute.xlu1 %2874  ;;  %v2896_v59 = vsel %vm12501_vm1, %v8548_v18, %v8625_v49  ;;  %vm12503_vm0 = vmmov %vm12501_vm1 }
 0x2c5   : > { %2842 = vmatprep.mubr.f32.mxu1 %v12446_v9  ;;  %6831 = vmatprep.subr.msk.mxu0 %vm7857_vm7, %v2897_v15  ;;  %v2892_v52 = vsel %vm12503_vm0, %v8625_v49, %v8548_v18  ;;  %vm12504_vm10 = vmmov %vm12502_vm3  ;;  %v6813_v18 = vld [vmem:[%s12444_s6 + $0xd0] sm:$0xff] }
 0x2c6   : > { %6832 = vmatpush1.msk.msra.mxu0 %vm7926_vm15, %v2893_v2  ;;  %v3035_v44 = vpop.permute.xlu0 %3034  ;;  %vm12505_vm14 = vmmov %vm12503_vm0 }
 0x2c7   : > { %6808 = vmatmul.mubr.msk.f32.gmra.mxu0 %vm1968_vm8, %v6796_v39  ;;  %6833 = vmatprep.subr.msk.mxu0 %vm7857_vm7, %v2896_v59  ;;  %v3043_v40 = vsel %vm12502_vm3, %v3035_v44, %v3027_v29  ;;  %v3039_v0 = vsel %vm12504_vm10, %v3027_v29, %v3035_v44  ;;  %v2895_v30 = vsel %vm12505_vm14, %v8582_v23, %v2877_v43  ;;  %vm12508_vm6 = vmmov %vm12503_vm0 }
 0x2c8   : > { %6824 = vmatmul.mubr.msk.f32.gmra.mxu1 %vm1968_vm8, %v6812_v21  ;;  %2702 = vmatprep.mubr.f32.mxu0 %v12446_v9  ;;  %v3023_v56 = vpop.permute.xlu1 %3022  ;;  %v2891_v34 = vsel %vm12508_vm6, %v2877_v43, %v8582_v23  ;;  %vm12511_vm13 = vmmov %vm12503_vm0  ;;  %v6798_v23 = vld [vmem:[%s12444_s6 + $0xb8] sm:$0xff]  ;;  %s7264_s6 = smov 51  }
 0x2c9   : > { %2848 = vmatprep.mubr.f32.mxu1 %v12446_v9  ;;  %6834 = vmatpush1.msk.msra.mxu0 %vm7926_vm15, %v2892_v52  ;;  %v2894_v36 = vsel %vm12511_vm13, %v2883_v41, %v2875_v17  ;;  %vm12512_vm2 = vmmov %vm12502_vm3 }
 0x2ca   : > { %6835 = vmatprep.subr.msk.mxu0 %vm7857_vm7, %v2895_v30  ;;  %6847 = vmatprep.subr.msk.mxu1 %vm12507_vm11, %v3043_v40  ;;  %v3031_v22 = vpop.permute.xlu0 %3030  ;;  %v3042_v3 = vsel %vm12512_vm2, %v8671_v8, %v3025_v24  ;;  %vm12513_vm12 = vmmov %vm12512_vm2 }
 0x2cb   : > { %6809 = vmatmul.mubr.msk.f32.gmra.mxu0 %vm1968_vm8, %v6797_v48  ;;  %6848 = vmatpush1.msk.msra.mxu1 %vm12510_vm5, %v3039_v0  ;;  %v3038_v35 = vsel %vm12513_vm12, %v3025_v24, %v8671_v8  ;;  %vm12514_vm4 = vmmov %vm12503_vm0 }
 0x2cc   : > { %6825 = vmatmul.mubr.msk.f32.gmra.mxu1 %vm1968_vm8, %v6813_v18  ;;  %6836 = vmatpush1.msk.msra.mxu0 %vm7926_vm15, %v2891_v34  ;;  %v2890_v57 = vsel %vm12514_vm4, %v2875_v17, %v2883_v41  ;;  %vm12516_vm9 = vmmov %vm12512_vm2  ;;  %v3021_v38 = vpop.permute.xlu1 %3020 }
 0x2cd   : > { %6837 = vmatprep.subr.msk.mxu0 %vm7857_vm7, %v2894_v36  ;;  %6849 = vmatprep.subr.msk.mxu1 %vm12507_vm11, %v3042_v3  ;;  %vm12515_vm7 = vmmov %vm12512_vm2  ;;  %v3037_v6 = vsel %vm12516_vm9, %v3023_v56, %v3031_v22 }
 0x2ce   : > { %2708 = vmatprep.mubr.f32.mxu0 %v12446_v9  ;;  %2854 = vmatprep.mubr.f32.mxu1 %v12446_v9  ;;  %v3041_v37 = vsel %vm12515_vm7, %v3031_v22, %v3023_v56  ;;  %v3029_v4 = vpop.permute.xlu0 %3028  ;;  %vm12517_vm1 = vmmov %vm12512_vm2 }
 0x2cf   : > { %6838 = vmatpush1.msk.msra.mxu0 %vm7926_vm15, %v2890_v57  ;;  %6850 = vmatpush1.msk.msra.mxu1 %vm12510_vm5, %v3038_v35  ;;  %v3040_v42 = vsel %vm12517_vm1, %v3029_v4, %v3021_v38  ;;  %vm12518_vm3 = vmmov %vm12517_vm1  ;;  %vm3419_vm15 = vcmask 80896  }
 0x2d0   : > { %6810 = vmatmul.mubr.msk.f32.gmra.mxu0 %vm1968_vm8, %v6798_v23  ;;  %6826 = vmatmul.mubr.msk.f32.gmra.mxu1 %vm1968_vm8, %v6814_v63  ;;  %v3036_v49 = vsel %vm12518_vm3, %v3021_v38, %v3029_v4 }
 0x2d1   : > { %6851 = vmatprep.subr.msk.mxu1 %vm12507_vm11, %v3041_v37  ;;  %2982 = vmatprep.mubr.f32.mxu0 %v12446_v9 }
 0x2d2   : > { %6852 = vmatpush1.msk.msra.mxu1 %vm12510_vm5, %v3037_v6  ;;  %3128 = vmatprep.mubr.f32.mxu1 %v12446_v9 }
 0x2d3   : > { %6853 = vmatprep.subr.msk.mxu1 %vm12507_vm11, %v3040_v42 }
 0x2d4   : > { %6839 = vmatmul.mubr.msk.f32.vlgmr.msra.gmra.mxu0 %vm1968_vm8, %v6827_v26  ;;  %6854 = vmatpush1.msk.msra.mxu1 %vm12510_vm5, %v3036_v49 }
 0x2d5   : > { %6855 = vmatmul.mubr.msk.f32.vlgmr.msra.gmra.mxu1 %vm1968_vm8, %v6843_v1  ;;  %2988 = vmatprep.mubr.f32.mxu0 %v12446_v9 }
 0x2d6   : > { %3134 = vmatprep.mubr.f32.mxu1 %v12446_v9 }
 0x2d8   : > { %6840 = vmatmul.mubr.msk.f32.gmra.mxu0 %vm1968_vm8, %v6828_v32 }
 0x2d9   : > { %6856 = vmatmul.mubr.msk.f32.gmra.mxu1 %vm1968_vm8, %v6844_v58  ;;  %2994 = vmatprep.mubr.f32.mxu0 %v12446_v9  ;;  %v8903_v49 = vpop.permute.xlu1 %3178 }
 0x2da   : > { %3140 = vmatprep.mubr.f32.mxu1 %v12446_v9 }
 0x2dc   : > { %6841 = vmatmul.mubr.msk.f32.gmra.mxu0 %vm1968_vm8, %v6829_v60 }
 0x2dd   : > { %6857 = vmatmul.mubr.msk.f32.gmra.mxu1 %vm1968_vm8, %v6845_v31  ;;  %3000 = vmatprep.mubr.f32.mxu0 %v12446_v9 }
 0x2de   : > { %3146 = vmatprep.mubr.f32.mxu1 %v12446_v9 }
 0x2e0   : > { %6842 = vmatmul.mubr.msk.f32.gmra.mxu0 %vm1968_vm8, %v6830_v28 }
 0x2e1   : > { %6858 = vmatmul.mubr.msk.f32.gmra.mxu1 %vm1968_vm8, %v6846_v11 }
 0x350   : > { %v2047_v7 = vpop.f32.mrf.mxu1 }
 0x352   : > { %v2049_v29 = vpop.f32.mrf.mxu1 }
 0x354   : > { %v2053_v12 = vpop.f32.mrf.mxu1 }
 0x356   : > { %v2055_v19 = vpop.f32.mrf.mxu1 }
 0x358   : > { %v2059_v8 = vpop.f32.mrf.mxu1 }
 0x35a   : > { %v2061_v16 = vpop.f32.mrf.mxu1 }
 0x35d   : > { %v8889_v20 = vpop.f32.mrf.mxu1  ;;  %v2148_v55 = vpop.f32.mrf.mxu0 }
 0x35e   : > { %v2149_v60 = vadd.f32 %v2148_v55, %v2047_v7 }
 0x35f   : > { %v8891_v47 = vpop.f32.mrf.mxu1  ;;  %v2150_v9 = vpop.f32.mrf.mxu0 }
 0x360   : > { %v2151_v38 = vadd.f32 %v2150_v9, %v2049_v29 }
 0x361   : > { %v2154_v54 = vpop.f32.mrf.mxu0 }
 0x362   : > { %v2286_v43 = vpop.f32.mrf.mxu1  ;;  %v2155_v63 = vadd.f32 %v2154_v54, %v2053_v12 }
 0x363   : > { %v2156_v46 = vpop.f32.mrf.mxu0  ;;  %v2309_v12 = vadd.f32 %v2286_v43, %v2149_v60 }
 0x364   : > { %v2288_v13 = vpop.f32.mrf.mxu1  ;;  %v2157_v37 = vadd.f32 %v2156_v46, %v2055_v19 }
 0x365   : > { %v2160_v41 = vpop.f32.mrf.mxu0  ;;  %v2310_v31 = vadd.f32 %v2288_v13, %v2151_v38 }
 0x366   : > { %v2292_v25 = vpop.f32.mrf.mxu1  ;;  %v2161_v26 = vadd.f32 %v2160_v41, %v2059_v8 }
 0x367   : > { %v2162_v62 = vpop.f32.mrf.mxu0  ;;  %v2311_v4 = vadd.f32 %v2292_v25, %v2155_v63 }
 0x368   : > { %v2294_v10 = vpop.f32.mrf.mxu1  ;;  %v2163_v11 = vadd.f32 %v2162_v62, %v2061_v16 }
 0x369   : > { %v2166_v33 = vpop.f32.mrf.mxu0  ;;  %v2312_v1 = vadd.f32 %v2294_v10, %v2157_v37 }
 0x36a   : > { %v2298_v24 = vpop.f32.mrf.mxu1  ;;  %v2167_v46 = vadd.f32 %v2166_v33, %v8889_v20 }
 0x36b   : > { %v2168_v14 = vpop.f32.mrf.mxu0  ;;  %v2313_v27 = vadd.f32 %v2298_v24, %v2161_v26 }
 0x36c   : > { %v2300_v50 = vpop.f32.mrf.mxu1  ;;  %v2169_v8 = vadd.f32 %v2168_v14, %v8891_v47 }
 0x36d   : > { %v2314_v29 = vadd.f32 %v2300_v50, %v2163_v11  ;;  %v3174_v50 = vpop.permute.xlu0 %3173 }
 0x36e   : > { %v2304_v5 = vpop.f32.mrf.mxu1 }
 0x36f   : > { %v2315_v7 = vadd.f32 %v2304_v5, %v2167_v46 }
 0x370   : > { %v2306_v2 = vpop.f32.mrf.mxu1 }
 0x371   : > { %v2316_v43 = vadd.f32 %v2306_v2, %v2169_v8  ;;  %v3169_v26 = vpop.permute.xlu0 %3168 }
 0x372   : > { %v2432_v15 = vpop.f32.mrf.mxu0  ;;  %v8893_v39 = vpop.f32.mrf.mxu1 }
 0x373   : > { %v2455_v41 = vadd.f32 %v2432_v15, %v2309_v12 }
 0x374   : > { %v2434_v17 = vpop.f32.mrf.mxu0  ;;  %v2548_v21 = vpop.f32.mrf.mxu1 }
 0x375   : > { %v2456_v54 = vadd.f32 %v2434_v17, %v2310_v31 }
 0x376   : > { %v2438_v45 = vpop.f32.mrf.mxu0  ;;  %v2552_v61 = vpop.f32.mrf.mxu1 }
 0x377   : > { %v2457_v32 = vadd.f32 %v2438_v45, %v2311_v4  ;;  %v8907_v45 = vpop.permute.xlu1 %3206  ;;  %v2570_v24 = vadd.f32 %v2548_v21, %v2456_v54 }
 0x378   : > { %v2440_v44 = vpop.f32.mrf.mxu0  ;;  %v2554_v59 = vpop.f32.mrf.mxu1 }
 0x379   : > { %v2571_v9 = vadd.f32 %v2552_v61, %v2457_v32 }
 0x37a   : > { %v2444_v40 = vpop.f32.mrf.mxu0  ;;  %v2558_v52 = vpop.f32.mrf.mxu1 }
 0x37b   : > { %v2459_v25 = vadd.f32 %v2444_v40, %v2313_v27  ;;  %v2569_v27 = vadd.f32 %v8893_v39, %v2455_v41 }
 0x37c   : > { %v2446_v0 = vpop.f32.mrf.mxu0  ;;  %v2560_v48 = vpop.f32.mrf.mxu1 }
 0x37d   : > { %v2460_v16 = vadd.f32 %v2446_v0, %v2314_v29 }
 0x37f   : > { %v2450_v18 = vpop.f32.mrf.mxu0  ;;  %v8895_v30 = vpop.f32.mrf.mxu1  ;;  %v2574_v61 = vadd.f32 %v2560_v48, %v2460_v16 }
 0x380   : > { %v2461_v63 = vadd.f32 %v2450_v18, %v2315_v7 }
 0x381   : > { %v2452_v56 = vpop.f32.mrf.mxu0  ;;  %v8897_v51 = vpop.f32.mrf.mxu1 }
 0x382   : > { %v2462_v47 = vadd.f32 %v2452_v56, %v2316_v43  ;;  %v2575_v2 = vadd.f32 %v8895_v30, %v2461_v63  ;;  %v3164_v43 = vpop.permute.xlu0 %3163 }
 0x383   : > { %v2692_v22 = vpop.f32.mrf.mxu0 }
 0x384   : > { %v8899_v34 = vpop.f32.mrf.mxu1  ;;  %v2715_v0 = vadd.f32 %v2692_v22, %v2569_v27  ;;  %v2576_v37 = vadd.f32 %v8897_v51, %v2462_v47 }
 0x385   : > { %12519 = vst [vmem:[#allocation35_spill] sm:$0xff] %v8899_v34  ;;  %v2694_v53 = vpop.f32.mrf.mxu0  ;;  %v2458_v34 = vadd.f32 %v2440_v44, %v2312_v1  ;;  %v2573_v44 = vadd.f32 %v2558_v52, %v2459_v25 }
 0x386   : > { %v8901_v36 = vpop.f32.mrf.mxu1  ;;  %v2716_v14 = vadd.f32 %v2694_v53, %v2570_v24 }
 0x387   : > { %12520 = vst [vmem:[#allocation36_spill] sm:$0xff] %v8901_v36  ;;  %v2698_v3 = vpop.f32.mrf.mxu0  ;;  %v2572_v55 = vadd.f32 %v2554_v59, %v2458_v34 }
 0x388   : > { %v2844_v23 = vpop.f32.mrf.mxu1  ;;  %v2717_v13 = vadd.f32 %v2698_v3, %v2571_v9  ;;  %v3202_v3 = vpop.permute.xlu1 %3201 }
 0x389   : > { %v2700_v35 = vpop.f32.mrf.mxu0 }
 0x38a   : > { %v2846_v57 = vpop.f32.mrf.mxu1  ;;  %v2718_v20 = vadd.f32 %v2700_v35, %v2572_v55  ;;  %v2863_v40 = vadd.f32 %v2844_v23, %v2717_v13 }
 0x38b   : > { %v2704_v6 = vpop.f32.mrf.mxu0 }
 0x38c   : > { %v2850_v42 = vpop.f32.mrf.mxu1  ;;  %v2719_v5 = vadd.f32 %v2704_v6, %v2573_v44  ;;  %v2864_v21 = vadd.f32 %v2846_v57, %v2718_v20  ;;  %v12522_v22 = vld [vmem:[#allocation35_spill] sm:$0xff]  ;;  %v3197_v46 = vpop.permute.xlu1 %3196 }
 0x38d   : > { %v2706_v58 = vpop.f32.mrf.mxu0  ;;  %v2861_v1 = vadd.f32 %v12522_v22, %v2715_v0 }
 0x38e   : > { %v2852_v28 = vpop.f32.mrf.mxu1  ;;  %v2720_v52 = vadd.f32 %v2706_v58, %v2574_v61  ;;  %v12521_v4 = vld [vmem:[#allocation36_spill] sm:$0xff]  ;;  %v2865_v53 = vadd.f32 %v2850_v42, %v2719_v5 }
 0x38f   : > { %v2862_v39 = vadd.f32 %v12521_v4, %v2716_v14 }
 0x390   : > { %v2710_v36 = vpop.f32.mrf.mxu0  ;;  %v2856_v19 = vpop.f32.mrf.mxu1  ;;  %v2866_v30 = vadd.f32 %v2852_v28, %v2720_v52 }
 0x391   : > { %v2721_v38 = vadd.f32 %v2710_v36, %v2575_v2 }
 0x392   : > { %v2712_v10 = vpop.f32.mrf.mxu0  ;;  %v2858_v62 = vpop.f32.mrf.mxu1 }
 0x393   : > { %v2722_v32 = vadd.f32 %v2712_v10, %v2576_v37  ;;  %v2867_v29 = vadd.f32 %v2856_v19, %v2721_v38 }
 0x394   : > { %v2984_v17 = vpop.f32.mrf.mxu0 }
 0x395   : > { %v3130_v33 = vpop.f32.mrf.mxu1  ;;  %v3007_v12 = vadd.f32 %v2984_v17, %v2861_v1  ;;  %v2868_v25 = vadd.f32 %v2858_v62, %v2722_v32 }
 0x396   : > { %v2986_v15 = vpop.f32.mrf.mxu0 }
 0x397   : > { %v3132_v59 = vpop.f32.mrf.mxu1  ;;  %v3008_v57 = vadd.f32 %v2986_v15, %v2862_v39  ;;  %v3153_v24 = vadd.f32 %v3130_v33, %v3007_v12 }
 0x398   : > { %v2990_v34 = vpop.f32.mrf.mxu0 }
 0x399   : > { %v3009_v18 = vadd.f32 %v2990_v34, %v2863_v40  ;;  %v3136_v35 = vpop.f32.mrf.mxu1  ;;  %v3154_v55 = vadd.f32 %v3132_v59, %v3008_v57  ;;  %v3181_v59 = vmul.f32 %v3164_v43, %v3153_v24 }
 0x39a   : > { %v2992_v56 = vpop.f32.mrf.mxu0 }
 0x39b   : > { %v3010_v48 = vadd.f32 %v2992_v56, %v2864_v21  ;;  %v3155_v23 = vadd.f32 %v3136_v35, %v3009_v18  ;;  %v3138_v6 = vpop.f32.mrf.mxu1  ;;  %v3182_v15 = vmul.f32 %v3164_v43, %v3154_v55  ;;  %v3192_v21 = vpop.permute.xlu0 %3191 }
 0x39c   : > { %v2996_v60 = vpop.f32.mrf.mxu0  ;;  %v3209_v35 = vadd.f32 %v3192_v21, %v3181_v59 }
 0x39d   : > { %v3183_v58 = vmul.f32 %v3169_v26, %v3155_v23  ;;  %v3011_v31 = vadd.f32 %v2996_v60, %v2865_v53  ;;  %v3142_v11 = vpop.f32.mrf.mxu1  ;;  %v3156_v51 = vadd.f32 %v3138_v6, %v3010_v48  ;;  %v3210_v52 = vadd.f32 %v3192_v21, %v3182_v15  ;;  %v580_v6 = vld [vmem:[%s12523_s9] sm:$0xff]  ;;  %v591_v15 = vld [vmem:[%s12526_s12 + $0x18] sm:$0xff] }
 0x39e   : > { %v2998_v54 = vpop.f32.mrf.mxu0  ;;  %v8940_v53 = vmax.f32 %v3209_v35, 0.0  ;;  %6998 = vmatprep.mubr.msk.f32.mxu0 %vm1968_vm8, %v580_v6  ;;  %7009 = vmatprep.mubr.msk.f32.mxu1 %vm1968_vm8, %v580_v6 }
 0x39f   : > { %v3012_v42 = vadd.f32 %v2998_v54, %v2866_v30  ;;  %v3157_v36 = vadd.f32 %v3142_v11, %v3011_v31  ;;  %v3144_v9 = vpop.f32.mrf.mxu1  ;;  %v3211_v8 = vadd.f32 %v3197_v46, %v3183_v58  ;;  %v3184_v41 = vmul.f32 %v3169_v26, %v3156_v51  ;;  %v581_v51 = vld [vmem:[%s12523_s9 + $0x8] sm:$0x3]  ;;  %s9514_s9 = sld [smem:[#allocation2 + $0xc]] }
 0x3a0   : > { %v3002_v7 = vpop.f32.mrf.mxu0  ;;  %v8934_v39 = vmax.f32 %v3210_v52, 0.0 }
 0x3a1   : > { %v3185_v10 = vmul.f32 %v3174_v50, %v3157_v36  ;;  %v3013_v16 = vadd.f32 %v3002_v7, %v2867_v29  ;;  %v3158_v28 = vadd.f32 %v3144_v9, %v3012_v42  ;;  %v3148_v13 = vpop.f32.mrf.mxu1  ;;  %v3212_v44 = vadd.f32 %v3197_v46, %v3184_v41  ;;  %v584_v46 = vld [vmem:[%s12524_s11] sm:$0xff]  ;;  %v583_v29 = vld [vmem:[%s12525_s10 + $0x8] sm:$0x3] }
 0x3a2   : > { %v3004_v17 = vpop.f32.mrf.mxu0  ;;  %v8914_v14 = vmax.f32 %v3211_v8, 0.0  ;;  %v3225_v38 = vadd.f32 %v8934_v39, %v8940_v53  ;;  %v3241_v23 = vmax.f32 %v8940_v53, %v8934_v39  ;;  %v582_v36 = vld [vmem:[%s12525_s10] sm:$0xff]  ;;  %s9516_s10 = sld [smem:[#allocation2 + $0xd]] }
 0x3a3   : > { %v3213_v63 = vadd.f32 %v3202_v3, %v3185_v10  ;;  %v3186_v20 = vmul.f32 %v3174_v50, %v3158_v28  ;;  %v3014_v27 = vadd.f32 %v3004_v17, %v2868_v25  ;;  %v3159_v19 = vadd.f32 %v3148_v13, %v3013_v16  ;;  %v3150_v47 = vpop.f32.mrf.mxu1  ;;  %v585_v17 = vld [vmem:[%s12524_s11 + $0x8] sm:$0xff] }
 0x3a4   : > { %v8916_v62 = vmax.f32 %v3212_v44, 0.0 }
 0x3a5   : > { %v3214_v61 = vadd.f32 %v3202_v3, %v3186_v20  ;;  %v3187_v40 = vmul.f32 %v8903_v49, %v3159_v19  ;;  %v3160_v5 = vadd.f32 %v3150_v47, %v3014_v27  ;;  %v8921_v0 = vmax.f32 %v3213_v63, 0.0  ;;  %v586_v63 = vld [vmem:[%s12524_s11 + $0x10] sm:$0xff]  ;;  %v587_v20 = vld [vmem:[%s12524_s11 + $0x18] sm:$0xff]  ;;  %v589_v27 = vld [vmem:[%s12526_s12 + $0x8] sm:$0xff]  ;;  %12586 = sst [smem:[#allocation83_spill]] %s9514_s9 }
 0x3a6   : > { %v3228_v33 = vadd.f32 %v8916_v62, %v8914_v14  ;;  %v3244_v48 = vmax.f32 %v8914_v14, %v8916_v62  ;;  %v588_v19 = vld [vmem:[%s12526_s12] sm:$0xff]  ;;  %v3416_v47 = vmul.f32 2.0, %v589_v27  ;;  %s9522_s11 = sld [smem:[#allocation2 + $0xe]] }
 0x3a7   : > { %v8923_v34 = vmax.f32 %v3214_v61, 0.0  ;;  %v3215_v50 = vadd.f32 %v8907_v45, %v3187_v40  ;;  %v3188_v2 = vmul.f32 %v8903_v49, %v3160_v5  ;;  %v3415_v61 = vmul.f32 2.0, %v588_v19  ;;  %v590_v5 = vld [vmem:[%s12526_s12 + $0x10] sm:$0xff]  ;;  %s9527_s12 = sld [smem:[#allocation2 + $0xf]] }
 0x3a8   : > { %3229 = vadd.xlane.f32.xlu1 %v3228_v33  ;;  %v3418_v33 = vmul.f32 2.0, %v591_v15  ;;  %v3417_v52 = vmul.f32 2.0, %v590_v5  ;;  %12587 = sst [smem:[#allocation84_spill]] %s9516_s10 }
 0x3a9   : > { %v3216_v3 = vadd.f32 %v8907_v45, %v3188_v2  ;;  %v3231_v18 = vadd.f32 %v8923_v34, %v8921_v0  ;;  %v8930_v37 = vmax.f32 %v3215_v50, 0.0  ;;  %v3247_v56 = vmax.f32 %v8921_v0, %v8923_v34  ;;  %s9668_s10 = sld [smem:[#allocation2 + $0x1d]] }
 0x3aa   : > { %s9678_s9 = sld [smem:[#allocation2 + $0x1e]] }
 0x3ab   : > { %v8932_v4 = vmax.f32 %v3216_v3, 0.0  ;;  %3232 = vadd.xlane.f32.xlu0 %v3231_v18 }
 0x3ad   : > { %v3234_v49 = vadd.f32 %v8932_v4, %v8930_v37  ;;  %v3250_v45 = vmax.f32 %v8930_v37, %v8932_v4 }
 0x3af   : > { %3248 = vmax.xlane.f32.xlu0 %v3247_v56  ;;  %3235 = vadd.xlane.f32.xlu1 %v3234_v49  ;;  %12606 = sst [smem:[#allocation97_spill]] %s9668_s10  ;;  %s12628_s10 = smov 114  }
 0x3b0   : > { %12607 = sst [smem:[#allocation98_spill]] %s9678_s9 }
 0x3b1   : > { %s9836_s9 = sld [smem:[#allocation2 + $0x25]] }
 0x3b3   : > { %3251 = vmax.xlane.f32.xlu0 %v3250_v45  ;;  %3226 = vadd.xlane.f32.xlu1 %v3225_v38 }
 0x3b7   : > { %3245 = vmax.xlane.f32.xlu0 %v3244_v48  ;;  %3242 = vmax.xlane.f32.xlu1 %v3241_v23 }
 0x431   : > { %v3230_v26 = vpop.xlane.xlu1 %3229 }
 0x432   : > { %v3238_v31 = vmul.f32 0.00390625, %v3230_v26 }
 0x434   : > { %v3233_v22 = vpop.xlane.xlu0 %3232 }
 0x435   : > { %v3239_v30 = vmul.f32 0.00390625, %v3233_v22 }
 0x438   : > { %v3249_v1 = vpop.xlane.xlu0 %3248  ;;  %v3236_v32 = vpop.xlane.xlu1 %3235 }
 0x439   : > { %v3240_v60 = vmul.f32 0.00390625, %v3236_v32 }
 0x43b   : > { %6990 = vmatprep.subr.mxu0 %v3240_v60 }
 0x43c   : > { %v3252_v57 = vpop.xlane.xlu0 %3251  ;;  %6991 = vmatpush3.msra.mxu0 %v3240_v60  ;;  %v3227_v58 = vpop.xlane.xlu1 %3226 }
 0x43d   : > { %6992 = vmatprep.subr.mxu0 %v3239_v30  ;;  %7001 = vmatprep.subr.mxu1 %v3252_v57  ;;  %v3237_v11 = vmul.f32 0.00390625, %v3227_v58 }
 0x43e   : > { %6993 = vmatpush3.msra.mxu0 %v3239_v30  ;;  %7002 = vmatpush3.msra.mxu1 %v3252_v57 }
 0x43f   : > { %6994 = vmatprep.subr.mxu0 %v3238_v31  ;;  %7003 = vmatprep.subr.mxu1 %v3249_v1 }
 0x440   : > { %7004 = vmatpush3.msra.mxu1 %v3249_v1  ;;  %v3246_v12 = vpop.xlane.xlu0 %3245  ;;  %6995 = vmatpush3.msra.mxu0 %v3238_v31  ;;  %v3243_v54 = vpop.xlane.xlu1 %3242 }
 0x441   : > { %6996 = vmatprep.subr.mxu0 %v3237_v11  ;;  %7005 = vmatprep.subr.mxu1 %v3246_v12 }
 0x442   : > { %6997 = vmatpush3.msra.mxu0 %v3237_v11  ;;  %7006 = vmatpush3.msra.mxu1 %v3246_v12 }
 0x443   : > { %7007 = vmatprep.subr.mxu1 %v3243_v54  ;;  %6999 = vmatmul.mubr.msk.f32.vlgmr.msra.gmra.mxu0 %vm1968_vm8, %v581_v51 }
 0x444   : > { %7008 = vmatpush3.msra.mxu1 %v3243_v54  ;;  %7016 = vmatprep.mubr.msk.f32.mxu0 %vm3419_vm15, %v584_v46 }
 0x445   : > { %7010 = vmatmul.mubr.msk.f32.vlgmr.msra.gmra.mxu1 %vm1968_vm8, %v581_v51  ;;  %vm3432_vm8 = vcmask 1041408  }
 0x503   : > { %v7000_v42 = vpop.f32.mrf.mxu0 }
 0x504   : > { %v3331_v9 = vadd.f32 %v7000_v42, %v583_v29 }
 0x505   : > { %v7011_v25 = vpop.f32.mrf.mxu1  ;;  %v3325_v8 = vpop.f32.mrf.mxu0 }
 0x506   : > { %v3335_v41 = vmax.f32 %v3331_v9, 0.0  ;;  %v3408_v7 = vadd.f32 %v7011_v25, %v583_v29  ;;  %v3326_v55 = vadd.f32 %v3325_v8, %v582_v36 }
 0x507   : > { %v3402_v10 = vpop.f32.mrf.mxu1 }
 0x508   : > { %v3412_v16 = vmax.f32 %v3408_v7, 0.0  ;;  %v3403_v28 = vadd.f32 %v3402_v10, %v582_v36  ;;  %v3334_v43 = vmax.f32 %v3326_v55, 0.0 }
 0x50a   : > { %v3414_v13 = vadd.f32 %v3412_v16, %v3335_v41  ;;  %v3411_v24 = vmax.f32 %v3403_v28, 0.0 }
 0x50c   : > { %v3413_v44 = vadd.f32 %v3411_v24, %v3334_v43  ;;  %7012 = vmatprep.subr.msk.mxu0 %vm3432_vm8, %v3414_v13 }
 0x50d   : > { %7013 = vmatpush3.msk.msra.mxu0 %vm3432_vm8, %v3414_v13 }
 0x50e   : > { %7014 = vmatprep.subr.mxu0 %v3413_v44 }
 0x50f   : > { %7015 = vmatpush3.msra.mxu0 %v3413_v44 }
 0x510   : > { %7017 = vmatmul.mubr.msk.f32.vlgmr.msra.gmra.mxu0 %vm3419_vm15, %v585_v17 }
 0x511   : > { %7019 = vmatprep.mubr.msk.f32.mxu0 %vm3419_vm15, %v586_v63 }
 0x514   : > { %7020 = vmatmul.mubr.msk.f32.gmra.mxu0 %vm3419_vm15, %v587_v20 }
 0x5d0   : > { %v7018_v40 = vpop.f32.mrf.mxu0 }
 0x5d1   : > { %v3508_v59 = vadd.f32 %v7018_v40, %v3416_v47 }
 0x5d2   : > { %v3502_v50 = vpop.f32.mrf.mxu0 }
 0x5d3   : > { %v3522_v2 = vmul.f32 0.5, %v3508_v59  ;;  %v3503_v21 = vadd.f32 %v3502_v50, %v3415_v61 }
 0x5d4   : > { %v7021_v3 = vpop.f32.mrf.mxu0 }
 0x5d5   : > { %7139 = vtanh.f32 %v3522_v2  ;;  %v3521_v18 = vmul.f32 0.5, %v3503_v21  ;;  %v3518_v35 = vadd.f32 %v7021_v3, %v3418_v33 }
 0x5d6   : > { %v3512_v56 = vpop.f32.mrf.mxu0 }
 0x5d7   : > { %7141 = vtanh.f32 %v3521_v18  ;;  %v3524_v49 = vmul.f32 0.5, %v3518_v35  ;;  %v3513_v45 = vadd.f32 %v3512_v56, %v3417_v52 }
 0x5d9   : > { %7143 = vtanh.f32 %v3524_v49  ;;  %v3523_v38 = vmul.f32 0.5, %v3513_v45 }
 0x5db   : > { %7145 = vtanh.f32 %v3523_v38 }
 0x5e2   : > { %v7140_v48 = vpop.eup %7139 }
 0x5e3   : > { %v3530_v23 = vmul.f32 0.5, %v7140_v48 }
 0x5e4   : > { %v7142_v6 = vpop.eup %7141 }
 0x5e5   : > { %v3534_v26 = vadd.f32 0.5, %v3530_v23  ;;  %v3529_v22 = vmul.f32 0.5, %v7142_v6 }
 0x5e6   : > { %v7144_v1 = vpop.eup %7143 }
 0x5e7   : > { %v3533_v32 = vadd.f32 0.5, %v3529_v22  ;;  %v3532_v60 = vmul.f32 0.5, %v7144_v1  ;;  %3544 = vperm.xlu1 %7137, %v3534_v26  }
 0x5e8   : > { %v7146_v30 = vpop.eup %7145 }
 0x5e9   : > { %v3531_v57 = vmul.f32 0.5, %v7146_v30  ;;  %3539 = vperm.xlu0 %7136, %v3533_v32   ;;  %v3536_v58 = vadd.f32 0.5, %v3532_v60 }
 0x5eb   : > { %v3535_v31 = vadd.f32 0.5, %v3531_v57 }
 0x5ed   : > { %3549 = vperm.xlu1 %7137, %v3535_v31   ;;  %3554 = vperm.xlu0 %7136, %v3536_v58  }
 0x662   : > { %v3545_v11 = vpop.permute.xlu1 %3544 }
 0x664   : > { %v3540_v12 = vpop.permute.xlu0 %3539 }
 0x665   : > { %v8995_v51 = vmul.f32 %v3540_v12, %v8940_v53  ;;  %v8998_v54 = vmul.f32 %v3540_v12, %v8934_v39  ;;  %v9013_v53 = vmul.f32 %v3545_v11, %v8914_v14  ;;  %v9016_v39 = vmul.f32 %v3545_v11, %v8916_v62 }
 0x667   : > { %12527 = vst [vmem:[#allocation39_spill] sm:$0xff] %v8995_v51  ;;  %12528 = vst [vmem:[#allocation38_spill] sm:$0xff] %v8998_v54  ;;  %v3583_v48 = vadd.f32 %v9013_v53, %v8995_v51  ;;  %v3592_v23 = vadd.f32 %v9016_v39, %v8998_v54 }
 0x668   : > { %v3550_v46 = vpop.permute.xlu1 %3549  ;;  %v3555_v29 = vpop.permute.xlu0 %3554  ;;  %12533 = vst [vmem:[#allocation45_spill] sm:$0xff] %v9013_v53  ;;  %12534 = vst [vmem:[#allocation48_spill] sm:$0xff] %v9016_v39 }
 0x669   : > { %v9001_v42 = vmul.f32 %v3550_v46, %v8921_v0  ;;  %v9004_v36 = vmul.f32 %v3550_v46, %v8923_v34  ;;  %v9007_v9 = vmul.f32 %v3555_v29, %v8930_v37  ;;  %v9010_v25 = vmul.f32 %v3555_v29, %v8932_v4 }
 0x66b   : > { %12529 = vst [vmem:[#allocation40_spill] sm:$0xff] %v9001_v42  ;;  %12530 = vst [vmem:[#allocation44_spill] sm:$0xff] %v9004_v36  ;;  %v3565_v8 = vmax.f32 %v8995_v51, %v9001_v42  ;;  %v3574_v0 = vmax.f32 %v8998_v54, %v9004_v36  ;;  %v3566_v34 = vmax.f32 %v9013_v53, %v9007_v9 }
 0x66c   : > { %12531 = vst [vmem:[#allocation42_spill] sm:$0xff] %v9007_v9  ;;  %12532 = vst [vmem:[#allocation46_spill] sm:$0xff] %v9010_v25  ;;  %v3575_v37 = vmax.f32 %v9016_v39, %v9010_v25  ;;  %v3584_v6 = vadd.f32 %v3583_v48, %v9001_v42  ;;  %v3593_v26 = vadd.f32 %v3592_v23, %v9004_v36 }
 0x66d   : > { %v3567_v4 = vmax.f32 %v3565_v8, %v3566_v34 }
 0x66e   : > { %v3576_v41 = vmax.f32 %v3574_v0, %v3575_v37  ;;  %v3585_v32 = vadd.f32 %v3584_v6, %v9007_v9  ;;  %v3594_v60 = vadd.f32 %v3593_v26, %v9010_v25 }
 0x66f   : > { %v3568_v7 = vrot.slane %v3567_v4, 4 }
 0x670   : > { %v3577_v14 = vrot.slane %v3576_v41, 4  ;;  %v3586_v58 = vrot.slane %v3585_v32, 4  ;;  %v3595_v31 = vrot.slane %v3594_v60, 4 }
 0x671   : > { %v3569_v55 = vmax.f32 %v3567_v4, %v3568_v7 }
 0x672   : > { %v3578_v10 = vmax.f32 %v3576_v41, %v3577_v14  ;;  %v3587_v46 = vadd.f32 %v3586_v58, %v3585_v32  ;;  %v3596_v29 = vadd.f32 %v3595_v31, %v3594_v60 }
 0x673   : > { %v3570_v62 = vrot.slane %v3569_v55, 2 }
 0x674   : > { %v3579_v16 = vrot.slane %v3578_v10, 2  ;;  %v3588_v34 = vrot.slane %v3587_v46, 2  ;;  %v3597_v37 = vrot.slane %v3596_v29, 2 }
 0x675   : > { %v3571_v28 = vmax.f32 %v3569_v55, %v3570_v62 }
 0x676   : > { %v3580_v13 = vmax.f32 %v3578_v10, %v3579_v16  ;;  %v3589_v7 = vadd.f32 %v3588_v34, %v3587_v46  ;;  %v3598_v14 = vadd.f32 %v3597_v37, %v3596_v29 }
 0x677   : > { %v3572_v43 = vrot.slane %v3571_v28, 1 }
 0x678   : > { %v3581_v24 = vrot.slane %v3580_v13, 1  ;;  %v3590_v62 = vrot.slane %v3589_v7, 1  ;;  %v3599_v16 = vrot.slane %v3598_v14, 1 }
 0x679   : > { %v9026_v44 = vmax.f32 %v3571_v28, %v3572_v43 }
 0x67a   : > { %v9028_v17 = vmax.f32 %v3580_v13, %v3581_v24  ;;  %v3591_v43 = vadd.f32 %v3590_v62, %v3589_v7  ;;  %v3600_v24 = vadd.f32 %v3599_v16, %v3598_v14 }
 0x67b   : > { %3604 = vrot.lane.b32.xlu1 %v9026_v44, %s7264_s6 }
 0x67c   : > { %3606 = vrot.lane.b32.xlu0 %v9028_v17, %s7264_s6  ;;  %v9306_v6 = vmul.f32 0.03125, %v3591_v43  ;;  %v9308_v26 = vmul.f32 0.03125, %v3600_v24 }
 0x67f   : > { %3664 = vrot.lane.b32.xlu1 %v9026_v44, %s7265_s14 }
 0x680   : > { %3666 = vrot.lane.b32.xlu0 %v9028_v17, %s7265_s14 }
 0x683   : > { %3724 = vrot.lane.b32.xlu1 %v9026_v44, %s7266_s29 }
 0x684   : > { %3726 = vrot.lane.b32.xlu0 %v9028_v17, %s7266_s29 }
 0x687   : > { %3784 = vrot.lane.b32.xlu1 %v9026_v44, %s7267_s23 }
 0x688   : > { %3786 = vrot.lane.b32.xlu0 %v9028_v17, %s7267_s23 }
 0x68b   : > { %3844 = vrot.lane.b32.xlu1 %v9026_v44, %s7268_s3 }
 0x68c   : > { %3846 = vrot.lane.b32.xlu0 %v9028_v17, %s7268_s3 }
 0x68f   : > { %3904 = vrot.lane.b32.xlu1 %v9026_v44, %s12042_s4 }
 0x690   : > { %3906 = vrot.lane.b32.xlu0 %v9028_v17, %s12042_s4  ;;  %s12050_s4 = smov 33  }
 0x693   : > { %3964 = vrot.lane.b32.xlu1 %v9026_v44, %s12044_s5 }
 0x694   : > { %3966 = vrot.lane.b32.xlu0 %v9028_v17, %s12044_s5  ;;  %s12052_s5 = smov 32  }
 0x697   : > { %4024 = vrot.lane.b32.xlu1 %v9026_v44, %s12046_s13 }
 0x698   : > { %4026 = vrot.lane.b32.xlu0 %v9028_v17, %s12046_s13  ;;  %s12054_s13 = smov 31  }
 0x69b   : > { %4084 = vrot.lane.b32.xlu1 %v9026_v44, %s12048_s20 }
 0x69c   : > { %4086 = vrot.lane.b32.xlu0 %v9028_v17, %s12048_s20  ;;  %s12062_s20 = smov 30  }
 0x69f   : > { %4144 = vrot.lane.b32.xlu1 %v9026_v44, %s12050_s4 }
 0x6a0   : > { %4146 = vrot.lane.b32.xlu0 %v9028_v17, %s12050_s4  ;;  %s12060_s4 = smov 29  }
 0x6a3   : > { %4204 = vrot.lane.b32.xlu1 %v9026_v44, %s12052_s5 }
 0x6a4   : > { %4206 = vrot.lane.b32.xlu0 %v9028_v17, %s12052_s5  ;;  %s12056_s5 = smov 19  }
 0x6a7   : > { %4264 = vrot.lane.b32.xlu1 %v9026_v44, %s12054_s13 }
 0x6a8   : > { %4266 = vrot.lane.b32.xlu0 %v9028_v17, %s12054_s13  ;;  %s12058_s13 = smov 18  }
 0x6ab   : > { %4324 = vrot.lane.b32.xlu1 %v9026_v44, %s12062_s20 }
 0x6ac   : > { %4326 = vrot.lane.b32.xlu0 %v9028_v17, %s12062_s20  ;;  %s12066_s20 = smov 2  }
 0x6af   : > { %4384 = vrot.lane.b32.xlu1 %v9026_v44, %s12060_s4 }
 0x6b0   : > { %4386 = vrot.lane.b32.xlu0 %v9028_v17, %s12060_s4  ;;  %s12064_s4 = smov 3  }
 0x6b3   : > { %4444 = vrot.lane.b32.xlu1 %v9026_v44, %s12056_s5 }
 0x6b4   : > { %4446 = vrot.lane.b32.xlu0 %v9028_v17, %s12056_s5  ;;  %s12070_s5 = smov 14  }
 0x6b7   : > { %4504 = vrot.lane.b32.xlu1 %v9026_v44, %s12058_s13 }
 0x6b8   : > { %4506 = vrot.lane.b32.xlu0 %v9028_v17, %s12058_s13  ;;  %s12068_s13 = smov 13  }
 0x6bb   : > { %4564 = vrot.lane.b32.xlu1 %v9026_v44, %s12429_s24 }
 0x6bc   : > { %4566 = vrot.lane.b32.xlu0 %v9028_v17, %s12429_s24 }
 0x6bf   : > { %4622 = vrot.lane.b32.xlu1 %v9026_v44, %s12428_s25 }
 0x6c0   : > { %4624 = vrot.lane.b32.xlu0 %v9028_v17, %s12428_s25 }
 0x6c3   : > { %4680 = vrot.lane.b32.xlu1 %v9026_v44, %s12430_s16 }
 0x6c4   : > { %4682 = vrot.lane.b32.xlu0 %v9028_v17, %s12430_s16 }
 0x6c7   : > { %4738 = vrot.lane.b32.xlu1 %v9026_v44, %s12070_s5 }
 0x6c8   : > { %4740 = vrot.lane.b32.xlu0 %v9028_v17, %s12070_s5  ;;  %s12072_s5 = smov 114  }
 0x6cb   : > { %4798 = vrot.lane.b32.xlu1 %v9026_v44, %s12068_s13 }
 0x6cc   : > { %4800 = vrot.lane.b32.xlu0 %v9028_v17, %s12068_s13  ;;  %s12074_s13 = smov 115  }
 0x6cf   : > { %4858 = vrot.lane.b32.xlu1 %v9026_v44, %s12064_s4 }
 0x6d0   : > { %4860 = vrot.lane.b32.xlu0 %v9028_v17, %s12064_s4  ;;  %s12142_s4 = smov 126  }
 0x6d3   : > { %4918 = vrot.lane.b32.xlu1 %v9026_v44, %s12066_s20 }
 0x6d4   : > { %4920 = vrot.lane.b32.xlu0 %v9028_v17, %s12066_s20  ;;  %s12076_s20 = smov 125  }
 0x6d7   : > { %4978 = vrot.lane.b32.xlu1 %v9026_v44, %s12431_s17 }
 0x6d8   : > { %4980 = vrot.lane.b32.xlu0 %v9028_v17, %s12431_s17 }
 0x6db   : > { %5065 = vrot.lane.b32.xlu1 %v9026_v44, %s12432_s26 }
 0x6dc   : > { %5067 = vrot.lane.b32.xlu0 %v9028_v17, %s12432_s26 }
 0x6df   : > { %5123 = vrot.lane.b32.xlu1 %v9026_v44, %s12142_s4 }
 0x6e0   : > { %5125 = vrot.lane.b32.xlu0 %v9028_v17, %s12142_s4  ;;  %s9488_s4 = sld [smem:[#allocation2 + $0x7]] }
 0x6e3   : > { %5183 = vrot.lane.b32.xlu1 %v9026_v44, %s12076_s20 }
 0x6e4   : > { %5185 = vrot.lane.b32.xlu0 %v9028_v17, %s12076_s20  ;;  %s12082_s20 = smov 99  }
 0x6e7   : > { %5243 = vrot.lane.b32.xlu1 %v9026_v44, %s12074_s13 }
 0x6e8   : > { %5245 = vrot.lane.b32.xlu0 %v9028_v17, %s12074_s13  ;;  %s12080_s13 = smov 109  }
 0x6eb   : > { %5303 = vrot.lane.b32.xlu1 %v9026_v44, %s12072_s5 }
 0x6ec   : > { %5305 = vrot.lane.b32.xlu0 %v9028_v17, %s12072_s5  ;;  %s12078_s5 = smov 110  }
 0x6ed   : > { %v9148_v20 = vpop.permute.xlu1 %3604 }
 0x6ee   : > { %v9146_v63 = vpop.permute.xlu0 %3606 }
 0x6ef   : > { %5363 = vrot.lane.b32.xlu1 %v9026_v44, %s12433_s0 }
 0x6f0   : > { %5365 = vrot.lane.b32.xlu0 %v9028_v17, %s12433_s0 }
 0x6f1   : > { %v9156_v19 = vpop.permute.xlu1 %3664 }
 0x6f2   : > { %v9154_v27 = vpop.permute.xlu0 %3666 }
 0x6f3   : > { %5421 = vrot.lane.b32.xlu1 %v9026_v44, %s12434_s27 }
 0x6f4   : > { %5423 = vrot.lane.b32.xlu0 %v9028_v17, %s12434_s27 }
 0x6f5   : > { %v9164_v15 = vpop.permute.xlu1 %3724 }
 0x6f6   : > { %v9162_v47 = vpop.permute.xlu0 %3726 }
 0x6f7   : > { %5479 = vrot.lane.b32.xlu1 %v9026_v44, %s12435_s30 }
 0x6f8   : > { %5481 = vrot.lane.b32.xlu0 %v9028_v17, %s12435_s30 }
 0x6f9   : > { %v9172_v40 = vpop.permute.xlu1 %3784 }
 0x6fa   : > { %v9170_v61 = vpop.permute.xlu0 %3786 }
 0x6fb   : > { %5537 = vrot.lane.b32.xlu1 %v9026_v44, %s12078_s5 }
 0x6fc   : > { %5539 = vrot.lane.b32.xlu0 %v9028_v17, %s12078_s5  ;;  %s12084_s5 = smov 98  }
 0x6fd   : > { %v9180_v59 = vpop.permute.xlu1 %3844 }
 0x6fe   : > { %v9178_v5 = vpop.permute.xlu0 %3846 }
 0x6ff   : > { %5597 = vrot.lane.b32.xlu1 %v9026_v44, %s12080_s13 }
 0x700   : > { %5599 = vrot.lane.b32.xlu0 %v9028_v17, %s12080_s13  ;;  %s12137_s13 = smov 97  }
 0x701   : > { %v9188_v50 = vpop.permute.xlu1 %3904 }
 0x702   : > { %v9186_v33 = vpop.permute.xlu0 %3906 }
 0x703   : > { %5657 = vrot.lane.b32.xlu1 %v9026_v44, %s12082_s20 }
 0x704   : > { %5659 = vrot.lane.b32.xlu0 %v9028_v17, %s12082_s20  ;;  %s12086_s20 = smov 96  }
 0x705   : > { %v9196_v21 = vpop.permute.xlu1 %3964 }
 0x706   : > { %v9194_v2 = vpop.permute.xlu0 %3966 }
 0x707   : > { %5717 = vrot.lane.b32.xlu1 %v9026_v44, %s12084_s5 }
 0x708   : > { %5719 = vrot.lane.b32.xlu0 %v9028_v17, %s12084_s5  ;;  %s12088_s5 = smov 95  }
 0x709   : > { %v9204_v3 = vpop.permute.xlu1 %4024 }
 0x70a   : > { %v9202_v52 = vpop.permute.xlu0 %4026 }
 0x70b   : > { %5777 = vrot.lane.b32.xlu1 %v9026_v44, %s12137_s13 }
 0x70c   : > { %5779 = vrot.lane.b32.xlu0 %v9028_v17, %s12137_s13  ;;  %s9486_s13 = sld [smem:[#allocation2 + $0x6]] }
 0x70d   : > { %v9212_v35 = vpop.permute.xlu1 %4084 }
 0x70e   : > { %v9210_v18 = vpop.permute.xlu0 %4086 }
 0x70f   : > { %5837 = vrot.lane.b32.xlu1 %v9026_v44, %s12086_s20 }
 0x710   : > { %5839 = vrot.lane.b32.xlu0 %v9028_v17, %s12086_s20  ;;  %s12090_s20 = smov 94  }
 0x711   : > { %v9220_v49 = vpop.permute.xlu1 %4144 }
 0x712   : > { %v9218_v56 = vpop.permute.xlu0 %4146 }
 0x713   : > { %5897 = vrot.lane.b32.xlu1 %v9026_v44, %s12088_s5 }
 0x714   : > { %5899 = vrot.lane.b32.xlu0 %v9028_v17, %s12088_s5  ;;  %s12092_s5 = smov 93  }
 0x715   : > { %v9228_v38 = vpop.permute.xlu1 %4204 }
 0x716   : > { %v9226_v45 = vpop.permute.xlu0 %4206 }
 0x717   : > { %5957 = vrot.lane.b32.xlu1 %v9026_v44, %s12090_s20 }
 0x718   : > { %5959 = vrot.lane.b32.xlu0 %v9028_v17, %s12090_s20  ;;  %s12094_s20 = smov 83  }
 0x719   : > { %v9242_v1 = vpop.permute.xlu1 %4264 }
 0x71a   : > { %v9240_v22 = vpop.permute.xlu0 %4266 }
 0x71b   : > { %6017 = vrot.lane.b32.xlu1 %v9026_v44, %s12092_s5 }
 0x71c   : > { %6019 = vrot.lane.b32.xlu0 %v9028_v17, %s12092_s5  ;;  %s12096_s5 = smov 82  }
 0x71d   : > { %v9252_v57 = vpop.permute.xlu1 %4324 }
 0x71e   : > { %v9250_v30 = vpop.permute.xlu0 %4326 }
 0x71f   : > { %6077 = vrot.lane.b32.xlu1 %v9026_v44, %s12094_s20 }
 0x720   : > { %6079 = vrot.lane.b32.xlu0 %v9028_v17, %s12094_s20  ;;  %s12098_s20 = smov 81  }
 0x721   : > { %v9260_v12 = vpop.permute.xlu1 %4384 }
 0x722   : > { %v9258_v11 = vpop.permute.xlu0 %4386 }
 0x723   : > { %6137 = vrot.lane.b32.xlu1 %v9026_v44, %s12096_s5 }
 0x724   : > { %6139 = vrot.lane.b32.xlu0 %v9028_v17, %s12096_s5  ;;  %s12100_s5 = smov 80  }
 0x725   : > { %v9268_v0 = vpop.permute.xlu1 %4444 }
 0x726   : > { %v9266_v8 = vpop.permute.xlu0 %4446 }
 0x727   : > { %6197 = vrot.lane.b32.xlu1 %v9026_v44, %s12098_s20 }
 0x728   : > { %6199 = vrot.lane.b32.xlu0 %v9028_v17, %s12098_s20  ;;  %s12102_s20 = smov 79  }
 0x729   : > { %v9276_v41 = vpop.permute.xlu1 %4504 }
 0x72a   : > { %v9274_v4 = vpop.permute.xlu0 %4506 }
 0x72b   : > { %6257 = vrot.lane.b32.xlu1 %v9026_v44, %s12100_s5 }
 0x72c   : > { %6259 = vrot.lane.b32.xlu0 %v9028_v17, %s12100_s5  ;;  %s12132_s5 = smov 78  }
 0x72d   : > { %v9284_v10 = vpop.permute.xlu1 %4564 }
 0x72e   : > { %v9282_v55 = vpop.permute.xlu0 %4566 }
 0x72f   : > { %6317 = vrot.lane.b32.xlu1 %v9026_v44, %s12102_s20 }
 0x730   : > { %6319 = vrot.lane.b32.xlu0 %v9028_v17, %s12102_s20  ;;  %s12130_s20 = smov 77  }
 0x731   : > { %v9292_v13 = vpop.permute.xlu1 %4622 }
 0x732   : > { %v9290_v28 = vpop.permute.xlu0 %4624 }
 0x733   : > { %6377 = vrot.lane.b32.xlu1 %v9026_v44, %s12132_s5 }
 0x734   : > { %6379 = vrot.lane.b32.xlu0 %v9028_v17, %s12132_s5  ;;  %s9478_s5 = sld [smem:[#allocation2 + $0x4]] }
 0x735   : > { %v9300_v23 = vpop.permute.xlu1 %4680 }
 0x736   : > { %v9298_v48 = vpop.permute.xlu0 %4682 }
 0x737   : > { %6437 = vrot.lane.b32.xlu1 %v9026_v44, %s12130_s20 }
 0x738   : > { %6439 = vrot.lane.b32.xlu0 %v9028_v17, %s12130_s20  ;;  %s12578_s20 = smov 14  }
 0x739   : > { %v9312_v60 = vpop.permute.xlu1 %4738 }
 0x73a   : > { %v9310_v32 = vpop.permute.xlu0 %4740 }
 0x73b   : > { %3634 = vrot.lane.b32.xlu1 %v9306_v6, %s7264_s6 }
 0x73c   : > { %3636 = vrot.lane.b32.xlu0 %v9308_v26, %s7264_s6  ;;  %s12539_s6 = smov 46  }
 0x73d   : > { %v9320_v31 = vpop.permute.xlu1 %4798 }
 0x73e   : > { %v9318_v58 = vpop.permute.xlu0 %4800 }
 0x73f   : > { %3694 = vrot.lane.b32.xlu1 %v9306_v6, %s7265_s14 }
 0x740   : > { %3696 = vrot.lane.b32.xlu0 %v9308_v26, %s7265_s14  ;;  %s12542_s14 = smov 45  }
 0x741   : > { %v9328_v29 = vpop.permute.xlu1 %4858 }
 0x742   : > { %v9326_v46 = vpop.permute.xlu0 %4860 }
 0x743   : > { %3754 = vrot.lane.b32.xlu1 %v9306_v6, %s7266_s29 }
 0x744   : > { %3756 = vrot.lane.b32.xlu0 %v9308_v26, %s7266_s29  ;;  %s12545_s29 = smov 35  }
 0x745   : > { %v9336_v37 = vpop.permute.xlu1 %4918 }
 0x746   : > { %v9334_v34 = vpop.permute.xlu0 %4920 }
 0x747   : > { %3814 = vrot.lane.b32.xlu1 %v9306_v6, %s7267_s23 }
 0x748   : > { %3816 = vrot.lane.b32.xlu0 %v9308_v26, %s7267_s23  ;;  %s12548_s23 = smov 34  }
 0x749   : > { %v9344_v14 = vpop.permute.xlu1 %4978 }
 0x74a   : > { %v9342_v7 = vpop.permute.xlu0 %4980  ;;  %12536 = vst [vmem:[#allocation49_spill] sm:$0xff] %v9344_v14 }
 0x74b   : > { %12535 = vst [vmem:[#allocation47_spill] sm:$0xff] %v9342_v7  ;;  %3874 = vrot.lane.b32.xlu1 %v9306_v6, %s7268_s3 }
 0x74c   : > { %3876 = vrot.lane.b32.xlu0 %v9308_v26, %s7268_s3  ;;  %s12551_s3 = smov 33  }
 0x74d   : > { %v9352_v16 = vpop.permute.xlu1 %5065 }
 0x74e   : > { %v9350_v62 = vpop.permute.xlu0 %5067  ;;  %12538 = vst [vmem:[#allocation35_spill] sm:$0xff] %v9352_v16 }
 0x74f   : > { %12537 = vst [vmem:[#allocation36_spill] sm:$0xff] %v9350_v62  ;;  %3934 = vrot.lane.b32.xlu1 %v9306_v6, %s12539_s6 }
 0x750   : > { %3936 = vrot.lane.b32.xlu0 %v9308_v26, %s12539_s6  ;;  %s12554_s6 = smov 32  }
 0x751   : > { %v9360_v24 = vpop.permute.xlu1 %5123 }
 0x752   : > { %v9358_v43 = vpop.permute.xlu0 %5125  ;;  %12541 = vst [vmem:[#allocation51_spill] sm:$0xff] %v9360_v24 }
 0x753   : > { %12540 = vst [vmem:[#allocation50_spill] sm:$0xff] %v9358_v43  ;;  %3994 = vrot.lane.b32.xlu1 %v9306_v6, %s12542_s14 }
 0x754   : > { %3996 = vrot.lane.b32.xlu0 %v9308_v26, %s12542_s14  ;;  %s12557_s14 = smov 31  }
 0x755   : > { %v9368_v9 = vpop.permute.xlu1 %5183 }
 0x756   : > { %v9366_v25 = vpop.permute.xlu0 %5185  ;;  %12544 = vst [vmem:[#allocation53_spill] sm:$0xff] %v9368_v9 }
 0x757   : > { %12543 = vst [vmem:[#allocation52_spill] sm:$0xff] %v9366_v25  ;;  %4054 = vrot.lane.b32.xlu1 %v9306_v6, %s12545_s29 }
 0x758   : > { %4056 = vrot.lane.b32.xlu0 %v9308_v26, %s12545_s29  ;;  %s12560_s29 = smov 30  }
 0x759   : > { %v9376_v42 = vpop.permute.xlu1 %5243 }
 0x75a   : > { %v9374_v36 = vpop.permute.xlu0 %5245  ;;  %12547 = vst [vmem:[#allocation55_spill] sm:$0xff] %v9376_v42 }
 0x75b   : > { %12546 = vst [vmem:[#allocation54_spill] sm:$0xff] %v9374_v36  ;;  %4114 = vrot.lane.b32.xlu1 %v9306_v6, %s12548_s23 }
 0x75c   : > { %4116 = vrot.lane.b32.xlu0 %v9308_v26, %s12548_s23  ;;  %s12563_s23 = smov 29  }
 0x75d   : > { %v9384_v53 = vpop.permute.xlu1 %5303 }
 0x75e   : > { %v9382_v39 = vpop.permute.xlu0 %5305  ;;  %12550 = vst [vmem:[#allocation57_spill] sm:$0xff] %v9384_v53 }
 0x75f   : > { %12549 = vst [vmem:[#allocation56_spill] sm:$0xff] %v9382_v39  ;;  %4174 = vrot.lane.b32.xlu1 %v9306_v6, %s12551_s3 }
 0x760   : > { %4176 = vrot.lane.b32.xlu0 %v9308_v26, %s12551_s3  ;;  %s12566_s3 = smov 19  }
 0x761   : > { %v9392_v51 = vpop.permute.xlu1 %5363 }
 0x762   : > { %v9390_v54 = vpop.permute.xlu0 %5365  ;;  %12553 = vst [vmem:[#allocation59_spill] sm:$0xff] %v9392_v51 }
 0x763   : > { %12552 = vst [vmem:[#allocation58_spill] sm:$0xff] %v9390_v54  ;;  %4234 = vrot.lane.b32.xlu1 %v9306_v6, %s12554_s6 }
 0x764   : > { %4236 = vrot.lane.b32.xlu0 %v9308_v26, %s12554_s6  ;;  %s12569_s6 = smov 18  }
 0x765   : > { %v9400_v39 = vpop.permute.xlu1 %5421 }
 0x766   : > { %v9398_v42 = vpop.permute.xlu0 %5423  ;;  %12556 = vst [vmem:[#allocation61_spill] sm:$0xff] %v9400_v39 }
 0x767   : > { %12555 = vst [vmem:[#allocation60_spill] sm:$0xff] %v9398_v42  ;;  %4294 = vrot.lane.b32.xlu1 %v9306_v6, %s12557_s14 }
 0x768   : > { %4296 = vrot.lane.b32.xlu0 %v9308_v26, %s12557_s14  ;;  %s6916_s14 = sld [smem:[#allocation2 + $0x49]] }
 0x769   : > { %v9408_v54 = vpop.permute.xlu1 %5479 }
 0x76a   : > { %v9406_v53 = vpop.permute.xlu0 %5481  ;;  %12559 = vst [vmem:[#allocation63_spill] sm:$0xff] %v9408_v54 }
 0x76b   : > { %12558 = vst [vmem:[#allocation62_spill] sm:$0xff] %v9406_v53  ;;  %4354 = vrot.lane.b32.xlu1 %v9306_v6, %s12560_s29 }
 0x76c   : > { %4356 = vrot.lane.b32.xlu0 %v9308_v26, %s12560_s29  ;;  %s6915_s29 = sld [smem:[#allocation2 + $0x18]] }
 0x76d   : > { %v9416_v42 = vpop.permute.xlu1 %5537 }
 0x76e   : > { %v9414_v51 = vpop.permute.xlu0 %5539  ;;  %12562 = vst [vmem:[#allocation65_spill] sm:$0xff] %v9416_v42 }
 0x76f   : > { %12561 = vst [vmem:[#allocation64_spill] sm:$0xff] %v9414_v51  ;;  %4414 = vrot.lane.b32.xlu1 %v9306_v6, %s12563_s23 }
 0x770   : > { %4416 = vrot.lane.b32.xlu0 %v9308_v26, %s12563_s23  ;;  %s9464_s23 = sld [smem:[#allocation2 + $0x1]] }
 0x771   : > { %v9424_v53 = vpop.permute.xlu1 %5597 }
 0x772   : > { %v9422_v39 = vpop.permute.xlu0 %5599  ;;  %12565 = vst [vmem:[#allocation67_spill] sm:$0xff] %v9424_v53 }
 0x773   : > { %12564 = vst [vmem:[#allocation66_spill] sm:$0xff] %v9422_v39  ;;  %4474 = vrot.lane.b32.xlu1 %v9306_v6, %s12566_s3 }
 0x774   : > { %4476 = vrot.lane.b32.xlu0 %v9308_v26, %s12566_s3  ;;  %s9470_s3 = sld [smem:[#allocation2 + $0x2]] }
 0x775   : > { %v9432_v51 = vpop.permute.xlu1 %5657 }
 0x776   : > { %v9430_v54 = vpop.permute.xlu0 %5659  ;;  %12568 = vst [vmem:[#allocation69_spill] sm:$0xff] %v9432_v51  ;;  %v7304_v51 = vmov 1966171168  }
 0x777   : > { %12567 = vst [vmem:[#allocation68_spill] sm:$0xff] %v9430_v54  ;;  %4534 = vrot.lane.b32.xlu1 %v9306_v6, %s12569_s6  ;;  %v3616_v36 = vunpack.c.l.s4 %v7304_v51 }
 0x778   : > { %4536 = vrot.lane.b32.xlu0 %v9308_v26, %s12569_s6  ;;  %s9472_s6 = sld [smem:[#allocation2 + $0x3]] }
 0x779   : > { %v9440_v39 = vpop.permute.xlu1 %5717 }
 0x77a   : > { %v9438_v42 = vpop.permute.xlu0 %5719  ;;  %12571 = vst [vmem:[#allocation71_spill] sm:$0xff] %v9440_v39 }
 0x77b   : > { %12570 = vst [vmem:[#allocation70_spill] sm:$0xff] %v9438_v42  ;;  %4592 = vrot.lane.b32.xlu1 %v9306_v6, %s12429_s24 }
 0x77c   : > { %4594 = vrot.lane.b32.xlu0 %v9308_v26, %s12429_s24  ;;  %s9462_s24 = sld [smem:[#allocation2]] }
 0x77d   : > { %v9448_v54 = vpop.permute.xlu1 %5777 }
 0x77e   : > { %v9446_v53 = vpop.permute.xlu0 %5779  ;;  %12573 = vst [vmem:[#allocation73_spill] sm:$0xff] %v9448_v54 }
 0x77f   : > { %12572 = vst [vmem:[#allocation72_spill] sm:$0xff] %v9446_v53  ;;  %4650 = vrot.lane.b32.xlu1 %v9306_v6, %s12428_s25 }
 0x780   : > { %4652 = vrot.lane.b32.xlu0 %v9308_v26, %s12428_s25  ;;  %s9539_s25 = sld [smem:[#allocation2 + $0x12]] }
 0x781   : > { %v9456_v39 = vpop.permute.xlu1 %5837 }
 0x782   : > { %v9454_v42 = vpop.permute.xlu0 %5839  ;;  %12575 = vst [vmem:[#allocation75_spill] sm:$0xff] %v9456_v39  ;;  %v5040_v39 = vstv %s6916_s14  ;;  %s9496_s14 = sld [smem:[#allocation2 + $0x8]] }
 0x783   : > { %12574 = vst [vmem:[#allocation74_spill] sm:$0xff] %v9454_v42  ;;  %4708 = vrot.lane.b32.xlu1 %v9306_v6, %s12430_s16  ;;  %v5041_v9 = vmul.f32 %v5040_v39, %v9306_v6  ;;  %v5042_v25 = vmul.f32 %v5040_v39, %v9308_v26  ;;  %v3617_v39 = vunpack.c.0.s8 %v3616_v36  ;;  %v12590_v36 = vld [vmem:[#allocation23_spill] sm:$0xff] }
 0x784   : > { %4710 = vrot.lane.b32.xlu0 %v9308_v26, %s12430_s16  ;;  %s9480_s16 = sld [smem:[#allocation2 + $0x5]] }
 0x785   : > { %v9468_v53 = vpop.permute.xlu1 %5897 }
 0x786   : > { %v9466_v54 = vpop.permute.xlu0 %5899  ;;  %12577 = vst [vmem:[#allocation77_spill] sm:$0xff] %v9468_v53  ;;  %v5036_v53 = vstv %s6915_s29  ;;  %s9506_s29 = sld [smem:[#allocation2 + $0xa]] }
 0x787   : > { %12576 = vst [vmem:[#allocation76_spill] sm:$0xff] %v9466_v54  ;;  %4768 = vrot.lane.b32.xlu1 %v9306_v6, %s12578_s20  ;;  %v5037_v51 = vmul.f32 %v5036_v53, %v9026_v44  ;;  %12593 = sst [smem:[#allocation87_spill]] %s9539_s25  ;;  %s12616_s25 = smov 125  }
 0x788   : > { %4770 = vrot.lane.b32.xlu0 %v9308_v26, %s12578_s20  ;;  %s12581_s20 = smov 13  }
 0x789   : > { %v9484_v54 = vpop.permute.xlu1 %5957  ;;  %v5043_v16 = vadd.f32 %v5041_v9, %v5037_v51  ;;  %v12592_v9 = vld [vmem:[#allocation30_spill] sm:$0xff]  ;;  %v9556_v51 = vld [vmem:[%s12276_s2] sm:$0x3]  ;;  %s9619_s2 = sld [smem:[#allocation2 + $0x19]] }
 0x78a   : > { %v9482_v42 = vpop.permute.xlu0 %5959  ;;  %12580 = vst [vmem:[#allocation79_spill] sm:$0xff] %v9484_v54  ;;  %v5038_v54 = vmul.f32 %v5036_v53, %v9028_v17  ;;  %v9525_v17 = vsub.s32 %v3617_v39, %v12590_v36  ;;  %vm3608_vm0 = vcmp.lt.s32.totalorder %v12592_v9, 51  ;;  %vm12183_vm10 = vcmp.lt.s32.totalorder %v12592_v9, 50 }
 0x78b   : > { %12579 = vst [vmem:[#allocation78_spill] sm:$0xff] %v9482_v42  ;;  %4828 = vrot.lane.b32.xlu1 %v9306_v6, %s12581_s20  ;;  %vm12181_vm6 = vcmp.lt.s32.totalorder %v12592_v9, 49  ;;  %vm543_vm5 = vcmp.ge.s32.totalorder %v9556_v51, 3  ;;  %vm544_vm13 = vcmp.le.s32.totalorder %v9556_v51, 18  ;;  %vm12175_vm2 = vcmp.lt.s32.totalorder %v12592_v9, 48 }
 0x78c   : > { %4830 = vrot.lane.b32.xlu0 %v9308_v26, %s12581_s20  ;;  %v5044_v43 = vadd.f32 %v5042_v25, %v5038_v54  ;;  %s12585_s20 = smov 3   ;;  %vm546_vm12 = vcmp.ge.s32.totalorder %v9556_v51, 2  ;;  %vm547_vm4 = vcmp.le.s32.totalorder %v9556_v51, 17  ;;  %v3610_v39 = vsel %vm3608_vm0, %v9146_v63, %v9148_v20 }
 0x78d   : > { %v9504_v24 = vpop.permute.xlu1 %6017  ;;  %vm12174_vm7 = vcmp.lt.s32.totalorder %v12592_v9, 47  ;;  %vm12179_vm9 = vcmp.lt.s32.totalorder %v12592_v9, 46  ;;  %vm12178_vm1 = vcmp.lt.s32.totalorder %v12592_v9, 45  ;;  %vm12182_vm3 = vcmp.lt.s32.totalorder %v12592_v9, 35 }
 0x78e   : > { %v9502_v42 = vpop.permute.xlu0 %6019  ;;  %12583 = vst [vmem:[#allocation81_spill] sm:$0xff] %v9504_v24  ;;  %v5047_v54 = vcombine.low %v5043_v16, %v5044_v43  ;;  %v9548_v43 = vld [vmem:[%s12275_s1] sm:$0x3]  ;;  %vm558_vm15 = vcmp.ge.s32.totalorder %v9556_v51, 4294967294  ;;  %vm559_vm8 = vcmp.le.s32.totalorder %v9556_v51, 13  ;;  %s9652_s1 = sld [smem:[#allocation2 + $0x1c]] }
 0x78f   : > { %12582 = vst [vmem:[#allocation80_spill] sm:$0xff] %v9502_v42  ;;  %4888 = vrot.lane.b32.xlu1 %v9306_v6, %s12585_s20  ;;  %vm522_vm14 = vcmp.ge.s32.totalorder %v9548_v43, 3  ;;  %vm523_vm11 = vcmp.le.s32.totalorder %v9548_v43, 18  ;;  %v12619_v42 = vld [vmem:[#allocation22_spill] sm:$0xff] }
 0x790   : > { %4890 = vrot.lane.b32.xlu0 %v9308_v26, %s12585_s20  ;;  %s9535_s20 = sld [smem:[#allocation2 + $0x11]]  ;;  %v9564_v36 = vrot.slane %v5047_v54, %v9525_v17  ;;  %v3609_v54 = vsel %vm3608_vm0, %v9148_v20, %v9146_v63  ;;  %v3729_v63 = vsel %vm12181_vm6, %v9164_v15, %v9162_v47  ;;  %v3730_v20 = vsel %vm12181_vm6, %v9162_v47, %v9164_v15 }
 0x791   : > { %v9520_v44 = vpop.permute.xlu1 %6077  ;;  %vm12620_vm6 = vnez %v12619_v42 }
 0x792   : > { %v9518_v53 = vpop.permute.xlu0 %6079  ;;  %12589 = vst [vmem:[#allocation86_spill] sm:$0xff] %v9520_v44  ;;  %12597 = vst [vmem:[#allocation89_spill] sm:$0xff] %v9564_v36  ;;  %v3670_v44 = vsel %vm12183_vm10, %v9154_v27, %v9156_v19 }
 0x793   : > { %12588 = vst [vmem:[#allocation85_spill] sm:$0xff] %v9518_v53  ;;  %4948 = vrot.lane.b32.xlu1 %v9306_v6, %s12591_s21 }
 0x794   : > { %4950 = vrot.lane.b32.xlu0 %v9308_v26, %s12591_s21  ;;  %s9611_s21 = sld [smem:[#allocation2 + $0x17]] }
 0x795   : > { %v9543_v16 = vpop.permute.xlu1 %6137 }
 0x796   : > { %v9541_v25 = vpop.permute.xlu0 %6139  ;;  %12595 = vst [vmem:[#allocation30_spill] sm:$0xff] %v9543_v16  ;;  %v3669_v16 = vsel %vm12183_vm10, %v9156_v19, %v9154_v27  ;;  %v3614_v19 = vcombine.low %v3610_v39, %v3609_v54  ;;  %v3734_v27 = vcombine.low %v3730_v20, %v3729_v63  ;;  %v3849_v63 = vsel %vm12174_vm7, %v9180_v59, %v9178_v5 }
 0x797   : > { %12594 = vst [vmem:[#allocation23_spill] sm:$0xff] %v9541_v25  ;;  %5006 = vrot.lane.b32.xlu1 %v9306_v6, %s12431_s17  ;;  %v3674_v24 = vcombine.low %v3670_v44, %v3669_v16  ;;  %v3789_v44 = vsel %vm12175_vm2, %v9172_v40, %v9170_v61  ;;  %v3790_v16 = vsel %vm12175_vm2, %v9170_v61, %v9172_v40  ;;  %vm9698_vm2 = vmand %vm543_vm5, %vm544_vm13  ;;  %vm525_vm13 = vcmp.ge.s32.totalorder %v9548_v43, 2 }
 0x798   : > { %5008 = vrot.lane.b32.xlu0 %v9308_v26, %s12431_s17  ;;  %s9608_s17 = sld [smem:[#allocation2 + $0x16]]  ;;  %v3850_v61 = vsel %vm12174_vm7, %v9178_v5, %v9180_v59  ;;  %v3621_v54 = vrot.slane %v3614_v19, %v9525_v17  ;;  %v9675_v7 = vrot.slane %v3734_v27, %v9525_v17  ;;  %vm9684_vm7 = vmand %vm522_vm14, %vm523_vm11  ;;  %v3794_v20 = vcombine.low %v3790_v16, %v3789_v44 }
 0x799   : > { %v9606_v53 = vpop.permute.xlu1 %6197  ;;  %v9672_v39 = vrot.slane %v3674_v24, %v9525_v17  ;;  %v3854_v62 = vcombine.low %v3850_v61, %v3849_v63  ;;  %v3909_v44 = vsel %vm12179_vm9, %v9188_v50, %v9186_v33  ;;  %v3910_v16 = vsel %vm12179_vm9, %v9186_v33, %v9188_v50  ;;  %vm9719_vm5 = vmand %vm546_vm12, %vm547_vm4 }
 0x79a   : > { %v9604_v25 = vpop.permute.xlu0 %6199  ;;  %12600 = vst [vmem:[#allocation92_spill] sm:$0xff] %v9606_v53  ;;  %12602 = sst [smem:[#allocation94_spill]] %s9611_s21  ;;  %vm561_vm14 = vcmp.ge.s32.totalorder %v9556_v51, 4294967293  ;;  %vm562_vm11 = vcmp.le.s32.totalorder %v9556_v51, 12  ;;  %v3969_v33 = vsel %vm12178_vm1, %v9196_v21, %v9194_v2  ;;  %v3970_v50 = vsel %vm12178_vm1, %v9194_v2, %v9196_v21  ;;  %vm12186_vm1 = vmand %vm9684_vm7, %vm9698_vm2 }
 0x79b   : > { %12599 = vst [vmem:[#allocation91_spill] sm:$0xff] %v9604_v25  ;;  %5093 = vrot.lane.b32.xlu1 %v9306_v6, %s12432_s26  ;;  %vm526_vm12 = vcmp.le.s32.totalorder %v9548_v43, 17  ;;  %v3628_v40 = vrot.slane %v3621_v54, %v9525_v17  ;;  %v3688_v19 = vrot.slane %v9672_v39, %v9525_v17  ;;  %v3748_v2 = vrot.slane %v9675_v7, %v9525_v17  ;;  %vm12191_vm9 = vmand %vm9684_vm7, %vm9719_vm5  ;;  %s9772_s21 = sld [smem:[#allocation2 + $0x22]] }
 0x79c   : > { %5095 = vrot.lane.b32.xlu0 %v9308_v26, %s12432_s26  ;;  %s9638_s26 = sld [smem:[#allocation2 + $0x1b]]  ;;  %v3801_v54 = vrot.slane %v3794_v20, %v9525_v17  ;;  %v3914_v5 = vcombine.low %v3910_v16, %v3909_v44  ;;  %v4029_v7 = vsel %vm12182_vm3, %v9204_v3, %v9202_v52  ;;  %v4030_v39 = vsel %vm12182_vm3, %v9202_v52, %v9204_v3  ;;  %vm12188_vm3 = vmand %vm9684_vm7, %vm12620_vm6 }
 0x79d   : > { %v9632_v25 = vpop.permute.xlu1 %6257  ;;  %v3861_v20 = vrot.slane %v3854_v62, %v9525_v17  ;;  %v3974_v44 = vcombine.low %v3970_v50, %v3969_v33  ;;  %vm12190_vm4 = vcmp.lt.s32.totalorder %v12592_v9, 77  ;;  %v4034_v33 = vcombine.low %v4030_v39, %v4029_v7  ;;  %v12626_v50 = vld [vmem:[#allocation21_spill] sm:$0xff]  ;;  %vm9872_vm10 = vmand %vm561_vm14, %vm562_vm11 }
 0x79e   : > { %12601 = sst [smem:[#allocation93_spill]] %s9608_s17  ;;  %v9630_v53 = vpop.permute.xlu0 %6259  ;;  %12604 = vst [vmem:[#allocation96_spill] sm:$0xff] %v9632_v25  ;;  %s12621_s17 = smov 115   ;;  %v3630_v52 = vsel %vm12186_vm1, %v3628_v40, 0.0  ;;  %v3808_v36 = vrot.slane %v3801_v54, %v9525_v17  ;;  %v3921_v15 = vrot.slane %v3914_v5, %v9525_v17  ;;  %v3690_v7 = vsel %vm12191_vm9, %v3688_v19, 0.0  ;;  %vm9814_vm1 = vmand %vm558_vm15, %vm559_vm8 }
 0x79f   : > { %12603 = vst [vmem:[#allocation95_spill] sm:$0xff] %v9630_v53  ;;  %5153 = vrot.lane.b32.xlu1 %v9306_v6, %s12605_s8  ;;  %v3750_v40 = vsel %vm12188_vm3, %v3748_v2, 0.0  ;;  %v3868_v19 = vrot.slane %v3861_v20, %v9525_v17  ;;  %v9822_v54 = vrot.slane %v3974_v44, %v9525_v17  ;;  %vm12627_vm15 = vnez %v12626_v50  ;;  %vm3911_vm3 = vmand %vm9684_vm7, %vm9814_vm1 }
 0x7a0   : > { %5155 = vrot.lane.b32.xlu0 %v9308_v26, %s12605_s8  ;;  %s9711_s8 = sld [smem:[#allocation2 + $0x1f]]  ;;  %vm12195_vm8 = vmand %vm9684_vm7, %vm12627_vm15  ;;  %v12631_v20 = vstv %s9462_s24  ;;  %v12632_v62 = vstv %s9464_s23  ;;  %vm12203_vm14 = vcmp.lt.s32.totalorder %v12592_v9, 31 }
 0x7a1   : > { %v9692_v14 = vpop.permute.xlu1 %6317  ;;  %v9854_v44 = vmul.f32 %v12631_v20, %v3630_v52  ;;  %s9876_s24 = sld [smem:[#allocation2 + $0x31]]  ;;  %v3988_v51 = vrot.slane %v9822_v54, %v9525_v17  ;;  %vm9904_vm11 = vmand %vm525_vm13, %vm526_vm12  ;;  %vm12640_vm13 = vcmp.lt.s32.totalorder %v12592_v9, 33 }
 0x7a2   : > { %v9690_v24 = vpop.permute.xlu0 %6319  ;;  %12611 = vst [vmem:[#allocation100_spill] sm:$0xff] %v9692_v14  ;;  %s9920_s23 = sld [smem:[#allocation2 + $0x32]]  ;;  %v4149_v16 = vsel %vm12640_vm13, %v9220_v49, %v9218_v56  ;;  %vm12641_vm12 = vmmov %vm12640_vm13  ;;  %vm12204_vm13 = vcmp.lt.s32.totalorder %v12592_v9, 30 }
 0x7a3   : > { %12610 = vst [vmem:[#allocation99_spill] sm:$0xff] %v9690_v24  ;;  %5213 = vrot.lane.b32.xlu1 %v9306_v6, %s12616_s25 }
 0x7a4   : > { %5215 = vrot.lane.b32.xlu0 %v9308_v26, %s12616_s25  ;;  %s9753_s25 = sld [smem:[#allocation2 + $0x21]] }
 0x7a5   : > { %v9766_v61 = vpop.permute.xlu1 %6377 }
 0x7a6   : > { %v9764_v21 = vpop.permute.xlu0 %6379  ;;  %12618 = vst [vmem:[#allocation102_spill] sm:$0xff] %v9766_v61  ;;  %v9858_v61 = vmul.f32 %v12632_v62, %v3690_v7  ;;  %v12635_v7 = vstv %s9470_s3  ;;  %s10018_s3 = sld [smem:[#allocation2 + $0x34]] }
 0x7a7   : > { %12617 = vst [vmem:[#allocation101_spill] sm:$0xff] %v9764_v21  ;;  %5273 = vrot.lane.b32.xlu1 %v9306_v6, %s12621_s17  ;;  %v9880_v20 = vmul.f32 %v12635_v7, %v3750_v40  ;;  %v12643_v21 = vstv %s9478_s5  ;;  %s9968_s5 = sld [smem:[#allocation2 + $0x33]] }
 0x7a8   : > { %5275 = vrot.lane.b32.xlu0 %v9308_v26, %s12621_s17  ;;  %s9818_s17 = sld [smem:[#allocation2 + $0x24]] }
 0x7a9   : > { %v6438_v3 = vpop.permute.xlu1 %6437 }
 0x7aa   : > { %v6440_v47 = vpop.permute.xlu0 %6439 }
 0x7ab   : > { %v9826_v2 = vsel %vm12190_vm4, %v6438_v3, %v6440_v47  ;;  %v9830_v39 = vsel %vm12190_vm4, %v6440_v47, %v6438_v3  ;;  %5333 = vrot.lane.b32.xlu1 %v9306_v6, %s12628_s10  ;;  %v12629_v47 = vld [vmem:[#allocation27_spill] sm:$0xff]  ;;  %v4041_v3 = vrot.slane %v4034_v33, %v9525_v17 }
 0x7ac   : > { %12624 = vst [vmem:[#allocation22_spill] sm:$0xff] %v9826_v2  ;;  %12625 = vst [vmem:[#allocation103_spill] sm:$0xff] %v9830_v39  ;;  %5335 = vrot.lane.b32.xlu0 %v9308_v26, %s12628_s10  ;;  %vm12630_vm4 = vnez %v12629_v47  ;;  %s9865_s10 = sld [smem:[#allocation2 + $0x26]]  ;;  %v3928_v39 = vrot.slane %v3921_v15, %v9525_v17  ;;  %v3810_v15 = vsel %vm12195_vm8, %v3808_v36, 0.0  ;;  %vm12638_vm8 = vcmp.lt.s32.totalorder %v12592_v9, 34 }
 0x7ad   : > { %vm12198_vm9 = vmand %vm9684_vm7, %vm12630_vm4  ;;  %v3635_v33 = vpop.permute.xlu1 %3634  ;;  %v4089_v54 = vsel %vm12638_vm8, %v9212_v35, %v9210_v18 }
 0x7ae   : > { %v3637_v62 = vpop.permute.xlu0 %3636  ;;  %v3870_v7 = vsel %vm12198_vm9, %v3868_v19, 0.0 }
 0x7af   : > { %v3638_v2 = vsel %vm3608_vm0, %v3635_v33, %v3637_v62  ;;  %v3639_v40 = vsel %vm3608_vm0, %v3637_v62, %v3635_v33  ;;  %vm12639_vm0 = vmmov %vm12638_vm8  ;;  %5391 = vrot.lane.b32.xlu1 %v9306_v6, %s12433_s0  ;;  %v4048_v33 = vrot.slane %v4041_v3, %v9525_v17  ;;  %v9945_v14 = vmul.f32 %v12643_v21, %v3870_v7 }
 0x7b0   : > { %v4090_v62 = vsel %vm12639_vm0, %v9210_v18, %v9212_v35  ;;  %v3642_v19 = vcombine.low %v3639_v40, %v3638_v2  ;;  %5393 = vrot.lane.b32.xlu0 %v9308_v26, %s12433_s0  ;;  %v4150_v18 = vsel %vm12641_vm12, %v9218_v56, %v9220_v49  ;;  %v12642_v35 = vstv %s9472_s6  ;;  %vm12205_vm8 = vmand %vm9684_vm7, %vm9872_vm10  ;;  %s9940_s0 = sld [smem:[#allocation2 + $0x27]] }
 0x7b1   : > { %v9934_v2 = vmul.f32 %v12642_v35, %v3810_v15  ;;  %v3695_v43 = vpop.permute.xlu1 %3694  ;;  %v3930_v56 = vsel %vm3911_vm3, %v3928_v39, 0.0  ;;  %vm12200_vm0 = vmand %vm9904_vm11, %vm9698_vm2  ;;  %v4094_v15 = vcombine.low %v4090_v62, %v4089_v54  ;;  %vm12644_vm12 = vcmp.lt.s32.totalorder %v12592_v9, 50  ;;  %s10085_s6 = sld [smem:[#allocation2 + $0x2a]] }
 0x7b2   : > { %v3649_v3 = vrot.slane %v3642_v19, %v9525_v17  ;;  %v3697_v40 = vpop.permute.xlu0 %3696  ;;  %vm12645_vm9 = vmmov %vm12644_vm12  ;;  %v4154_v39 = vcombine.low %v4150_v18, %v4149_v16  ;;  %v3990_v54 = vsel %vm12205_vm8, %v3988_v51, 0.0  ;;  %v12647_v62 = vstv %s9480_s16  ;;  %s12661_s16 = smov 109  }
 0x7b3   : > { %v3698_v21 = vsel %vm12644_vm12, %v3695_v43, %v3697_v40  ;;  %v3699_v7 = vsel %vm12645_vm9, %v3697_v40, %v3695_v43  ;;  %5449 = vrot.lane.b32.xlu1 %v9306_v6, %s12434_s27  ;;  %vm12646_vm9 = vcmp.lt.s32.totalorder %v12592_v9, 32  ;;  %v9981_v43 = vmul.f32 %v12647_v62, %v3930_v56 }
 0x7b4   : > { %v3656_v35 = vrot.slane %v3649_v3, %v9525_v17  ;;  %v3702_v24 = vcombine.low %v3699_v7, %v3698_v21  ;;  %5451 = vrot.lane.b32.xlu0 %v9308_v26, %s12434_s27  ;;  %v4209_v16 = vsel %vm12646_vm9, %v9228_v38, %v9226_v45  ;;  %v4050_v18 = vsel %vm12200_vm0, %v4048_v33, 0.0  ;;  %vm12648_vm12 = vmmov %vm12646_vm9  ;;  %s10009_s27 = sld [smem:[#allocation2 + $0x28]] }
 0x7b5   : > { %v4210_v51 = vsel %vm12648_vm12, %v9226_v45, %v9228_v38  ;;  %v3659_v40 = vstv %s9876_s24  ;;  %vm12649_vm9 = vmand %vm9684_vm7, %vm9698_vm2  ;;  %v3755_v62 = vpop.permute.xlu1 %3754  ;;  %v4101_v33 = vrot.slane %v4094_v15, %v9525_v17  ;;  %vm12650_vm0 = vcmp.lt.s32.totalorder %v12592_v9, 49  ;;  %s10093_s24 = sld [smem:[#allocation2 + $0x36]] }
 0x7b6   : > { %v3658_v56 = vsel %vm12649_vm9, %v3656_v35, 0.0  ;;  %v3709_v21 = vrot.slane %v3702_v24, %v9525_v17  ;;  %v3757_v7 = vpop.permute.xlu0 %3756  ;;  %vm12651_vm12 = vmmov %vm12650_vm0  ;;  %v12652_v38 = vstv %s9486_s13  ;;  %v4161_v35 = vrot.slane %v4154_v39, %v9525_v17  ;;  %s10060_s13 = sld [smem:[#allocation2 + $0x29]] }
 0x7b7   : > { %v3758_v3 = vsel %vm12650_vm0, %v3755_v62, %v3757_v7  ;;  %v3759_v45 = vsel %vm12651_vm12, %v3757_v7, %v3755_v62  ;;  %v10007_v19 = vmul.f32 %v12652_v38, %v3990_v54  ;;  %v3719_v24 = vstv %s9920_s23  ;;  %5507 = vrot.lane.b32.xlu1 %v9306_v6, %s12435_s30  ;;  %vm12654_vm0 = vmand %vm9684_vm7, %vm9719_vm5  ;;  %s12665_s23 = smov 99  }
 0x7b8   : > { %v3716_v49 = vrot.slane %v3709_v21, %v9525_v17  ;;  %v3762_v25 = vcombine.low %v3759_v45, %v3758_v3  ;;  %5509 = vrot.lane.b32.xlu0 %v9308_v26, %s12435_s30  ;;  %v4214_v15 = vcombine.low %v4210_v51, %v4209_v16  ;;  %v3660_v54 = vmul.f32 %v3659_v40, %v3658_v56  ;;  %s12657_s30 = smov 110  }
 0x7b9   : > { %v12653_v7 = vstv %s9488_s4  ;;  %v4269_v39 = vsel %vm12203_vm14, %v9242_v1, %v9240_v22  ;;  %v4270_v3 = vsel %vm12203_vm14, %v9240_v22, %v9242_v1  ;;  %v3815_v40 = vpop.permute.xlu1 %3814  ;;  %v4108_v56 = vrot.slane %v4101_v33, %v9525_v17  ;;  %s10051_s4 = sld [smem:[#allocation2 + $0x35]]  ;;  %vm12206_vm14 = vmand %vm9904_vm11, %vm12620_vm6 }
 0x7ba   : > { %v10022_v62 = vmul.f32 %v12653_v7, %v4050_v18  ;;  %v3718_v16 = vsel %vm12654_vm0, %v3716_v49, 0.0  ;;  %v3769_v18 = vrot.slane %v3762_v25, %v9525_v17  ;;  %v3817_v51 = vpop.permute.xlu0 %3816  ;;  %vm12655_vm9 = vcmp.lt.s32.totalorder %v12592_v9, 48  ;;  %vm12207_vm0 = vmand %vm9904_vm11, %vm9719_vm5 }
 0x7bb   : > { %v3720_v21 = vmul.f32 %v3719_v24, %v3718_v16  ;;  %v3818_v45 = vsel %vm12655_vm9, %v3815_v40, %v3817_v51  ;;  %vm12656_vm12 = vmmov %vm12655_vm9  ;;  %v4168_v22 = vrot.slane %v4161_v35, %v9525_v17  ;;  %v3779_v1 = vstv %s9968_s5  ;;  %5567 = vrot.lane.b32.xlu1 %v9306_v6, %s12657_s30  ;;  %s10130_s5 = sld [smem:[#allocation2 + $0x37]] }
 0x7bc   : > { %v3819_v7 = vsel %vm12656_vm12, %v3817_v51, %v3815_v40  ;;  %v3776_v38 = vrot.slane %v3769_v18, %v9525_v17  ;;  %5569 = vrot.lane.b32.xlu0 %v9308_v26, %s12657_s30  ;;  %v4221_v25 = vrot.slane %v4214_v15, %v9525_v17  ;;  %v4274_v49 = vcombine.low %v4270_v3, %v4269_v39  ;;  %vm12658_vm12 = vmand %vm9684_vm7, %vm12620_vm6  ;;  %s12673_s30 = sld [smem:[#allocation82_spill]] }
 0x7bd   : > { %v3822_v53 = vcombine.low %v3819_v7, %v3818_v45  ;;  %v3661_v33 = vadd.f32 %v3660_v54, %v9854_v44  ;;  %v3721_v24 = vadd.f32 %v3720_v21, %v9858_v61  ;;  %v4329_v35 = vsel %vm12204_vm13, %v9252_v57, %v9250_v30  ;;  %v3875_v39 = vpop.permute.xlu1 %3874 }
 0x7be   : > { %v4330_v44 = vsel %vm12204_vm13, %v9250_v30, %v9252_v57  ;;  %vm12210_vm9 = vcmp.lt.s32.totalorder %v12592_v9, 29  ;;  %v3778_v61 = vsel %vm12658_vm12, %v3776_v38, 0.0  ;;  %v3877_v54 = vpop.permute.xlu0 %3876  ;;  %vm12659_vm13 = vcmp.lt.s32.totalorder %v12592_v9, 47 }
 0x7bf   : > { %v3829_v15 = vrot.slane %v3822_v53, %v9525_v17  ;;  %v3722_v3 = vadd.f32 %v3721_v24, %v3661_v33  ;;  %v3780_v30 = vmul.f32 %v3779_v1, %v3778_v61  ;;  %v3878_v57 = vsel %vm12659_vm13, %v3875_v39, %v3877_v54  ;;  %vm12660_vm8 = vmmov %vm12659_vm13  ;;  %5627 = vrot.lane.b32.xlu1 %v9306_v6, %s12661_s16 }
 0x7c0   : > { %v3879_v16 = vsel %vm12660_vm8, %v3877_v54, %v3875_v39  ;;  %v3839_v38 = vstv %s10018_s3  ;;  %5629 = vrot.lane.b32.xlu0 %v9308_v26, %s12661_s16  ;;  %v4334_v40 = vcombine.low %v4330_v44, %v4329_v35  ;;  %v4110_v45 = vsel %vm12207_vm0, %v4108_v56, 0.0  ;;  %vm12662_vm8 = vmand %vm9684_vm7, %vm12627_vm15  ;;  %s10143_s3 = sld [smem:[#allocation2 + $0x2b]] }
 0x7c1   : > { %v3836_v53 = vrot.slane %v3829_v15, %v9525_v17  ;;  %v3882_v18 = vcombine.low %v3879_v16, %v3878_v57  ;;  %v3781_v21 = vadd.f32 %v3780_v30, %v9880_v20  ;;  %v4170_v7 = vsel %vm12206_vm14, %v4168_v22, 0.0  ;;  %v3935_v35 = vpop.permute.xlu1 %3934  ;;  %s10216_s16 = sld [smem:[#allocation2 + $0x39]] }
 0x7c2   : > { %v4228_v1 = vrot.slane %v4221_v25, %v9525_v17  ;;  %v4281_v33 = vrot.slane %v4274_v49, %v9525_v17  ;;  %v3937_v56 = vpop.permute.xlu0 %3936  ;;  %vm12209_vm13 = vcmp.lt.s32.totalorder %v12592_v9, 19  ;;  %vm12663_vm12 = vcmp.lt.s32.totalorder %v12592_v9, 46 }
 0x7c3   : > { %v3838_v20 = vsel %vm12662_vm8, %v3836_v53, 0.0  ;;  %v3889_v24 = vrot.slane %v3882_v18, %v9525_v17  ;;  %v3782_v22 = vadd.f32 %v3781_v21, %v3722_v3  ;;  %v3938_v25 = vsel %vm12663_vm12, %v3935_v35, %v3937_v56  ;;  %vm12664_vm14 = vmmov %vm12663_vm12  ;;  %5687 = vrot.lane.b32.xlu1 %v9306_v6, %s12665_s23  ;;  %v12804_v53 = vld [vmem:[#allocation71_spill] sm:$0xff] }
 0x7c4   : > { %v3840_v44 = vmul.f32 %v3839_v38, %v3838_v20  ;;  %v3939_v49 = vsel %vm12664_vm14, %v3937_v56, %v3935_v35  ;;  %vm4211_vm8 = vmand %vm9904_vm11, %vm12627_vm15  ;;  %v3899_v61 = vstv %s10051_s4  ;;  %5689 = vrot.lane.b32.xlu0 %v9308_v26, %s12665_s23  ;;  %v12666_v39 = vstv %s9496_s14  ;;  %s10172_s14 = sld [smem:[#allocation2 + $0x38]] }
 0x7c5   : > { %v3896_v15 = vrot.slane %v3889_v24, %v9525_v17  ;;  %v3942_v54 = vcombine.low %v3939_v49, %v3938_v25  ;;  %v10134_v3 = vmul.f32 %v12666_v39, %v4110_v45  ;;  %v4341_v30 = vrot.slane %v4334_v40, %v9525_v17  ;;  %vm12668_vm12 = vmand %vm9684_vm7, %vm12630_vm4  ;;  %v3995_v45 = vpop.permute.xlu1 %3994  ;;  %s10204_s4 = sld [smem:[#allocation2 + $0x2c]] }
 0x7c6   : > { %v3841_v57 = vadd.f32 %v3840_v44, %v9934_v2  ;;  %v12667_v16 = vstv %s9498_s7  ;;  %v4288_v18 = vrot.slane %v4281_v33, %v9525_v17  ;;  %v3997_v40 = vpop.permute.xlu0 %3996  ;;  %vm12669_vm0 = vcmp.lt.s32.totalorder %v12592_v9, 45  ;;  %s12671_s7 = smov 98   ;;  %s12681_s23 = sld [smem:[#allocation83_spill]] }
 0x7c7   : > { %v10140_v38 = vmul.f32 %v12667_v16, %v4170_v7  ;;  %v3898_v21 = vsel %vm12668_vm12, %v3896_v15, 0.0  ;;  %v3949_v2 = vrot.slane %v3942_v54, %v9525_v17  ;;  %v4230_v7 = vsel %vm4211_vm8, %v4228_v1, 0.0  ;;  %vm12670_vm14 = vmmov %vm12669_vm0  ;;  %5747 = vrot.lane.b32.xlu1 %v9306_v6, %s12671_s7  ;;  %v12803_v1 = vld [vmem:[#allocation70_spill] sm:$0xff] }
 0x7c8   : > { %v3842_v33 = vadd.f32 %v3841_v57, %v3782_v22  ;;  %v3900_v20 = vmul.f32 %v3899_v61, %v3898_v21  ;;  %v3998_v24 = vsel %vm12669_vm0, %v3995_v45, %v3997_v40  ;;  %v3999_v56 = vsel %vm12670_vm14, %v3997_v40, %v3995_v45  ;;  %vm4271_vm12 = vmand %vm9904_vm11, %vm12630_vm4  ;;  %5749 = vrot.lane.b32.xlu0 %v9308_v26, %s12671_s7  ;;  %s10256_s7 = sld [smem:[#allocation2 + $0x3a]] }
 0x7c9   : > { %v3959_v35 = vstv %s10093_s24  ;;  %v3956_v44 = vrot.slane %v3949_v2, %v9525_v17  ;;  %v4002_v25 = vcombine.low %v3999_v56, %v3998_v24  ;;  %v4348_v22 = vrot.slane %v4341_v30, %v9525_v17  ;;  %v4055_v57 = vpop.permute.xlu1 %4054  ;;  %vm12208_vm0 = vmand %vm9904_vm11, %vm9814_vm1  ;;  %s10229_s24 = sld [smem:[#allocation2 + $0x2d]] }
 0x7ca   : > { %v4389_v49 = vsel %vm12210_vm9, %v9260_v12, %v9258_v11  ;;  %v4390_v61 = vsel %vm12210_vm9, %v9258_v11, %v9260_v12  ;;  %v3901_v15 = vadd.f32 %v3900_v20, %v9945_v14  ;;  %v4057_v30 = vpop.permute.xlu0 %4056  ;;  %v12672_v16 = vstv %s9506_s29  ;;  %s12676_s29 = smov 97  }
 0x7cb   : > { %v3958_v54 = vsel %vm3911_vm3, %v3956_v44, 0.0  ;;  %v4009_v39 = vrot.slane %v4002_v25, %v9525_v17  ;;  %v10193_v21 = vmul.f32 %v12672_v16, %v4230_v7  ;;  %v4290_v11 = vsel %vm4271_vm12, %v4288_v18, 0.0  ;;  %5807 = vrot.lane.b32.xlu1 %v9306_v6, %s12676_s29 }
 0x7cc   : > { %v3902_v12 = vadd.f32 %v3901_v15, %v3842_v33  ;;  %v3960_v14 = vmul.f32 %v3959_v35, %v3958_v54  ;;  %vm12674_vm3 = vcmp.lt.s32.totalorder %v12592_v9, 35  ;;  %v4394_v45 = vcombine.low %v4390_v61, %v4389_v49  ;;  %5809 = vrot.lane.b32.xlu0 %v9308_v26, %s12676_s29  ;;  %s10308_s29 = sld [smem:[#allocation2 + $0x2e]] }
 0x7cd   : > { %v4058_v2 = vsel %vm12674_vm3, %v4055_v57, %v4057_v30  ;;  %vm12675_vm14 = vmmov %vm12674_vm3  ;;  %v4019_v7 = vstv %s10130_s5  ;;  %v4016_v18 = vrot.slane %v4009_v39, %v9525_v17  ;;  %v12677_v24 = vstv %s12673_s30  ;;  %v4115_v15 = vpop.permute.xlu1 %4114  ;;  %s12682_s5 = smov 96   ;;  %s10288_s30 = sld [smem:[#allocation2 + $0x3b]] }
 0x7ce   : > { %v4059_v40 = vsel %vm12675_vm14, %v4057_v30, %v4055_v57  ;;  %v3961_v33 = vadd.f32 %v3960_v14, %v9981_v43  ;;  %v10221_v56 = vmul.f32 %v12677_v24, %v4290_v11  ;;  %v4350_v35 = vsel %vm12208_vm0, %v4348_v22, 0.0  ;;  %vm12678_vm3 = vmand %vm9684_vm7, %vm9872_vm10  ;;  %v4117_v61 = vpop.permute.xlu0 %4116 }
 0x7cf   : > { %v4062_v20 = vcombine.low %v4059_v40, %v4058_v2  ;;  %v4449_v25 = vsel %vm12209_vm13, %v9268_v0, %v9266_v8  ;;  %v4450_v43 = vsel %vm12209_vm13, %v9266_v8, %v9268_v0  ;;  %v4018_v49 = vsel %vm12678_vm3, %v4016_v18, 0.0  ;;  %5867 = vrot.lane.b32.xlu1 %v9306_v6, %s12682_s5  ;;  %vm12685_vm3 = vmand %vm9904_vm11, %vm9698_vm2 }
 0x7d0   : > { %v3962_v54 = vadd.f32 %v3961_v33, %v3902_v12  ;;  %v4020_v39 = vmul.f32 %v4019_v7, %v4018_v49  ;;  %vm12679_vm14 = vcmp.lt.s32.totalorder %v12592_v9, 34  ;;  %v4401_v8 = vrot.slane %v4394_v45, %v9525_v17  ;;  %5869 = vrot.lane.b32.xlu0 %v9308_v26, %s12682_s5  ;;  %vm12698_vm13 = vmand %vm9904_vm11, %vm12620_vm6  ;;  %s12699_s5 = sld [smem:[#allocation84_spill]] }
 0x7d1   : > { %v4069_v22 = vrot.slane %v4062_v20, %v9525_v17  ;;  %v4118_v30 = vsel %vm12679_vm14, %v4115_v15, %v4117_v61  ;;  %vm12680_vm0 = vmmov %vm12679_vm14  ;;  %v4079_v0 = vstv %s10172_s14  ;;  %v4454_v11 = vcombine.low %v4450_v43, %v4449_v25  ;;  %v4175_v18 = vpop.permute.xlu1 %4174  ;;  %s12689_s14 = smov 95  }
 0x7d2   : > { %v4119_v57 = vsel %vm12680_vm0, %v4117_v61, %v4115_v15  ;;  %vm12683_vm7 = vcmp.lt.s32.totalorder %v12592_v9, 18  ;;  %v4021_v2 = vadd.f32 %v4020_v39, %v10007_v19  ;;  %v4177_v7 = vpop.permute.xlu0 %4176  ;;  %v12686_v20 = vstv %s12681_s23  ;;  %s10325_s23 = sld [smem:[#allocation2 + $0x3c]] }
 0x7d3   : > { %v4076_v59 = vrot.slane %v4069_v22, %v9525_v17  ;;  %v4122_v16 = vcombine.low %v4119_v57, %v4118_v30  ;;  %v4509_v12 = vsel %vm12683_vm7, %v9276_v41, %v9274_v4  ;;  %vm12684_vm0 = vmmov %vm12683_vm7  ;;  %v10275_v33 = vmul.f32 %v12686_v20, %v4350_v35  ;;  %5927 = vrot.lane.b32.xlu1 %v9306_v6, %s12689_s14 }
 0x7d4   : > { %v4510_v14 = vsel %vm12684_vm0, %v9274_v4, %v9276_v41  ;;  %v4022_v25 = vadd.f32 %v4021_v2, %v3962_v54  ;;  %vm12687_vm14 = vcmp.lt.s32.totalorder %v12592_v9, 33  ;;  %v4139_v49 = vstv %s10216_s16  ;;  %5929 = vrot.lane.b32.xlu0 %v9308_v26, %s12689_s14  ;;  %s12695_s16 = smov 94   ;;  %s10364_s14 = sld [smem:[#allocation2 + $0x3d]] }
 0x7d5   : > { %v4078_v40 = vsel %vm12685_vm3, %v4076_v59, 0.0  ;;  %v4129_v45 = vrot.slane %v4122_v16, %v9525_v17  ;;  %v4178_v4 = vsel %vm12687_vm14, %v4175_v18, %v4177_v7  ;;  %vm12688_vm7 = vmmov %vm12687_vm14  ;;  %v4514_v19 = vcombine.low %v4510_v14, %v4509_v12  ;;  %v4235_v59 = vpop.permute.xlu1 %4234 }
 0x7d6   : > { %v4080_v43 = vmul.f32 %v4079_v0, %v4078_v40  ;;  %v4179_v41 = vsel %vm12688_vm7, %v4177_v7, %v4175_v18  ;;  %v4408_v35 = vrot.slane %v4401_v8, %v9525_v17  ;;  %v4461_v15 = vrot.slane %v4454_v11, %v9525_v17  ;;  %vm12692_vm14 = vmand %vm9904_vm11, %vm9719_vm5 }
 0x7d7   : > { %v4136_v22 = vrot.slane %v4129_v45, %v9525_v17  ;;  %v4182_v61 = vcombine.low %v4179_v41, %v4178_v4  ;;  %vm12690_vm0 = vcmp.lt.s32.totalorder %v12592_v9, 17  ;;  %vm12693_vm7 = vcmp.lt.s32.totalorder %v12592_v9, 32  ;;  %5987 = vrot.lane.b32.xlu1 %v9306_v6, %s12695_s16 }
 0x7d8   : > { %v4081_v54 = vadd.f32 %v4080_v43, %v10022_v62  ;;  %v4568_v30 = vsel %vm12690_vm0, %v9284_v10, %v9282_v55  ;;  %vm12691_vm3 = vmmov %vm12690_vm0  ;;  %v4237_v62 = vpop.permute.xlu0 %4236  ;;  %v4199_v14 = vstv %s10256_s7  ;;  %5989 = vrot.lane.b32.xlu0 %v9308_v26, %s12695_s16  ;;  %s12704_s7 = smov 93   ;;  %s10403_s16 = sld [smem:[#allocation2 + $0x3e]] }
 0x7d9   : > { %v4569_v57 = vsel %vm12691_vm3, %v9282_v55, %v9284_v10  ;;  %v4138_v8 = vsel %vm12692_vm14, %v4136_v22, 0.0  ;;  %v4189_v0 = vrot.slane %v4182_v61, %v9525_v17  ;;  %v4238_v12 = vsel %vm12693_vm7, %v4235_v59, %v4237_v62  ;;  %vm12694_vm0 = vmmov %vm12693_vm7  ;;  %v12702_v61 = vld [vmem:[#allocation20_spill] sm:$0xff] }
 0x7da   : > { %v4082_v16 = vadd.f32 %v4081_v54, %v4022_v25  ;;  %v4140_v11 = vmul.f32 %v4139_v49, %v4138_v8  ;;  %v4239_v55 = vsel %vm12694_vm0, %v4237_v62, %v4235_v59  ;;  %vm12211_vm3 = vmand %vm9904_vm11, %vm9872_vm10  ;;  %v4521_v10 = vrot.slane %v4514_v19, %v9525_v17  ;;  %v4295_v19 = vpop.permute.xlu1 %4294 }
 0x7db   : > { %v4196_v2 = vrot.slane %v4189_v0, %v9525_v17  ;;  %v4242_v40 = vcombine.low %v4239_v55, %v4238_v12  ;;  %v4572_v45 = vcombine.low %v4569_v57, %v4568_v30  ;;  %vm12696_vm14 = vcmp.lt.s32.totalorder %v12592_v9, 16  ;;  %6047 = vrot.lane.b32.xlu1 %v9306_v6, %s12704_s7 }
 0x7dc   : > { %v4626_v7 = vsel %vm12696_vm14, %v9292_v13, %v9290_v28  ;;  %vm12697_vm7 = vmmov %vm12696_vm14  ;;  %v4141_v20 = vadd.f32 %v4140_v11, %v10134_v3  ;;  %v4468_v25 = vrot.slane %v4461_v15, %v9525_v17  ;;  %v4297_v41 = vpop.permute.xlu0 %4296  ;;  %vm12214_vm14 = vcmp.lt.s32.totalorder %v12592_v9, 13  ;;  %6049 = vrot.lane.b32.xlu0 %v9308_v26, %s12704_s7  ;;  %s10484_s7 = sld [smem:[#allocation2 + $0x2f]] }
 0x7dd   : > { %v4627_v18 = vsel %vm12697_vm7, %v9290_v28, %v9292_v13  ;;  %v4198_v43 = vsel %vm12698_vm13, %v4196_v2, 0.0  ;;  %v4249_v4 = vrot.slane %v4242_v40, %v9525_v17  ;;  %v4410_v28 = vsel %vm12211_vm3, %v4408_v35, 0.0 }
 0x7de   : > { %v4142_v13 = vadd.f32 %v4141_v20, %v4082_v16  ;;  %v4200_v3 = vmul.f32 %v4199_v14, %v4198_v43  ;;  %vm12700_vm7 = vcmp.lt.s32.totalorder %v12592_v9, 31  ;;  %vm12703_vm0 = vnez %v12702_v61  ;;  %v4355_v55 = vpop.permute.xlu1 %4354 }
 0x7df   : > { %v4298_v49 = vsel %vm12700_vm7, %v4295_v19, %v4297_v41  ;;  %vm12701_vm13 = vmmov %vm12700_vm7  ;;  %v4630_v15 = vcombine.low %v4627_v18, %v4626_v7  ;;  %v4259_v54 = vstv %s10288_s30  ;;  %v4256_v35 = vrot.slane %v4249_v4, %v9525_v17  ;;  %s12708_s30 = smov 83  }
 0x7e0   : > { %v4299_v22 = vsel %vm12701_vm13, %v4297_v41, %v4295_v19  ;;  %vm12212_vm9 = vmand %vm12703_vm0, %vm9698_vm2  ;;  %v4528_v57 = vrot.slane %v4521_v10, %v9525_v17  ;;  %v10368_v8 = vrot.slane %v4572_v45, %v9525_v17  ;;  %v4201_v0 = vadd.f32 %v4200_v3, %v10140_v38  ;;  %v4357_v12 = vpop.permute.xlu0 %4356  ;;  %6109 = vrot.lane.b32.xlu0 %v9308_v26, %s12708_s30 }
 0x7e1   : > { %v4302_v30 = vcombine.low %v4299_v22, %v4298_v49  ;;  %v12705_v62 = vstv %s12699_s5  ;;  %v4258_v16 = vsel %vm4211_vm8, %v4256_v35, 0.0  ;;  %v4470_v10 = vsel %vm12212_vm9, %v4468_v25, 0.0  ;;  %vm12213_vm7 = vmand %vm12703_vm0, %vm9719_vm5  ;;  %6107 = vrot.lane.b32.xlu1 %v9306_v6, %s12708_s30  ;;  %s12720_s5 = smov 81   ;;  %s12769_s30 = smov 77  }
 0x7e2   : > { %v10373_v59 = vmul.f32 %v12705_v62, %v4410_v28  ;;  %v4202_v14 = vadd.f32 %v4201_v0, %v4142_v13  ;;  %v4260_v2 = vmul.f32 %v4259_v54, %v4258_v16  ;;  %vm12706_vm8 = vcmp.lt.s32.totalorder %v12592_v9, 30 }
 0x7e3   : > { %v4309_v11 = vrot.slane %v4302_v30, %v9525_v17  ;;  %v4358_v40 = vsel %vm12706_vm8, %v4355_v55, %v4357_v12  ;;  %vm12707_vm13 = vmmov %vm12706_vm8  ;;  %v4637_v7 = vrot.slane %v4630_v15, %v9525_v17  ;;  %vm12216_vm3 = vcmp.lt.s32.totalorder %v12592_v9, 3  ;;  %v4415_v15 = vpop.permute.xlu1 %4414 }
 0x7e4   : > { %v4359_v45 = vsel %vm12707_vm13, %v4357_v12, %v4355_v55  ;;  %v4319_v18 = vstv %s10325_s23  ;;  %v4586_v43 = vrot.slane %v10368_v8, %v9525_v17  ;;  %vm12215_vm8 = vcmp.lt.s32.totalorder %v12592_v9, 2  ;;  %v4417_v22 = vpop.permute.xlu0 %4416  ;;  %s10443_s23 = sld [smem:[#allocation2 + $0x3f]] }
 0x7e5   : > { %v4316_v20 = vrot.slane %v4309_v11, %v9525_v17  ;;  %v4362_v25 = vcombine.low %v4359_v45, %v4358_v40  ;;  %v4261_v4 = vadd.f32 %v4260_v2, %v10193_v21  ;;  %v12709_v41 = vstv %s9522_s11  ;;  %s12714_s11 = smov 82  }
 0x7e6   : > { %v10411_v19 = vmul.f32 %v12709_v41, %v4470_v10  ;;  %v4530_v28 = vsel %vm12213_vm7, %v4528_v57, 0.0  ;;  %vm12710_vm13 = vcmp.lt.s32.totalorder %v12592_v9, 15  ;;  %vm12712_vm7 = vcmp.lt.s32.totalorder %v12592_v9, 29  ;;  %6169 = vrot.lane.b32.xlu0 %v9308_v26, %s12714_s11  ;;  %6167 = vrot.lane.b32.xlu1 %v9306_v6, %s12714_s11  ;;  %s11561_s11 = sld [smem:[#allocation2 + $0x55]] }
 0x7e7   : > { %v4684_v13 = vsel %vm12710_vm13, %v9300_v23, %v9298_v48  ;;  %vm12711_vm9 = vmmov %vm12710_vm13  ;;  %v4318_v21 = vsel %vm4271_vm12, %v4316_v20, 0.0  ;;  %v4369_v49 = vrot.slane %v4362_v25, %v9525_v17  ;;  %v4262_v54 = vadd.f32 %v4261_v4, %v4202_v14  ;;  %v4475_v14 = vpop.permute.xlu1 %4474  ;;  %v12722_v4 = vld [vmem:[#allocation25_spill] sm:$0xff] }
 0x7e8   : > { %v4685_v3 = vsel %vm12711_vm9, %v9298_v48, %v9300_v23  ;;  %v4320_v35 = vmul.f32 %v4319_v18, %v4318_v21  ;;  %v4418_v30 = vsel %vm12712_vm7, %v4415_v15, %v4417_v22  ;;  %vm12713_vm13 = vmmov %vm12712_vm7  ;;  %v4644_v48 = vrot.slane %v4637_v7, %v9525_v17 }
 0x7e9   : > { %v4419_v57 = vsel %vm12713_vm13, %v4417_v22, %v4415_v15  ;;  %v4379_v23 = vstv %s10364_s14  ;;  %v4376_v8 = vrot.slane %v4369_v49, %v9525_v17  ;;  %v4688_v62 = vcombine.low %v4685_v3, %v4684_v13  ;;  %vm12717_vm13 = vmand %vm9904_vm11, %vm9814_vm1  ;;  %v12724_v13 = vld [vmem:[#allocation24_spill] sm:$0xff]  ;;  %s12755_s14 = sld [smem:[#allocation87_spill]] }
 0x7ea   : > { %v4422_v0 = vcombine.low %v4419_v57, %v4418_v30  ;;  %vm12715_vm9 = vcmp.lt.s32.totalorder %v12592_v9, 14  ;;  %v4321_v12 = vadd.f32 %v4320_v35, %v10221_v56  ;;  %v4803_v55 = vsel %vm12214_vm14, %v9320_v31, %v9318_v58  ;;  %v4477_v56 = vpop.permute.xlu0 %4476  ;;  %6229 = vrot.lane.b32.xlu0 %v9308_v26, %s12720_s5  ;;  %6227 = vrot.lane.b32.xlu1 %v9306_v6, %s12720_s5  ;;  %vm12726_vm7 = vmand %vm9904_vm11, %vm9872_vm10  ;;  %s12789_s5 = sld [smem:[#allocation90_spill]] }
 0x7eb   : > { %v4743_v16 = vsel %vm12715_vm9, %v9312_v60, %v9310_v32  ;;  %vm12716_vm12 = vmmov %vm12715_vm9  ;;  %v4804_v10 = vsel %vm12214_vm14, %v9318_v58, %v9320_v31  ;;  %v4439_v45 = vstv %s10403_s16  ;;  %v12721_v20 = vstv %s9527_s12  ;;  %v10502_v35 = vpop.permute.xlu1 %4534  ;;  %s12727_s12 = smov 80   ;;  %s12770_s16 = sld [smem:[#allocation88_spill]] }
 0x7ec   : > { %v4744_v11 = vsel %vm12716_vm12, %v9310_v32, %v9312_v60  ;;  %v4378_v32 = vsel %vm12717_vm13, %v4376_v8, 0.0  ;;  %v4429_v60 = vrot.slane %v4422_v0, %v9525_v17  ;;  %v4322_v2 = vadd.f32 %v4321_v12, %v4262_v54  ;;  %v12730_v12 = vld [vmem:[#allocation47_spill] sm:$0xff] }
 0x7ed   : > { %v4380_v40 = vmul.f32 %v4379_v23, %v4378_v32  ;;  %vm12718_vm12 = vcmp.lt.s32.totalorder %v12592_v9, 19  ;;  %v10482_v25 = vmul.f32 %v12721_v20, %v4530_v28  ;;  %vm12723_vm13 = vnez %v12722_v4 }
 0x7ee   : > { %v4478_v58 = vsel %vm12718_vm12, %v4475_v14, %v4477_v56  ;;  %vm12719_vm14 = vmmov %vm12718_vm12  ;;  %v4436_v7 = vrot.slane %v4429_v60, %v9525_v17  ;;  %v4588_v41 = vsel %vm12723_vm13, %v4586_v43, 0.0  ;;  %v4748_v21 = vcombine.low %v4744_v11, %v4743_v16  ;;  %v10500_v54 = vpop.permute.xlu0 %4536  ;;  %6289 = vrot.lane.b32.xlu0 %v9308_v26, %s12727_s12  ;;  %6287 = vrot.lane.b32.xlu1 %v9306_v6, %s12727_s12  ;;  %s12794_s12 = sld [smem:[#allocation93_spill]] }
 0x7ef   : > { %v4479_v31 = vsel %vm12719_vm14, %v4477_v56, %v4475_v14  ;;  %vm12725_vm14 = vnez %v12724_v13  ;;  %vm12217_vm12 = vcmp.lt.s32.totalorder %v12592_v9, 115  ;;  %v4381_v49 = vadd.f32 %v4380_v40, %v10275_v33  ;;  %v10556_v56 = vpop.permute.xlu1 %4592 }
 0x7f0   : > { %v4482_v18 = vcombine.low %v4479_v31, %v4478_v58  ;;  %v4646_v3 = vsel %vm12725_vm14, %v4644_v48, 0.0  ;;  %v4695_v22 = vrot.slane %v4688_v62, %v9525_v17  ;;  %v4808_v15 = vcombine.low %v4804_v10, %v4803_v55  ;;  %v12731_v55 = vld [vmem:[#allocation49_spill] sm:$0xff] }
 0x7f1   : > { %vm12218_vm9 = vcmp.lt.s32.totalorder %v12592_v9, 114  ;;  %v4438_v43 = vsel %vm12726_vm7, %v4436_v7, 0.0  ;;  %v4863_v33 = vsel %vm12216_vm3, %v9328_v29, %v9326_v46  ;;  %v4864_v36 = vsel %vm12216_vm3, %v9326_v46, %v9328_v29  ;;  %v12736_v7 = vld [vmem:[#allocation35_spill] sm:$0xff] }
 0x7f2   : > { %v4489_v28 = vrot.slane %v4482_v18, %v9525_v17  ;;  %v4382_v30 = vadd.f32 %v4381_v49, %v4322_v2  ;;  %v4440_v57 = vmul.f32 %v4439_v45, %v4438_v43  ;;  %v4923_v48 = vsel %vm12215_vm8, %v9336_v37, %v9334_v34  ;;  %v10554_v60 = vpop.permute.xlu0 %4594  ;;  %v12735_v45 = vld [vmem:[#allocation36_spill] sm:$0xff]  ;;  %v12741_v49 = vld [vmem:[#allocation51_spill] sm:$0xff] }
 0x7f3   : > { %v4924_v23 = vsel %vm12215_vm8, %v9334_v34, %v9336_v37  ;;  %v4499_v8 = vstv %s10443_s23  ;;  %v12728_v46 = vstv %s9529_s18  ;;  %v12729_v62 = vstv %s9535_s20  ;;  %vm12734_vm8 = vmand %vm12703_vm0, %vm9698_vm2  ;;  %s12739_s18 = smov 79   ;;  %s12752_s20 = smov 78  }
 0x7f4   : > { %v4496_v0 = vrot.slane %v4489_v28, %v9525_v17  ;;  %v10528_v29 = vmul.f32 %v12728_v46, %v4588_v41  ;;  %v10532_v16 = vmul.f32 %v12729_v62, %v4646_v3  ;;  %v10535_v11 = vrot.slane %v4748_v21, %v9525_v17  ;;  %6349 = vrot.lane.b32.xlu0 %v9308_v26, %s12739_s18  ;;  %v12740_v21 = vld [vmem:[#allocation50_spill] sm:$0xff]  ;;  %s12788_s23 = sld [smem:[#allocation105_spill]] }
 0x7f5   : > { %v4441_v34 = vadd.f32 %v4440_v57, %v10373_v59  ;;  %v10539_v37 = vrot.slane %v4808_v15, %v9525_v17  ;;  %vm12732_vm11 = vcmp.lt.s32.totalorder %v12592_v9, 1  ;;  %v4868_v14 = vcombine.low %v4864_v36, %v4863_v33  ;;  %6347 = vrot.lane.b32.xlu1 %v9306_v6, %s12739_s18  ;;  %v12744_v36 = vld [vmem:[#allocation52_spill] sm:$0xff]  ;;  %s12798_s18 = sld [smem:[#allocation94_spill]] }
 0x7f6   : > { %v4982_v10 = vsel %vm12732_vm11, %v12731_v55, %v12730_v12  ;;  %vm12733_vm7 = vmmov %vm12732_vm11  ;;  %v4498_v59 = vsel %vm12734_vm8, %v4496_v0, 0.0  ;;  %v4928_v2 = vcombine.low %v4924_v23, %v4923_v48  ;;  %v4702_v31 = vrot.slane %v4695_v22, %v9525_v17  ;;  %v10594_v23 = vpop.permute.xlu0 %4652 }
 0x7f7   : > { %v4983_v32 = vsel %vm12733_vm7, %v12730_v12, %v12731_v55  ;;  %v4442_v40 = vadd.f32 %v4441_v34, %v4382_v30  ;;  %v4500_v58 = vmul.f32 %v4499_v8, %v4498_v59  ;;  %vm12737_vm11 = vcmp.lt.s32.totalorder %v12592_v9, 127  ;;  %v12745_v30 = vld [vmem:[#allocation53_spill] sm:$0xff]  ;;  %v10596_v8 = vpop.permute.xlu1 %4650  ;;  %v12750_v12 = vld [vmem:[#allocation54_spill] sm:$0xff]  ;;  %v12751_v55 = vld [vmem:[#allocation55_spill] sm:$0xff] }
 0x7f8   : > { %v5069_v18 = vsel %vm12737_vm11, %v12736_v7, %v12735_v45  ;;  %vm12738_vm8 = vmmov %vm12737_vm11  ;;  %v4986_v3 = vcombine.low %v4983_v32, %v4982_v10  ;;  %vm12742_vm7 = vcmp.lt.s32.totalorder %v12592_v9, 126  ;;  %v4762_v28 = vrot.slane %v10535_v11, %v9525_v17  ;;  %v12748_v11 = vld [vmem:[#allocation29_spill] sm:$0xff]  ;;  %6409 = vrot.lane.b32.xlu0 %v9308_v26, %s12752_s20 }
 0x7f9   : > { %v5070_v20 = vsel %vm12738_vm8, %v12735_v45, %v12736_v7  ;;  %v5128_v22 = vsel %vm12742_vm7, %v12741_v49, %v12740_v21  ;;  %vm12743_vm11 = vmmov %vm12742_vm7  ;;  %v4501_v43 = vadd.f32 %v4500_v58, %v10411_v19  ;;  %v4822_v33 = vrot.slane %v10539_v37, %v9525_v17  ;;  %6407 = vrot.lane.b32.xlu1 %v9306_v6, %s12752_s20  ;;  %v12756_v45 = vld [vmem:[#allocation58_spill] sm:$0xff]  ;;  %v12757_v7 = vld [vmem:[#allocation59_spill] sm:$0xff]  ;;  %s10793_s20 = sld [smem:[#allocation2 + $0x40]] }
 0x7fa   : > { %v5129_v15 = vsel %vm12743_vm11, %v12740_v21, %v12741_v49  ;;  %vm12746_vm8 = vcmp.lt.s32.totalorder %v12592_v9, 125  ;;  %v4875_v19 = vrot.slane %v4868_v14, %v9525_v17  ;;  %v10600_v0 = vrot.slane %v4928_v2, %v9525_v17  ;;  %v12753_v2 = vld [vmem:[#allocation56_spill] sm:$0xff]  ;;  %v12761_v21 = vld [vmem:[#allocation61_spill] sm:$0xff] }
 0x7fb   : > { %v5188_v57 = vsel %vm12746_vm8, %v12745_v30, %v12744_v36  ;;  %vm12747_vm7 = vmmov %vm12746_vm8  ;;  %v5073_v46 = vcombine.low %v5069_v18, %v5070_v20  ;;  %v10603_v62 = vadd.f32 %v4501_v43, %v4442_v40  ;;  %vm12749_vm8 = vnez %v12748_v11  ;;  %v12754_v40 = vld [vmem:[#allocation57_spill] sm:$0xff]  ;;  %v10651_v43 = vpop.permute.xlu1 %4708 }
 0x7fc   : > { %v5189_v48 = vsel %vm12747_vm7, %v12744_v36, %v12745_v30  ;;  %v4704_v34 = vsel %vm12749_vm8, %v4702_v31, 0.0  ;;  %v5133_v37 = vcombine.low %v5128_v22, %v5129_v15  ;;  %v5248_v10 = vsel %vm12217_vm12, %v12751_v55, %v12750_v12  ;;  %v10649_v15 = vpop.permute.xlu0 %4710  ;;  %6469 = vrot.lane.b32.xlu0 %v9308_v26, %s12769_s30 }
 0x7fd   : > { %v5249_v32 = vsel %vm12217_vm12, %v12750_v12, %v12751_v55  ;;  %v4993_v59 = vrot.slane %v4986_v3, %v9525_v17  ;;  %v5193_v14 = vcombine.low %v5188_v57, %v5189_v48  ;;  %v5308_v58 = vsel %vm12218_vm9, %v12754_v40, %v12753_v2  ;;  %vm12220_vm12 = vmand %vm12703_vm0, %vm9814_vm1  ;;  %v12760_v3 = vld [vmem:[#allocation60_spill] sm:$0xff]  ;;  %v12764_v57 = vld [vmem:[#allocation62_spill] sm:$0xff]  ;;  %6467 = vrot.lane.b32.xlu1 %v9306_v6, %s12769_s30  ;;  %s11505_s30 = sld [smem:[#allocation2 + $0x52]] }
 0x7fe   : > { %v5309_v31 = vsel %vm12218_vm9, %v12753_v2, %v12754_v40  ;;  %vm12758_vm11 = vcmp.lt.s32.totalorder %v12592_v9, 113  ;;  %vm12762_vm9 = vcmp.lt.s32.totalorder %v12592_v9, 112  ;;  %v5080_v36 = vrot.slane %v5073_v46, %v9525_v17  ;;  %v12765_v48 = vld [vmem:[#allocation63_spill] sm:$0xff] }
 0x7ff   : > { %v5367_v18 = vsel %vm12758_vm11, %v12757_v7, %v12756_v45  ;;  %vm12759_vm3 = vmmov %vm12758_vm11  ;;  %v5425_v49 = vsel %vm12762_vm9, %v12761_v21, %v12760_v3  ;;  %v5253_v30 = vcombine.low %v5248_v10, %v5249_v32  ;;  %v12768_v2 = vstv %s12755_s14  ;;  %s12814_s14 = sld [smem:[#allocation97_spill]] }
 0x800   : > { %v5368_v20 = vsel %vm12759_vm3, %v12756_v45, %v12757_v7  ;;  %vm12763_vm7 = vmmov %vm12762_vm9  ;;  %vm12766_vm3 = vcmp.lt.s32.totalorder %v12592_v9, 111  ;;  %v10668_v40 = vmul.f32 %v12768_v2, %v4704_v34  ;;  %v5140_v45 = vrot.slane %v5133_v37, %v9525_v17 }
 0x801   : > { %v5426_v22 = vsel %vm12763_vm7, %v12760_v3, %v12761_v21  ;;  %vm12219_vm11 = vmand %vm12703_vm0, %vm9872_vm10  ;;  %v5483_v12 = vsel %vm12766_vm3, %v12765_v48, %v12764_v57  ;;  %v5313_v7 = vcombine.low %v5308_v58, %v5309_v31  ;;  %v4764_v46 = vsel %vm12220_vm12, %v4762_v28, 0.0  ;;  %v12771_v58 = vld [vmem:[#allocation64_spill] sm:$0xff]  ;;  %v12772_v31 = vld [vmem:[#allocation65_spill] sm:$0xff] }
 0x802   : > { %vm12767_vm9 = vmmov %vm12766_vm3  ;;  %v4882_v34 = vrot.slane %v4875_v19, %v9525_v17  ;;  %v5371_v10 = vcombine.low %v5367_v18, %v5368_v20  ;;  %v5429_v32 = vcombine.low %v5425_v49, %v5426_v22  ;;  %v4824_v26 = vsel %vm12219_vm11, %v4822_v33, 0.0  ;;  %v10696_v18 = vpop.permute.xlu0 %4770  ;;  %v10698_v20 = vpop.permute.xlu1 %4768  ;;  %v12775_v33 = vld [vmem:[#allocation31_spill] sm:$0xff] }
 0x803   : > { %v5484_v55 = vsel %vm12767_vm9, %v12764_v57, %v12765_v48  ;;  %v5200_v6 = vrot.slane %v5193_v14, %v9525_v17  ;;  %vm12773_vm3 = vcmp.lt.s32.totalorder %v12592_v9, 110  ;;  %vm12776_vm11 = vnez %v12775_v33 }
 0x804   : > { %v5487_v37 = vcombine.low %v5483_v12, %v5484_v55  ;;  %v5542_v28 = vsel %vm12773_vm3, %v12772_v31, %v12771_v58  ;;  %vm12774_vm9 = vmmov %vm12773_vm3  ;;  %v4942_v14 = vrot.slane %v10600_v0, %v9525_v17  ;;  %v5000_v3 = vrot.slane %v4993_v59, %v9525_v17 }
 0x805   : > { %v5543_v19 = vsel %vm12774_vm9, %v12771_v58, %v12772_v31  ;;  %vm12221_vm12 = vmand %vm12776_vm11, %vm9698_vm2  ;;  %v5087_v21 = vrot.slane %v5080_v36, %v9525_v17  ;;  %v5260_v49 = vrot.slane %v5253_v30, %v9525_v17  ;;  %v5147_v22 = vrot.slane %v5140_v45, %v9525_v17  ;;  %v12783_v31 = vld [vmem:[#allocation32_spill] sm:$0xff] }
 0x806   : > { %v5320_v57 = vrot.slane %v5313_v7, %v9525_v17  ;;  %v12777_v48 = vstv %s12770_s16  ;;  %v12778_v55 = vstv %s9574_s22  ;;  %v5378_v0 = vrot.slane %v5371_v10, %v9525_v17  ;;  %v12780_v10 = vld [vmem:[#allocation67_spill] sm:$0xff]  ;;  %v10747_v58 = vpop.permute.xlu1 %4828  ;;  %s11521_s16 = sld [smem:[#allocation2 + $0x53]] }
 0x807   : > { %v10714_v12 = vmul.f32 %v12777_v48, %v4764_v46  ;;  %v10718_v2 = vmul.f32 %v12778_v55, %v4824_v26  ;;  %v5436_v59 = vrot.slane %v5429_v32, %v9525_v17  ;;  %v5547_v36 = vcombine.low %v5542_v28, %v5543_v19  ;;  %v12779_v46 = vld [vmem:[#allocation66_spill] sm:$0xff]  ;;  %v12791_v55 = vld [vmem:[#allocation69_spill] sm:$0xff]  ;;  %s11537_s22 = sld [smem:[#allocation2 + $0x54]] }
 0x808   : > { %v4884_v30 = vsel %vm12221_vm12, %v4882_v34, 0.0  ;;  %v5207_v45 = vrot.slane %v5200_v6, %v9525_v17  ;;  %v5494_v7 = vrot.slane %v5487_v37, %v9525_v17  ;;  %vm12781_vm7 = vcmp.lt.s32.totalorder %v12592_v9, 109  ;;  %v10745_v34 = vpop.permute.xlu0 %4830  ;;  %v12785_v6 = vld [vmem:[#allocation33_spill] sm:$0xff] }
 0x809   : > { %v5602_v32 = vsel %vm12781_vm7, %v12780_v10, %v12779_v46  ;;  %vm12782_vm9 = vmmov %vm12781_vm7  ;;  %vm12784_vm12 = vnez %v12783_v31  ;;  %vm12786_vm3 = vnez %v12785_v6  ;;  %v5267_v19 = vrot.slane %v5260_v49, %v9525_v17  ;;  %v12790_v49 = vld [vmem:[#allocation68_spill] sm:$0xff] }
 0x80a   : > { %v5603_v26 = vsel %vm12782_vm9, %v12779_v46, %v12780_v10  ;;  %v5002_v28 = vsel %vm12784_vm12, %v5000_v3, 0.0  ;;  %v5089_v37 = vsel %vm12786_vm3, %v5087_v21, 0.0  ;;  %vm12787_vm7 = vmand %vm12776_vm11, %vm9719_vm5  ;;  %v10766_v3 = vld [vmem:[%s12788_s23] sm:$0x3]  ;;  %v5327_v21 = vrot.slane %v5320_v57, %v9525_v17  ;;  %v12796_v57 = vld [vmem:[#allocation34_spill] sm:$0xff]  ;;  %s11566_s23 = sld [smem:[#allocation2 + $0x56]] }
 0x80b   : > { %v4944_v48 = vsel %vm12787_vm7, %v4942_v14, 0.0  ;;  %vm12792_vm7 = vcmp.lt.s32.totalorder %v12592_v9, 99  ;;  %vm12795_vm3 = vmand %vm12776_vm11, %vm9814_vm1  ;;  %vm12797_vm12 = vnez %v12796_v57  ;;  %v5385_v41 = vrot.slane %v5378_v0, %v9525_v17 }
 0x80c   : > { %v5662_v14 = vsel %vm12792_vm7, %v12791_v55, %v12790_v49  ;;  %vm12793_vm9 = vmmov %vm12792_vm7  ;;  %v5149_v10 = vsel %vm12795_vm3, %v5147_v22, 0.0  ;;  %v5443_v38 = vrot.slane %v5436_v59, %v9525_v17  ;;  %v5501_v22 = vrot.slane %v5494_v7, %v9525_v17  ;;  %v10800_v0 = vpop.permute.xlu0 %4890 }
 0x80d   : > { %v5663_v46 = vsel %vm12793_vm9, %v12790_v49, %v12791_v55  ;;  %vm12223_vm14 = vmand %vm12797_vm12, %vm9698_vm2  ;;  %v5554_v49 = vrot.slane %v5547_v36, %v9525_v17  ;;  %v5607_v55 = vcombine.low %v5602_v32, %v5603_v26  ;;  %v12799_v59 = vstv %s12789_s5  ;;  %v10806_v36 = vpop.permute.xlu1 %4888  ;;  %s11584_s5 = sld [smem:[#allocation2 + $0x57]] }
 0x80e   : > { %vm12222_vm3 = vmand %vm12797_vm12, %vm9719_vm5  ;;  %v10804_v39 = vmul.f32 %v12799_v59, %v4884_v30  ;;  %v12800_v32 = vstv %s12794_s12  ;;  %v5667_v44 = vcombine.low %v5662_v14, %v5663_v46  ;;  %vm12805_vm9 = vcmp.lt.s32.totalorder %v12592_v9, 98  ;;  %s11597_s12 = sld [smem:[#allocation2 + $0x58]] }
 0x80f   : > { %v10810_v26 = vmul.f32 %v12800_v32, %v4944_v48  ;;  %vm12802_vm7 = vmand %vm12776_vm11, %vm9872_vm10  ;;  %v5722_v7 = vsel %vm12805_vm9, %v12804_v53, %v12803_v1  ;;  %v5269_v48 = vsel %vm12223_vm14, %v5267_v19, 0.0  ;;  %v12808_v46 = vstv %s9619_s2  ;;  %s12815_s2 = sld [smem:[#allocation98_spill]] }
 0x810   : > { %v5209_v24 = vsel %vm12802_vm7, %v5207_v45, 0.0  ;;  %vm12806_vm8 = vmmov %vm12805_vm9  ;;  %v12807_v45 = vstv %s12798_s18  ;;  %v10836_v59 = vmul.f32 %v12808_v46, %v5089_v37  ;;  %v12809_v32 = vstv %s9628_s19  ;;  %s10853_s19 = sld [smem:[#allocation2 + $0x41]] }
 0x811   : > { %12801 = vst [vmem:[#allocation21_spill] sm:$0xff] %v10810_v26  ;;  %v5723_v30 = vsel %vm12806_vm8, %v12803_v1, %v12804_v53  ;;  %v10832_v14 = vmul.f32 %v12807_v45, %v5002_v28  ;;  %v10840_v51 = vmul.f32 %v12809_v32, %v5149_v10  ;;  %v5329_v53 = vsel %vm12222_vm3, %v5327_v21, 0.0  ;;  %v12810_v1 = vld [vmem:[#allocation37_spill] sm:$0xff]  ;;  %v12816_v10 = vld [vmem:[#allocation43_spill] sm:$0xff]  ;;  %v10857_v21 = vpop.permute.xlu0 %4950  ;;  %s11625_s18 = sld [smem:[#allocation2 + $0x59]] }
 0x812   : > { %vm12811_vm8 = vnez %v12810_v1  ;;  %v12812_v26 = vld [vmem:[#allocation41_spill] sm:$0xff]  ;;  %v5561_v37 = vrot.slane %v5554_v49, %v9525_v17  ;;  %v5614_v19 = vrot.slane %v5607_v55, %v9525_v17  ;;  %vm12817_vm7 = vnez %v12816_v10 }
 0x813   : > { %v5387_v6 = vsel %vm12811_vm8, %v5385_v41, 0.0  ;;  %vm12813_vm9 = vnez %v12812_v26  ;;  %v5503_v45 = vsel %vm12817_vm7, %v5501_v22, 0.0  ;;  %v5727_v46 = vcombine.low %v5722_v7, %v5723_v30  ;;  %v10859_v41 = vpop.permute.xlu1 %4948  ;;  %v12822_v22 = vld [vmem:[#allocation72_spill] sm:$0xff]  ;;  %v12823_v7 = vld [vmem:[#allocation73_spill] sm:$0xff] }
 0x814   : > { %v5445_v28 = vsel %vm12813_vm9, %v5443_v38, 0.0  ;;  %v12818_v32 = vstv %s9638_s26  ;;  %v12820_v38 = vstv %s9652_s1  ;;  %v5674_v55 = vrot.slane %v5667_v44, %v9525_v17  ;;  %s10882_s1 = sld [smem:[#allocation2 + $0x42]] }
 0x815   : > { %v10863_v26 = vmul.f32 %v12818_v32, %v5209_v24  ;;  %v10867_v49 = vmul.f32 %v12820_v38, %v5269_v48  ;;  %vm12824_vm14 = vcmp.lt.s32.totalorder %v12592_v9, 97  ;;  %v12826_v48 = vstv %s12814_s14  ;;  %s10904_s26 = sld [smem:[#allocation2 + $0x43]] }
 0x816   : > { %v5782_v30 = vsel %vm12824_vm14, %v12823_v7, %v12822_v22  ;;  %vm12825_vm7 = vmmov %vm12824_vm14  ;;  %v10886_v32 = vmul.f32 %v12826_v48, %v5329_v53  ;;  %v12828_v38 = vstv %s12815_s2  ;;  %vm12832_vm14 = vcmp.lt.s32.totalorder %v12592_v9, 18  ;;  %s11677_s14 = sld [smem:[#allocation2 + $0x5c]] }
 0x817   : > { %12819 = vst [vmem:[#allocation27_spill] sm:$0xff] %v10863_v26  ;;  %12821 = vst [vmem:[#allocation20_spill] sm:$0xff] %v10867_v49  ;;  %v5783_v24 = vsel %vm12825_vm7, %v12822_v22, %v12823_v7  ;;  %v10890_v10 = vmul.f32 %v12828_v38, %v5387_v6  ;;  %v12830_v49 = vstv %s9711_s8  ;;  %v4538_v1 = vsel %vm12832_vm14, %v10502_v35, %v10500_v54  ;;  %v10933_v48 = vpop.permute.xlu1 %5006  ;;  %v12844_v38 = vld [vmem:[#allocation75_spill] sm:$0xff]  ;;  %s11067_s8 = sld [smem:[#allocation2 + $0x46]] }
 0x818   : > { %12827 = vst [vmem:[#allocation25_spill] sm:$0xff] %v10886_v32  ;;  %v10894_v44 = vmul.f32 %v12830_v49, %v5445_v28  ;;  %vm12833_vm7 = vmmov %vm12832_vm14  ;;  %v12834_v53 = vstv %s9732_s15  ;;  %v5621_v6 = vrot.slane %v5614_v19, %v9525_v17  ;;  %vm12837_vm3 = vcmp.lt.s32.totalorder %v12592_v9, 17  ;;  %v12847_v28 = vld [vmem:[#allocation76_spill] sm:$0xff]  ;;  %s10968_s15 = sld [smem:[#allocation2 + $0x44]] }
 0x819   : > { %12829 = vst [vmem:[#allocation24_spill] sm:$0xff] %v10890_v10  ;;  %v4539_v22 = vsel %vm12833_vm7, %v10500_v54, %v10502_v35  ;;  %v10908_v7 = vmul.f32 %v12834_v53, %v5503_v45  ;;  %vm12836_vm14 = vmand %vm12797_vm12, %vm9814_vm1  ;;  %v5734_v54 = vrot.slane %v5727_v46, %v9525_v17  ;;  %v5787_v35 = vcombine.low %v5782_v30, %v5783_v24  ;;  %v10931_v45 = vpop.permute.xlu0 %5008  ;;  %v12843_v24 = vld [vmem:[#allocation74_spill] sm:$0xff]  ;;  %s11687_s2 = sld [smem:[#allocation2 + $0x5d]] }
 0x81a   : > { %12831 = vst [vmem:[#allocation47_spill] sm:$0xff] %v10894_v44  ;;  %v5563_v49 = vsel %vm12836_vm14, %v5561_v37, 0.0  ;;  %v4596_v19 = vsel %vm12837_vm3, %v10556_v56, %v10554_v60  ;;  %vm12838_vm9 = vmmov %vm12837_vm3  ;;  %vm12839_vm14 = vcmp.le.s32.totalorder %v10766_v3, 13  ;;  %vm12840_vm7 = vcmp.ge.s32.totalorder %v10766_v3, 4294967294 }
 0x81b   : > { %12835 = vst [vmem:[#allocation49_spill] sm:$0xff] %v10908_v7  ;;  %v4597_v37 = vsel %vm12838_vm9, %v10554_v60, %v10556_v56  ;;  %vm10939_vm8 = vmand %vm12840_vm7, %vm12839_vm14  ;;  %v5681_v30 = vrot.slane %v5674_v55, %v9525_v17  ;;  %vm12845_vm3 = vcmp.lt.s32.totalorder %v12592_v9, 96  ;;  %v4542_v56 = vcombine.low %v4539_v22, %v4538_v1  ;;  %v12848_v7 = vld [vmem:[#allocation77_spill] sm:$0xff] }
 0x81c   : > { %v5842_v53 = vsel %vm12845_vm3, %v12844_v38, %v12843_v24  ;;  %vm12846_vm9 = vmmov %vm12845_vm3  ;;  %vm12849_vm7 = vcmp.lt.s32.totalorder %v12592_v9, 95  ;;  %vm12851_vm3 = vcmp.lt.s32.totalorder %v12592_v9, 16  ;;  %v12858_v26 = vstv %s9772_s21  ;;  %s11024_s21 = sld [smem:[#allocation2 + $0x45]] }
 0x81d   : > { %v5843_v60 = vsel %vm12846_vm9, %v12843_v24, %v12844_v38  ;;  %v5902_v44 = vsel %vm12849_vm7, %v12848_v7, %v12847_v28  ;;  %vm12850_vm14 = vmmov %vm12849_vm7  ;;  %v4654_v10 = vsel %vm12851_vm3, %v10596_v8, %v10594_v23  ;;  %v4600_v24 = vcombine.low %v4597_v37, %v4596_v19  ;;  %v10996_v19 = vpop.permute.xlu1 %5093 }
 0x81e   : > { %v5903_v55 = vsel %vm12850_vm14, %v12847_v28, %v12848_v7  ;;  %vm12852_vm9 = vmmov %vm12851_vm3  ;;  %v12853_v38 = vstv %s9753_s25  ;;  %vm12856_vm3 = vcmp.lt.s32.totalorder %v12592_v9, 15  ;;  %v5847_v37 = vcombine.low %v5842_v53, %v5843_v60  ;;  %s11279_s25 = sld [smem:[#allocation2 + $0x4a]] }
 0x81f   : > { %v4655_v1 = vsel %vm12852_vm9, %v10594_v23, %v10596_v8  ;;  %v10973_v32 = vmul.f32 %v12853_v38, %v5563_v49  ;;  %vm12855_vm7 = vmand %vm12797_vm12, %vm9872_vm10  ;;  %v5741_v23 = vrot.slane %v5734_v54, %v9525_v17  ;;  %v5794_v8 = vrot.slane %v5787_v35, %v9525_v17 }
 0x820   : > { %v5623_v7 = vsel %vm12855_vm7, %v5621_v6, 0.0  ;;  %vm12225_vm14 = vmand %vm10939_vm8, %vm9698_vm2  ;;  %v4712_v28 = vsel %vm12856_vm3, %v10651_v43, %v10649_v15  ;;  %v10994_v6 = vpop.permute.xlu0 %5095  ;;  %v5907_v38 = vcombine.low %v5902_v44, %v5903_v55  ;;  %v4549_v54 = vrot.slane %v4542_v56, %v9525_v17 }
 0x821   : > { %12854 = vst [vmem:[#allocation36_spill] sm:$0xff] %v10973_v32  ;;  %vm12857_vm9 = vmmov %vm12856_vm3  ;;  %v4658_v22 = vcombine.low %v4655_v1, %v4654_v10  ;;  %v4675_v35 = vstv %s10882_s1  ;;  %v11007_v57 = vmul.f32 %v12858_v26, %v5623_v7  ;;  %vm12859_vm3 = vcmp.lt.s32.totalorder %v12592_v9, 14  ;;  %v11036_v55 = vpop.permute.xlu1 %5153  ;;  %v12864_v7 = vld [vmem:[#allocation79_spill] sm:$0xff]  ;;  %s11723_s1 = sld [smem:[#allocation2 + $0x5f]] }
 0x822   : > { %v4713_v49 = vsel %vm12857_vm9, %v10649_v15, %v10651_v43  ;;  %vm12226_vm7 = vmand %vm10939_vm8, %vm9719_vm5  ;;  %v5683_v15 = vsel %vm12225_vm14, %v5681_v30, 0.0  ;;  %v4607_v43 = vrot.slane %v4600_v24, %v9525_v17  ;;  %v4772_v10 = vsel %vm12859_vm3, %v10698_v20, %v10696_v18 }
 0x823   : > { %v4716_v44 = vcombine.low %v4713_v49, %v4712_v28  ;;  %vm12860_vm9 = vmmov %vm12859_vm3  ;;  %v5801_v53 = vrot.slane %v5794_v8, %v9525_v17  ;;  %vm12861_vm14 = vcmp.lt.s32.totalorder %v12592_v9, 13  ;;  %v5914_v1 = vrot.slane %v5907_v38, %v9525_v17 }
 0x824   : > { %v4773_v26 = vsel %vm12860_vm9, %v10696_v18, %v10698_v20  ;;  %v4832_v30 = vsel %vm12861_vm14, %v10747_v58, %v10745_v34  ;;  %vm12862_vm3 = vmmov %vm12861_vm14  ;;  %v11034_v56 = vpop.permute.xlu0 %5155  ;;  %v5743_v18 = vsel %vm12226_vm7, %v5741_v23, 0.0  ;;  %v5854_v20 = vrot.slane %v5847_v37, %v9525_v17 }
 0x825   : > { %v4833_v60 = vsel %vm12862_vm3, %v10745_v34, %v10747_v58  ;;  %v4556_v24 = vrot.slane %v4549_v54, %v9525_v17  ;;  %v4665_v34 = vrot.slane %v4658_v22, %v9525_v17  ;;  %vm12227_vm9 = vmand %vm10939_vm8, %vm12620_vm6  ;;  %v12863_v58 = vld [vmem:[#allocation78_spill] sm:$0xff]  ;;  %vm12865_vm3 = vcmp.lt.s32.totalorder %v12592_v9, 94 }
 0x826   : > { %v5962_v23 = vsel %vm12865_vm3, %v12864_v7, %v12863_v58  ;;  %v4776_v28 = vcombine.low %v4773_v26, %v4772_v10  ;;  %v12866_v49 = vstv %s9789_s28  ;;  %vm12867_vm7 = vmmov %vm12865_vm3  ;;  %v4614_v38 = vrot.slane %v4607_v43, %v9525_v17  ;;  %s11099_s28 = sld [smem:[#allocation2 + $0x47]] }
 0x827   : > { %v11059_v37 = vmul.f32 %v12866_v49, %v5683_v15  ;;  %v5963_v22 = vsel %vm12867_vm7, %v12863_v58, %v12864_v7  ;;  %v4723_v54 = vrot.slane %v4716_v44, %v9525_v17  ;;  %v4836_v32 = vcombine.low %v4833_v60, %v4832_v30  ;;  %v11079_v58 = vpop.permute.xlu1 %5213 }
 0x828   : > { %vm12868_vm3 = vcmp.lt.s32.totalorder %v12592_v9, 3  ;;  %v11077_v26 = vpop.permute.xlu0 %5215  ;;  %v12870_v43 = vstv %s9818_s17  ;;  %v5803_v44 = vsel %vm12227_vm9, %v5801_v53, 0.0  ;;  %v5861_v30 = vrot.slane %v5854_v20, %v9525_v17  ;;  %s11305_s17 = sld [smem:[#allocation2 + $0x4b]] }
 0x829   : > { %v4892_v10 = vsel %vm12868_vm3, %v10806_v36, %v10800_v0  ;;  %vm12869_vm14 = vmmov %vm12868_vm3  ;;  %v11083_v7 = vmul.f32 %v12870_v43, %v5743_v18  ;;  %v5921_v60 = vrot.slane %v5914_v1, %v9525_v17  ;;  %v5967_v18 = vcombine.low %v5962_v23, %v5963_v22 }
 0x82a   : > { %v4893_v15 = vsel %vm12869_vm14, %v10800_v0, %v10806_v36  ;;  %vm12871_vm14 = vmand %vm12703_vm0, %vm9719_vm5  ;;  %v4672_v36 = vrot.slane %v4665_v34, %v9525_v17  ;;  %v4783_v53 = vrot.slane %v4776_v28, %v9525_v17  ;;  %vm12872_vm3 = vcmp.lt.s32.totalorder %v12592_v9, 2 }
 0x82b   : > { %v4558_v0 = vsel %vm12871_vm14, %v4556_v24, 0.0  ;;  %v4952_v20 = vsel %vm12872_vm3, %v10859_v41, %v10857_v21  ;;  %vm12873_vm9 = vmmov %vm12872_vm3  ;;  %v4616_v24 = vsel %vm12723_vm13, %v4614_v38, 0.0  ;;  %v4730_v34 = vrot.slane %v4723_v54, %v9525_v17  ;;  %v11135_v38 = vpop.permute.xlu1 %5273 }
 0x82c   : > { %v4953_v1 = vsel %vm12873_vm9, %v10857_v21, %v10859_v41  ;;  %vm12229_vm14 = vmand %vm10939_vm8, %vm12627_vm15  ;;  %v4843_v23 = vrot.slane %v4836_v32, %v9525_v17  ;;  %v4896_v28 = vcombine.low %v4893_v15, %v4892_v10  ;;  %v12874_v21 = vstv %s10793_s20  ;;  %v11133_v32 = vpop.permute.xlu0 %5275  ;;  %s11647_s20 = sld [smem:[#allocation2 + $0x5b]] }
 0x82d   : > { %vm12228_vm3 = vmand %vm10939_vm8, %vm12630_vm4  ;;  %v4560_v41 = vmul.f32 %v12874_v21, %v4558_v0  ;;  %v4853_v49 = vstv %s11024_s21  ;;  %vm12875_vm9 = vcmp.lt.s32.totalorder %v12592_v9, 1  ;;  %vm12877_vm7 = vnez %v12724_v13  ;;  %s11786_s21 = sld [smem:[#allocation2 + $0x61]] }
 0x82e   : > { %v5010_v4 = vsel %vm12875_vm9, %v10933_v48, %v10931_v45  ;;  %vm12876_vm13 = vmmov %vm12875_vm9  ;;  %v4674_v54 = vsel %vm12877_vm7, %v4672_v36, 0.0  ;;  %v4956_v10 = vcombine.low %v4953_v1, %v4952_v20  ;;  %v12878_v15 = vstv %s9836_s9  ;;  %s11164_s9 = sld [smem:[#allocation2 + $0x48]] }
 0x82f   : > { %v5011_v22 = vsel %vm12876_vm13, %v10931_v45, %v10933_v48  ;;  %v11141_v43 = vmul.f32 %v12878_v15, %v5803_v44  ;;  %v5863_v0 = vsel %vm12229_vm14, %v5861_v30, 0.0  ;;  %v11149_v45 = vrot.slane %v5967_v18, %v9525_v17 }
 0x830   : > { %vm12231_vm9 = vcmp.lt.s32.totalorder %v12592_v9, 82  ;;  %v12880_v48 = vstv %s10853_s19  ;;  %v4790_v36 = vrot.slane %v4783_v53, %v9525_v17  ;;  %v5923_v44 = vsel %vm12228_vm3, %v5921_v60, 0.0  ;;  %v12882_v53 = vld [vmem:[#allocation80_spill] sm:$0xff]  ;;  %s11703_s19 = sld [smem:[#allocation2 + $0x5e]] }
 0x831   : > { %12879 = vst [vmem:[#allocation35_spill] sm:$0xff] %v11141_v43  ;;  %v4618_v13 = vmul.f32 %v12880_v48, %v4616_v24  ;;  %vm12881_vm7 = vnez %v12748_v11  ;;  %v4850_v18 = vrot.slane %v4843_v23, %v9525_v17  ;;  %v4903_v20 = vrot.slane %v4896_v28, %v9525_v17  ;;  %v12883_v24 = vld [vmem:[#allocation81_spill] sm:$0xff]  ;;  %v11177_v23 = vpop.permute.xlu0 %5335  ;;  %v11179_v28 = vpop.permute.xlu1 %5333 }
 0x832   : > { %v4732_v30 = vsel %vm12881_vm7, %v4730_v34, 0.0  ;;  %v5014_v1 = vcombine.low %v5011_v22, %v5010_v4  ;;  %vm12884_vm13 = vcmp.lt.s32.totalorder %v12592_v9, 93  ;;  %v4561_v60 = vadd.f32 %v4560_v41, %v10482_v25 }
 0x833   : > { %v6022_v21 = vsel %vm12884_vm13, %v12883_v24, %v12882_v53  ;;  %vm12885_vm3 = vmmov %vm12884_vm13  ;;  %v4676_v34 = vmul.f32 %v4675_v35, %v4674_v54  ;;  %v4913_v15 = vstv %s11067_s8  ;;  %v4973_v4 = vstv %s11099_s28  ;;  %s13006_s8 = sld [smem:[#allocation12_spill]] }
 0x834   : > { %v6023_v11 = vsel %vm12885_vm3, %v12882_v53, %v12883_v24  ;;  %v4963_v22 = vrot.slane %v4956_v10, %v9525_v17  ;;  %v12886_v48 = vstv %s9865_s10  ;;  %v4619_v43 = vadd.f32 %v4618_v13, %v10528_v29  ;;  %vm12888_vm3 = vmand %vm12703_vm0, %vm9814_vm1  ;;  %v12891_v24 = vld [vmem:[#allocation85_spill] sm:$0xff]  ;;  %s11356_s10 = sld [smem:[#allocation2 + $0x4c]] }
 0x835   : > { %v11186_v8 = vmul.f32 %v12886_v48, %v5863_v0  ;;  %v12887_v53 = vstv %s10904_s26  ;;  %v4792_v35 = vsel %vm12888_vm3, %v4790_v36, 0.0  ;;  %v12889_v41 = vstv %s9940_s0  ;;  %vm12890_vm13 = vmand %vm12703_vm0, %vm9872_vm10  ;;  %v12892_v48 = vld [vmem:[#allocation86_spill] sm:$0xff]  ;;  %s11381_s0 = sld [smem:[#allocation2 + $0x4d]] }
 0x836   : > { %v4734_v25 = vmul.f32 %v12887_v53, %v4732_v30  ;;  %v11199_v54 = vmul.f32 %v12889_v41, %v5923_v44  ;;  %v6027_v10 = vcombine.low %v6022_v21, %v6023_v11  ;;  %v4852_v0 = vsel %vm12890_vm13, %v4850_v18, 0.0  ;;  %v11218_v18 = vpop.permute.xlu0 %5393  ;;  %s11754_s26 = sld [smem:[#allocation2 + $0x60]] }
 0x837   : > { %v4910_v29 = vrot.slane %v4903_v20, %v9525_v17  ;;  %v5021_v13 = vrot.slane %v5014_v1, %v9525_v17  ;;  %v5981_v30 = vrot.slane %v11149_v45, %v9525_v17  ;;  %vm12893_vm3 = vcmp.lt.s32.totalorder %v12592_v9, 83  ;;  %v11220_v20 = vpop.permute.xlu1 %5391 }
 0x838   : > { %v6082_v36 = vsel %vm12893_vm3, %v12892_v48, %v12891_v24  ;;  %vm541_vm7 = vcmp.le.s32.totalorder %v10766_v3, 12  ;;  %v4562_v61 = vadd.f32 %v4561_v60, %v10603_v62  ;;  %v4677_v44 = vadd.f32 %v4676_v34, %v10532_v16 }
 0x839   : > { %v12894_v1 = vstv %s10968_s15  ;;  %v4970_v21 = vrot.slane %v4963_v22, %v9525_v17  ;;  %vm12895_vm0 = vcmp.lt.s32.totalorder %v12592_v9, 127  ;;  %v6083_v16 = vsel %vm12893_vm3, %v12891_v24, %v12892_v48  ;;  %s11770_s15 = sld [smem:[#allocation2 + $0x30]]  ;;  %s512_s28 = sand.u32 1, %s13006_s8  }
 0x83a   : > { %v4794_v45 = vmul.f32 %v12894_v1, %v4792_v35  ;;  %v5097_v11 = vsel %vm12895_vm0, %v10996_v19, %v10994_v6  ;;  %vm12896_vm13 = vmmov %vm12895_vm0  ;;  %v4620_v60 = vadd.f32 %v4619_v43, %v4562_v61  ;;  %v4735_v34 = vadd.f32 %v4734_v25, %v10668_v40 }
 0x83b   : > { %v5098_v62 = vsel %vm12896_vm13, %v10994_v6, %v10996_v19  ;;  %v4854_v53 = vmul.f32 %v4853_v49, %v4852_v0  ;;  %v6034_v22 = vrot.slane %v6027_v10, %v9525_v17  ;;  %vm12897_vm0 = vmand %vm12776_vm11, %vm9698_vm2  ;;  %v5031_v41 = vstv %s11164_s9  ;;  %v11254_v49 = vpop.permute.xlu0 %5451  ;;  %v11256_v25 = vpop.permute.xlu1 %5449  ;;  %v12900_v0 = vld [vmem:[#allocation23_spill] sm:$0xff]  ;;  %s6637_s9 = sshll.u32 %s512_s28, 6 }
 0x83c   : > { %v4912_v35 = vsel %vm12897_vm0, %v4910_v29, 0.0  ;;  %v5028_v6 = vrot.slane %v5021_v13, %v9525_v17  ;;  %v4678_v19 = vadd.f32 %v4677_v44, %v4620_v60  ;;  %v5101_v1 = vcombine.low %v5097_v11, %v5098_v62  ;;  %v12901_v29 = vld [vmem:[#allocation30_spill] sm:$0xff]  ;;  %vm12902_vm0 = vmand %vm12776_vm11, %vm9719_vm5 }
 0x83d   : > { %vm12898_vm13 = vcmp.lt.s32.totalorder %v12592_v9, 126  ;;  %v6087_v10 = vcombine.low %v6082_v36, %v6083_v16  ;;  %v6142_v13 = vsel %vm12231_vm9, %v12901_v29, %v12900_v0  ;;  %v4795_v24 = vadd.f32 %v4794_v45, %v10714_v12 }
 0x83e   : > { %v5157_v43 = vsel %vm12898_vm13, %v11036_v55, %v11034_v56  ;;  %vm12899_vm3 = vmmov %vm12898_vm13  ;;  %v4972_v48 = vsel %vm12902_vm0, %v4970_v21, 0.0  ;;  %v4855_v36 = vadd.f32 %v4854_v53, %v10718_v2  ;;  %v4914_v12 = vmul.f32 %v4913_v15, %v4912_v35  ;;  %v12906_v53 = vld [vmem:[#allocation91_spill] sm:$0xff] }
 0x83f   : > { %v5158_v40 = vsel %vm12899_vm3, %v11034_v56, %v11036_v55  ;;  %vm12230_vm13 = vmand %vm10939_vm8, %vm9814_vm1  ;;  %v6143_v56 = vsel %vm12231_vm9, %v12900_v0, %v12901_v29  ;;  %v4736_v55 = vadd.f32 %v4735_v34, %v4678_v19  ;;  %vm12903_vm3 = vnez %v12783_v31  ;;  %v11291_v31 = vpop.permute.xlu0 %5509  ;;  %v11293_v62 = vpop.permute.xlu1 %5507 }
 0x840   : > { %v5030_v61 = vsel %vm12903_vm3, %v5028_v6, 0.0  ;;  %v5161_v44 = vcombine.low %v5157_v43, %v5158_v40  ;;  %vm12904_vm0 = vcmp.lt.s32.totalorder %v12592_v9, 125  ;;  %v6041_v11 = vrot.slane %v6034_v22, %v9525_v17  ;;  %v12915_v40 = vld [vmem:[#allocation21_spill] sm:$0xff] }
 0x841   : > { %v5217_v45 = vsel %vm12904_vm0, %v11079_v58, %v11077_v26  ;;  %vm12905_vm14 = vmmov %vm12904_vm0  ;;  %v4974_v2 = vmul.f32 %v4973_v4, %v4972_v48  ;;  %v5108_v15 = vrot.slane %v5101_v1, %v9525_v17  ;;  %v5983_v16 = vsel %vm12230_vm13, %v5981_v30, 0.0 }
 0x842   : > { %v5218_v21 = vsel %vm12905_vm14, %v11077_v26, %v11079_v58  ;;  %v6094_v60 = vrot.slane %v6087_v10, %v9525_v17  ;;  %v6147_v34 = vcombine.low %v6142_v13, %v6143_v56  ;;  %v12907_v26 = vld [vmem:[#allocation92_spill] sm:$0xff]  ;;  %vm12908_vm14 = vcmp.lt.s32.totalorder %v12592_v9, 81  ;;  %vm12233_vm13 = vmand %vm10939_vm8, %vm9872_vm10 }
 0x843   : > { %v6202_v58 = vsel %vm12908_vm14, %v12907_v26, %v12906_v53  ;;  %v4796_v4 = vadd.f32 %v4795_v24, %v4736_v55  ;;  %vm12909_vm3 = vmmov %vm12908_vm14  ;;  %v4915_v30 = vadd.f32 %v4914_v12, %v10804_v39  ;;  %v5032_v35 = vmul.f32 %v5031_v41, %v5030_v61  ;;  %v11344_v13 = vpop.permute.xlu0 %5569  ;;  %v11346_v24 = vpop.permute.xlu1 %5567 }
 0x844   : > { %v6203_v22 = vsel %vm12909_vm3, %v12906_v53, %v12907_v26  ;;  %v5221_v6 = vcombine.low %v5217_v45, %v5218_v21  ;;  %vm12910_vm14 = vcmp.ge.s32.totalorder %v10766_v3, 4294967293  ;;  %v5168_v43 = vrot.slane %v5161_v44, %v9525_v17 }
 0x845   : > { %vm11321_vm9 = vmand %vm12910_vm14, %vm541_vm7  ;;  %v4856_v1 = vadd.f32 %v4855_v36, %v4796_v4  ;;  %vm12913_vm3 = vcmp.lt.s32.totalorder %v12592_v9, 115  ;;  %v4975_v10 = vadd.f32 %v4974_v2, %v12915_v40  ;;  %v5115_v3 = vrot.slane %v5108_v15, %v9525_v17 }
 0x846   : > { %v5277_v39 = vsel %vm12913_vm3, %v11135_v38, %v11133_v32  ;;  %vm12914_vm0 = vmmov %vm12913_vm3  ;;  %vm12916_vm7 = vcmp.lt.s32.totalorder %v12592_v9, 114  ;;  %v6207_v48 = vcombine.low %v6202_v58, %v6203_v22  ;;  %v6043_v56 = vsel %vm12233_vm13, %v6041_v11, 0.0  ;;  %v12919_v11 = vld [vmem:[#allocation33_spill] sm:$0xff] }
 0x847   : > { %v5278_v41 = vsel %vm12914_vm0, %v11133_v32, %v11135_v38  ;;  %v5337_v0 = vsel %vm12916_vm7, %v11179_v28, %v11177_v23  ;;  %vm12917_vm14 = vmmov %vm12916_vm7  ;;  %v6101_v32 = vrot.slane %v6094_v60, %v9525_v17  ;;  %v6154_v38 = vrot.slane %v6147_v34, %v9525_v17  ;;  %v5630_v34 = vpop.permute.xlu0 %5629  ;;  %v5628_v53 = vpop.permute.xlu1 %5627 }
 0x848   : > { %v5338_v29 = vsel %vm12917_vm14, %v11177_v23, %v11179_v28  ;;  %v4916_v55 = vadd.f32 %v4915_v30, %v4856_v1  ;;  %v5033_v36 = vadd.f32 %v5032_v35, %v10832_v14  ;;  %v5228_v23 = vrot.slane %v5221_v6, %v9525_v17  ;;  %vm12232_vm0 = vmand %vm11321_vm9, %vm9698_vm2 }
 0x849   : > { %v5281_v28 = vcombine.low %v5277_v39, %v5278_v41  ;;  %v5118_v12 = vstv %s11279_s25  ;;  %v5175_v61 = vrot.slane %v5168_v43, %v9525_v17  ;;  %v5341_v44 = vcombine.low %v5337_v0, %v5338_v29 }
 0x84a   : > { %v12918_v45 = vstv %s10009_s27  ;;  %v4976_v14 = vadd.f32 %v4975_v10, %v4916_v55  ;;  %vm12920_vm3 = vnez %v12919_v11  ;;  %vm12921_vm7 = vcmp.lt.s32.totalorder %v12592_v9, 113  ;;  %s11397_s27 = sld [smem:[#allocation2 + $0x4e]] }
 0x84b   : > { %v11367_v21 = vmul.f32 %v12918_v45, %v5983_v16  ;;  %v5117_v2 = vsel %vm12920_vm3, %v5115_v3, 0.0  ;;  %v5395_v15 = vsel %vm12921_vm7, %v11220_v20, %v11218_v18  ;;  %vm12922_vm14 = vmmov %vm12921_vm7  ;;  %v6161_v26 = vrot.slane %v6154_v38, %v9525_v17  ;;  %v5690_v0 = vpop.permute.xlu0 %5689  ;;  %v5688_v29 = vpop.permute.xlu1 %5687  ;;  %v12930_v38 = vld [vmem:[#allocation96_spill] sm:$0xff] }
 0x84c   : > { %v5396_v60 = vsel %vm12922_vm14, %v11218_v18, %v11220_v20  ;;  %v5178_v16 = vstv %s11305_s17  ;;  %v12923_v58 = vstv %s10060_s13  ;;  %v6103_v22 = vsel %vm12232_vm0, %v6101_v32, 0.0  ;;  %vm12234_vm3 = vmand %vm11321_vm9, %vm9719_vm5  ;;  %v12929_v32 = vld [vmem:[#allocation95_spill] sm:$0xff]  ;;  %s11433_s13 = sld [smem:[#allocation2 + $0x4f]]  ;;  %s514_s17 = scalar_lea.vmem [#allocation7], %s6637_s9 }
 0x84d   : > { %v11385_v4 = vmul.f32 %v12923_v58, %v6043_v56  ;;  %v11393_v30 = vrot.slane %v6207_v48, %v9525_v17  ;;  %v5034_v18 = vadd.f32 %v5033_v36, %v4976_v14  ;;  %v5235_v20 = vrot.slane %v5228_v23, %v9525_v17  ;;  %vm12924_vm7 = vmand %vm12776_vm11, %vm9814_vm1  ;;  %v12935_v14 = vld [vmem:[#allocation89_spill] sm:$0xff] }
 0x84e   : > { %v5288_v35 = vrot.slane %v5281_v28, %v9525_v17  ;;  %v5119_v6 = vmul.f32 %v5118_v12, %v5117_v2  ;;  %v5177_v1 = vsel %vm12924_vm7, %v5175_v61, 0.0  ;;  %v5348_v43 = vrot.slane %v5341_v44, %v9525_v17 }
 0x84f   : > { %v5399_v39 = vcombine.low %v5395_v15, %v5396_v60  ;;  %vm12925_vm14 = vcmp.lt.s32.totalorder %v12592_v9, 112  ;;  %vm12927_vm13 = vcmp.lt.s32.totalorder %v12592_v9, 111  ;;  %v5238_v55 = vstv %s11356_s10  ;;  %v5750_v15 = vpop.permute.xlu0 %5749  ;;  %v5748_v60 = vpop.permute.xlu1 %5747  ;;  %s6545_s10 = sshll.u32 %s514_s17, 4  ;;  %s11859_s10 = int_to_ptr.vmem [resolvable:$true] %s6545_s10 }
 0x850   : > { %v5453_v41 = vsel %vm12925_vm14, %v11256_v25, %v11254_v49  ;;  %vm12926_vm0 = vmmov %vm12925_vm14  ;;  %v5511_v10 = vsel %vm12927_vm13, %v11293_v62, %v11291_v31  ;;  %vm12931_vm14 = vcmp.lt.s32.totalorder %v12592_v9, 80  ;;  %v5295_v23 = vrot.slane %v5288_v35, %v9525_v17 }
 0x851   : > { %v5454_v40 = vsel %vm12926_vm0, %v11254_v49, %v11256_v25  ;;  %vm12928_vm7 = vmmov %vm12927_vm13  ;;  %v6262_v48 = vsel %vm12931_vm14, %v12930_v38, %v12929_v32  ;;  %v12933_v25 = vstv %s10085_s6  ;;  %v5355_v28 = vrot.slane %v5348_v43, %v9525_v17  ;;  %s11464_s6 = sld [smem:[#allocation2 + $0x50]] }
 0x852   : > { %v5512_v3 = vsel %vm12928_vm7, %v11291_v31, %v11293_v62  ;;  %vm12932_vm0 = vmmov %vm12931_vm14  ;;  %v11437_v56 = vmul.f32 %v12933_v25, %v6103_v22  ;;  %v6163_v31 = vsel %vm12234_vm3, %v6161_v26, 0.0  ;;  %v5179_v62 = vmul.f32 %v5178_v16, %v5177_v1 }
 0x853   : > { %v6263_v49 = vsel %vm12932_vm0, %v12929_v32, %v12930_v38  ;;  %vm12934_vm13 = vmand %vm12776_vm11, %vm9872_vm10  ;;  %v5406_v12 = vrot.slane %v5399_v39, %v9525_v17  ;;  %v5457_v61 = vcombine.low %v5453_v41, %v5454_v40  ;;  %v5515_v44 = vcombine.low %v5511_v10, %v5512_v3  ;;  %v5810_v3 = vpop.permute.xlu0 %5809  ;;  %v5808_v32 = vpop.permute.xlu1 %5807 }
 0x854   : > { %v5237_v36 = vsel %vm12934_vm13, %v5235_v20, 0.0  ;;  %v6221_v45 = vrot.slane %v11393_v30, %v9525_v17  ;;  %v12936_v11 = vrot.slane %v12935_v14, %v9525_v17  ;;  %v5120_v2 = vadd.f32 %v5119_v6, %v10836_v59  ;;  %vm12941_vm14 = vmand %vm12797_vm12, %vm9698_vm2 }
 0x855   : > { %v12937_v26 = vstv %s10143_s3  ;;  %v6267_v58 = vcombine.low %v6262_v48, %v6263_v49  ;;  %v5298_v22 = vstv %s11381_s0  ;;  %vm12938_vm11 = vcmp.lt.s32.totalorder %v12592_v9, 110  ;;  %s11481_s3 = sld [smem:[#allocation2 + $0x51]]  ;;  %vm12942_vm13 = vmand %vm12797_vm12, %vm9719_vm5 }
 0x856   : > { %v5063_v33 = vadd.f32 %v12936_v11, %v5034_v18  ;;  %v11461_v16 = vmul.f32 %v12937_v26, %v6163_v31  ;;  %v5571_v30 = vsel %vm12938_vm11, %v11346_v24, %v11344_v13  ;;  %vm12939_vm7 = vmmov %vm12938_vm11  ;;  %v5180_v59 = vadd.f32 %v5179_v62, %v10840_v51  ;;  %v12947_v62 = vld [vmem:[#allocation27_spill] sm:$0xff] }
 0x857   : > { %v5572_v18 = vsel %vm12939_vm7, %v11344_v13, %v11346_v24  ;;  %v5239_v20 = vmul.f32 %v5238_v55, %v5237_v36  ;;  %v5297_v6 = vsel %vm12941_vm14, %v5295_v23, 0.0  ;;  %v5358_v1 = vstv %s11397_s27  ;;  %v5870_v11 = vpop.permute.xlu0 %5869 }
 0x858   : > { %vm6321_vm0 = vcmp.lt.s32.totalorder %v12592_v9, 79  ;;  %v5357_v13 = vsel %vm12942_vm13, %v5355_v28, 0.0  ;;  %v5413_v51 = vrot.slane %v5406_v12, %v9525_v17  ;;  %v5464_v24 = vrot.slane %v5457_v61, %v9525_v17 }
 0x859   : > { %v5522_v43 = vrot.slane %v5515_v44, %v9525_v17  ;;  %v5121_v39 = vadd.f32 %v5120_v2, %v5063_v33  ;;  %v5575_v41 = vcombine.low %v5571_v30, %v5572_v18  ;;  %vm12943_vm11 = vcmp.lt.s32.totalorder %v12592_v9, 109  ;;  %v5868_v33 = vpop.permute.xlu1 %5867  ;;  %v12955_v18 = vld [vmem:[#allocation25_spill] sm:$0xff] }
 0x85a   : > { %v5631_v40 = vsel %vm12943_vm11, %v5628_v53, %v5630_v34  ;;  %vm12944_vm7 = vmmov %vm12943_vm11  ;;  %v11497_v38 = vrot.slane %v6267_v58, %v9525_v17  ;;  %v5416_v48 = vstv %s11433_s13  ;;  %vm12945_vm14 = vcmp.lt.s32.totalorder %v12592_v9, 99  ;;  %s13014_s13 = sld [smem:[#allocation119_spill]] }
 0x85b   : > { %v5632_v10 = vsel %vm12944_vm7, %v5630_v34, %v5628_v53  ;;  %v5691_v49 = vsel %vm12945_vm14, %v5688_v29, %v5690_v0  ;;  %vm12946_vm13 = vmmov %vm12945_vm14  ;;  %v5181_v31 = vadd.f32 %v5180_v59, %v5121_v39  ;;  %v5240_v55 = vadd.f32 %v5239_v20, %v12947_v62  ;;  %v12948_v34 = vld [vmem:[#allocation37_spill] sm:$0xff]  ;;  %v12965_v62 = vld [vmem:[#allocation100_spill] sm:$0xff] }
 0x85c   : > { %v5692_v25 = vsel %vm12946_vm13, %v5690_v0, %v5688_v29  ;;  %v5299_v36 = vmul.f32 %v5298_v22, %v5297_v6  ;;  %v5359_v23 = vmul.f32 %v5358_v1, %v5357_v13  ;;  %vm12235_vm11 = vmand %vm11321_vm9, %vm12620_vm6  ;;  %vm12949_vm7 = vnez %v12948_v34  ;;  %v12956_v1 = vld [vmem:[#allocation41_spill] sm:$0xff] }
 0x85d   : > { %v5415_v53 = vsel %vm12949_vm7, %v5413_v51, 0.0  ;;  %v5471_v28 = vrot.slane %v5464_v24, %v9525_v17  ;;  %v5529_v0 = vrot.slane %v5522_v43, %v9525_v17  ;;  %v5635_v29 = vcombine.low %v5631_v40, %v5632_v10  ;;  %v12958_v43 = vld [vmem:[#allocation43_spill] sm:$0xff]  ;;  %v5930_v10 = vpop.permute.xlu0 %5929 }
 0x85e   : > { %v5582_v12 = vrot.slane %v5575_v41, %v9525_v17  ;;  %v5695_v61 = vcombine.low %v5691_v49, %v5692_v25  ;;  %vm12950_vm14 = vcmp.lt.s32.totalorder %v12592_v9, 98  ;;  %v5474_v2 = vstv %s11464_s6 }
 0x85f   : > { %v5751_v44 = vsel %vm12950_vm14, %v5748_v60, %v5750_v15  ;;  %vm12951_vm13 = vmmov %vm12950_vm14  ;;  %vm12952_vm7 = vcmp.lt.s32.totalorder %v12592_v9, 97  ;;  %v11532_v22 = vsel %vm12235_vm11, %v6221_v45, 0.0  ;;  %v5241_v30 = vadd.f32 %v5240_v55, %v5181_v31  ;;  %v12964_v31 = vld [vmem:[#allocation99_spill] sm:$0xff] }
 0x860   : > { %v5752_v14 = vsel %vm12951_vm13, %v5750_v15, %v5748_v60  ;;  %v5811_v26 = vsel %vm12952_vm7, %v5808_v32, %v5810_v3  ;;  %vm12953_vm3 = vmmov %vm12952_vm7  ;;  %v12954_v15 = vld [vmem:[#allocation20_spill] sm:$0xff]  ;;  %v5360_v59 = vadd.f32 %v5359_v23, %v12955_v18  ;;  %v5532_v20 = vstv %s11481_s3  ;;  %s13017_s3 = sld [smem:[#allocation18_spill]] }
 0x861   : > { %v5812_v58 = vsel %vm12953_vm3, %v5810_v3, %v5808_v32  ;;  %v5300_v60 = vadd.f32 %v5299_v36, %v12954_v15  ;;  %v5417_v6 = vmul.f32 %v5416_v48, %v5415_v53  ;;  %vm12957_vm14 = vnez %v12956_v1  ;;  %v5928_v3 = vpop.permute.xlu1 %5927  ;;  %v12966_v53 = vld [vmem:[#allocation24_spill] sm:$0xff] }
 0x862   : > { %v5473_v13 = vsel %vm12957_vm14, %v5471_v28, 0.0  ;;  %v5642_v51 = vrot.slane %v5635_v29, %v9525_v17  ;;  %v5755_v24 = vcombine.low %v5751_v44, %v5752_v14  ;;  %vm12959_vm3 = vnez %v12958_v43  ;;  %v12972_v43 = vld [vmem:[#allocation49_spill] sm:$0xff] }
 0x863   : > { %v5531_v45 = vsel %vm12959_vm3, %v5529_v0, 0.0  ;;  %v5589_v39 = vrot.slane %v5582_v12, %v9525_v17  ;;  %v5702_v41 = vrot.slane %v5695_v61, %v9525_v17  ;;  %v5815_v40 = vcombine.low %v5811_v26, %v5812_v58 }
 0x864   : > { %vm12960_vm13 = vcmp.lt.s32.totalorder %v12592_v9, 96  ;;  %vm12962_vm14 = vcmp.lt.s32.totalorder %v12592_v9, 95  ;;  %v11558_v55 = vsel %vm6321_vm0, %v12965_v62, %v12964_v31  ;;  %v5301_v36 = vadd.f32 %v5300_v60, %v5241_v30  ;;  %v12968_v60 = vld [vmem:[#allocation47_spill] sm:$0xff] }
 0x865   : > { %v5871_v32 = vsel %vm12960_vm13, %v5868_v33, %v5870_v11  ;;  %vm12961_vm7 = vmmov %vm12960_vm13  ;;  %v5931_v49 = vsel %vm12962_vm14, %v5928_v3, %v5930_v10  ;;  %v5475_v23 = vmul.f32 %v5474_v2, %v5473_v13  ;;  %v5592_v34 = vstv %s11505_s30  ;;  %v5988_v2 = vpop.permute.xlu1 %5987  ;;  %s11861_s30 = scalar_lea.sflag [#allocation3], %s512_s28 }
 0x866   : > { %v5872_v48 = vsel %vm12961_vm7, %v5870_v11, %v5868_v33  ;;  %vm12963_vm11 = vmmov %vm12962_vm14  ;;  %v5418_v28 = vadd.f32 %v5417_v6, %v12966_v53  ;;  %v5533_v0 = vmul.f32 %v5532_v20, %v5531_v45  ;;  %v5649_v29 = vrot.slane %v5642_v51, %v9525_v17  ;;  %v5990_v33 = vpop.permute.xlu0 %5989  ;;  %p13020_p12 = scmp.ne.s32.totalorder %s13017_s3, 0 }
 0x867   : > { %v5932_v25 = vsel %vm12963_vm11, %v5930_v10, %v5928_v3  ;;  %v5762_v12 = vrot.slane %v5755_v24, %v9525_v17  ;;  %vm12967_vm11 = vmand %vm12797_vm12, %vm9814_vm1  ;;  %v5709_v44 = vrot.slane %v5702_v41, %v9525_v17  ;;  %v5875_v14 = vcombine.low %v5871_v32, %v5872_v48 }
 0x868   : > { %v5591_v61 = vsel %vm12967_vm11, %v5589_v39, 0.0  ;;  %v5935_v11 = vcombine.low %v5931_v49, %v5932_v25  ;;  %v11578_v26 = vsel %vm6321_vm0, %v12964_v31, %v12965_v62  ;;  %v5361_v58 = vadd.f32 %v5360_v59, %v5301_v36  ;;  %vm12971_vm14 = vmand %vm12797_vm12, %vm9872_vm10 }
 0x869   : > { %v5652_v30 = vstv %s11521_s16  ;;  %v5822_v15 = vrot.slane %v5815_v40, %v9525_v17  ;;  %v5476_v18 = vadd.f32 %v5475_v23, %v12968_v60  ;;  %v5712_v20 = vstv %s11537_s22  ;;  %vm12973_vm11 = vmand %vm10939_vm8, %vm9698_vm2  ;;  %v6048_v10 = vpop.permute.xlu1 %6047  ;;  %s7182_s16 = scalar_lea.vmem %s11859_s10, 1024  ;;  %s7305_s22 = smov [#allocation7]  }
 0x86a   : > { %vm12969_vm3 = vcmp.lt.s32.totalorder %v12592_v9, 94  ;;  %vm6381_vm7 = vcmp.lt.s32.totalorder %v12592_v9, 78  ;;  %v5419_v13 = vadd.f32 %v5418_v28, %v5361_v58  ;;  %v5593_v51 = vmul.f32 %v5592_v34, %v5591_v61  ;;  %v6050_v40 = vpop.permute.xlu0 %6049  ;;  %v12977_v34 = vld [vmem:[#allocation36_spill] sm:$0xff]  ;;  %p7183_p10 = scmp.ne.s32.totalorder %s11859_s10, %s7182_s16 }
 0x86b   : > { %v5991_v6 = vsel %vm12969_vm3, %v5988_v2, %v5990_v33  ;;  %vm12970_vm13 = vmmov %vm12969_vm3  ;;  %v5651_v59 = vsel %vm12971_vm14, %v5649_v29, 0.0  ;;  %v5769_v24 = vrot.slane %v5762_v12, %v9525_v17  ;;  %v5534_v45 = vadd.f32 %v5533_v0, %v12972_v43 }
 0x86c   : > { %v5992_v1 = vsel %vm12970_vm13, %v5990_v33, %v5988_v2  ;;  %v5711_v39 = vsel %vm12973_vm11, %v5709_v44, 0.0  ;;  %v5882_v35 = vrot.slane %v5875_v14, %v9525_v17  ;;  %v5942_v41 = vrot.slane %v5935_v11, %v9525_v17  ;;  %vm12978_vm13 = vmand %vm10939_vm8, %vm9719_vm5  ;;  %p7184_p0 = pnand %p7183_p10, %p13020_p12 }
 0x86d   : > { %v5829_v3 = vrot.slane %v5822_v15, %v9525_v17  ;;  %v5995_v32 = vcombine.low %v5991_v6, %v5992_v1  ;;  %vm12974_vm12 = vcmp.lt.s32.totalorder %v12592_v9, 93  ;;  %v5477_v25 = vadd.f32 %v5476_v18, %v5419_v13  ;;  %v6108_v11 = vpop.permute.xlu1 %6107  ;;  %vm12979_vm14 = vmand %vm10939_vm8, %vm12620_vm6 }
 0x86e   : > { %v6051_v48 = vsel %vm12974_vm12, %v6048_v10, %v6050_v40  ;;  %vm12975_vm3 = vmmov %vm12974_vm12  ;;  %v5653_v31 = vmul.f32 %v5652_v30, %v5651_v59  ;;  %v5772_v62 = vstv %s11561_s11  ;;  %v12976_v36 = vstv %s10204_s4  ;;  %v6110_v14 = vpop.permute.xlu0 %6109  ;;  %s11642_s4 = sld [smem:[#allocation2 + $0x5a]]  ;;  %p7185_p7 = pneg %p7184_p0 }
 0x86f   : > { %v6052_v49 = vsel %vm12975_vm3, %v6050_v40, %v6048_v10  ;;  %v11616_v23 = vmul.f32 %v12976_v36, %v11532_v22  ;;  %v5594_v53 = vadd.f32 %v5593_v51, %v12977_v34  ;;  %v5771_v28 = vsel %vm12978_vm13, %v5769_v24, 0.0  ;;  %vm12982_vm3 = vmand %vm10939_vm8, %vm12627_vm15  ;;  %v12986_v10 = vld [vmem:[#allocation101_spill] sm:$0xff]  ;;  %s7186_s11 = sshll.u32 %s7305_s22, 4  ;;  %s7187_s11 = int_to_ptr.vmem [resolvable:$false] %s7186_s11 }
 0x870   : > { %v5832_v0 = vstv %s11566_s23  ;;  %v6055_v29 = vcombine.low %v6051_v48, %v6052_v49  ;;  %v5535_v12 = vadd.f32 %v5534_v45, %v5477_v25  ;;  %v5713_v61 = vmul.f32 %v5712_v20, %v5711_v39  ;;  %vm12983_vm13 = vmand %vm10939_vm8, %vm12630_vm4  ;;  %s7188_s23 = scalar_lea.vmem %s7187_s11, 2048  ;;  %p7189_p8 = scmp.lt.s32.totalorder %s11859_s10, %s7187_s11 }
 0x871   : > { %v5889_v44 = vrot.slane %v5882_v35, %v9525_v17  ;;  %v5949_v22 = vrot.slane %v5942_v41, %v9525_v17  ;;  %v5831_v33 = vsel %vm12979_vm14, %v5829_v3, 0.0  ;;  %v6002_v2 = vrot.slane %v5995_v32, %v9525_v17  ;;  %v6168_v39 = vpop.permute.xlu1 %6167  ;;  %v12987_v3 = vld [vmem:[#allocation102_spill] sm:$0xff]  ;;  %p7190_p11 = scmp.lt.s32.totalorder %s7188_s23, %s7182_s16 }
 0x872   : > { %vm12980_vm11 = vcmp.lt.s32.totalorder %v12592_v9, 83  ;;  %v6281_v15 = vrot.slane %v11497_v38, %v9525_v17  ;;  %v5654_v60 = vadd.f32 %v5653_v31, %v11007_v57  ;;  %v5773_v18 = vmul.f32 %v5772_v62, %v5771_v28  ;;  %v6170_v45 = vpop.permute.xlu0 %6169  ;;  %v12988_v28 = vld [vmem:[#allocation35_spill] sm:$0xff] }
 0x873   : > { %v6111_v58 = vsel %vm12980_vm11, %v6108_v11, %v6110_v14  ;;  %vm12981_vm12 = vmmov %vm12980_vm11  ;;  %v5595_v6 = vadd.f32 %v5594_v53, %v5535_v12  ;;  %v5892_v1 = vstv %s11584_s5  ;;  %v5952_v13 = vstv %s11597_s12  ;;  %p7191_p13 = por %p7190_p11, %p7189_p8 }
 0x874   : > { %v6112_v30 = vsel %vm12981_vm12, %v6110_v14, %v6108_v11  ;;  %v6062_v51 = vrot.slane %v6055_v29, %v9525_v17  ;;  %v5714_v59 = vadd.f32 %v5713_v61, %v11059_v37  ;;  %v5833_v24 = vmul.f32 %v5832_v0, %v5831_v33  ;;  %vm12989_vm12 = vmand %vm10939_vm8, %vm9814_vm1 }
 0x875   : > { %v6115_v20 = vcombine.low %v6111_v58, %v6112_v30  ;;  %v5891_v57 = vsel %vm12982_vm3, %v5889_v44, 0.0  ;;  %v5951_v43 = vsel %vm12983_vm13, %v5949_v22, 0.0  ;;  %v6009_v35 = vrot.slane %v6002_v2, %v9525_v17  ;;  %v6228_v61 = vpop.permute.xlu1 %6227  ;;  %p7192_p1 = pnand %p7191_p13, %p7185_p7 }
 0x876   : > { %vm12984_vm14 = vcmp.lt.s32.totalorder %v12592_v9, 82  ;;  %v6382_v32 = vsel %vm6381_vm7, %v12987_v3, %v12986_v10  ;;  %v5655_v48 = vadd.f32 %v5654_v60, %v5595_v6  ;;  %v5774_v49 = vadd.f32 %v5773_v18, %v11083_v7  ;;  %v6230_v12 = vpop.permute.xlu0 %6229 }
 0x877   : > { %v6122_v37 = vrot.slane %v6115_v20, %v9525_v17  ;;  %v6171_v41 = vsel %vm12984_vm14, %v6168_v39, %v6170_v45  ;;  %vm12985_vm11 = vmmov %vm12984_vm14  ;;  %v6383_v31 = vsel %vm6381_vm7, %v12986_v10, %v12987_v3  ;;  %v5893_v62 = vmul.f32 %v5892_v1, %v5891_v57 }
 0x878   : > { %v6172_v40 = vsel %vm12985_vm11, %v6170_v45, %v6168_v39  ;;  %v6012_v36 = vstv %s11625_s18  ;;  %v6069_v34 = vrot.slane %v6062_v51, %v9525_v17  ;;  %v5715_v53 = vadd.f32 %v5714_v59, %v5655_v48  ;;  %vm12992_vm14 = vmand %vm10939_vm8, %vm9872_vm10 }
 0x879   : > { %v6175_v25 = vcombine.low %v6171_v41, %v6172_v40  ;;  %v5834_v0 = vadd.f32 %v5833_v24, %v12988_v28  ;;  %v5953_v29 = vmul.f32 %v5952_v13, %v5951_v43  ;;  %v6011_v44 = vsel %vm12989_vm12, %v6009_v35, 0.0  ;;  %vm6264_vm11 = vmand %vm11321_vm9, %vm12627_vm15  ;;  %v6288_v46 = vpop.permute.xlu1 %6287 }
 0x87a   : > { %v6129_v22 = vrot.slane %v6122_v37, %v9525_v17  ;;  %vm12990_vm3 = vcmp.lt.s32.totalorder %v12592_v9, 81  ;;  %v6327_v33 = vcombine.low %v11558_v55, %v11578_v26  ;;  %v6387_v2 = vcombine.low %v6382_v32, %v6383_v31  ;;  %v6290_v26 = vpop.permute.xlu0 %6289  ;;  %vm12993_vm8 = vmand %vm11321_vm9, %vm9698_vm2 }
 0x87b   : > { %v6182_v7 = vrot.slane %v6175_v25, %v9525_v17  ;;  %v6231_v14 = vsel %vm12990_vm3, %v6228_v61, %v6230_v12  ;;  %vm12991_vm13 = vmmov %vm12990_vm3  ;;  %v5775_v58 = vadd.f32 %v5774_v49, %v5715_v53  ;;  %v5894_v60 = vadd.f32 %v5893_v62, %v11186_v8 }
 0x87c   : > { %v6232_v11 = vsel %vm12991_vm13, %v6230_v12, %v6228_v61  ;;  %v6072_v18 = vstv %s11642_s4  ;;  %v6071_v20 = vsel %vm12992_vm14, %v6069_v34, 0.0  ;;  %v6132_v6 = vstv %s11647_s20  ;;  %vm12996_vm2 = vmand %vm11321_vm9, %vm9719_vm5 }
 0x87d   : > { %v6235_v30 = vcombine.low %v6231_v14, %v6232_v11  ;;  %v5835_v1 = vadd.f32 %v5834_v0, %v5775_v58  ;;  %v6013_v13 = vmul.f32 %v6012_v36, %v6011_v44  ;;  %v6189_v51 = vrot.slane %v6182_v7, %v9525_v17  ;;  %v6348_v38 = vpop.permute.xlu1 %6347  ;;  %vm12997_vm5 = vmand %vm11321_vm9, %vm12620_vm6  ;;  %v12999_v44 = vld [vmem:[#allocation103_spill] sm:$0xff] }
 0x87e   : > { %v5954_v8 = vadd.f32 %v5953_v29, %v11199_v54  ;;  %v6131_v59 = vsel %vm12993_vm8, %v6129_v22, 0.0  ;;  %vm12994_vm12 = vcmp.lt.s32.totalorder %v12592_v9, 80  ;;  %v6334_v43 = vrot.slane %v6327_v33, %v9525_v17  ;;  %v6350_v48 = vpop.permute.xlu0 %6349  ;;  %vm6324_vm6 = vmand %vm11321_vm9, %vm12630_vm4 }
 0x87f   : > { %v6242_v55 = vrot.slane %v6235_v30, %v9525_v17  ;;  %v6291_v24 = vsel %vm12994_vm12, %v6288_v46, %v6290_v26  ;;  %vm12995_vm3 = vmmov %vm12994_vm12  ;;  %v6073_v45 = vmul.f32 %v6072_v18, %v6071_v20  ;;  %v6394_v54 = vrot.slane %v6387_v2, %v9525_v17 }
 0x880   : > { %v6292_v57 = vsel %vm12995_vm3, %v6290_v26, %v6288_v46  ;;  %v5895_v27 = vadd.f32 %v5894_v60, %v5835_v1  ;;  %v6192_v37 = vstv %s11677_s14  ;;  %v6283_v41 = vsel %vm6264_vm11, %v6281_v15, 0.0  ;;  %vm6384_vm15 = vmand %vm11321_vm9, %vm9814_vm1 }
 0x881   : > { %v6249_v39 = vrot.slane %v6242_v55, %v9525_v17  ;;  %v6295_v35 = vcombine.low %v6291_v24, %v6292_v57  ;;  %v6014_v40 = vadd.f32 %v6013_v13, %v11367_v21  ;;  %v6133_v10 = vmul.f32 %v6132_v6, %v6131_v59  ;;  %v6408_v61 = vpop.permute.xlu1 %6407 }
 0x882   : > { %v6191_v3 = vsel %vm12996_vm2, %v6189_v51, 0.0  ;;  %v5955_v49 = vadd.f32 %v5954_v8, %v5895_v27  ;;  %v6252_v25 = vstv %s11687_s2  ;;  %v6351_v31 = vsel %vm6321_vm0, %v6348_v38, %v6350_v48  ;;  %v6410_v12 = vpop.permute.xlu0 %6409 }
 0x883   : > { %v6302_v32 = vrot.slane %v6295_v35, %v9525_v17  ;;  %v6352_v21 = vsel %vm6321_vm0, %v6350_v48, %v6348_v38  ;;  %v6074_v15 = vadd.f32 %v6073_v45, %v11385_v4  ;;  %v6251_v63 = vsel %vm12997_vm5, %v6249_v39, 0.0 }
 0x884   : > { %v6355_v36 = vcombine.low %v6351_v31, %v6352_v21  ;;  %v6341_v34 = vrot.slane %v6334_v43, %v9525_v17  ;;  %v6401_v53 = vrot.slane %v6394_v54, %v9525_v17  ;;  %v6193_v28 = vmul.f32 %v6192_v37, %v6191_v3 }
 0x885   : > { %v6309_v62 = vrot.slane %v6302_v32, %v9525_v17  ;;  %v6312_v0 = vstv %s11703_s19  ;;  %v6015_v29 = vadd.f32 %v6014_v40, %v5955_v49  ;;  %v6134_v4 = vadd.f32 %v6133_v10, %v11437_v56  ;;  %v12998_v56 = vld [vmem:[#allocation22_spill] sm:$0xff]  ;;  %v6468_v8 = vpop.permute.xlu1 %6467 }
 0x886   : > { %v6362_v7 = vrot.slane %v6355_v36, %v9525_v17  ;;  %v13000_v22 = vcombine.low %v12998_v56, %v12999_v44  ;;  %v6253_v50 = vmul.f32 %v6252_v25, %v6251_v63  ;;  %v6411_v11 = vsel %vm6381_vm7, %v6408_v61, %v6410_v12  ;;  %v6470_v46 = vpop.permute.xlu0 %6469  ;;  %v13009_v56 = vld [vmem:[#allocation26_spill] sm:$0xff] }
 0x887   : > { %v6311_v42 = vsel %vm6264_vm11, %v6309_v62, 0.0  ;;  %v6412_v33 = vsel %vm6381_vm7, %v6410_v12, %v6408_v61  ;;  %v6075_v2 = vadd.f32 %v6074_v15, %v6015_v29  ;;  %v6372_v58 = vstv %s11723_s1  ;;  %vm6444_vm7 = vmand %vm11321_vm9, %vm9872_vm10  ;;  %v13008_v12 = vld [vmem:[#allocation28_spill] sm:$0xff] }
 0x888   : > { %v6454_v14 = vrot.slane %v13000_v22, %v9525_v17  ;;  %v6369_v30 = vrot.slane %v6362_v7, %v9525_v17  ;;  %v6415_v60 = vcombine.low %v6411_v11, %v6412_v33  ;;  %v6194_v18 = vadd.f32 %v6193_v28, %v11461_v16  ;;  %v13010_v22 = vld [vmem:[#allocation39_spill] sm:$0xff]  ;;  %v13012_v33 = vld [vmem:[#allocation45_spill] sm:$0xff] }
 0x889   : > { %v13001_v20 = vstv %s10229_s24  ;;  %v6313_v1 = vmul.f32 %v6312_v0, %v6311_v42  ;;  %v6343_v13 = vsel %vm6324_vm6, %v6341_v34, 0.0  ;;  %v6135_v51 = vadd.f32 %v6134_v4, %v6075_v2  ;;  %s592_s24 = sld [smem:[#allocation5]] }
 0x88a   : > { %v6285_v6 = vmul.f32 %v13001_v20, %v6283_v41  ;;  %v6371_v55 = vsel %vm6324_vm6, %v6369_v30, 0.0  ;;  %v6403_v16 = vsel %vm6384_vm15, %v6401_v53, 0.0  ;;  %v6422_v26 = vrot.slane %v6415_v60, %v9525_v17  ;;  %v13015_v60 = vld [vmem:[#allocation40_spill] sm:$0xff] }
 0x88b   : > { %v6254_v59 = vadd.f32 %v6253_v50, %v11616_v23  ;;  %v6373_v24 = vmul.f32 %v6372_v58, %v6371_v55  ;;  %vm13002_vm0 = vcmp.lt.s32.totalorder %v12592_v9, 77  ;;  %v6461_v43 = vrot.slane %v6454_v14, %v9525_v17  ;;  %v13011_v50 = vld [vmem:[#allocation38_spill] sm:$0xff]  ;;  %v13013_v58 = vld [vmem:[#allocation48_spill] sm:$0xff] }
 0x88c   : > { %v6471_v47 = vsel %vm13002_vm0, %v6468_v8, %v6470_v46  ;;  %vm13003_vm4 = vmmov %vm13002_vm0  ;;  %v6432_v45 = vstv %s11754_s26  ;;  %v6429_v39 = vrot.slane %v6422_v26, %v9525_v17  ;;  %v6195_v23 = vadd.f32 %v6194_v18, %v6135_v51  ;;  %v13016_v20 = vld [vmem:[#allocation44_spill] sm:$0xff]  ;;  %v13019_v51 = vld [vmem:[#allocation46_spill] sm:$0xff] }
 0x88d   : > { %v6472_v57 = vsel %vm13003_vm4, %v6470_v46, %v6468_v8  ;;  %v6314_v54 = vadd.f32 %v6313_v1, %v6285_v6  ;;  %v13004_v27 = vstv %s10308_s29  ;;  %v13005_v3 = vstv %s10484_s7  ;;  %s6640_s29 = sld [smem:[#allocation5 + $0x1]]  ;;  %v13018_v1 = vld [vmem:[#allocation42_spill] sm:$0xff] }
 0x88e   : > { %v6475_v35 = vcombine.low %v6471_v47, %v6472_v57  ;;  %v6345_v37 = vmul.f32 %v13004_v27, %v6343_v13  ;;  %v6431_v9 = vsel %vm6384_vm15, %v6429_v39, 0.0  ;;  %v6255_v40 = vadd.f32 %v6254_v59, %v6195_v23  ;;  %s13007_s7 = sld [smem:[#allocation15_spill]] }
 0x88f   : > { %v6405_v32 = vmul.f32 %v13005_v3, %v6403_v16  ;;  %v6433_v48 = vmul.f32 %v6432_v45, %v6431_v9  ;;  %v6464_v38 = vstv %s11770_s15  ;;  %v6463_v49 = vsel %vm6444_vm7, %v6461_v43, 0.0 }
 0x890   : > { %v6482_v41 = vrot.slane %v6475_v35, %v9525_v17  ;;  %v6374_v10 = vadd.f32 %v6373_v24, %v6345_v37  ;;  %v6492_v25 = vstv %s11786_s21  ;;  %v6315_v31 = vadd.f32 %v6314_v54, %v6255_v40 }
 0x891   : > { %v6434_v21 = vadd.f32 %v6433_v48, %v6405_v32  ;;  %v6465_v63 = vmul.f32 %v6464_v38, %v6463_v49  ;;  %v6496_v28 = vstv %s592_s24 }
 0x892   : > { %v6489_v5 = vrot.slane %v6482_v41, %v9525_v17  ;;  %v6375_v62 = vadd.f32 %v6374_v10, %v6315_v31 }
 0x893   : > { %v6498_v29 = vstv %s6640_s29 }
 0x894   : > { %v6491_v15 = vsel %vm6444_vm7, %v6489_v5, 0.0  ;;  %v6435_v34 = vadd.f32 %v6434_v21, %v6375_v62  ;;  %s6971_s25 = sshll.u32 %s13007_s7, 10 }
 0x895   : > { %v6493_v36 = vmul.f32 %v6492_v25, %v6491_v15  ;;  %s11853_s6 = scalar_lea.hbm %s13014_s13, %s6971_s25 }
 0x897   : > { %v6494_v53 = vadd.f32 %v6493_v36, %v6465_v63 }
 0x899   : > { %v6495_v0 = vadd.f32 %v6494_v53, %v6435_v34 }
 0x89b   : > { %v6497_v4 = vmul.f32 %v6496_v28, %v6495_v0 }
 0x89d   : > { %v6499_v17 = vadd.f32 %v6498_v29, %v6497_v4 }
 0x89f   : > { %v6500_v42 = vmul.f32 0.5, %v6499_v17 }
 0x8a1   : > { %7147 = vtanh.f32 %v6500_v42 }
 0x8ae   : > { %v7148_v19 = vpop.eup %7147 }
 0x8af   : > { %v6502_v7 = vmul.f32 0.5, %v7148_v19 }
 0x8b1   : > { %v6503_v52 = vadd.f32 0.5, %v6502_v7 }
 0x8b3   : > { %v6508_v61 = vrot.slane %v6503_v52, %v13008_v12  ;;  %v6512_v44 = vrot.slane %v6503_v52, %v13009_v56 }
 0x8b5   : > { %v6515_v14 = vmul.f32 %v6508_v61, %v13010_v22  ;;  %v6516_v11 = vmul.f32 %v6512_v44, %v13011_v50  ;;  %v6517_v2 = vmul.f32 %v6508_v61, %v13012_v33  ;;  %v6518_v30 = vmul.f32 %v6512_v44, %v13013_v58 }
 0x8b6   : > { %v6519_v18 = vmul.f32 %v6508_v61, %v13015_v60  ;;  %v6520_v6 = vmul.f32 %v6512_v44, %v13016_v20  ;;  %v6521_v13 = vmul.f32 %v6508_v61, %v13018_v1  ;;  %v6522_v55 = vmul.f32 %v6512_v44, %v13019_v51 }
 0x8b7   : > { %6523 = vst [vmem:[%s514_s17] sm:$0xff] %v6515_v14  ;;  %6524 = vst [vmem:[%s514_s17 + $0x8] sm:$0xff] %v6516_v11 }
 0x8b8   : > { %6525 = vst [vmem:[%s514_s17 + $0x10] sm:$0xff] %v6517_v2  ;;  %6526 = vst [vmem:[%s514_s17 + $0x18] sm:$0xff] %v6518_v30 }
 0x8b9   : > { %6527 = vst [vmem:[%s514_s17 + $0x20] sm:$0xff] %v6519_v18  ;;  %6528 = vst [vmem:[%s514_s17 + $0x28] sm:$0xff] %v6520_v6 }
 0x8ba   : > { %6529 = vst [vmem:[%s514_s17 + $0x30] sm:$0xff] %v6521_v13  ;;  %6530 = vst [vmem:[%s514_s17 + $0x38] sm:$0xff] %v6522_v55 }
 0x8bb   : > { %7195 = shalt.err (!%p7192_p1)
}
 0x8bc   : > { %s7196_s5 = scalar_lea.hbm %s11853_s6, 1024  ;;  %s7200_s4 = scalar_lea.hbm %s13014_s13, 2048 }
 0x8bd   : > { %p7197_p2 = scmp.ne.s32.totalorder %s11853_s6, %s7196_s5  ;;  %p7201_p9 = scmp.lt.s32.totalorder %s11853_s6, %s13014_s13 }
 0x8be   : > { %p7202_p5 = scmp.lt.s32.totalorder %s7200_s4, %s7196_s5 }
 0x8bf   : > { %p7198_p3 = pnand %p7197_p2, %p13020_p12 }
 0x8c0   : > { %p7203_p6 = por %p7202_p5, %p7201_p9 }
 0x8c1   : > { %p7199_p4 = pneg %p7198_p3 }
 0x8c3   : > { %p7204_p10 = pnand %p7203_p6, %p7199_p4 }
 0x8c5   : > { %7207 = shalt.err (!%p7204_p10)
}
 0x8c6   : > { %s7306_s2 = smov 256   ;;  %s13021_s19 = smov 16  }
 0x8c7   : > { %7032 = dma.vmem_to_hbm [thread:$0]  (%p13020_p12), %s11859_s10, 1024, %s11853_s6, %s11861_s30, %s7306_s2, %s7306_s2, %s13021_s19  }
 0x8c8 PF: > { %s13022_s1 = sld [smem:[#allocation14_spill]] }
 0x8c9   : > { %s13023_s26 = sld [smem:[#allocation11_spill]] }
 0x8ca   : > { %s13024_s15 = sld [smem:[#allocation19_spill]] }
 0x8ce   : > { %p7049_p0 = scmp.ge.s32.totalorder %s13022_s1, 2 }
 0x8cf   : > { %s6560_s21 = sand.u32 1, %s13023_s26  }
 0x8d0   : > { %p13025_p7 = scmp.ne.s32.totalorder %s13024_s15, 0  ;;  %s6561_s24 = scalar_lea.sflag [#allocation3], %s6560_s21 }
 0x8d2   : > { %p7042_p8 = pnand %p7049_p0, %p13025_p7 }
 0x8d4   : > { %p7043_p11 = pneg %p7042_p8 }
 0x8d6   : > { %7233 = dma.done.wait (%p7043_p11), %s6561_s24, 1024  }
 0x8d7   : > { %7235 = vsyncadd (%p7043_p11), %s6561_s24, 4294966272  ;;  %s13026_s21 = sld [smem:[#allocation16_spill]] }
 0x8d8   : > { %s13027_s18 = sld [smem:[#allocation12_spill]] }
 0x8d9   : > { %s13028_s19 = sld [smem:[#allocation13_spill]] }
 0x8da   : > { %s13029_s20 = sld [smem:[#allocation17_spill]] }
 0x8dd   : > { %p27_p13 = scmp.ge.s32.totalorder %s13026_s21, 4  }
 0x8df   :  { %29 = sbr.rel (!%p27_p13) target bundleno = 22 (0x16), region = 140 }
 0x8e4   :  { %6566 = vsyncpa [#allocation3], 1 }
 0x8e5   :  { %6568 = vsyncpa [#allocation3 + $0x1], 1 }
 0x8e6   :  { %6569 = vsyncpa [#allocation4], 1 }
 0x8e7   :  { %6571 = vsyncpa [#allocation4 + $0x1], 1 }
 0x8e8   :  { %6572 = vsyncpa [#allocation6], 1 }

</bundles_post_ra>
